<compile_context>
chip_gen: v7x
topology: tpu7x:2x2x1
jax: 0.10.0
libtpu: 0.0.40
codegen_flags: <defaults>
</compile_context>

<pallas_src>
import functools
import jax
import jax.numpy as jnp
import numpy as np
from jax.experimental import pallas as pl
from jax.experimental.pallas import tpu as pltpu


def gcn_kernel(x_ref, w11_ref, w12_ref, w21_ref, w22_ref, o_ref,
               x1_acc, x2_acc, *, ks):
    """Grid = (batch, Cin_tiles); Cin tile index is the (innermost) reduction axis.

    x_ref  : (1, H, W, TK)        bf16  input tile (one batch elem, one Cin tile)
    w11_ref: (TK,  ks*Cout)       bf16  conv1_1 taps stacked along output dim
    w12_ref: (Cout, ks*Cout)      bf16  conv1_2 taps stacked along output dim
    w21_ref: (TK,  ks*Cout)       bf16  conv2_1 taps stacked along output dim
    w22_ref: (Cout, ks*Cout)      bf16  conv2_2 taps stacked along output dim
    o_ref  : (1, Ho, Wo, Cout)    f32   output (resident across the Cin axis)
    x1_acc : (Ho, W, Cout)        f32   scratch: conv1_1 result (accumulated over Cin)
    x2_acc : (H, Wo, Cout)        f32   scratch: conv2_1 result (accumulated over Cin)
    """
    _, H, W, tk = x_ref.shape
    Cout = w12_ref.shape[0]
    Ho, Wo = H - ks + 1, W - ks + 1

    k = pl.program_id(1)
    nk = pl.num_programs(1)

    @pl.when(k == 0)
    def _init():
        x1_acc[...] = jnp.zeros_like(x1_acc)
        x2_acc[...] = jnp.zeros_like(x2_acc)

    x = x_ref[0]                             # (H, W, TK) bf16
    xf = x.reshape(H * W, tk)                # tile-aligned reshape (W % 8 == 0)

    # ---- stage 1, branch 1: (ks,1) conv along H, Cin->Cout, taps fused ----
    y = jnp.dot(xf, w11_ref[...], preferred_element_type=jnp.float32)
    y = y.reshape(H, W, ks * Cout)
    p1 = y[0:Ho, :, 0:Cout]
    for t in range(1, ks):                   # static unroll: shift = leading-dim slice
        p1 = p1 + y[t:t + Ho, :, t * Cout:(t + 1) * Cout]
    x1_acc[...] += p1

    # ---- stage 1, branch 2: (1,ks) conv along W, Cin->Cout, taps fused ----
    y = jnp.dot(xf, w21_ref[...], preferred_element_type=jnp.float32)
    y = y.reshape(H, W, ks * Cout)
    p2 = y[:, 0:Wo, 0:Cout]
    for t in range(1, ks):                   # shift = small sublane slice of Cout-wide output
        p2 = p2 + y[:, t:t + Wo, t * Cout:(t + 1) * Cout]
    x2_acc[...] += p2

    # ---- stage 2 (Cout->Cout convs) only once the Cin reduction is done ----
    @pl.when(k == nk - 1)
    def _finalize():
        # branch 1, second conv: (1,ks) along W
        x1 = x1_acc[...].astype(jnp.bfloat16).reshape(Ho * W, Cout)
        y1 = jnp.dot(x1, w12_ref[...], preferred_element_type=jnp.float32)
        y1 = y1.reshape(Ho, W, ks * Cout)
        out1 = y1[:, 0:Wo, 0:Cout]
        for t in range(1, ks):
            out1 = out1 + y1[:, t:t + Wo, t * Cout:(t + 1) * Cout]
        # write branch 1 first, then accumulate branch 2 (short live ranges)
        o_ref[0] = out1.astype(o_ref.dtype)

        # branch 2, second conv: (ks,1) along H
        x2 = x2_acc[...].astype(jnp.bfloat16).reshape(H * Wo, Cout)
        y2 = jnp.dot(x2, w22_ref[...], preferred_element_type=jnp.float32)
        y2 = y2.reshape(H, Wo, ks * Cout)
        out2 = y2[0:Ho, :, 0:Cout]
        for t in range(1, ks):
            out2 = out2 + y2[t:t + Ho, :, t * Cout:(t + 1) * Cout]
        o_ref[0] = o_ref[0] + out2.astype(o_ref.dtype)


def _stack_taps(w):
    """(ks, Ci, Co) -> (Ci, ks*Co) with column block t == tap t."""
    ks, ci, co = w.shape
    return jnp.transpose(w, (1, 0, 2)).reshape(ci, ks * co)


def gcn_forward(x_nhwc, w11, w12, w21, w22, *, ks, tk=128):
    N, H, W, Cin = x_nhwc.shape
    Cout = w11.shape[-1]
    Ho, Wo = H - ks + 1, W - ks + 1

    tk = min(tk, Cin)
    assert Cin % tk == 0, "Cin must be divisible by the Cin tile size"
    kt = Cin // tk

    # bf16 operands feed the MXU; accumulation stays f32 inside the kernel.
    xb = x_nhwc.astype(jnp.bfloat16)
    w11s = _stack_taps(w11).astype(jnp.bfloat16)   # (Cin,  ks*Cout)
    w12s = _stack_taps(w12).astype(jnp.bfloat16)   # (Cout, ks*Cout)
    w21s = _stack_taps(w21).astype(jnp.bfloat16)   # (Cin,  ks*Cout)
    w22s = _stack_taps(w22).astype(jnp.bfloat16)   # (Cout, ks*Cout)

    kernel = functools.partial(gcn_kernel, ks=ks)
    return pl.pallas_call(
        kernel,
        out_shape=jax.ShapeDtypeStruct((N, Ho, Wo, Cout), jnp.float32),
        grid=(N, kt),                                    # batch (parallel) x Cin tiles (reduction)
        in_specs=[
            pl.BlockSpec((1, H, W, tk), lambda n, k: (n, 0, 0, k)),
            pl.BlockSpec((tk, ks * Cout), lambda n, k: (k, 0)),
            # Stage-2 weights: constant block index -> fetched once.
            # TODO(synk): at production sizes (Cin=4096, Cout=256) mark these
            # pipeline_mode=pl.Buffered(1) and raise vmem_limit_bytes.
            pl.BlockSpec((Cout, ks * Cout), lambda n, k: (0, 0)),
            pl.BlockSpec((tk, ks * Cout), lambda n, k: (k, 0)),
            pl.BlockSpec((Cout, ks * Cout), lambda n, k: (0, 0)),
        ],
        out_specs=pl.BlockSpec((1, Ho, Wo, Cout), lambda n, k: (n, 0, 0, 0)),
        scratch_shapes=[
            pltpu.VMEM((Ho, W, Cout), jnp.float32),      # conv1_1 accumulator
            pltpu.VMEM((H, Wo, Cout), jnp.float32),      # conv2_1 accumulator
        ],
        compiler_params=pltpu.CompilerParams(
            dimension_semantics=("parallel", "arbitrary")),
    )(xb, w11s, w12s, w21s, w22s)


def reference_forward(x_nhwc, w11, w12, w21, w22):
    """Pure-JAX reference using lax conv (VALID, no bias), NHWC / HWIO."""
    dn = ("NHWC", "HWIO", "NHWC")
    conv = lambda inp, w: jax.lax.conv_general_dilated(
        inp, w, window_strides=(1, 1), padding="VALID", dimension_numbers=dn)
    x1 = conv(x_nhwc, w11[:, None])   # (ks,1,Cin,Cout)  -> conv along H
    x1 = conv(x1, w12[None, :])       # (1,ks,Cout,Cout) -> conv along W
    x2 = conv(x_nhwc, w21[None, :])   # (1,ks,Cin,Cout)  -> conv along W
    x2 = conv(x2, w22[:, None])       # (ks,1,Cout,Cout) -> conv along H
    return x1 + x2


def kaiming_normal(key, ks, cin, cout):
    # kaiming_normal_ default: gain=sqrt(2), fan_in = cin * kh * kw = cin * ks.
    std = np.sqrt(2.0 / (cin * ks))
    return std * jax.random.normal(key, (ks, cin, cout), dtype=jnp.float32)


if __name__ == "__main__":
    # Small, shape-consistent config (PyTorch defaults are 4096->256; scaled
    # down).  Cout=128 keeps output stores lane-dense and the per-tap lane
    # slices 128-aligned, mirroring the production Cout=256 case.
    N, H, W = 2, 16, 16
    Cin, Cout, ks = 256, 128, 7   # dilation=1 => padding=0 (VALID)

    key = jax.random.PRNGKey(0)
    kx, k11, k12, k21, k22 = jax.random.split(key, 5)

    # Input as PyTorch would see it: NCHW; transpose to the kernel's NHWC layout.
    x_nchw = jax.random.normal(kx, (N, Cin, H, W), dtype=jnp.float32)
    x_nhwc = jnp.transpose(x_nchw, (0, 2, 3, 1))

    w11 = kaiming_normal(k11, ks, Cin, Cout)    # conv1_1: (ks,1)
    w12 = kaiming_normal(k12, ks, Cout, Cout)   # conv1_2: (1,ks)
    w21 = kaiming_normal(k21, ks, Cin, Cout)    # conv2_1: (1,ks)
    w22 = kaiming_normal(k22, ks, Cout, Cout)   # conv2_2: (ks,1)

    out = jax.block_until_ready(gcn_forward(x_nhwc, w11, w12, w21, w22, ks=ks))

    # Reference on bf16-rounded operands (same rounding the kernel applies),
    # accumulated in f32 by the XLA convs.
    rnd = lambda a: a.astype(jnp.bfloat16).astype(jnp.float32)
    ref = jax.block_until_ready(reference_forward(
        rnd(x_nhwc), rnd(w11), rnd(w12), rnd(w21), rnd(w22)))
    np.testing.assert_allclose(np.asarray(out), np.asarray(ref),
                               rtol=2e-2, atol=5e-2)

    # Back to NCHW if the PyTorch-facing layout is needed: out.transpose(0,3,1,2)
    print("KERNEL_OK")
</pallas_src>

<mosaic_0001>
module attributes {stable_mosaic.version = 11 : i64} {
  func.func @gcn_kernel(%arg0: i32, %arg1: i32, %arg2: memref<1x16x16x128xbf16, #tpu.memory_space<vmem>>, %arg3: memref<128x896xbf16, #tpu.memory_space<vmem>>, %arg4: memref<128x896xbf16, #tpu.memory_space<vmem>>, %arg5: memref<128x896xbf16, #tpu.memory_space<vmem>>, %arg6: memref<128x896xbf16, #tpu.memory_space<vmem>>, %arg7: memref<1x10x10x128xf32, #tpu.memory_space<vmem>>, %arg8: memref<10x16x128xf32, #tpu.memory_space<vmem>>, %arg9: memref<16x10x128xf32, #tpu.memory_space<vmem>>) attributes {dimension_semantics = [#tpu.dimension_semantics<parallel>, #tpu.dimension_semantics<arbitrary>], iteration_bounds = array<i64: 2, 2>, scalar_prefetch = 0 : i64, scratch_operands = 2 : i64, tpu.core_type = #tpu.core_type<tc>, window_params = [{transform_indices = @transform_0, window_bounds = array<i64: 1, 16, 16, 128>}, {transform_indices = @transform_1, window_bounds = array<i64: 128, 896>}, {pipeline_mode = #tpu.pipeline_mode<synchronous>, transform_indices = @transform_2, window_bounds = array<i64: 128, 896>}, {transform_indices = @transform_3, window_bounds = array<i64: 128, 896>}, {pipeline_mode = #tpu.pipeline_mode<synchronous>, transform_indices = @transform_4, window_bounds = array<i64: 128, 896>}, {transform_indices = @transform_5, window_bounds = array<i64: 1, 10, 10, 128>}]} {
    %c0_i32 = arith.constant 0 : i32
    %0 = arith.cmpi eq, %arg1, %c0_i32 : i32
    %1 = arith.extui %0 : i1 to i32
    %c0_i32_0 = arith.constant 0 : i32
    %2 = arith.cmpi ne, %1, %c0_i32_0 : i32
    scf.if %2 {
      %cst_22 = arith.constant 0.000000e+00 : f32
      %47 = vector.broadcast %cst_22 : f32 to vector<10x16x128xf32>
      %c0_23 = arith.constant 0 : index
      %c0_24 = arith.constant 0 : index
      %c0_25 = arith.constant 0 : index
      %48 = vector.load %arg8[%c0_23, %c0_24, %c0_25] : memref<10x16x128xf32, #tpu.memory_space<vmem>>, vector<10x16x128xf32>
      tpu.vector_store %arg8[%c0_23, %c0_24, %c0_25], %47 {strides = array<i32>} : memref<10x16x128xf32, #tpu.memory_space<vmem>>, vector<10x16x128xf32>,
      %cst_26 = arith.constant 0.000000e+00 : f32
      %49 = vector.broadcast %cst_26 : f32 to vector<16x10x128xf32>
      %c0_27 = arith.constant 0 : index
      %c0_28 = arith.constant 0 : index
      %c0_29 = arith.constant 0 : index
      %50 = vector.load %arg9[%c0_27, %c0_28, %c0_29] : memref<16x10x128xf32, #tpu.memory_space<vmem>>, vector<16x10x128xf32>
      tpu.vector_store %arg9[%c0_27, %c0_28, %c0_29], %49 {strides = array<i32>} : memref<16x10x128xf32, #tpu.memory_space<vmem>>, vector<16x10x128xf32>,
    } else {
    }
    %c0 = arith.constant 0 : index
    %c0_1 = arith.constant 0 : index
    %c0_2 = arith.constant 0 : index
    %c0_3 = arith.constant 0 : index
    %3 = vector.load %arg2[%c0, %c0_1, %c0_2, %c0_3] : memref<1x16x16x128xbf16, #tpu.memory_space<vmem>>, vector<1x16x16x128xbf16>
    %4 = vector.shape_cast %3 : vector<1x16x16x128xbf16> to vector<16x16x128xbf16>
    %5 = vector.shape_cast %4 : vector<16x16x128xbf16> to vector<256x128xbf16>
    %c0_4 = arith.constant 0 : index
    %c0_5 = arith.constant 0 : index
    %6 = vector.load %arg3[%c0_4, %c0_5] : memref<128x896xbf16, #tpu.memory_space<vmem>>, vector<128x896xbf16>
    %cst = arith.constant dense<0.000000e+00> : vector<256x896xf32>
    %7 = tpu.matmul %5, %6, %cst {dimension_numbers = #tpu.dot_dimension_numbers<[1], [0], [0], [1], [0, 0, 1, 1], [], []>} : vector<256x128xbf16>, vector<128x896xbf16>, vector<256x896xf32> -> vector<256x896xf32>
    %8 = vector.shape_cast %7 : vector<256x896xf32> to vector<16x16x896xf32>
    %9 = vector.extract_strided_slice %8 {offsets = [0, 0, 0], sizes = [10, 16, 128], strides = [1, 1, 1]} : vector<16x16x896xf32> to vector<10x16x128xf32>
    %10 = vector.extract_strided_slice %8 {offsets = [1, 0, 128], sizes = [10, 16, 128], strides = [1, 1, 1]} : vector<16x16x896xf32> to vector<10x16x128xf32>
    %11 = arith.addf %9, %10 : vector<10x16x128xf32>
    %12 = vector.extract_strided_slice %8 {offsets = [2, 0, 256], sizes = [10, 16, 128], strides = [1, 1, 1]} : vector<16x16x896xf32> to vector<10x16x128xf32>
    %13 = arith.addf %11, %12 : vector<10x16x128xf32>
    %14 = vector.extract_strided_slice %8 {offsets = [3, 0, 384], sizes = [10, 16, 128], strides = [1, 1, 1]} : vector<16x16x896xf32> to vector<10x16x128xf32>
    %15 = arith.addf %13, %14 : vector<10x16x128xf32>
    %16 = vector.extract_strided_slice %8 {offsets = [4, 0, 512], sizes = [10, 16, 128], strides = [1, 1, 1]} : vector<16x16x896xf32> to vector<10x16x128xf32>
    %17 = arith.addf %15, %16 : vector<10x16x128xf32>
    %18 = vector.extract_strided_slice %8 {offsets = [5, 0, 640], sizes = [10, 16, 128], strides = [1, 1, 1]} : vector<16x16x896xf32> to vector<10x16x128xf32>
    %19 = arith.addf %17, %18 : vector<10x16x128xf32>
    %20 = vector.extract_strided_slice %8 {offsets = [6, 0, 768], sizes = [10, 16, 128], strides = [1, 1, 1]} : vector<16x16x896xf32> to vector<10x16x128xf32>
    %21 = arith.addf %19, %20 : vector<10x16x128xf32>
    %c0_6 = arith.constant 0 : index
    %c0_7 = arith.constant 0 : index
    %c0_8 = arith.constant 0 : index
    %22 = vector.load %arg8[%c0_6, %c0_7, %c0_8] : memref<10x16x128xf32, #tpu.memory_space<vmem>>, vector<10x16x128xf32>
    %23 = arith.addf %22, %21 : vector<10x16x128xf32>
    %c0_9 = arith.constant 0 : index
    %c0_10 = arith.constant 0 : index
    %c0_11 = arith.constant 0 : index
    %24 = vector.load %arg8[%c0_9, %c0_10, %c0_11] : memref<10x16x128xf32, #tpu.memory_space<vmem>>, vector<10x16x128xf32>
    tpu.vector_store %arg8[%c0_9, %c0_10, %c0_11], %23 {strides = array<i32>} : memref<10x16x128xf32, #tpu.memory_space<vmem>>, vector<10x16x128xf32>,
    %c0_12 = arith.constant 0 : index
    %c0_13 = arith.constant 0 : index
    %25 = vector.load %arg5[%c0_12, %c0_13] : memref<128x896xbf16, #tpu.memory_space<vmem>>, vector<128x896xbf16>
    %cst_14 = arith.constant dense<0.000000e+00> : vector<256x896xf32>
    %26 = tpu.matmul %5, %25, %cst_14 {dimension_numbers = #tpu.dot_dimension_numbers<[1], [0], [0], [1], [0, 0, 1, 1], [], []>} : vector<256x128xbf16>, vector<128x896xbf16>, vector<256x896xf32> -> vector<256x896xf32>
    %27 = vector.shape_cast %26 : vector<256x896xf32> to vector<16x16x896xf32>
    %28 = vector.extract_strided_slice %27 {offsets = [0, 0, 0], sizes = [16, 10, 128], strides = [1, 1, 1]} : vector<16x16x896xf32> to vector<16x10x128xf32>
    %29 = vector.extract_strided_slice %27 {offsets = [0, 1, 128], sizes = [16, 10, 128], strides = [1, 1, 1]} : vector<16x16x896xf32> to vector<16x10x128xf32>
    %30 = arith.addf %28, %29 : vector<16x10x128xf32>
    %31 = vector.extract_strided_slice %27 {offsets = [0, 2, 256], sizes = [16, 10, 128], strides = [1, 1, 1]} : vector<16x16x896xf32> to vector<16x10x128xf32>
    %32 = arith.addf %30, %31 : vector<16x10x128xf32>
    %33 = vector.extract_strided_slice %27 {offsets = [0, 3, 384], sizes = [16, 10, 128], strides = [1, 1, 1]} : vector<16x16x896xf32> to vector<16x10x128xf32>
    %34 = arith.addf %32, %33 : vector<16x10x128xf32>
    %35 = vector.extract_strided_slice %27 {offsets = [0, 4, 512], sizes = [16, 10, 128], strides = [1, 1, 1]} : vector<16x16x896xf32> to vector<16x10x128xf32>
    %36 = arith.addf %34, %35 : vector<16x10x128xf32>
    %37 = vector.extract_strided_slice %27 {offsets = [0, 5, 640], sizes = [16, 10, 128], strides = [1, 1, 1]} : vector<16x16x896xf32> to vector<16x10x128xf32>
    %38 = arith.addf %36, %37 : vector<16x10x128xf32>
    %39 = vector.extract_strided_slice %27 {offsets = [0, 6, 768], sizes = [16, 10, 128], strides = [1, 1, 1]} : vector<16x16x896xf32> to vector<16x10x128xf32>
    %40 = arith.addf %38, %39 : vector<16x10x128xf32>
    %c0_15 = arith.constant 0 : index
    %c0_16 = arith.constant 0 : index
    %c0_17 = arith.constant 0 : index
    %41 = vector.load %arg9[%c0_15, %c0_16, %c0_17] : memref<16x10x128xf32, #tpu.memory_space<vmem>>, vector<16x10x128xf32>
    %42 = arith.addf %41, %40 : vector<16x10x128xf32>
    %c0_18 = arith.constant 0 : index
    %c0_19 = arith.constant 0 : index
    %c0_20 = arith.constant 0 : index
    %43 = vector.load %arg9[%c0_18, %c0_19, %c0_20] : memref<16x10x128xf32, #tpu.memory_space<vmem>>, vector<16x10x128xf32>
    tpu.vector_store %arg9[%c0_18, %c0_19, %c0_20], %42 {strides = array<i32>} : memref<16x10x128xf32, #tpu.memory_space<vmem>>, vector<16x10x128xf32>,
    %c1_i32 = arith.constant 1 : i32
    %44 = arith.cmpi eq, %arg1, %c1_i32 : i32
    %45 = arith.extui %44 : i1 to i32
    %c0_i32_21 = arith.constant 0 : i32
    %46 = arith.cmpi ne, %45, %c0_i32_21 : i32
    scf.if %46 {
      %c0_22 = arith.constant 0 : index
      %c0_23 = arith.constant 0 : index
      %c0_24 = arith.constant 0 : index
      %47 = vector.load %arg8[%c0_22, %c0_23, %c0_24] : memref<10x16x128xf32, #tpu.memory_space<vmem>>, vector<10x16x128xf32>
      %48 = arith.truncf %47 : vector<10x16x128xf32> to vector<10x16x128xbf16>
      %49 = vector.shape_cast %48 : vector<10x16x128xbf16> to vector<160x128xbf16>
      %c0_25 = arith.constant 0 : index
      %c0_26 = arith.constant 0 : index
      %50 = vector.load %arg4[%c0_25, %c0_26] : memref<128x896xbf16, #tpu.memory_space<vmem>>, vector<128x896xbf16>
      %cst_27 = arith.constant dense<0.000000e+00> : vector<160x896xf32>
      %51 = tpu.matmul %49, %50, %cst_27 {dimension_numbers = #tpu.dot_dimension_numbers<[1], [0], [0], [1], [0, 0, 1, 1], [], []>} : vector<160x128xbf16>, vector<128x896xbf16>, vector<160x896xf32> -> vector<160x896xf32>
      %52 = vector.shape_cast %51 : vector<160x896xf32> to vector<10x16x896xf32>
      %53 = vector.extract_strided_slice %52 {offsets = [0, 0, 0], sizes = [10, 10, 128], strides = [1, 1, 1]} : vector<10x16x896xf32> to vector<10x10x128xf32>
      %54 = vector.extract_strided_slice %52 {offsets = [0, 1, 128], sizes = [10, 10, 128], strides = [1, 1, 1]} : vector<10x16x896xf32> to vector<10x10x128xf32>
      %55 = arith.addf %53, %54 : vector<10x10x128xf32>
      %56 = vector.extract_strided_slice %52 {offsets = [0, 2, 256], sizes = [10, 10, 128], strides = [1, 1, 1]} : vector<10x16x896xf32> to vector<10x10x128xf32>
      %57 = arith.addf %55, %56 : vector<10x10x128xf32>
      %58 = vector.extract_strided_slice %52 {offsets = [0, 3, 384], sizes = [10, 10, 128], strides = [1, 1, 1]} : vector<10x16x896xf32> to vector<10x10x128xf32>
      %59 = arith.addf %57, %58 : vector<10x10x128xf32>
      %60 = vector.extract_strided_slice %52 {offsets = [0, 4, 512], sizes = [10, 10, 128], strides = [1, 1, 1]} : vector<10x16x896xf32> to vector<10x10x128xf32>
      %61 = arith.addf %59, %60 : vector<10x10x128xf32>
      %62 = vector.extract_strided_slice %52 {offsets = [0, 5, 640], sizes = [10, 10, 128], strides = [1, 1, 1]} : vector<10x16x896xf32> to vector<10x10x128xf32>
      %63 = arith.addf %61, %62 : vector<10x10x128xf32>
      %64 = vector.extract_strided_slice %52 {offsets = [0, 6, 768], sizes = [10, 10, 128], strides = [1, 1, 1]} : vector<10x16x896xf32> to vector<10x10x128xf32>
      %65 = arith.addf %63, %64 : vector<10x10x128xf32>
      %c0_28 = arith.constant 0 : index
      %c0_29 = arith.constant 0 : index
      %c0_30 = arith.constant 0 : index
      %c0_31 = arith.constant 0 : index
      %66 = vector.load %arg7[%c0_28, %c0_29, %c0_30, %c0_31] : memref<1x10x10x128xf32, #tpu.memory_space<vmem>>, vector<1x10x10x128xf32>
      %67 = vector.shape_cast %66 : vector<1x10x10x128xf32> to vector<10x10x128xf32>
      %68 = vector.shape_cast %65 : vector<10x10x128xf32> to vector<1x10x10x128xf32>
      tpu.vector_store %arg7[%c0_28, %c0_29, %c0_30, %c0_31], %68 {strides = array<i32>} : memref<1x10x10x128xf32, #tpu.memory_space<vmem>>, vector<1x10x10x128xf32>,
      %c0_32 = arith.constant 0 : index
      %c0_33 = arith.constant 0 : index
      %c0_34 = arith.constant 0 : index
      %69 = vector.load %arg9[%c0_32, %c0_33, %c0_34] : memref<16x10x128xf32, #tpu.memory_space<vmem>>, vector<16x10x128xf32>
      %70 = arith.truncf %69 : vector<16x10x128xf32> to vector<16x10x128xbf16>
      %71 = vector.shape_cast %70 : vector<16x10x128xbf16> to vector<160x128xbf16>
      %c0_35 = arith.constant 0 : index
      %c0_36 = arith.constant 0 : index
      %72 = vector.load %arg6[%c0_35, %c0_36] : memref<128x896xbf16, #tpu.memory_space<vmem>>, vector<128x896xbf16>
      %cst_37 = arith.constant dense<0.000000e+00> : vector<160x896xf32>
      %73 = tpu.matmul %71, %72, %cst_37 {dimension_numbers = #tpu.dot_dimension_numbers<[1], [0], [0], [1], [0, 0, 1, 1], [], []>} : vector<160x128xbf16>, vector<128x896xbf16>, vector<160x896xf32> -> vector<160x896xf32>
      %74 = vector.shape_cast %73 : vector<160x896xf32> to vector<16x10x896xf32>
      %75 = vector.extract_strided_slice %74 {offsets = [0, 0, 0], sizes = [10, 10, 128], strides = [1, 1, 1]} : vector<16x10x896xf32> to vector<10x10x128xf32>
      %76 = vector.extract_strided_slice %74 {offsets = [1, 0, 128], sizes = [10, 10, 128], strides = [1, 1, 1]} : vector<16x10x896xf32> to vector<10x10x128xf32>
      %77 = arith.addf %75, %76 : vector<10x10x128xf32>
      %78 = vector.extract_strided_slice %74 {offsets = [2, 0, 256], sizes = [10, 10, 128], strides = [1, 1, 1]} : vector<16x10x896xf32> to vector<10x10x128xf32>
      %79 = arith.addf %77, %78 : vector<10x10x128xf32>
      %80 = vector.extract_strided_slice %74 {offsets = [3, 0, 384], sizes = [10, 10, 128], strides = [1, 1, 1]} : vector<16x10x896xf32> to vector<10x10x128xf32>
      %81 = arith.addf %79, %80 : vector<10x10x128xf32>
      %82 = vector.extract_strided_slice %74 {offsets = [4, 0, 512], sizes = [10, 10, 128], strides = [1, 1, 1]} : vector<16x10x896xf32> to vector<10x10x128xf32>
      %83 = arith.addf %81, %82 : vector<10x10x128xf32>
      %84 = vector.extract_strided_slice %74 {offsets = [5, 0, 640], sizes = [10, 10, 128], strides = [1, 1, 1]} : vector<16x10x896xf32> to vector<10x10x128xf32>
      %85 = arith.addf %83, %84 : vector<10x10x128xf32>
      %86 = vector.extract_strided_slice %74 {offsets = [6, 0, 768], sizes = [10, 10, 128], strides = [1, 1, 1]} : vector<16x10x896xf32> to vector<10x10x128xf32>
      %87 = arith.addf %85, %86 : vector<10x10x128xf32>
      %c0_38 = arith.constant 0 : index
      %c0_39 = arith.constant 0 : index
      %c0_40 = arith.constant 0 : index
      %c0_41 = arith.constant 0 : index
      %88 = vector.load %arg7[%c0_38, %c0_39, %c0_40, %c0_41] : memref<1x10x10x128xf32, #tpu.memory_space<vmem>>, vector<1x10x10x128xf32>
      %89 = vector.shape_cast %88 : vector<1x10x10x128xf32> to vector<10x10x128xf32>
      %90 = arith.addf %89, %87 : vector<10x10x128xf32>
      %c0_42 = arith.constant 0 : index
      %c0_43 = arith.constant 0 : index
      %c0_44 = arith.constant 0 : index
      %c0_45 = arith.constant 0 : index
      %91 = vector.load %arg7[%c0_42, %c0_43, %c0_44, %c0_45] : memref<1x10x10x128xf32, #tpu.memory_space<vmem>>, vector<1x10x10x128xf32>
      %92 = vector.shape_cast %91 : vector<1x10x10x128xf32> to vector<10x10x128xf32>
      %93 = vector.shape_cast %90 : vector<10x10x128xf32> to vector<1x10x10x128xf32>
      tpu.vector_store %arg7[%c0_42, %c0_43, %c0_44, %c0_45], %93 {strides = array<i32>} : memref<1x10x10x128xf32, #tpu.memory_space<vmem>>, vector<1x10x10x128xf32>,
    } else {
    }
    return
  }
  func.func @transform_0(%arg0: i32, %arg1: i32) -> (i32, i32, i32, i32) {
    %c0_i32 = arith.constant 0 : i32
    %c0_i32_0 = arith.constant 0 : i32
    %c0_i32_1 = arith.constant 0 : i32
    return %arg0, %c0_i32, %c0_i32_0, %arg1 : i32, i32, i32, i32
  }
  func.func @transform_1(%arg0: i32, %arg1: i32) -> (i32, i32) {
    %c0_i32 = arith.constant 0 : i32
    %c0_i32_0 = arith.constant 0 : i32
    return %arg1, %c0_i32 : i32, i32
  }
  func.func @transform_2(%arg0: i32, %arg1: i32) -> (i32, i32) {
    %c0_i32 = arith.constant 0 : i32
    %c0_i32_0 = arith.constant 0 : i32
    %c0_i32_1 = arith.constant 0 : i32
    return %c0_i32, %c0_i32_0 : i32, i32
  }
  func.func @transform_3(%arg0: i32, %arg1: i32) -> (i32, i32) {
    %c0_i32 = arith.constant 0 : i32
    %c0_i32_0 = arith.constant 0 : i32
    return %arg1, %c0_i32 : i32, i32
  }
  func.func @transform_4(%arg0: i32, %arg1: i32) -> (i32, i32) {
    %c0_i32 = arith.constant 0 : i32
    %c0_i32_0 = arith.constant 0 : i32
    %c0_i32_1 = arith.constant 0 : i32
    return %c0_i32, %c0_i32_0 : i32, i32
  }
  func.func @transform_5(%arg0: i32, %arg1: i32) -> (i32, i32, i32, i32) {
    %c0_i32 = arith.constant 0 : i32
    %c0_i32_0 = arith.constant 0 : i32
    %c0_i32_1 = arith.constant 0 : i32
    %c0_i32_2 = arith.constant 0 : i32
    return %arg0, %c0_i32, %c0_i32_0, %c0_i32_1 : i32, i32, i32, i32
  }
}

</mosaic_0001>

<bundles_post_ra>
// kernel: tpu_custom_call.1
= control target key start
LH: loop header
LB: loop body
LE: loop exit
PB: predicated region body
PF: predicated region fallthrough
CT: control target
= control target key end

     0   :  { %s14809_s0 = inlined_call_operand.hbm [shape: bf16[2,16,16,256], index: 0, kind: input, shape index: {}]   ;;  %s14810_s1 = inlined_call_operand.hbm [shape: bf16[256,896], index: 1, kind: input, shape index: {}]   ;;  %s14811_s2 = inlined_call_operand.hbm [shape: bf16[128,896], index: 2, kind: input, shape index: {}]   ;;  %s14812_s3 = inlined_call_operand.hbm [shape: bf16[256,896], index: 3, kind: input, shape index: {}]   ;;  %s14813_s4 = inlined_call_operand.hbm [shape: bf16[128,896], index: 4, kind: input, shape index: {}]   ;;  %s14814_s5 = inlined_call_operand.vmem [shape: f32[2,10,10,128], index: 5, kind: output, shape index: {}]  }
   0x1   :  { %14935 = sst [smem:[#allocation100_spill]] %s14809_s0 }
   0x2   :  { %14936 = sst [smem:[#allocation101_spill]] %s14810_s1 }
   0x3   :  { %14937 = sst [smem:[#allocation102_spill]] %s14811_s2 }
   0x4   :  { %14938 = sst [smem:[#allocation103_spill]] %s14813_s4 }
   0x5   :  { %14939 = sst [smem:[#allocation104_spill]] %s14814_s5 }
   0x6   :  { %10 = vsyncpa [#allocation5], 0 }
   0x7   :  { %12 = vsyncpa [#allocation5 + $0x1], 0 }
   0x8   :  { %13 = vsyncpa [#allocation7], 0 }
   0x9   :  { %15 = vsyncpa [#allocation7 + $0x1], 0 }
   0xa   :  { %16 = vsyncpa [#allocation10], 0 }
   0xb   :  { %18 = vsyncpa [#allocation10 + $0x1], 0  ;;  %s11264_s18 = smov 0   ;;  %s11266_s19 = smov 0  }
   0xc   :  { %s11268_s20 = smov 0   ;;  %s11270_s21 = smov 0  }
   0xd   :  { %s11272_s22 = smov 0   ;;  %s11274_s23 = smov 0  }
   0xe   :  { %s11276_s24 = smov 0   ;;  %s11278_s25 = smov 0  }
   0xf   :  { %s11280_s26 = smov 0   ;;  %s11282_s27 = smov 0  }
  0x10   :  { %s11284_s28 = smov 0  }
  0x11 LB: > { %14940 = sst [smem:[#allocation17_spill]] %s11201_s24  ;;  %s14820_s29 = sadd.s32 4294967295, %s11217_s28   ;;  %s11217_s28 = sphi %s11284_s28, %s24_s28   ;;  %s11213_s27 = sphi %s11282_s27, %s15273_s27   ;;  %s11209_s26 = sphi %s11280_s26, %s15281_s26   ;;  %s11205_s25 = sphi %s11278_s25, %s15271_s25   ;;  %s11201_s24 = sphi %s11276_s24, %s15280_s24   ;;  %s11197_s23 = sphi %s11274_s23, %s15279_s23   ;;  %s11193_s22 = sphi %s11272_s22, %s15278_s22   ;;  %s11189_s21 = sphi %s11270_s21, %s15277_s21   ;;  %s11185_s20 = sphi %s11268_s20, %s15276_s20   ;;  %s11181_s19 = sphi %s11266_s19, %s15275_s19   ;;  %s11177_s18 = sphi %s11264_s18, %s15274_s18  }
  0x12   : > { %14941 = sst [smem:[#allocation18_spill]] %s11205_s25  ;;  %p58_p0 = scmp.ne.s32.totalorder %s11193_s22, %s11189_s21 }
  0x13   : > { %14942 = sst [smem:[#allocation19_spill]] %s11213_s27  ;;  %p11319_p1 = scmp.eq.s32.totalorder %s14820_s29, 0 }
  0x14   : > { %p84_p2 = scmp.ne.s32.totalorder %s11181_s19, %s11177_s18  ;;  %p9933_p3 = scmp.ge.s32.totalorder %s11217_s28, 1 }
  0x15   : > { %s14943_s30 = scalar_select %p11319_p1, 1, 0 }
  0x16   : > { %p189_p4 = scmp.lt.s32.totalorder %s11217_s28, 5  ;;  %p11328_p5 = por %p11319_p1, %p58_p0 }
  0x17   : > { %p11334_p6 = por %p84_p2, %p11319_p1  ;;  %s11219_s9 = smov [#allocation8]  }
  0x18   : > { %s14944_s6 = scalar_select %p11328_p5, 1, 0 }
  0x19   : > { %s14945_s7 = scalar_select %p11334_p6, 1, 0 }
  0x1a   : > { %p11338_p7 = pnand %p9933_p3, %p189_p4  ;;  %s201_s10 = sshll.u32 %s11219_s9, 4  ;;  %s202_s10 = int_to_ptr.vmem [resolvable:$true] %s201_s10 }
  0x1b   : > { %s11220_s12 = smov [#allocation11]   ;;  %s14948_s2 = sld [smem:[#allocation102_spill]] }
  0x1c   : > { %s14946_s8 = scalar_select %p11338_p7, 1, 0 }
  0x1d   : > { %p10491_p8 = pneg %p11338_p7  ;;  %s214_s13 = sshll.u32 %s11220_s12, 4  ;;  %s215_s13 = int_to_ptr.vmem [resolvable:$true] %s214_s13 }
  0x1f   : > { %p11346_p9 = pnand %p10491_p8, %p11319_p1 }
  0x21   : > { %s10965_s16 = scalar_lea.hbm %s14948_s2, 7168  ;;  %p10967_p11 = pneg %p11346_p9 }
  0x22   : > { %p10966_p10 = scmp.ne.s32.totalorder %s14948_s2, %s10965_s16  ;;  %p10972_p0 = scmp.lt.u32.totalorder %s10965_s16, %s14948_s2 }
  0x24   : > { %p10968_p12 = pnand %p10967_p11, %p10966_p10 }
  0x26   : > { %p10969_p13 = pneg %p10968_p12 }
  0x28   : > { %p10974_p2 = pnand %p10972_p0, %p10969_p13 }
  0x2a   : > { %10977 = shalt.err (!%p10974_p2)
}
  0x2b   : > { %s10978_s12 = scalar_lea.vmem %s202_s10, 7168  ;;  %p10986_p1 = scmp.lt.s32.totalorder %s202_s10, %s202_s10 }
  0x2c   : > { %p10979_p3 = scmp.ne.s32.totalorder %s202_s10, %s10978_s12  ;;  %p10987_p6 = scmp.lt.s32.totalorder %s10978_s12, %s10978_s12 }
  0x2e   : > { %p10981_p4 = pnand %p10979_p3, %p10967_p11  ;;  %p10988_p5 = por %p10987_p6, %p10986_p1 }
  0x30   : > { %p10982_p8 = pneg %p10981_p4 }
  0x32   : > { %p10989_p7 = pnand %p10988_p5, %p10982_p8 }
  0x34   : > { %10992 = shalt.err (!%p10989_p7)
}
  0x35   : > { %s14821_s14 = smov 448   ;;  %s14823_s15 = smov 28  }
  0x36   : > { %10494 = dma.hbm_to_vmem [thread:$0]  (!%p11346_p9), %s14948_s2, 7168, %s202_s10, [#allocation7], %s14821_s14, %s14821_s14, %s14823_s15  }
  0x37   : > { %s14949_s4 = sld [smem:[#allocation103_spill]] }
  0x3d   : > { %s10993_s9 = scalar_lea.hbm %s14949_s4, 7168 }
  0x3e   : > { %p10994_p1 = scmp.ne.s32.totalorder %s14949_s4, %s10993_s9  ;;  %p11000_p7 = scmp.lt.u32.totalorder %s10993_s9, %s14949_s4 }
  0x40   : > { %p10996_p5 = pnand %p10994_p1, %p10967_p11 }
  0x42   : > { %p10997_p6 = pneg %p10996_p5 }
  0x44   : > { %p11002_p10 = pnand %p11000_p7, %p10997_p6 }
  0x46   : > { %11005 = shalt.err (!%p11002_p10)
}
  0x47   : > { %s11006_s10 = scalar_lea.vmem %s215_s13, 7168  ;;  %p11014_p2 = scmp.lt.s32.totalorder %s215_s13, %s215_s13 }
  0x48   : > { %p11007_p12 = scmp.ne.s32.totalorder %s215_s13, %s11006_s10  ;;  %p11015_p3 = scmp.lt.s32.totalorder %s11006_s10, %s11006_s10 }
  0x4a   : > { %p11009_p13 = pnand %p11007_p12, %p10967_p11  ;;  %p11016_p4 = por %p11015_p3, %p11014_p2 }
  0x4c   : > { %p11010_p0 = pneg %p11009_p13 }
  0x4e   : > { %p11017_p8 = pnand %p11016_p4, %p11010_p0 }
  0x50   : > { %11020 = shalt.err (!%p11017_p8)
}
  0x51   : > { %10497 = dma.hbm_to_vmem [thread:$0]  (!%p11346_p9), %s14949_s4, 7168, %s215_s13, [#allocation10], %s14821_s14, %s14821_s14, %s14823_s15  }
  0x52   : > { %s33_s29 = sadd.s32 1, %s11209_s26  ;;  %s36_s11 = sadd.s32 1, %s11213_s27 }
  0x53   : > { %p34_p11 = scmp.ge.s32.totalorder %s33_s29, 2  ;;  %s45_s16 = sadd.s32 1, %s11197_s23 }
  0x54   : > { %p52_p1 = scmp.ne.s32.totalorder %s11197_s23, %s11193_s22  ;;  %p14828_p5 = scmp.eq.s32.totalorder %s11217_s28, 0 }
  0x55   : > { %s15283_s29 = smov (%p34_p11, %s33_s29), 0  ;;  %s15285_s11 = smov (!%p34_p11, %s36_s11), %s11213_s27 }
  0x56   : > { %14950 = sst [smem:[#allocation20_spill]] %s15283_s29  ;;  %s11409_s17 = ssub.s32 %s11209_s26, %s15283_s29 }
  0x57   : > { %p11413_p9 = por %p14828_p5, %p52_p1  ;;  %p38_p6 = scmp.ge.s32.totalorder %s15285_s11, 2 }
  0x58   : > { %p69_p7 = scmp.eq.s32.totalorder %s11409_s17, 0  ;;  %p14827_p10 = scmp.lt.s32.totalorder %s11217_s28, 4 }
  0x59   : > { %s228_s18 = sand.u32 1, %s11197_s23   ;;  %s15287_s11 = smov (%p38_p6, %s15285_s11), 0 }
  0x5a   : > { %14952 = sst [smem:[#allocation21_spill]] %s15287_s11  ;;  %s9937_s21 = sshll.u32 %s228_s18, 7 }
  0x5b   : > { %s40_s9 = ssub.s32 %s11213_s27, %s15287_s11  ;;  %s9938_s10 = sshll.u32 %s11213_s27, 6 }
  0x5c   : > { %s42_s12 = sor.u32 %s11409_s17, %s40_s9  ;;  %s237_s5 = sadd.s32 %s11209_s26, %s9938_s10 }
  0x5d   : > { %p43_p12 = scmp.eq.s32.totalorder %s42_s12, 0  ;;  %s9939_s24 = sshll.u32 %s237_s5, 6 }
  0x5e   : > { %s232_s14 = scalar_lea.vmem [#allocation4], %s9937_s21  ;;  %s14953_s0 = sld [smem:[#allocation100_spill]] }
  0x5f   : > { %s240_s15 = sshll.u32 %s232_s14, 4  ;;  %p11441_p13 = pnand %p14827_p10, %p11413_p9  ;;  %s11435_s15 = int_to_ptr.vmem [resolvable:$true] %s240_s15 }
  0x60   : > { %s11428_s2 = scalar_select %p43_p12, %s11197_s23, %s45_s16  }
  0x61   : > { %s11445_s14 = scalar_lea.sflag [#allocation5], %s228_s18  ;;  %p11023_p2 = pneg %p11441_p13 }
  0x64   : > { %s11433_s25 = scalar_lea.hbm %s14953_s0, %s9939_s24  ;;  %s11026_s13 = scalar_lea.hbm %s14953_s0, 8192 }
  0x65   : > { %s11021_s16 = scalar_lea.hbm %s11433_s25, 2048  ;;  %p11027_p8 = scmp.lt.u32.totalorder %s11433_s25, %s14953_s0 }
  0x66   : > { %p11022_p0 = scmp.ne.s32.totalorder %s11433_s25, %s11021_s16  ;;  %p11028_p11 = scmp.lt.u32.totalorder %s11026_s13, %s11021_s16 }
  0x67   : > { %p11030_p9 = scmp.lt.u32.totalorder %s11021_s16, %s11433_s25 }
  0x68   : > { %p11024_p3 = pnand %p11023_p2, %p11022_p0  ;;  %p11029_p1 = por %p11028_p11, %p11027_p8 }
  0x6a   : > { %p11025_p4 = pneg %p11024_p3  ;;  %p11031_p6 = por %p11030_p9, %p11029_p1 }
  0x6c   : > { %p11032_p12 = pnand %p11031_p6, %p11025_p4 }
  0x6e   : > { %11035 = shalt.err (!%p11032_p12)
}
  0x6f   : > { %s11036_s18 = scalar_lea.vmem %s11435_s15, 2048  ;;  %s11223_s10 = smov [#allocation4]  }
  0x70   : > { %p11037_p0 = scmp.ne.s32.totalorder %s11435_s15, %s11036_s18  ;;  %s11041_s5 = sshll.u32 %s11223_s10, 4  ;;  %s11042_s5 = int_to_ptr.vmem [resolvable:$false] %s11041_s5 }
  0x71   : > { %s11043_s24 = scalar_lea.vmem %s11042_s5, 4096  ;;  %p11044_p5 = scmp.lt.s32.totalorder %s11435_s15, %s11042_s5 }
  0x72   : > { %p11039_p3 = pnand %p11037_p0, %p11023_p2  ;;  %p11045_p8 = scmp.lt.s32.totalorder %s11043_s24, %s11036_s18 }
  0x74   : > { %p11040_p10 = pneg %p11039_p3  ;;  %p11046_p11 = por %p11045_p8, %p11044_p5 }
  0x76   : > { %p11047_p1 = pnand %p11046_p11, %p11040_p10 }
  0x78   : > { %11050 = shalt.err (!%p11047_p1)
}
  0x79   : > { %s11224_s16 = smov 128   ;;  %s11225_s4 = smov 64  }
  0x7a   : > { %s11226_s29 = smov 4   ;;  %s250_s13 = sand.u32 1, %s11217_s28  }
  0x7b   : > { %10501 = dma.hbm_to_vmem [thread:$0]  (!%p11441_p13), %s11433_s25, 2048, %s11435_s15, %s11445_s14, %s11224_s16, %s11225_s4, %s11226_s29  }
  0x7c   : > { %s71_s21 = sadd.s32 1, %s11185_s20  ;;  %p78_p5 = scmp.ne.s32.totalorder %s11185_s20, %s11181_s19 }
  0x7d   : > { %s11480_s12 = scalar_select %p69_p7, %s11185_s20, %s71_s21  }
  0x7e   : > { %p14955_p10 = scmp.eq.s32.totalorder %s11217_s28, 0  ;;  %s252_s18 = sand.u32 1, %s11185_s20  }
  0x7f   : > { %s10472_s10 = smul.u32 7168, %s11209_s26  ;;  %p14956_p4 = scmp.lt.s32.totalorder %s11217_s28, 4 }
  0x80   : > { %p80_p2 = por %p78_p5, %p14955_p10  ;;  %s11486_s5 = smul.u32 448, %s252_s18 }
  0x81   : > { %s14958_s1 = sld [smem:[#allocation101_spill]]  ;;  %s11505_s29 = scalar_lea.hbm %s14812_s3, %s10472_s10 }
  0x82   : > { %p11490_p9 = pnand %p14956_p4, %p80_p2  ;;  %s254_s17 = scalar_lea.vmem [#allocation6], %s11486_s5 }
  0x83   : > { %s262_s14 = sshll.u32 %s254_s17, 4  ;;  %s11509_s21 = scalar_lea.sflag [#allocation7], %s250_s13  ;;  %s11500_s14 = int_to_ptr.vmem [resolvable:$true] %s262_s14 }
  0x84   : > { %p11053_p13 = pneg %p11490_p9 }
  0x87   : > { %s11497_s15 = scalar_lea.hbm %s14958_s1, %s10472_s10  ;;  %s11056_s17 = scalar_lea.hbm %s14958_s1, 14336 }
  0x88   : > { %s11051_s18 = scalar_lea.hbm %s11497_s15, 7168  ;;  %p11057_p0 = scmp.lt.u32.totalorder %s11497_s15, %s14958_s1 }
  0x89   : > { %p11052_p7 = scmp.ne.s32.totalorder %s11497_s15, %s11051_s18  ;;  %p11058_p3 = scmp.lt.u32.totalorder %s11056_s17, %s11051_s18 }
  0x8a   : > { %p11060_p11 = scmp.lt.u32.totalorder %s11051_s18, %s11497_s15 }
  0x8b   : > { %p11054_p6 = pnand %p11053_p13, %p11052_p7  ;;  %p11059_p8 = por %p11058_p3, %p11057_p0 }
  0x8d   : > { %p11055_p12 = pneg %p11054_p6  ;;  %p11061_p1 = por %p11060_p11, %p11059_p8 }
  0x8f   : > { %p11062_p5 = pnand %p11061_p1, %p11055_p12 }
  0x91   : > { %11065 = shalt.err (!%p11062_p5)
}
  0x92   : > { %s11066_s10 = scalar_lea.vmem %s11500_s14, 7168  ;;  %s11227_s16 = smov [#allocation6]  }
  0x93   : > { %p11067_p10 = scmp.ne.s32.totalorder %s11500_s14, %s11066_s10  ;;  %s11071_s4 = sshll.u32 %s11227_s16, 4  ;;  %s11072_s4 = int_to_ptr.vmem [resolvable:$false] %s11071_s4 }
  0x94   : > { %s11073_s0 = scalar_lea.vmem %s11072_s4, 14336  ;;  %p11074_p7 = scmp.lt.s32.totalorder %s11500_s14, %s11072_s4 }
  0x95   : > { %p11069_p2 = pnand %p11067_p10, %p11053_p13  ;;  %p11075_p6 = scmp.lt.s32.totalorder %s11073_s0, %s11066_s10 }
  0x97   : > { %p11070_p4 = pneg %p11069_p2  ;;  %p11076_p0 = por %p11075_p6, %p11074_p7 }
  0x99   : > { %p11077_p3 = pnand %p11076_p0, %p11070_p4 }
  0x9b   : > { %11080 = shalt.err (!%p11077_p3)
}
  0x9c   : > { %s14959_s11 = smov 28   ;;  %s14960_s18 = smov 448  }
  0x9d   : > { %10504 = dma.hbm_to_vmem [thread:$0]  (!%p11490_p9), %s11497_s15, 7168, %s11500_s14, %s11509_s21, %s14960_s18, %s14960_s18, %s14959_s11  }
  0x9e   : > { %s276_s9 = scalar_lea.vmem [#allocation9], %s11486_s5  ;;  %s11545_s17 = scalar_lea.sflag [#allocation10], %s250_s13 }
  0x9f   : > { %s284_s25 = sshll.u32 %s276_s9, 4  ;;  %s11081_s10 = scalar_lea.hbm %s11505_s29, 7168  ;;  %s11541_s25 = int_to_ptr.vmem [resolvable:$true] %s284_s25 }
  0xa0   : > { %p11082_p12 = scmp.ne.s32.totalorder %s11505_s29, %s11081_s10  ;;  %s11086_s0 = scalar_lea.hbm %s14812_s3, 14336 }
  0xa1   : > { %p11087_p1 = scmp.lt.u32.totalorder %s11505_s29, %s14812_s3  ;;  %p11088_p5 = scmp.lt.u32.totalorder %s11086_s0, %s11081_s10 }
  0xa2   : > { %p11084_p8 = pnand %p11082_p12, %p11053_p13  ;;  %p11090_p2 = scmp.lt.u32.totalorder %s11081_s10, %s11505_s29 }
  0xa3   : > { %p11089_p10 = por %p11088_p5, %p11087_p1 }
  0xa4   : > { %p11085_p11 = pneg %p11084_p8 }
  0xa5   : > { %p11091_p4 = por %p11090_p2, %p11089_p10 }
  0xa7   : > { %p11092_p7 = pnand %p11091_p4, %p11085_p11 }
  0xa9   : > { %11095 = shalt.err (!%p11092_p7)
}
  0xaa   : > { %s11096_s13 = scalar_lea.vmem %s11541_s25, 7168  ;;  %s11228_s5 = smov [#allocation9]  }
  0xab   : > { %p11097_p6 = scmp.ne.s32.totalorder %s11541_s25, %s11096_s13  ;;  %s11101_s15 = sshll.u32 %s11228_s5, 4  ;;  %s11102_s15 = int_to_ptr.vmem [resolvable:$false] %s11101_s15 }
  0xac   : > { %s11103_s1 = scalar_lea.vmem %s11102_s15, 14336  ;;  %p11104_p12 = scmp.lt.s32.totalorder %s11541_s25, %s11102_s15 }
  0xad   : > { %p11099_p0 = pnand %p11097_p6, %p11053_p13  ;;  %p11105_p8 = scmp.lt.s32.totalorder %s11103_s1, %s11096_s13 }
  0xaf   : > { %p11100_p3 = pneg %p11099_p0  ;;  %p11106_p1 = por %p11105_p8, %p11104_p12 }
  0xb1   : > { %p11107_p5 = pnand %p11106_p1, %p11100_p3 }
  0xb3   : > { %11110 = shalt.err (!%p11107_p5)
}
  0xb4   : > { %10507 = dma.hbm_to_vmem [thread:$0]  (!%p11490_p9), %s11505_s29, 7168, %s11541_s25, %s11545_s17, %s14960_s18, %s14960_s18, %s14959_s11  }
  0xb5   : > { %p14961_p13 = scmp.ne.s32.totalorder %s14946_s8, 0 }
  0xb6   : > { %s298_s27 = sand.u32 (!%p14961_p13), 1, %s11193_s22   ;;  %p14962_p11 = scmp.ne.s32.totalorder (!%p14961_p13), %s14944_s6, 0 }
  0xb7   : > { %296 = sbr.rel (%p14961_p13) target bundleno = 1605 (0x645), region = 40  ;;  %s9947_s14 = sshll.u32 (!%p14961_p13), %s298_s27, 7 }
  0xb8   : > { %s299_s21 = scalar_lea.sflag (!%p14961_p13), [#allocation5], %s298_s27  ;;  %s11577_s9 = scalar_lea.vmem (!%p14961_p13), [#allocation4], %s9947_s14 }
  0xbe   : > { %11156 = dma.done.wait (%p14962_p11), %s299_s21, 2048  }
  0xbf   : > { %11158 = vsyncadd (%p14962_p11), %s299_s21, 4294965248  ;;  %s14963_s24 = sadd.s32 4294967295, %s11217_s28   ;;  %s309_s11 = sand.u32 1, %s11181_s19  }
  0xc0   : > { %s307_s29 = sand.u32 1, %s14963_s24   ;;  %s10475_s8 = smul.u32 448, %s309_s11 }
  0xc1   : > { %s308_s18 = scalar_lea.sflag [#allocation7], %s307_s29  ;;  %p14964_p9 = scmp.ne.s32.totalorder %s14945_s7, 0 }
  0xc2   : > { %s11586_s25 = scalar_lea.vmem [#allocation6], %s10475_s8 }
  0xc3   : > { %11160 = dma.done.wait (%p14964_p9), %s308_s18, 7168  }
  0xc4   : > { %11162 = vsyncadd (%p14964_p9), %s308_s18, 4294960128  ;;  %p14965_p10 = scmp.ne.s32.totalorder %s14943_s30, 0 }
  0xc6   : > { %11164 = dma.done.wait (%p14965_p10), [#allocation7], 7168  }
  0xc7   : > { %11166 = vsyncadd (%p14965_p10), [#allocation7], 4294960128  ;;  %s321_s6 = scalar_lea.sflag [#allocation10], %s307_s29  ;;  %s11596_s17 = scalar_lea.vmem [#allocation9], %s10475_s8 }
  0xc8   : > { %11168 = dma.done.wait (%p14964_p9), %s321_s6, 7168  }
  0xc9   : > { %11170 = vsyncadd (%p14964_p9), %s321_s6, 4294960128 }
  0xca   : > { %11172 = dma.done.wait (%p14965_p10), [#allocation10], 7168  }
  0xcb   : > { %11174 = vsyncadd (%p14965_p10), [#allocation10], 4294960128  ;;  %s14966_s10 = sld [smem:[#allocation18_spill]]  ;;  %s14967_s13 = sld [smem:[#allocation104_spill]] }
  0xcc   : > { %s14968_s15 = sld [smem:[#allocation17_spill]] }
  0xd1   : > { %p367_p2 = scmp.lt.s32.totalorder %s14966_s10, 1 }
  0xd2   : > { %p9951_p4 = scmp.ne.s32.totalorder %s14968_s15, 0 }
  0xd3   : > { %s15289_s10 = smov (!%p367_p2, %s14966_s10), 1  ;;  %v11229_v0 = vmov (!%p9951_p4), 0.0  }
  0xd4   : > { %s10476_s16 = smul.u32 160, %s15289_s10  ;;  %377 = vst [vmem:[#allocation2] sm:$0xff] (!%p9951_p4), %v11229_v0  ;;  %378 = vst [vmem:[#allocation2 + $0x8] sm:$0xff] (!%p9951_p4), %v11229_v0 }
  0xd5   : > { %376 = sbr.rel (%p9951_p4) target bundleno = 238 (0xee), region = 64  ;;  %379 = vst [vmem:[#allocation2 + $0x10] sm:$0xff] (!%p9951_p4), %v11229_v0  ;;  %380 = vst [vmem:[#allocation2 + $0x18] sm:$0xff] (!%p9951_p4), %v11229_v0 }
  0xd6   : > { %s11611_s5 = scalar_lea.vmem %s14967_s13, %s10476_s16  ;;  %381 = vst [vmem:[#allocation2 + $0x20] sm:$0xff] (!%p9951_p4), %v11229_v0  ;;  %382 = vst [vmem:[#allocation2 + $0x28] sm:$0xff] (!%p9951_p4), %v11229_v0 }
  0xd7   : > { %383 = vst [vmem:[#allocation2 + $0x30] sm:$0xff] (!%p9951_p4), %v11229_v0  ;;  %384 = vst [vmem:[#allocation2 + $0x38] sm:$0xff] (!%p9951_p4), %v11229_v0 }
  0xd8   : > { %385 = vst [vmem:[#allocation2 + $0x40] sm:$0xff] (!%p9951_p4), %v11229_v0  ;;  %386 = vst [vmem:[#allocation2 + $0x48] sm:$0xff] (!%p9951_p4), %v11229_v0 }
  0xd9   : > { %387 = vst [vmem:[#allocation2 + $0x50] sm:$0xff] (!%p9951_p4), %v11229_v0  ;;  %388 = vst [vmem:[#allocation2 + $0x58] sm:$0xff] (!%p9951_p4), %v11229_v0 }
  0xda   : > { %389 = vst [vmem:[#allocation2 + $0x60] sm:$0xff] (!%p9951_p4), %v11229_v0  ;;  %390 = vst [vmem:[#allocation2 + $0x68] sm:$0xff] (!%p9951_p4), %v11229_v0 }
  0xdb   : > { %391 = vst [vmem:[#allocation2 + $0x70] sm:$0xff] (!%p9951_p4), %v11229_v0  ;;  %392 = vst [vmem:[#allocation2 + $0x78] sm:$0xff] (!%p9951_p4), %v11229_v0 }
  0xdc   : > { %393 = vst [vmem:[#allocation2 + $0x80] sm:$0xff] %v11229_v0  ;;  %394 = vst [vmem:[#allocation2 + $0x88] sm:$0xff] %v11229_v0 }
  0xdd   : > { %395 = vst [vmem:[#allocation2 + $0x90] sm:$0xff] %v11229_v0  ;;  %396 = vst [vmem:[#allocation2 + $0x98] sm:$0xff] %v11229_v0 }
  0xde   : > { %397 = vst [vmem:[#allocation3] sm:$0xff] %v11229_v0  ;;  %398 = vst [vmem:[#allocation3 + $0x8] sm:$0x3] %v11229_v0 }
  0xdf   : > { %399 = vst [vmem:[#allocation3 + $0x10] sm:$0xff] %v11229_v0  ;;  %400 = vst [vmem:[#allocation3 + $0x18] sm:$0x3] %v11229_v0 }
  0xe0   : > { %401 = vst [vmem:[#allocation3 + $0x20] sm:$0xff] %v11229_v0  ;;  %402 = vst [vmem:[#allocation3 + $0x28] sm:$0x3] %v11229_v0 }
  0xe1   : > { %403 = vst [vmem:[#allocation3 + $0x30] sm:$0xff] %v11229_v0  ;;  %404 = vst [vmem:[#allocation3 + $0x38] sm:$0x3] %v11229_v0 }
  0xe2   : > { %405 = vst [vmem:[#allocation3 + $0x40] sm:$0xff] %v11229_v0  ;;  %406 = vst [vmem:[#allocation3 + $0x48] sm:$0x3] %v11229_v0 }
  0xe3   : > { %407 = vst [vmem:[#allocation3 + $0x50] sm:$0xff] %v11229_v0  ;;  %408 = vst [vmem:[#allocation3 + $0x58] sm:$0x3] %v11229_v0 }
  0xe4   : > { %409 = vst [vmem:[#allocation3 + $0x60] sm:$0xff] %v11229_v0  ;;  %410 = vst [vmem:[#allocation3 + $0x68] sm:$0x3] %v11229_v0 }
  0xe5   : > { %411 = vst [vmem:[#allocation3 + $0x70] sm:$0xff] %v11229_v0  ;;  %412 = vst [vmem:[#allocation3 + $0x78] sm:$0x3] %v11229_v0 }
  0xe6   : > { %413 = vst [vmem:[#allocation3 + $0x80] sm:$0xff] %v11229_v0  ;;  %414 = vst [vmem:[#allocation3 + $0x88] sm:$0x3] %v11229_v0 }
  0xe7   : > { %415 = vst [vmem:[#allocation3 + $0x90] sm:$0xff] %v11229_v0  ;;  %416 = vst [vmem:[#allocation3 + $0x98] sm:$0x3] %v11229_v0 }
  0xe8   : > { %417 = vst [vmem:[#allocation3 + $0xa0] sm:$0xff] %v11229_v0  ;;  %418 = vst [vmem:[#allocation3 + $0xa8] sm:$0x3] %v11229_v0 }
  0xe9   : > { %419 = vst [vmem:[#allocation3 + $0xb0] sm:$0xff] %v11229_v0  ;;  %420 = vst [vmem:[#allocation3 + $0xb8] sm:$0x3] %v11229_v0 }
  0xea   : > { %421 = vst [vmem:[#allocation3 + $0xc0] sm:$0xff] %v11229_v0  ;;  %422 = vst [vmem:[#allocation3 + $0xc8] sm:$0x3] %v11229_v0 }
  0xeb   : > { %423 = vst [vmem:[#allocation3 + $0xd0] sm:$0xff] %v11229_v0  ;;  %424 = vst [vmem:[#allocation3 + $0xd8] sm:$0x3] %v11229_v0 }
  0xec   : > { %425 = vst [vmem:[#allocation3 + $0xe0] sm:$0xff] %v11229_v0  ;;  %426 = vst [vmem:[#allocation3 + $0xe8] sm:$0x3] %v11229_v0 }
  0xed   : > { %427 = vst [vmem:[#allocation3 + $0xf0] sm:$0xff] %v11229_v0  ;;  %428 = vst [vmem:[#allocation3 + $0xf8] sm:$0x3] %v11229_v0 }
  0xee PF: > { %v10613_v1 = vld [vmem:[%s11586_s25 + $0x4] ss:$28 sps:$4 sm:$0xff]   ;;  %v10615_v2 = vld [vmem:[%s11586_s25 + $0xc] ss:$28 sps:$4 sm:$0xff]   ;;  %v11230_v3 = vmov 0   ;;  %v11677_v50 = vld [vmem:[%s11577_s9 + $0x10] sm:$0xff]  }
  0xef   : > { %941 = vmatprep.mubr.bf16.mxu0 %v11230_v3  ;;  %1110 = vmatprep.mubr.bf16.mxu1 %v11230_v3  ;;  %v10617_v4 = vld [vmem:[%s11586_s25] ss:$28 sps:$4 sm:$0xff]   ;;  %v10618_v5 = vld [vmem:[%s11586_s25 + $0x8] ss:$28 sps:$4 sm:$0xff]   ;;  %v10623_v8 = vld [vmem:[%s11586_s25 + $0x38] ss:$28 sps:$4 sm:$0xff]  }
  0xf0   : > { %909 = vmatprep.subr.bf16.mxu0 %v10613_v1  ;;  %1078 = vmatprep.subr.bf16.mxu1 %v10615_v2  ;;  %v10619_v6 = vld [vmem:[%s11586_s25 + $0x3c] ss:$28 sps:$4 sm:$0xff]   ;;  %v10621_v7 = vld [vmem:[%s11586_s25 + $0x44] ss:$28 sps:$4 sm:$0xff]   ;;  %v10625_v10 = vld [vmem:[%s11586_s25 + $0x74] ss:$28 sps:$4 sm:$0xff]  }
  0xf1   : > { %910 = vmatpush1.bf16.msra.mxu0 %v10617_v4  ;;  %1079 = vmatpush1.bf16.msra.mxu1 %v10618_v5  ;;  %v10624_v9 = vld [vmem:[%s11586_s25 + $0x40] ss:$28 sps:$4 sm:$0xff]   ;;  %v10629_v12 = vld [vmem:[%s11586_s25 + $0x70] ss:$28 sps:$4 sm:$0xff]   ;;  %v10630_v13 = vld [vmem:[%s11586_s25 + $0x78] ss:$28 sps:$4 sm:$0xff]  }
  0xf2   : > { %911 = vmatprep.subr.bf16.mxu0 %v10619_v6  ;;  %1080 = vmatprep.subr.bf16.mxu1 %v10621_v7  ;;  %v10627_v11 = vld [vmem:[%s11586_s25 + $0x7c] ss:$28 sps:$4 sm:$0xff]   ;;  %v10631_v14 = vld [vmem:[%s11586_s25 + $0xac] ss:$28 sps:$4 sm:$0xff]   ;;  %v10633_v15 = vld [vmem:[%s11586_s25 + $0xb4] ss:$28 sps:$4 sm:$0xff]  }
  0xf3   : > { %v10635_v16 = vld [vmem:[%s11586_s25 + $0xa8] ss:$28 sps:$4 sm:$0xff]   ;;  %v10636_v17 = vld [vmem:[%s11586_s25 + $0xb0] ss:$28 sps:$4 sm:$0xff]   ;;  %v10641_v20 = vld [vmem:[%s11586_s25 + $0xe0] ss:$28 sps:$4 sm:$0xff]  }
  0xf4   : > { %v10637_v18 = vld [vmem:[%s11586_s25 + $0xe4] ss:$28 sps:$4 sm:$0xff]   ;;  %v10639_v19 = vld [vmem:[%s11586_s25 + $0xec] ss:$28 sps:$4 sm:$0xff]   ;;  %v10643_v22 = vld [vmem:[%s11586_s25 + $0x11c] ss:$28 sps:$4 sm:$0xff]  }
  0xf5   : > { %912 = vmatpush1.bf16.msra.mxu0 %v10623_v8  ;;  %1081 = vmatpush1.bf16.msra.mxu1 %v10624_v9  ;;  %v10642_v21 = vld [vmem:[%s11586_s25 + $0xe8] ss:$28 sps:$4 sm:$0xff]   ;;  %v10647_v24 = vld [vmem:[%s11586_s25 + $0x118] ss:$28 sps:$4 sm:$0xff]   ;;  %v10648_v25 = vld [vmem:[%s11586_s25 + $0x120] ss:$28 sps:$4 sm:$0xff]  }
  0xf6   : > { %913 = vmatprep.subr.bf16.mxu0 %v10625_v10  ;;  %1082 = vmatprep.subr.bf16.mxu1 %v10627_v11  ;;  %v10645_v23 = vld [vmem:[%s11586_s25 + $0x124] ss:$28 sps:$4 sm:$0xff]   ;;  %v10649_v26 = vld [vmem:[%s11586_s25 + $0x154] ss:$28 sps:$4 sm:$0xff]   ;;  %v10651_v27 = vld [vmem:[%s11586_s25 + $0x15c] ss:$28 sps:$4 sm:$0xff]  }
  0xf7   : > { %v10653_v28 = vld [vmem:[%s11586_s25 + $0x150] ss:$28 sps:$4 sm:$0xff]   ;;  %v10654_v29 = vld [vmem:[%s11586_s25 + $0x158] ss:$28 sps:$4 sm:$0xff]   ;;  %v10659_v32 = vld [vmem:[%s11586_s25 + $0x188] ss:$28 sps:$4 sm:$0xff]  }
  0xf8   : > { %v10655_v30 = vld [vmem:[%s11586_s25 + $0x18c] ss:$28 sps:$4 sm:$0xff]   ;;  %v10657_v31 = vld [vmem:[%s11586_s25 + $0x194] ss:$28 sps:$4 sm:$0xff]   ;;  %v11651_v36 = vld [vmem:[%s11577_s9] sm:$0xff]   ;;  %vm2869_vm0 = vcmask 1046528  }
  0xf9   : > { %914 = vmatpush1.bf16.msra.mxu0 %v10629_v12  ;;  %1083 = vmatpush1.bf16.msra.mxu1 %v10630_v13  ;;  %v10660_v33 = vld [vmem:[%s11586_s25 + $0x190] ss:$28 sps:$4 sm:$0xff]   ;;  %v10662_v34 = vld [vmem:[%s11586_s25 + $0x18] ss:$28 sps:$4 sm:$0xff]   ;;  %v10669_v40 = vld [vmem:[%s11586_s25 + $0x48] ss:$28 sps:$4 sm:$0xff]  }
  0xfa   : > { %915 = vmatprep.subr.bf16.mxu0 %v10631_v14  ;;  %1084 = vmatprep.subr.bf16.mxu1 %v10633_v15  ;;  %v10665_v35 = vld [vmem:[%s11586_s25 + $0x14] ss:$28 sps:$4 sm:$0xff]   ;;  %v10671_v39 = vld [vmem:[%s11586_s25 + $0x4c] ss:$28 sps:$4 sm:$0xff]   ;;  %v10677_v42 = vld [vmem:[%s11586_s25 + $0x84] ss:$28 sps:$4 sm:$0xff]  }
  0xfb   : > { %v10663_v37 = vld [vmem:[%s11586_s25 + $0x10] ss:$28 sps:$4 sm:$0xff]   ;;  %v10674_v41 = vld [vmem:[%s11586_s25 + $0x88] ss:$28 sps:$4 sm:$0xff]   ;;  %v10675_v44 = vld [vmem:[%s11586_s25 + $0x80] ss:$28 sps:$4 sm:$0xff]  }
  0xfc   : > { %v10668_v38 = vld [vmem:[%s11586_s25 + $0x50] ss:$28 sps:$4 sm:$0xff]   ;;  %v10680_v45 = vld [vmem:[%s11586_s25 + $0xc0] ss:$28 sps:$4 sm:$0xff]   ;;  %v10681_v47 = vld [vmem:[%s11586_s25 + $0xb8] ss:$28 sps:$4 sm:$0xff]  }
  0xfd   : > { %916 = vmatpush1.bf16.msra.mxu0 %v10635_v16  ;;  %1085 = vmatpush1.bf16.msra.mxu1 %v10636_v17  ;;  %v11664_v43 = vld [vmem:[%s11577_s9 + $0x8] sm:$0xff]   ;;  %v10683_v46 = vld [vmem:[%s11586_s25 + $0xbc] ss:$28 sps:$4 sm:$0xff]   ;;  %v10689_v49 = vld [vmem:[%s11586_s25 + $0xf4] ss:$28 sps:$4 sm:$0xff]   ;;  %vm3014_vm1 = vcmask 1045504  }
  0xfe   : > { %917 = vmatprep.subr.bf16.mxu0 %v10637_v18  ;;  %1086 = vmatprep.subr.bf16.mxu1 %v10639_v19  ;;  %v10686_v48 = vld [vmem:[%s11586_s25 + $0xf8] ss:$28 sps:$4 sm:$0xff]   ;;  %v10687_v51 = vld [vmem:[%s11586_s25 + $0xf0] ss:$28 sps:$4 sm:$0xff]   ;;  %v10693_v54 = vld [vmem:[%s11586_s25 + $0x128] ss:$28 sps:$4 sm:$0xff]  }
  0xff   : > { %v10692_v52 = vld [vmem:[%s11586_s25 + $0x130] ss:$28 sps:$4 sm:$0xff]   ;;  %v10698_v55 = vld [vmem:[%s11586_s25 + $0x168] ss:$28 sps:$4 sm:$0xff]   ;;  %v11690_v57 = vld [vmem:[%s11577_s9 + $0x18] sm:$0xff]   ;;  %vm3159_vm2 = vcmask 1044480  }
 0x100   : > { %v10695_v53 = vld [vmem:[%s11586_s25 + $0x12c] ss:$28 sps:$4 sm:$0xff]   ;;  %v10701_v56 = vld [vmem:[%s11586_s25 + $0x164] ss:$28 sps:$4 sm:$0xff]   ;;  %v10707_v60 = vld [vmem:[%s11586_s25 + $0x19c] ss:$28 sps:$4 sm:$0xff]  }
 0x101   : > { %918 = vmatpush1.bf16.msra.mxu0 %v10641_v20  ;;  %1087 = vmatpush1.bf16.msra.mxu1 %v10642_v21  ;;  %v10699_v58 = vld [vmem:[%s11586_s25 + $0x160] ss:$28 sps:$4 sm:$0xff]   ;;  %v10705_v61 = vld [vmem:[%s11586_s25 + $0x198] ss:$28 sps:$4 sm:$0xff]   ;;  %v10714_v63 = vld [vmem:[%s11596_s17 + $0xc] ss:$28 sps:$4 sm:$0xff]  }
 0x102   : > { %919 = vmatprep.subr.bf16.mxu0 %v10643_v22  ;;  %1088 = vmatprep.subr.bf16.mxu1 %v10645_v23  ;;  %v10704_v59 = vld [vmem:[%s11586_s25 + $0x1a0] ss:$28 sps:$4 sm:$0xff]   ;;  %v11710_v1 = vld [vmem:[%s11577_s9 + $0x28] sm:$0xff]   ;;  %v11717_v2 = vld [vmem:[%s11577_s9 + $0x30] sm:$0xff]   ;;  %vm3304_vm3 = vcmask 1043456   ;;  %vm3449_vm4 = vcmask 1042432  }
 0x103   : > { %v10711_v62 = vld [vmem:[%s11596_s17 + $0x4] ss:$28 sps:$4 sm:$0xff]   ;;  %v11724_v4 = vld [vmem:[%s11577_s9 + $0x38] sm:$0xff]   ;;  %v11738_v6 = vld [vmem:[%s11577_s9 + $0x48] sm:$0xff]   ;;  %vm3594_vm5 = vcmask 1041408   ;;  %s14969_s30 = sld [smem:[#allocation17_spill]] }
 0x104   : > { %v11703_v0 = vld [vmem:[%s11577_s9 + $0x20] sm:$0xff]   ;;  %v11745_v7 = vld [vmem:[%s11577_s9 + $0x50] sm:$0xff]   ;;  %v11752_v8 = vld [vmem:[%s11577_s9 + $0x58] sm:$0xff]  }
 0x105   : > { %920 = vmatpush1.bf16.msra.mxu0 %v10647_v24  ;;  %1089 = vmatpush1.bf16.msra.mxu1 %v10648_v25  ;;  %v11731_v5 = vld [vmem:[%s11577_s9 + $0x40] sm:$0xff]   ;;  %v11766_v10 = vld [vmem:[%s11577_s9 + $0x68] sm:$0xff]   ;;  %v11773_v11 = vld [vmem:[%s11577_s9 + $0x70] sm:$0xff]  }
 0x106   : > { %921 = vmatprep.subr.bf16.mxu0 %v10649_v26  ;;  %1090 = vmatprep.subr.bf16.mxu1 %v10651_v27  ;;  %v11759_v9 = vld [vmem:[%s11577_s9 + $0x60] sm:$0xff]   ;;  %v11780_v12 = vld [vmem:[%s11577_s9 + $0x78] sm:$0xff]   ;;  %v10720_v19 = vld [vmem:[%s11596_s17 + $0x74] ss:$28 sps:$4 sm:$0xff]  }
 0x107   : > { %v10709_v13 = vld [vmem:[%s11596_s17] ss:$28 sps:$4 sm:$0xff]   ;;  %v10712_v14 = vld [vmem:[%s11596_s17 + $0x8] ss:$28 sps:$4 sm:$0xff]   ;;  %v10715_v17 = vld [vmem:[%s11596_s17 + $0x38] ss:$28 sps:$4 sm:$0xff]  }
 0x108   : > { %v10717_v15 = vld [vmem:[%s11596_s17 + $0x3c] ss:$28 sps:$4 sm:$0xff]   ;;  %v10723_v16 = vld [vmem:[%s11596_s17 + $0x44] ss:$28 sps:$4 sm:$0xff]   ;;  %v10718_v21 = vld [vmem:[%s11596_s17 + $0x70] ss:$28 sps:$4 sm:$0xff]  }
 0x109   : > { %922 = vmatpush1.bf16.msra.mxu0 %v10653_v28  ;;  %1091 = vmatpush1.bf16.msra.mxu1 %v10654_v29  ;;  %v10721_v18 = vld [vmem:[%s11596_s17 + $0x40] ss:$28 sps:$4 sm:$0xff]   ;;  %v10730_v22 = vld [vmem:[%s11596_s17 + $0x78] ss:$28 sps:$4 sm:$0xff]   ;;  %v10726_v23 = vld [vmem:[%s11596_s17 + $0xac] ss:$28 sps:$4 sm:$0xff]  }
 0x10a   : > { %923 = vmatprep.subr.bf16.mxu0 %v10655_v30  ;;  %1092 = vmatprep.subr.bf16.mxu1 %v10657_v31  ;;  %v10732_v20 = vld [vmem:[%s11596_s17 + $0x7c] ss:$28 sps:$4 sm:$0xff]   ;;  %v10741_v24 = vld [vmem:[%s11596_s17 + $0xb4] ss:$28 sps:$4 sm:$0xff]   ;;  %v10724_v25 = vld [vmem:[%s11596_s17 + $0xa8] ss:$28 sps:$4 sm:$0xff]  }
 0x10b   : > { %v10739_v26 = vld [vmem:[%s11596_s17 + $0xb0] ss:$28 sps:$4 sm:$0xff]   ;;  %v10729_v27 = vld [vmem:[%s11596_s17 + $0xe4] ss:$28 sps:$4 sm:$0xff]   ;;  %v10735_v31 = vld [vmem:[%s11596_s17 + $0x11c] ss:$28 sps:$4 sm:$0xff]  }
 0x10c   : > { %v10750_v28 = vld [vmem:[%s11596_s17 + $0xec] ss:$28 sps:$4 sm:$0xff]   ;;  %v10727_v29 = vld [vmem:[%s11596_s17 + $0xe0] ss:$28 sps:$4 sm:$0xff]   ;;  %p10080_p7 = scmp.ne.s32.totalorder %s14969_s30, 1 }
 0x10d   : > { %924 = vmatpush1.bf16.msra.mxu0 %v10659_v32  ;;  %1093 = vmatpush1.bf16.msra.mxu1 %v10660_v33  ;;  %v10748_v30 = vld [vmem:[%s11596_s17 + $0xe8] ss:$28 sps:$4 sm:$0xff]   ;;  %v10733_v33 = vld [vmem:[%s11596_s17 + $0x118] ss:$28 sps:$4 sm:$0xff]  }
 0x10e   : > { %10303 = vmatprep.subr.bf16.mxu1 %v10662_v34  ;;  %1247 = vmatprep.subr.bf16.mxu0 %v10665_v35  ;;  %v10756_v32 = vld [vmem:[%s11596_s17 + $0x124] ss:$28 sps:$4 sm:$0xff]   ;;  %v10738_v35 = vld [vmem:[%s11596_s17 + $0x154] ss:$28 sps:$4 sm:$0xff]  }
 0x110   : > { %942 = vmatmul.mubr.bf16.vlgmr.msra.gmra.mrb[0].mxu0 %v11651_v36  ;;  %1111 = vmatmul.mubr.bf16.vlgmr.msra.gmra.mrb[0].mxu1 %v11651_v36 }
 0x111   : > { %10304 = vmatpush3.bf16.msra.mxu1 %v10662_v34  ;;  %1248 = vmatpush1.bf16.msra.mxu0 %v10663_v37  ;;  %v10754_v34 = vld [vmem:[%s11596_s17 + $0x120] ss:$28 sps:$4 sm:$0xff]  }
 0x112   : > { %949 = vmatprep.mubr.bf16.mxu0 %v11230_v3  ;;  %1116 = vmatprep.mubr.bf16.mxu1 %v11230_v3  ;;  %v10762_v37 = vld [vmem:[%s11596_s17 + $0x15c] ss:$28 sps:$4 sm:$0xff]  }
 0x113   : > { %10305 = vmatprep.subr.bf16.mxu1 %v10668_v38  ;;  %1249 = vmatprep.subr.bf16.mxu0 %v10671_v39  ;;  %v10760_v39 = vld [vmem:[%s11596_s17 + $0x158] ss:$28 sps:$4 sm:$0xff]  }
 0x115   : > { %10306 = vmatpush3.bf16.msra.mxu1 %v10668_v38  ;;  %1250 = vmatpush1.bf16.msra.mxu0 %v10669_v40  ;;  %v10736_v38 = vld [vmem:[%s11596_s17 + $0x150] ss:$28 sps:$4 sm:$0xff]  }
 0x116   : > { %10307 = vmatprep.subr.bf16.mxu1 %v10674_v41  ;;  %1251 = vmatprep.subr.bf16.mxu0 %v10677_v42  ;;  %v10744_v40 = vld [vmem:[%s11596_s17 + $0x18c] ss:$28 sps:$4 sm:$0xff]  }
 0x117   : > { %v10742_v42 = vld [vmem:[%s11596_s17 + $0x188] ss:$28 sps:$4 sm:$0xff]  }
 0x118   : > { %950 = vmatmul.mubr.bf16.gmra.mrb[4].mxu0 %v11664_v43  ;;  %1117 = vmatmul.mubr.bf16.gmra.mrb[4].mxu1 %v11664_v43 }
 0x119   : > { %959 = vmatprep.mubr.bf16.mxu0 %v11230_v3  ;;  %1122 = vmatprep.mubr.bf16.mxu1 %v11230_v3 }
 0x11a   : > { %10308 = vmatpush3.bf16.msra.mxu1 %v10674_v41  ;;  %1252 = vmatpush1.bf16.msra.mxu0 %v10675_v44  ;;  %v10768_v41 = vld [vmem:[%s11596_s17 + $0x194] ss:$28 sps:$4 sm:$0xff]  }
 0x11b   : > { %10309 = vmatprep.subr.bf16.mxu1 %v10680_v45  ;;  %1253 = vmatprep.subr.bf16.mxu0 %v10683_v46  ;;  %v10766_v44 = vld [vmem:[%s11596_s17 + $0x190] ss:$28 sps:$4 sm:$0xff]   ;;  %v11834_v46 = vld [vmem:[%s11596_s17 + $0x18] ss:$28 sps:$4 sm:$0xff]  }
 0x11e   : > { %10310 = vmatpush3.bf16.msra.mxu1 %v10680_v45  ;;  %1254 = vmatpush1.bf16.msra.mxu0 %v10681_v47  ;;  %v10747_v45 = vld [vmem:[%s11596_s17 + $0x14] ss:$28 sps:$4 sm:$0xff]  }
 0x11f   : > { %10311 = vmatprep.subr.bf16.mxu1 %v10686_v48  ;;  %1255 = vmatprep.subr.bf16.mxu0 %v10689_v49  ;;  %v10745_v47 = vld [vmem:[%s11596_s17 + $0x10] ss:$28 sps:$4 sm:$0xff]   ;;  %v10751_v49 = vld [vmem:[%s11596_s17 + $0x48] ss:$28 sps:$4 sm:$0xff]  }
 0x120   : > { %960 = vmatmul.mubr.bf16.gmra.mrb[8].mxu0 %v11677_v50  ;;  %1123 = vmatmul.mubr.bf16.gmra.mrb[8].mxu1 %v11677_v50 }
 0x121   : > { %969 = vmatprep.mubr.bf16.mxu0 %v11230_v3  ;;  %1130 = vmatprep.mubr.bf16.mxu1 %v11230_v3 }
 0x122   : > { %10312 = vmatpush3.bf16.msra.mxu1 %v10686_v48  ;;  %1256 = vmatpush1.bf16.msra.mxu0 %v10687_v51  ;;  %v10753_v48 = vld [vmem:[%s11596_s17 + $0x4c] ss:$28 sps:$4 sm:$0xff]   ;;  %v10759_v51 = vld [vmem:[%s11596_s17 + $0x84] ss:$28 sps:$4 sm:$0xff]  }
 0x123   : > { %10313 = vmatprep.subr.bf16.mxu1 %v10692_v52  ;;  %1257 = vmatprep.subr.bf16.mxu0 %v10695_v53  ;;  %v10765_v53 = vld [vmem:[%s11596_s17 + $0xbc] ss:$28 sps:$4 sm:$0xff]  }
 0x126   : > { %10314 = vmatpush3.bf16.msra.mxu1 %v10692_v52  ;;  %1258 = vmatpush1.bf16.msra.mxu0 %v10693_v54  ;;  %v10757_v52 = vld [vmem:[%s11596_s17 + $0x80] ss:$28 sps:$4 sm:$0xff]   ;;  %v10763_v54 = vld [vmem:[%s11596_s17 + $0xb8] ss:$28 sps:$4 sm:$0xff]  }
 0x127   : > { %10315 = vmatprep.subr.bf16.mxu1 %v10698_v55  ;;  %1259 = vmatprep.subr.bf16.mxu0 %v10701_v56  ;;  %v10769_v56 = vld [vmem:[%s11596_s17 + $0xf0] ss:$28 sps:$4 sm:$0xff]  }
 0x128   : > { %970 = vmatmul.mubr.bf16.gmra.mrb[12].mxu0 %v11690_v57  ;;  %1131 = vmatmul.mubr.bf16.gmra.mrb[12].mxu1 %v11690_v57 }
 0x129   : > { %979 = vmatprep.mubr.bf16.mxu0 %v11230_v3  ;;  %1140 = vmatprep.mubr.bf16.mxu1 %v11230_v3 }
 0x12a   : > { %10316 = vmatpush3.bf16.msra.mxu1 %v10698_v55  ;;  %1260 = vmatpush1.bf16.msra.mxu0 %v10699_v58  ;;  %v10771_v55 = vld [vmem:[%s11596_s17 + $0xf4] ss:$28 sps:$4 sm:$0xff]   ;;  %v10775_v58 = vld [vmem:[%s11596_s17 + $0x12c] ss:$28 sps:$4 sm:$0xff]  }
 0x12b   : > { %10317 = vmatprep.subr.bf16.mxu1 %v10704_v59  ;;  %1261 = vmatprep.subr.bf16.mxu0 %v10707_v60 }
 0x12e   : > { %10318 = vmatpush3.bf16.msra.mxu1 %v10704_v59  ;;  %1262 = vmatpush1.bf16.msra.mxu0 %v10705_v61  ;;  %v10773_v59 = vld [vmem:[%s11596_s17 + $0x128] ss:$28 sps:$4 sm:$0xff]  }
 0x12f   : > { %2097 = vmatprep.subr.bf16.mxu1 %v10711_v62  ;;  %2290 = vmatprep.subr.bf16.mxu0 %v10714_v63  ;;  %v10779_v62 = vld [vmem:[%s11596_s17 + $0x164] ss:$28 sps:$4 sm:$0xff]  }
 0x130   : > { %980 = vmatmul.mubr.bf16.gmra.mrb[16].mxu0 %v11703_v0  ;;  %1141 = vmatmul.mubr.bf16.gmra.mrb[16].mxu1 %v11703_v0 }
 0x131   : > { %989 = vmatprep.mubr.bf16.mxu0 %v11230_v3  ;;  %1150 = vmatprep.mubr.bf16.mxu1 %v11230_v3 }
 0x138   : > { %990 = vmatmul.mubr.bf16.gmra.mrb[20].mxu0 %v11710_v1  ;;  %1151 = vmatmul.mubr.bf16.gmra.mrb[20].mxu1 %v11710_v1 }
 0x139   : > { %999 = vmatprep.mubr.bf16.mxu0 %v11230_v3  ;;  %1160 = vmatprep.mubr.bf16.mxu1 %v11230_v3 }
 0x140   : > { %1000 = vmatmul.mubr.bf16.gmra.mrb[24].mxu0 %v11717_v2  ;;  %1161 = vmatmul.mubr.bf16.gmra.mrb[24].mxu1 %v11717_v2 }
 0x141   : > { %1009 = vmatprep.mubr.bf16.mxu0 %v11230_v3  ;;  %1170 = vmatprep.mubr.bf16.mxu1 %v11230_v3 }
 0x148   : > { %1010 = vmatmul.mubr.bf16.gmra.mrb[28].mxu0 %v11724_v4  ;;  %1171 = vmatmul.mubr.bf16.gmra.mrb[28].mxu1 %v11724_v4 }
 0x149   : > { %1019 = vmatprep.mubr.bf16.mxu0 %v11230_v3  ;;  %1180 = vmatprep.mubr.bf16.mxu1 %v11230_v3 }
 0x150   : > { %1020 = vmatmul.mubr.bf16.gmra.mrb[32].mxu0 %v11731_v5  ;;  %1181 = vmatmul.mubr.bf16.gmra.mrb[32].mxu1 %v11731_v5 }
 0x151   : > { %1029 = vmatprep.mubr.bf16.mxu0 %v11230_v3  ;;  %1190 = vmatprep.mubr.bf16.mxu1 %v11230_v3 }
 0x158   : > { %1030 = vmatmul.mubr.bf16.gmra.mrb[36].mxu0 %v11738_v6  ;;  %1191 = vmatmul.mubr.bf16.gmra.mrb[36].mxu1 %v11738_v6 }
 0x159   : > { %1039 = vmatprep.mubr.bf16.mxu0 %v11230_v3  ;;  %1200 = vmatprep.mubr.bf16.mxu1 %v11230_v3 }
 0x160   : > { %1040 = vmatmul.mubr.bf16.gmra.mrb[40].mxu0 %v11745_v7  ;;  %1201 = vmatmul.mubr.bf16.gmra.mrb[40].mxu1 %v11745_v7 }
 0x161   : > { %1047 = vmatprep.mubr.bf16.mxu0 %v11230_v3  ;;  %1210 = vmatprep.mubr.bf16.mxu1 %v11230_v3 }
 0x168   : > { %1048 = vmatmul.mubr.bf16.gmra.mrb[44].mxu0 %v11752_v8  ;;  %1211 = vmatmul.mubr.bf16.gmra.mrb[44].mxu1 %v11752_v8 }
 0x169   : > { %1053 = vmatprep.mubr.bf16.mxu0 %v11230_v3  ;;  %1220 = vmatprep.mubr.bf16.mxu1 %v11230_v3 }
 0x170   : > { %1054 = vmatmul.mubr.bf16.gmra.mrb[48].mxu0 %v11759_v9  ;;  %1221 = vmatmul.mubr.bf16.gmra.mrb[48].mxu1 %v11759_v9 }
 0x171   : > { %1059 = vmatprep.mubr.bf16.mxu0 %v11230_v3  ;;  %1228 = vmatprep.mubr.bf16.mxu1 %v11230_v3 }
 0x178   : > { %1060 = vmatmul.mubr.bf16.gmra.mrb[52].mxu0 %v11766_v10  ;;  %1229 = vmatmul.mubr.bf16.gmra.mrb[52].mxu1 %v11766_v10 }
 0x179   : > { %1065 = vmatprep.mubr.bf16.mxu0 %v11230_v3  ;;  %1234 = vmatprep.mubr.bf16.mxu1 %v11230_v3 }
 0x180   : > { %1066 = vmatmul.mubr.bf16.gmra.mrb[56].mxu0 %v11773_v11  ;;  %1235 = vmatmul.mubr.bf16.gmra.mrb[56].mxu1 %v11773_v11 }
 0x181   : > { %1071 = vmatprep.mubr.bf16.mxu0 %v11230_v3  ;;  %1240 = vmatprep.mubr.bf16.mxu1 %v11230_v3 }
 0x188   : > { %1072 = vmatmul.mubr.bf16.gmra.mrb[60].mxu0 %v11780_v12  ;;  %1241 = vmatmul.mubr.bf16.gmra.mrb[60].mxu1 %v11780_v12 }
 0x189   : > { %1279 = vmatprep.mubr.bf16.mxu0 %v11230_v3  ;;  %10319 = vmatprep.mubr.bf16.mxu1 %v11651_v36 }
 0x190   : > { %1280 = vmatmul.mubr.bf16.vlgmr.msra.gmra.mrb[64].mxu0 %v11651_v36  ;;  %10320 = vmatmul.mubr.bf16.vlgmr.msra.gmra.mrb[64].mxu1 %v11664_v43 }
 0x191   : > { %2098 = vmatpush1.bf16.msra.mxu1 %v10709_v13  ;;  %2291 = vmatpush1.bf16.msra.mxu0 %v10712_v14 }
 0x192   : > { %1285 = vmatprep.mubr.bf16.mxu0 %v11230_v3  ;;  %10323 = vmatprep.mubr.bf16.mxu1 %v11677_v50 }
 0x193   : > { %2099 = vmatprep.subr.bf16.mxu1 %v10717_v15  ;;  %2292 = vmatprep.subr.bf16.mxu0 %v10723_v16 }
 0x195   : > { %2100 = vmatpush1.bf16.msra.mxu1 %v10715_v17  ;;  %2293 = vmatpush1.bf16.msra.mxu0 %v10721_v18  ;;  %v10777_v18 = vld [vmem:[%s11596_s17 + $0x160] ss:$28 sps:$4 sm:$0xff]  }
 0x196   : > { %2101 = vmatprep.subr.bf16.mxu1 %v10720_v19  ;;  %2294 = vmatprep.subr.bf16.mxu0 %v10732_v20  ;;  %v10783_v19 = vld [vmem:[%s11596_s17 + $0x19c] ss:$28 sps:$4 sm:$0xff]  }
 0x197   : > { %v10781_v20 = vld [vmem:[%s11596_s17 + $0x198] ss:$28 sps:$4 sm:$0xff]  }
 0x198   : > { %1286 = vmatmul.mubr.bf16.gmra.mrb[68].mxu0 %v11664_v43  ;;  %10324 = vmatmul.mubr.bf16.gmra.mrb[68].mxu1 %v11690_v57 }
 0x199   : > { %1291 = vmatprep.mubr.bf16.mxu0 %v11230_v3  ;;  %10327 = vmatprep.mubr.bf16.mxu1 %v11703_v0 }
 0x19a   : > { %2102 = vmatpush1.bf16.msra.mxu1 %v10718_v21  ;;  %2295 = vmatpush1.bf16.msra.mxu0 %v10730_v22 }
 0x19b   : > { %2103 = vmatprep.subr.bf16.mxu1 %v10726_v23  ;;  %2296 = vmatprep.subr.bf16.mxu0 %v10741_v24 }
 0x19e   : > { %2104 = vmatpush1.bf16.msra.mxu1 %v10724_v25  ;;  %2297 = vmatpush1.bf16.msra.mxu0 %v10739_v26 }
 0x19f   : > { %2105 = vmatprep.subr.bf16.mxu1 %v10729_v27  ;;  %2298 = vmatprep.subr.bf16.mxu0 %v10750_v28 }
 0x1a0   : > { %1292 = vmatmul.mubr.bf16.gmra.mrb[72].mxu0 %v11677_v50  ;;  %10328 = vmatmul.mubr.bf16.gmra.mrb[72].mxu1 %v11710_v1 }
 0x1a1   : > { %1297 = vmatprep.mubr.bf16.mxu0 %v11230_v3  ;;  %10331 = vmatprep.mubr.bf16.mxu1 %v11717_v2 }
 0x1a2   : > { %2106 = vmatpush1.bf16.msra.mxu1 %v10727_v29  ;;  %2299 = vmatpush1.bf16.msra.mxu0 %v10748_v30 }
 0x1a3   : > { %2107 = vmatprep.subr.bf16.mxu1 %v10735_v31  ;;  %2300 = vmatprep.subr.bf16.mxu0 %v10756_v32 }
 0x1a6   : > { %2108 = vmatpush1.bf16.msra.mxu1 %v10733_v33  ;;  %2301 = vmatpush1.bf16.msra.mxu0 %v10754_v34 }
 0x1a7   : > { %2109 = vmatprep.subr.bf16.mxu1 %v10738_v35  ;;  %2302 = vmatprep.subr.bf16.mxu0 %v10762_v37 }
 0x1a8   : > { %1298 = vmatmul.mubr.bf16.gmra.mrb[76].mxu0 %v11690_v57  ;;  %10332 = vmatmul.mubr.bf16.gmra.mrb[76].mxu1 %v11724_v4 }
 0x1a9   : > { %1303 = vmatprep.mubr.bf16.mxu0 %v11230_v3  ;;  %10335 = vmatprep.mubr.bf16.mxu1 %v11731_v5 }
 0x1aa   : > { %2110 = vmatpush1.bf16.msra.mxu1 %v10736_v38  ;;  %2303 = vmatpush1.bf16.msra.mxu0 %v10760_v39 }
 0x1ab   : > { %2111 = vmatprep.subr.bf16.mxu1 %v10744_v40  ;;  %2304 = vmatprep.subr.bf16.mxu0 %v10768_v41 }
 0x1ae   : > { %2112 = vmatpush1.bf16.msra.mxu1 %v10742_v42  ;;  %2305 = vmatpush1.bf16.msra.mxu0 %v10766_v44 }
 0x1af   : > { %2483 = vmatprep.subr.bf16.mxu1 %v10747_v45  ;;  %10351 = vmatprep.subr.bf16.mxu0 %v11834_v46 }
 0x1b0   : > { %1304 = vmatmul.mubr.bf16.gmra.mrb[80].mxu0 %v11703_v0  ;;  %10336 = vmatmul.mubr.bf16.gmra.mrb[80].mxu1 %v11738_v6 }
 0x1b1   : > { %1311 = vmatprep.mubr.bf16.mxu0 %v11230_v3  ;;  %10339 = vmatprep.mubr.bf16.mxu1 %v11745_v7 }
 0x1b8   : > { %1312 = vmatmul.mubr.bf16.gmra.mrb[84].mxu0 %v11710_v1  ;;  %10340 = vmatmul.mubr.bf16.gmra.mrb[84].mxu1 %v11752_v8 }
 0x1b9   : > { %1321 = vmatprep.mubr.bf16.mxu0 %v11230_v3  ;;  %10343 = vmatprep.mubr.bf16.mxu1 %v11759_v9 }
 0x1c0   : > { %1322 = vmatmul.mubr.bf16.gmra.mrb[88].mxu0 %v11717_v2  ;;  %10344 = vmatmul.mubr.bf16.gmra.mrb[88].mxu1 %v11766_v10 }
 0x1c1   : > { %1331 = vmatprep.mubr.bf16.mxu0 %v11230_v3  ;;  %10347 = vmatprep.mubr.bf16.mxu1 %v11773_v11 }
 0x1c8   : > { %1332 = vmatmul.mubr.bf16.gmra.mrb[92].mxu0 %v11724_v4  ;;  %10348 = vmatmul.mubr.bf16.gmra.mrb[92].mxu1 %v11780_v12 }
 0x1c9   : > { %1341 = vmatprep.mubr.bf16.mxu0 %v11230_v3  ;;  %2129 = vmatprep.mubr.bf16.mxu1 %v11230_v3 }
 0x1d0   : > { %1342 = vmatmul.mubr.bf16.gmra.mrb[96].mxu0 %v11731_v5  ;;  %2130 = vmatmul.mubr.bf16.vlgmr.msra.gmra.mrb[96].mxu1 %v11651_v36 }
 0x1d1   : > { %2484 = vmatpush1.bf16.msra.mxu1 %v10745_v47  ;;  %1351 = vmatprep.mubr.bf16.mxu0 %v11230_v3 }
 0x1d2   : > { %2139 = vmatprep.mubr.bf16.mxu1 %v11230_v3  ;;  %2485 = vmatprep.subr.bf16.mxu1 %v10753_v48 }
 0x1d5   : > { %2486 = vmatpush1.bf16.msra.mxu1 %v10751_v49 }
 0x1d6   : > { %2487 = vmatprep.subr.bf16.mxu1 %v10759_v51 }
 0x1d8   : > { %1352 = vmatmul.mubr.bf16.gmra.mrb[100].mxu0 %v11738_v6  ;;  %2140 = vmatmul.mubr.bf16.gmra.mrb[100].mxu1 %v11664_v43 }
 0x1d9   : > { %1361 = vmatprep.mubr.bf16.mxu0 %v11230_v3  ;;  %2149 = vmatprep.mubr.bf16.mxu1 %v11230_v3 }
 0x1da   : > { %2488 = vmatpush1.bf16.msra.mxu1 %v10757_v52 }
 0x1db   : > { %2489 = vmatprep.subr.bf16.mxu1 %v10765_v53 }
 0x1de   : > { %2490 = vmatpush1.bf16.msra.mxu1 %v10763_v54 }
 0x1df   : > { %2491 = vmatprep.subr.bf16.mxu1 %v10771_v55 }
 0x1e0   : > { %1362 = vmatmul.mubr.bf16.gmra.mrb[104].mxu0 %v11745_v7  ;;  %2150 = vmatmul.mubr.bf16.gmra.mrb[104].mxu1 %v11677_v50 }
 0x1e1   : > { %1371 = vmatprep.mubr.bf16.mxu0 %v11230_v3  ;;  %2159 = vmatprep.mubr.bf16.mxu1 %v11230_v3 }
 0x1e2   : > { %2492 = vmatpush1.bf16.msra.mxu1 %v10769_v56 }
 0x1e3   : > { %v1112_v60 = vpop.f32.mrb[0].mxu1  ;;  %v943_v61 = vpop.f32.mrb[0].mxu0  ;;  %2493 = vmatprep.subr.bf16.mxu1 %v10775_v58 }
 0x1e4   : > { %v1113_v63 = vpop.f32.mrb[1].mxu1  ;;  %v945_v13 = vpop.f32.mrb[1].mxu0 }
 0x1e5   : > { %v1114_v14 = vpop.f32.mrb[2].mxu1  ;;  %v946_v15 = vpop.f32.mrb[2].mxu0 }
 0x1e6   : > { %v1115_v16 = vpop.f32.mrb[3].mxu1  ;;  %v948_v17 = vpop.f32.mrb[3].mxu0  ;;  %2494 = vmatpush1.bf16.msra.mxu1 %v10773_v59 }
 0x1e7   : > { %2495 = vmatprep.subr.bf16.mxu1 %v10779_v62 }
 0x1e8   : > { %1372 = vmatmul.mubr.bf16.gmra.mrb[108].mxu0 %v11752_v8  ;;  %2160 = vmatmul.mubr.bf16.gmra.mrb[108].mxu1 %v11690_v57 }
 0x1e9   : > { %1381 = vmatprep.mubr.bf16.mxu0 %v11230_v3  ;;  %2169 = vmatprep.mubr.bf16.mxu1 %v11230_v3 }
 0x1ea   : > { %2496 = vmatpush1.bf16.msra.mxu1 %v10777_v18 }
 0x1eb   : > { %v951_v21 = vpop.f32.mrb[4].mxu0  ;;  %v1118_v22 = vpop.f32.mrb[4].mxu1  ;;  %2497 = vmatprep.subr.bf16.mxu1 %v10783_v19 }
 0x1ec   : > { %v953_v23 = vpop.f32.mrb[5].mxu0  ;;  %v1119_v24 = vpop.f32.mrb[5].mxu1 }
 0x1ed   : > { %v1565_v25 = vadd.f32 %v953_v23, %v943_v61  ;;  %v955_v26 = vpop.f32.mrb[6].mxu0  ;;  %v1120_v27 = vpop.f32.mrb[6].mxu1 }
 0x1ee   : > { %v957_v28 = vpop.f32.mrb[7].mxu0  ;;  %v1121_v29 = vpop.f32.mrb[7].mxu1  ;;  %2498 = vmatpush1.bf16.msra.mxu1 %v10781_v20 }
 0x1ef   : > { %v1566_v30 = vadd.f32 %v957_v28, %v946_v15 }
 0x1f0   : > { %1382 = vmatmul.mubr.bf16.gmra.mrb[112].mxu0 %v11759_v9  ;;  %2170 = vmatmul.mubr.bf16.gmra.mrb[112].mxu1 %v11703_v0 }
 0x1f1   : > { %1391 = vmatprep.mubr.bf16.mxu0 %v11230_v3  ;;  %2179 = vmatprep.mubr.bf16.mxu1 %v11230_v3 }
 0x1f3   : > { %v961_v31 = vpop.f32.mrb[8].mxu0  ;;  %v1124_v32 = vpop.f32.mrb[8].mxu1 }
 0x1f4   : > { %v1585_v33 = vadd.f32 %v1565_v25, %v1124_v32  ;;  %v963_v34 = vpop.f32.mrb[9].mxu0  ;;  %v1126_v35 = vpop.f32.mrb[9].mxu1 }
 0x1f5   : > { %v1567_v37 = vadd.f32 %v963_v34, %v951_v21  ;;  %v965_v38 = vpop.f32.mrb[10].mxu0  ;;  %v1127_v39 = vpop.f32.mrb[10].mxu1 }
 0x1f6   : > { %v1586_v40 = vadd.f32 %v1566_v30, %v1127_v39  ;;  %v967_v41 = vpop.f32.mrb[11].mxu0  ;;  %v1129_v42 = vpop.f32.mrb[11].mxu1 }
 0x1f7   : > { %v1568_v44 = vadd.f32 %v967_v41, %v955_v26  ;;  %v10780_v41 = vld [vmem:[%s11596_s17 + $0x88] ss:$28 sps:$4 sm:$0xff]  }
 0x1f8   : > { %1392 = vmatmul.mubr.bf16.gmra.mrb[116].mxu0 %v11766_v10  ;;  %2180 = vmatmul.mubr.bf16.gmra.mrb[116].mxu1 %v11710_v1 }
 0x1f9   : > { %1401 = vmatprep.mubr.bf16.mxu0 %v11230_v3  ;;  %2189 = vmatprep.mubr.bf16.mxu1 %v11230_v3 }
 0x1fb   : > { %v971_v45 = vpop.f32.mrb[12].mxu0  ;;  %v1132_v47 = vpop.f32.mrb[12].mxu1 }
 0x1fc   : > { %v1587_v48 = vadd.f32 %v1567_v37, %v1132_v47  ;;  %v973_v49 = vpop.f32.mrb[13].mxu0  ;;  %v1134_v51 = vpop.f32.mrb[13].mxu1 }
 0x1fd   : > { %v1569_v52 = vadd.f32 %v973_v49, %v961_v31  ;;  %v11892_v53 = vadd.f32 %v1585_v33, %v1134_v51  ;;  %v975_v54 = vpop.f32.mrb[14].mxu0  ;;  %v1136_v55 = vpop.f32.mrb[14].mxu1 }
 0x1fe   : > { %v1588_v56 = vadd.f32 %v1568_v44, %v1136_v55  ;;  %v977_v58 = vpop.f32.mrb[15].mxu0  ;;  %v1138_v59 = vpop.f32.mrb[15].mxu1 }
 0x1ff   : > { %v1570_v60 = vadd.f32 %v977_v58, %v965_v38  ;;  %v11894_v61 = vadd.f32 %v1586_v40, %v1138_v59  ;;  %v10776_v38 = vld [vmem:[%s11596_s17 + $0x50] ss:$28 sps:$4 sm:$0xff]   ;;  %v10784_v59 = vld [vmem:[%s11596_s17 + $0xc0] ss:$28 sps:$4 sm:$0xff]  }
 0x200   : > { %1402 = vmatmul.mubr.bf16.gmra.mrb[120].mxu0 %v11773_v11  ;;  %2190 = vmatmul.mubr.bf16.gmra.mrb[120].mxu1 %v11717_v2 }
 0x201   : > { %1409 = vmatprep.mubr.bf16.mxu0 %v11230_v3  ;;  %2199 = vmatprep.mubr.bf16.mxu1 %v11230_v3 }
 0x203   : > { %v981_v62 = vpop.f32.mrb[16].mxu0  ;;  %v1142_v63 = vpop.f32.mrb[16].mxu1 }
 0x204   : > { %v1589_v13 = vadd.f32 %v1569_v52, %v1142_v63  ;;  %v983_v14 = vpop.f32.mrb[17].mxu0  ;;  %v1144_v15 = vpop.f32.mrb[17].mxu1  ;;  %v10785_v63 = vld [vmem:[%s11596_s17 + $0xf8] ss:$28 sps:$4 sm:$0xff]  }
 0x205   : > { %v1571_v16 = vadd.f32 %v983_v14, %v971_v45  ;;  %v11900_v17 = vadd.f32 %v1587_v48, %v1144_v15  ;;  %v985_v18 = vpop.f32.mrb[18].mxu0  ;;  %v1146_v19 = vpop.f32.mrb[18].mxu1 }
 0x206   : > { %v1590_v20 = vadd.f32 %v1570_v60, %v1146_v19  ;;  %v987_v21 = vpop.f32.mrb[19].mxu0  ;;  %v1148_v22 = vpop.f32.mrb[19].mxu1 }
 0x207   : > { %v1572_v23 = vadd.f32 %v987_v21, %v975_v54  ;;  %v11902_v24 = vadd.f32 %v1588_v56, %v1148_v22 }
 0x208   : > { %1410 = vmatmul.mubr.bf16.gmra.mrb[124].mxu0 %v11780_v12  ;;  %2200 = vmatmul.mubr.bf16.gmra.mrb[124].mxu1 %v11724_v4 }
 0x209   : > { %2209 = vmatprep.mubr.bf16.mxu1 %v11230_v3  ;;  %2322 = vmatprep.mubr.bf16.mxu0 %v11230_v3 }
 0x20b   : > { %v991_v25 = vpop.f32.mrb[20].mxu0  ;;  %v1152_v26 = vpop.f32.mrb[20].mxu1 }
 0x20c   : > { %v1591_v27 = vadd.f32 %v1571_v16, %v1152_v26  ;;  %v993_v28 = vpop.f32.mrb[21].mxu0  ;;  %v1154_v29 = vpop.f32.mrb[21].mxu1  ;;  %v10786_v26 = vld [vmem:[%s11596_s17 + $0x130] ss:$28 sps:$4 sm:$0xff]  }
 0x20d   : > { %v1573_v30 = vadd.f32 %v993_v28, %v981_v62  ;;  %v11908_v31 = vadd.f32 %v1589_v13, %v1154_v29  ;;  %v995_v32 = vpop.f32.mrb[22].mxu0  ;;  %v1156_v33 = vpop.f32.mrb[22].mxu1  ;;  %v10787_v29 = vld [vmem:[%s11596_s17 + $0x168] ss:$28 sps:$4 sm:$0xff]  }
 0x20e   : > { %v1592_v34 = vadd.f32 %v1572_v23, %v1156_v33  ;;  %v997_v35 = vpop.f32.mrb[23].mxu0  ;;  %v1158_v37 = vpop.f32.mrb[23].mxu1 }
 0x20f   : > { %v1574_v39 = vadd.f32 %v997_v35, %v985_v18  ;;  %v11911_v40 = vadd.f32 %v1590_v20, %v1158_v37 }
 0x210   : > { %2210 = vmatmul.mubr.bf16.gmra.mrb[128].mxu1 %v11731_v5  ;;  %2323 = vmatmul.mubr.bf16.vlgmr.msra.gmra.mrb[128].mxu0 %v11651_v36 }
 0x211   : > { %10352 = vmatpush3.bf16.msra.mxu0 %v11834_v46  ;;  %2219 = vmatprep.mubr.bf16.mxu1 %v11230_v3 }
 0x212   : > { %2332 = vmatprep.mubr.bf16.mxu0 %v11230_v3  ;;  %10353 = vmatprep.subr.bf16.mxu0 %v10776_v38 }
 0x213   : > { %v1001_v42 = vpop.f32.mrb[24].mxu0  ;;  %v1162_v44 = vpop.f32.mrb[24].mxu1 }
 0x214   : > { %v1593_v45 = vadd.f32 %v1573_v30, %v1162_v44  ;;  %v1003_v47 = vpop.f32.mrb[25].mxu0  ;;  %v1164_v48 = vpop.f32.mrb[25].mxu1 }
 0x215   : > { %v1575_v49 = vadd.f32 %v1003_v47, %v991_v25  ;;  %v11919_v51 = vadd.f32 %v1591_v27, %v1164_v48  ;;  %v1005_v52 = vpop.f32.mrb[26].mxu0  ;;  %v1166_v54 = vpop.f32.mrb[26].mxu1  ;;  %10354 = vmatpush3.bf16.msra.mxu0 %v10776_v38 }
 0x216   : > { %v1594_v36 = vadd.f32 %v1574_v39, %v1166_v54  ;;  %v1007_v46 = vpop.f32.mrb[27].mxu0  ;;  %v1168_v55 = vpop.f32.mrb[27].mxu1  ;;  %10355 = vmatprep.subr.bf16.mxu0 %v10780_v41 }
 0x217   : > { %v1576_v56 = vadd.f32 %v1007_v46, %v995_v32  ;;  %v11921_v58 = vadd.f32 %v1592_v34, %v1168_v55 }
 0x218   : > { %2220 = vmatmul.mubr.bf16.gmra.mrb[132].mxu1 %v11738_v6  ;;  %2333 = vmatmul.mubr.bf16.gmra.mrb[132].mxu0 %v11664_v43 }
 0x219   : > { %2229 = vmatprep.mubr.bf16.mxu1 %v11230_v3  ;;  %2342 = vmatprep.mubr.bf16.mxu0 %v11230_v3 }
 0x21a   : > { %10356 = vmatpush3.bf16.msra.mxu0 %v10780_v41 }
 0x21b   : > { %v1011_v60 = vpop.f32.mrb[28].mxu0  ;;  %v1172_v62 = vpop.f32.mrb[28].mxu1  ;;  %10357 = vmatprep.subr.bf16.mxu0 %v10784_v59 }
 0x21c   : > { %v1595_v13 = vadd.f32 %v1575_v49, %v1172_v62  ;;  %v1013_v14 = vpop.f32.mrb[29].mxu0  ;;  %v1174_v15 = vpop.f32.mrb[29].mxu1 }
 0x21d   : > { %v1577_v16 = vadd.f32 %v1013_v14, %v1001_v42  ;;  %v11929_v18 = vadd.f32 %v1593_v45, %v1174_v15  ;;  %v1015_v19 = vpop.f32.mrb[30].mxu0  ;;  %v1176_v20 = vpop.f32.mrb[30].mxu1  ;;  %v10788_v45 = vld [vmem:[%s11596_s17 + $0x1a0] ss:$28 sps:$4 sm:$0xff]  }
 0x21e   : > { %v1596_v21 = vadd.f32 %v1576_v56, %v1176_v20  ;;  %v1017_v43 = vpop.f32.mrb[31].mxu0  ;;  %v1178_v22 = vpop.f32.mrb[31].mxu1  ;;  %10358 = vmatpush3.bf16.msra.mxu0 %v10784_v59 }
 0x21f   : > { %v1578_v23 = vadd.f32 %v1017_v43, %v1005_v52  ;;  %v11931_v25 = vadd.f32 %v1594_v36, %v1178_v22  ;;  %10359 = vmatprep.subr.bf16.mxu0 %v10785_v63 }
 0x220   : > { %2230 = vmatmul.mubr.bf16.gmra.mrb[136].mxu1 %v11745_v7  ;;  %2343 = vmatmul.mubr.bf16.gmra.mrb[136].mxu0 %v11677_v50 }
 0x221   : > { %2239 = vmatprep.mubr.bf16.mxu1 %v11230_v3  ;;  %2352 = vmatprep.mubr.bf16.mxu0 %v11230_v3 }
 0x222   : > { %10360 = vmatpush3.bf16.msra.mxu0 %v10785_v63 }
 0x223   : > { %v1021_v27 = vpop.f32.mrb[32].mxu0  ;;  %v1182_v28 = vpop.f32.mrb[32].mxu1  ;;  %10361 = vmatprep.subr.bf16.mxu0 %v10786_v26 }
 0x224   : > { %v1597_v30 = vadd.f32 %v1577_v16, %v1182_v28  ;;  %v1023_v32 = vpop.f32.mrb[33].mxu0  ;;  %v1184_v33 = vpop.f32.mrb[33].mxu1 }
 0x225   : > { %v1579_v34 = vadd.f32 %v1023_v32, %v1011_v60  ;;  %v11939_v35 = vadd.f32 %v1595_v13, %v1184_v33  ;;  %v1025_v37 = vpop.f32.mrb[34].mxu0  ;;  %v1186_v38 = vpop.f32.mrb[34].mxu1 }
 0x226   : > { %v1598_v39 = vadd.f32 %v1578_v23, %v1186_v38  ;;  %v1027_v50 = vpop.f32.mrb[35].mxu0  ;;  %v1188_v41 = vpop.f32.mrb[35].mxu1  ;;  %10362 = vmatpush3.bf16.msra.mxu0 %v10786_v26 }
 0x227   : > { %v1580_v42 = vadd.f32 %v1027_v50, %v1015_v19  ;;  %v11941_v44 = vadd.f32 %v1596_v21, %v1188_v41  ;;  %10363 = vmatprep.subr.bf16.mxu0 %v10787_v29 }
 0x228   : > { %2240 = vmatmul.mubr.bf16.gmra.mrb[140].mxu1 %v11752_v8  ;;  %2353 = vmatmul.mubr.bf16.gmra.mrb[140].mxu0 %v11690_v57 }
 0x229   : > { %2249 = vmatprep.mubr.bf16.mxu1 %v11230_v3  ;;  %2362 = vmatprep.mubr.bf16.mxu0 %v11230_v3 }
 0x22a   : > { %10364 = vmatpush3.bf16.msra.mxu0 %v10787_v29 }
 0x22b   : > { %v1031_v47 = vpop.f32.mrb[36].mxu0  ;;  %v1192_v48 = vpop.f32.mrb[36].mxu1  ;;  %10365 = vmatprep.subr.bf16.mxu0 %v10788_v45 }
 0x22c   : > { %v1599_v49 = vadd.f32 %v1579_v34, %v1192_v48  ;;  %v1033_v52 = vpop.f32.mrb[37].mxu0  ;;  %v1194_v54 = vpop.f32.mrb[37].mxu1 }
 0x22d   : > { %v1581_v36 = vadd.f32 %v1033_v52, %v1021_v27  ;;  %v11948_v46 = vadd.f32 %v1597_v30, %v1194_v54  ;;  %v1035_v55 = vpop.f32.mrb[38].mxu0  ;;  %v1196_v56 = vpop.f32.mrb[38].mxu1 }
 0x22e   : > { %v1600_v59 = vadd.f32 %v1580_v42, %v1196_v56  ;;  %v1037_v60 = vpop.f32.mrb[39].mxu0  ;;  %v1198_v62 = vpop.f32.mrb[39].mxu1  ;;  %10366 = vmatpush3.bf16.msra.mxu0 %v10788_v45 }
 0x22f   : > { %v1582_v57 = vadd.f32 %v1037_v60, %v1025_v37  ;;  %v11950_v63 = vadd.f32 %v1598_v39, %v1198_v62 }
 0x230   : > { %2250 = vmatmul.mubr.bf16.gmra.mrb[144].mxu1 %v11759_v9  ;;  %2363 = vmatmul.mubr.bf16.gmra.mrb[144].mxu0 %v11703_v0 }
 0x231   : > { %2259 = vmatprep.mubr.bf16.mxu1 %v11230_v3  ;;  %2372 = vmatprep.mubr.bf16.mxu0 %v11230_v3 }
 0x233   : > { %v1041_v13 = vpop.f32.mrb[40].mxu0  ;;  %v1202_v14 = vpop.f32.mrb[40].mxu1 }
 0x234   : > { %v1601_v15 = vadd.f32 %v1581_v36, %v1202_v14  ;;  %v1042_v16 = vpop.f32.mrb[41].mxu0  ;;  %v1204_v19 = vpop.f32.mrb[41].mxu1 }
 0x235   : > { %v1583_v20 = vadd.f32 %v1042_v16, %v1031_v47  ;;  %v11956_v21 = vadd.f32 %v1599_v49, %v1204_v19  ;;  %v1044_v43 = vpop.f32.mrb[42].mxu0  ;;  %v1206_v22 = vpop.f32.mrb[42].mxu1  ;;  %v11982_v19 = vld [vmem:[%s11577_s9] sm:$0xff]  }
 0x236   : > { %v1602_v23 = vadd.f32 %v1582_v57, %v1206_v22  ;;  %v1045_v26 = vpop.f32.mrb[43].mxu0  ;;  %v1208_v27 = vpop.f32.mrb[43].mxu1 }
 0x237   : > { %v1584_v28 = vadd.f32 %v1045_v26, %v1035_v55  ;;  %v11958_v29 = vadd.f32 %v1600_v59, %v1208_v27 }
 0x238   : > { %2260 = vmatmul.mubr.bf16.gmra.mrb[148].mxu1 %v11766_v10  ;;  %2373 = vmatmul.mubr.bf16.gmra.mrb[148].mxu0 %v11710_v1 }
 0x239   : > { %2269 = vmatprep.mubr.bf16.mxu1 %v11230_v3  ;;  %2382 = vmatprep.mubr.bf16.mxu0 %v11230_v3 }
 0x23b   : > { %v1212_v0 = vpop.f32.mrb[44].mxu1  ;;  %v1049_v30 = vpop.f32.mrb[44].mxu0 }
 0x23c   : > { %v1603_v32 = vadd.f32 %v1583_v20, %v1212_v0  ;;  %v1214_v33 = vpop.f32.mrb[45].mxu1  ;;  %v1050_v34 = vpop.f32.mrb[45].mxu0 }
 0x23d   : > { %v11964_v37 = vadd.f32 %v1601_v15, %v1214_v33  ;;  %v1216_v38 = vpop.f32.mrb[46].mxu1  ;;  %v1051_v39 = vpop.f32.mrb[46].mxu0 }
 0x23e   : > { %v1604_v50 = vadd.f32 %v1584_v28, %v1216_v38  ;;  %v1218_v41 = vpop.f32.mrb[47].mxu1  ;;  %v1052_v42 = vpop.f32.mrb[47].mxu0 }
 0x23f   : > { %v11966_v45 = vadd.f32 %v1602_v23, %v1218_v41 }
 0x240   : > { %2270 = vmatmul.mubr.bf16.gmra.mrb[152].mxu1 %v11773_v11  ;;  %2383 = vmatmul.mubr.bf16.gmra.mrb[152].mxu0 %v11717_v2 }
 0x241   : > { %2279 = vmatprep.mubr.bf16.mxu1 %v11230_v3  ;;  %2392 = vmatprep.mubr.bf16.mxu0 %v11230_v3 }
 0x243   : > { %v1222_v1 = vpop.f32.mrb[48].mxu1  ;;  %v1055_v47 = vpop.f32.mrb[48].mxu0 }
 0x244   : > { %v1223_v48 = vpop.f32.mrb[49].mxu1  ;;  %v1056_v49 = vpop.f32.mrb[49].mxu0 }
 0x245   : > { %v11972_v52 = vadd.f32 %v1603_v32, %v1223_v48  ;;  %v1225_v54 = vpop.f32.mrb[50].mxu1  ;;  %v1057_v36 = vpop.f32.mrb[50].mxu0 }
 0x246   : > { %v1226_v55 = vpop.f32.mrb[51].mxu1  ;;  %v1058_v56 = vpop.f32.mrb[51].mxu0 }
 0x247   : > { %v11974_v59 = vadd.f32 %v1604_v50, %v1226_v55 }
 0x248   : > { %2280 = vmatmul.mubr.bf16.gmra.mrb[156].mxu1 %v11780_v12  ;;  %2393 = vmatmul.mubr.bf16.gmra.mrb[156].mxu0 %v11724_v4 }
 0x249   : > { %2402 = vmatprep.mubr.bf16.mxu0 %v11230_v3  ;;  %2515 = vmatprep.mubr.bf16.mxu1 %v11230_v3 }
 0x24b   : > { %v1230_v2 = vpop.f32.mrb[52].mxu1  ;;  %v1061_v60 = vpop.f32.mrb[52].mxu0 }
 0x24c   : > { %v1231_v62 = vpop.f32.mrb[53].mxu1  ;;  %v1062_v57 = vpop.f32.mrb[53].mxu0 }
 0x24d   : > { %v1232_v13 = vpop.f32.mrb[54].mxu1  ;;  %v1063_v14 = vpop.f32.mrb[54].mxu0 }
 0x24e   : > { %v1233_v15 = vpop.f32.mrb[55].mxu1  ;;  %v1064_v16 = vpop.f32.mrb[55].mxu0 }
 0x250   : > { %2403 = vmatmul.mubr.bf16.gmra.mrb[160].mxu0 %v11731_v5  ;;  %2516 = vmatmul.mubr.bf16.vlgmr.msra.gmra.mrb[160].mxu1 %v11982_v19  ;;  %v11989_v5 = vld [vmem:[%s11577_s9 + $0x8] sm:$0xff]  }
 0x251   : > { %2412 = vmatprep.mubr.bf16.mxu0 %v11230_v3  ;;  %2525 = vmatprep.mubr.bf16.mxu1 %v11230_v3 }
 0x253   : > { %v1236_v4 = vpop.f32.mrb[56].mxu1  ;;  %v1067_v20 = vpop.f32.mrb[56].mxu0 }
 0x254   : > { %v1237_v43 = vpop.f32.mrb[57].mxu1  ;;  %v1068_v22 = vpop.f32.mrb[57].mxu0 }
 0x255   : > { %v1238_v23 = vpop.f32.mrb[58].mxu1  ;;  %v1069_v26 = vpop.f32.mrb[58].mxu0 }
 0x256   : > { %v1239_v27 = vpop.f32.mrb[59].mxu1  ;;  %v1070_v28 = vpop.f32.mrb[59].mxu0 }
 0x258   : > { %2413 = vmatmul.mubr.bf16.gmra.mrb[164].mxu0 %v11738_v6  ;;  %2526 = vmatmul.mubr.bf16.gmra.mrb[164].mxu1 %v11989_v5  ;;  %v11996_v6 = vld [vmem:[%s11577_s9 + $0x10] sm:$0xff]  }
 0x259   : > { %2422 = vmatprep.mubr.bf16.mxu0 %v11230_v3  ;;  %2535 = vmatprep.mubr.bf16.mxu1 %v11230_v3 }
 0x25b   : > { %v1242_v0 = vpop.f32.mrb[60].mxu1  ;;  %v1073_v30 = vpop.f32.mrb[60].mxu0 }
 0x25c   : > { %v1243_v32 = vpop.f32.mrb[61].mxu1  ;;  %v1074_v33 = vpop.f32.mrb[61].mxu0 }
 0x25d   : > { %v1244_v34 = vpop.f32.mrb[62].mxu1  ;;  %v1075_v38 = vpop.f32.mrb[62].mxu0 }
 0x25e   : > { %v1245_v39 = vpop.f32.mrb[63].mxu1  ;;  %v1076_v50 = vpop.f32.mrb[63].mxu0 }
 0x260   : > { %2423 = vmatmul.mubr.bf16.gmra.mrb[168].mxu0 %v11745_v7  ;;  %2536 = vmatmul.mubr.bf16.gmra.mrb[168].mxu1 %v11996_v6  ;;  %v12003_v7 = vld [vmem:[%s11577_s9 + $0x18] sm:$0xff]  }
 0x261   : > { %2432 = vmatprep.mubr.bf16.mxu0 %v11230_v3  ;;  %2545 = vmatprep.mubr.bf16.mxu1 %v11230_v3 }
 0x263   : > { %v10321_v41 = vpop.f32.mrb[64].mxu1  ;;  %v1281_v42 = vpop.f32.mrb[64].mxu0 }
 0x264   : > { %v1450_v1 = vpop.f32.mrb[65].mxu1  ;;  %v1282_v47 = vpop.f32.mrb[65].mxu0 }
 0x265   : > { %v10322_v48 = vpop.f32.mrb[66].mxu1  ;;  %v1283_v49 = vpop.f32.mrb[66].mxu0 }
 0x266   : > { %v1452_v54 = vpop.f32.mrb[67].mxu1  ;;  %v1284_v36 = vpop.f32.mrb[67].mxu0 }
 0x267   : > { %v12045_v36 = vld [vmem:[%s11577_s9 + $0x38] sm:$0xff]  }
 0x268   : > { %2433 = vmatmul.mubr.bf16.gmra.mrb[172].mxu0 %v11752_v8  ;;  %2546 = vmatmul.mubr.bf16.gmra.mrb[172].mxu1 %v12003_v7  ;;  %v12010_v8 = vld [vmem:[%s11577_s9 + $0x20] sm:$0xff]  }
 0x269   : > { %2442 = vmatprep.mubr.bf16.mxu0 %v11230_v3  ;;  %2555 = vmatprep.mubr.bf16.mxu1 %v11230_v3 }
 0x26b   : > { %v10325_v55 = vpop.f32.mrb[68].mxu1  ;;  %v1287_v56 = vpop.f32.mrb[68].mxu0 }
 0x26c   : > { %v1462_v2 = vpop.f32.mrb[69].mxu1  ;;  %v1288_v60 = vpop.f32.mrb[69].mxu0 }
 0x26d   : > { %v10326_v62 = vpop.f32.mrb[70].mxu1  ;;  %v1289_v57 = vpop.f32.mrb[70].mxu0 }
 0x26e   : > { %v1464_v13 = vpop.f32.mrb[71].mxu1  ;;  %v1290_v14 = vpop.f32.mrb[71].mxu0  ;;  %v1685_v57 = vld [vmem:[#allocation2] sm:$0xff] }
 0x270   : > { %2443 = vmatmul.mubr.bf16.gmra.mrb[176].mxu0 %v11759_v9  ;;  %2556 = vmatmul.mubr.bf16.gmra.mrb[176].mxu1 %v12010_v8  ;;  %v12017_v9 = vld [vmem:[%s11577_s9 + $0x28] sm:$0xff]  }
 0x271   : > { %2452 = vmatprep.mubr.bf16.mxu0 %v11230_v3  ;;  %2565 = vmatprep.mubr.bf16.mxu1 %v11230_v3 }
 0x273   : > { %v10329_v15 = vpop.f32.mrb[72].mxu1  ;;  %v1293_v16 = vpop.f32.mrb[72].mxu0 }
 0x274   : > { %v1474_v4 = vpop.f32.mrb[73].mxu1  ;;  %v1294_v20 = vpop.f32.mrb[73].mxu0 }
 0x275   : > { %v10330_v43 = vpop.f32.mrb[74].mxu1  ;;  %v1295_v22 = vpop.f32.mrb[74].mxu0  ;;  %v1686_v4 = vld [vmem:[#allocation2 + $0x8] sm:$0xff]  ;;  %v12061_v20 = vld [vmem:[%s11577_s9 + $0x40] sm:$0xff]  }
 0x276   : > { %v1476_v23 = vpop.f32.mrb[75].mxu1  ;;  %v1296_v26 = vpop.f32.mrb[75].mxu0 }
 0x278   : > { %2453 = vmatmul.mubr.bf16.gmra.mrb[180].mxu0 %v11766_v10  ;;  %2566 = vmatmul.mubr.bf16.gmra.mrb[180].mxu1 %v12017_v9  ;;  %v12028_v10 = vld [vmem:[%s11577_s9 + $0x30] sm:$0xff]  }
 0x279   : > { %2462 = vmatprep.mubr.bf16.mxu0 %v11230_v3  ;;  %2575 = vmatprep.mubr.bf16.mxu1 %v11230_v3 }
 0x27b   : > { %v12022_v27 = vpop.f32.mrb[76].mxu1  ;;  %v1299_v28 = vpop.f32.mrb[76].mxu0 }
 0x27c   : > { %v1486_v0 = vpop.f32.mrb[77].mxu1  ;;  %v1300_v30 = vpop.f32.mrb[77].mxu0 }
 0x27d   : > { %v12024_v32 = vpop.f32.mrb[78].mxu1  ;;  %v1301_v33 = vpop.f32.mrb[78].mxu0 }
 0x27e   : > { %v1489_v34 = vpop.f32.mrb[79].mxu1  ;;  %v1302_v38 = vpop.f32.mrb[79].mxu0 }
 0x280   : > { %2463 = vmatmul.mubr.bf16.gmra.mrb[184].mxu0 %v11773_v11  ;;  %2576 = vmatmul.mubr.bf16.gmra.mrb[184].mxu1 %v12028_v10 }
 0x281   : > { %2472 = vmatprep.mubr.bf16.mxu0 %v11230_v3  ;;  %2585 = vmatprep.mubr.bf16.mxu1 %v11230_v3 }
 0x283   : > { %v1305_v39 = vpop.f32.mrb[80].mxu0  ;;  %v12033_v50 = vpop.f32.mrb[80].mxu1 }
 0x284   : > { %v1625_v41 = vadd.f32 %v11892_v53, %v1305_v39  ;;  %v1307_v42 = vpop.f32.mrb[81].mxu0  ;;  %v12036_v1 = vpop.f32.mrb[81].mxu1 }
 0x285   : > { %v1308_v47 = vpop.f32.mrb[82].mxu0  ;;  %v12038_v48 = vpop.f32.mrb[82].mxu1 }
 0x286   : > { %v1626_v11 = vadd.f32 %v11894_v61, %v1308_v47  ;;  %v12041_v49 = vpop.f32.mrb[83].mxu1  ;;  %v1310_v54 = vpop.f32.mrb[83].mxu0  ;;  %v1688_v47 = vld [vmem:[#allocation2 + $0x18] sm:$0xff] }
 0x288   : > { %2473 = vmatmul.mubr.bf16.gmra.mrb[188].mxu0 %v11780_v12  ;;  %2586 = vmatmul.mubr.bf16.gmra.mrb[188].mxu1 %v12045_v36 }
 0x289   : > { %2595 = vmatprep.mubr.bf16.mxu1 %v11230_v3  ;;  %10367 = vmatprep.mubr.bf16.mxu0 %v11982_v19 }
 0x28b   : > { %v1313_v53 = vpop.f32.mrb[84].mxu0  ;;  %v12050_v55 = vpop.f32.mrb[84].mxu1 }
 0x28c   : > { %v1627_v56 = vadd.f32 %v11900_v17, %v1313_v53  ;;  %v1315_v61 = vpop.f32.mrb[85].mxu0  ;;  %v12053_v2 = vpop.f32.mrb[85].mxu1 }
 0x28d   : > { %v1645_v60 = vadd.f32 %v1625_v41, %v1315_v61  ;;  %v1317_v62 = vpop.f32.mrb[86].mxu0  ;;  %v12055_v12 = vpop.f32.mrb[86].mxu1 }
 0x28e   : > { %v1628_v13 = vadd.f32 %v11902_v24, %v1317_v62  ;;  %v1319_v14 = vpop.f32.mrb[87].mxu0  ;;  %v12058_v15 = vpop.f32.mrb[87].mxu1 }
 0x28f   : > { %v1665_v19 = vadd.f32 %v1645_v60, %v1486_v0  ;;  %v1646_v16 = vadd.f32 %v1626_v11, %v1319_v14  ;;  %v12079_v11 = vld [vmem:[%s11577_s9 + $0x48] sm:$0xff]  }
 0x290   : > { %2596 = vmatmul.mubr.bf16.gmra.mrb[192].mxu1 %v12061_v20  ;;  %10368 = vmatmul.mubr.bf16.vlgmr.msra.gmra.mrb[192].mxu0 %v11989_v5 }
 0x291   : > { %v1705_v17 = vadd.f32 %v1685_v57, %v1665_v19  ;;  %v1666_v43 = vadd.f32 %v1646_v16, %v1489_v34  ;;  %2605 = vmatprep.mubr.bf16.mxu1 %v11230_v3  ;;  %10371 = vmatprep.mubr.bf16.mxu0 %v11996_v6  ;;  %v1687_v34 = vld [vmem:[#allocation2 + $0x10] sm:$0xff] }
 0x293   : > { %1725 = vst [vmem:[#allocation2] sm:$0xff] %v1705_v17  ;;  %v1706_v24 = vadd.f32 %v1686_v4, %v1666_v43  ;;  %v1323_v22 = vpop.f32.mrb[88].mxu0  ;;  %v12067_v23 = vpop.f32.mrb[88].mxu1  ;;  %v1690_v4 = vld [vmem:[#allocation2 + $0x28] sm:$0xff]  ;;  %v12098_v17 = vld [vmem:[%s11577_s9 + $0x50] sm:$0xff]  }
 0x294   : > { %v1629_v26 = vadd.f32 %v11908_v31, %v1323_v22  ;;  %v1325_v28 = vpop.f32.mrb[89].mxu0  ;;  %v12070_v0 = vpop.f32.mrb[89].mxu1 }
 0x295   : > { %1726 = vst [vmem:[#allocation2 + $0x8] sm:$0xff] %v1706_v24  ;;  %v1647_v30 = vadd.f32 %v1627_v56, %v1325_v28  ;;  %v1327_v5 = vpop.f32.mrb[90].mxu0  ;;  %v12072_v33 = vpop.f32.mrb[90].mxu1 }
 0x296   : > { %v1630_v38 = vadd.f32 %v11911_v40, %v1327_v5  ;;  %v1329_v6 = vpop.f32.mrb[91].mxu0  ;;  %v12075_v39 = vpop.f32.mrb[91].mxu1 }
 0x297   : > { %v1667_v41 = vadd.f32 %v12022_v27, %v1647_v30  ;;  %v1648_v42 = vadd.f32 %v1628_v13, %v1329_v6 }
 0x298   : > { %2606 = vmatmul.mubr.bf16.gmra.mrb[196].mxu1 %v12079_v11  ;;  %10372 = vmatmul.mubr.bf16.gmra.mrb[196].mxu0 %v12003_v7 }
 0x299   : > { %v1707_v31 = vadd.f32 %v1687_v34, %v1667_v41  ;;  %v1668_v54 = vadd.f32 %v12024_v32, %v1648_v42  ;;  %2615 = vmatprep.mubr.bf16.mxu1 %v11230_v3  ;;  %10375 = vmatprep.mubr.bf16.mxu0 %v12010_v8  ;;  %v1689_v32 = vld [vmem:[#allocation2 + $0x20] sm:$0xff]  ;;  %v1691_v34 = vld [vmem:[#allocation2 + $0x30] sm:$0xff] }
 0x29b   : > { %1727 = vst [vmem:[#allocation2 + $0x10] sm:$0xff] %v1707_v31  ;;  %v1708_v40 = vadd.f32 %v1688_v47, %v1668_v54  ;;  %v1333_v53 = vpop.f32.mrb[92].mxu0  ;;  %v12086_v27 = vpop.f32.mrb[92].mxu1  ;;  %v1692_v31 = vld [vmem:[#allocation2 + $0x38] sm:$0xff] }
 0x29c   : > { %v1631_v56 = vadd.f32 %v11919_v51, %v1333_v53  ;;  %v1335_v61 = vpop.f32.mrb[93].mxu0  ;;  %v12089_v60 = vpop.f32.mrb[93].mxu1 }
 0x29d   : > { %1728 = vst [vmem:[#allocation2 + $0x18] sm:$0xff] %v1708_v40  ;;  %v1649_v7 = vadd.f32 %v1629_v26, %v1335_v61  ;;  %v1337_v62 = vpop.f32.mrb[94].mxu0  ;;  %v12091_v57 = vpop.f32.mrb[94].mxu1 }
 0x29e   : > { %v1632_v13 = vadd.f32 %v11921_v58, %v1337_v62  ;;  %v1339_v8 = vpop.f32.mrb[95].mxu0  ;;  %v12094_v14 = vpop.f32.mrb[95].mxu1 }
 0x29f   : > { %v1669_v19 = vadd.f32 %v1649_v7, %v12036_v1  ;;  %v1650_v16 = vadd.f32 %v1630_v38, %v1339_v8 }
 0x2a0   : > { %2616 = vmatmul.mubr.bf16.gmra.mrb[200].mxu1 %v12098_v17  ;;  %10376 = vmatmul.mubr.bf16.gmra.mrb[200].mxu0 %v12017_v9 }
 0x2a1   : > { %v1709_v51 = vadd.f32 %v1689_v32, %v1669_v19  ;;  %v1670_v43 = vadd.f32 %v1650_v16, %v12041_v49  ;;  %2625 = vmatprep.mubr.bf16.mxu1 %v11230_v3  ;;  %10379 = vmatprep.mubr.bf16.mxu0 %v12028_v10  ;;  %v1693_v19 = vld [vmem:[#allocation2 + $0x40] sm:$0xff] }
 0x2a3   : > { %1729 = vst [vmem:[#allocation2 + $0x20] sm:$0xff] %v1709_v51  ;;  %v1710_v58 = vadd.f32 %v1690_v4, %v1670_v43  ;;  %v1343_v24 = vpop.f32.mrb[96].mxu0  ;;  %v2131_v22 = vpop.f32.mrb[96].mxu1 }
 0x2a4   : > { %v1633_v1 = vadd.f32 %v11929_v18, %v1343_v24  ;;  %v1345_v26 = vpop.f32.mrb[97].mxu0  ;;  %v2133_v28 = vpop.f32.mrb[97].mxu1  ;;  %v10800_v18 = vld [vmem:[%s11577_s9 + $0x58] sm:$0xff]  }
 0x2a5   : > { %1730 = vst [vmem:[#allocation2 + $0x28] sm:$0xff] %v1710_v58  ;;  %v1651_v30 = vadd.f32 %v1631_v56, %v1345_v26  ;;  %v1347_v5 = vpop.f32.mrb[98].mxu0  ;;  %v2135_v9 = vpop.f32.mrb[98].mxu1  ;;  %v2870_v41 = vrot.slane %v2133_v28, 1  ;;  %v10801_v26 = vld [vmem:[%s11577_s9 + $0x60] sm:$0xff]  }
 0x2a6   : > { %v1634_v49 = vadd.f32 %v11931_v25, %v1347_v5  ;;  %v1349_v38 = vpop.f32.mrb[99].mxu0  ;;  %v2137_v6 = vpop.f32.mrb[99].mxu1 }
 0x2a7   : > { %v1671_v10 = vadd.f32 %v12033_v50, %v1651_v30  ;;  %v1652_v42 = vadd.f32 %v1632_v13, %v1349_v38  ;;  %v2871_v47 = vrot.slane %v2137_v6, 1 }
 0x2a8   : > { %2626 = vmatmul.mubr.bf16.gmra.mrb[204].mxu1 %v10800_v18  ;;  %10380 = vmatmul.mubr.bf16.gmra.mrb[204].mxu0 %v12045_v36 }
 0x2a9   : > { %v1711_v54 = vadd.f32 %v1691_v34, %v1671_v10  ;;  %v1672_v40 = vadd.f32 %v12038_v48, %v1652_v42  ;;  %v2872_v53 = vsel %vm2869_vm0, %v2870_v41, %v2871_v47  ;;  %v12112_v56 = vadd.f32 %v2871_v47, %v2135_v9  ;;  %2635 = vmatprep.mubr.bf16.mxu1 %v11230_v3  ;;  %v1695_v10 = vld [vmem:[#allocation2 + $0x50] sm:$0xff] }
 0x2aa   : > { %v12115_v25 = vadd.f32 %v2872_v53, %v2131_v22  ;;  %10383 = vmatprep.mubr.bf16.mxu0 %v12061_v20  ;;  %v1694_v22 = vld [vmem:[#allocation2 + $0x48] sm:$0xff]  ;;  %v1696_v53 = vld [vmem:[#allocation2 + $0x58] sm:$0xff] }
 0x2ab   : > { %1731 = vst [vmem:[#allocation2 + $0x30] sm:$0xff] %v1711_v54  ;;  %v1712_v50 = vadd.f32 %v1692_v31, %v1672_v40  ;;  %v1353_v61 = vpop.f32.mrb[100].mxu0  ;;  %v2141_v7 = vpop.f32.mrb[100].mxu1 }
 0x2ac   : > { %v1635_v62 = vadd.f32 %v11939_v35, %v1353_v61  ;;  %v1355_v36 = vpop.f32.mrb[101].mxu0  ;;  %v2143_v32 = vpop.f32.mrb[101].mxu1 }
 0x2ad   : > { %1732 = vst [vmem:[#allocation2 + $0x38] sm:$0xff] %v1712_v50  ;;  %v1653_v48 = vadd.f32 %v1633_v1, %v1355_v36  ;;  %v1357_v13 = vpop.f32.mrb[102].mxu0  ;;  %v2145_v8 = vpop.f32.mrb[102].mxu1  ;;  %v2873_v43 = vrot.slane %v2143_v32, 1  ;;  %v10802_v50 = vld [vmem:[%s11577_s9 + $0x68] sm:$0xff]  }
 0x2ae   : > { %v1636_v16 = vadd.f32 %v11941_v44, %v1357_v13  ;;  %v1359_v4 = vpop.f32.mrb[103].mxu0  ;;  %v2147_v51 = vpop.f32.mrb[103].mxu1 }
 0x2af   : > { %v1673_v20 = vadd.f32 %v1653_v48, %v12053_v2  ;;  %v1654_v58 = vadd.f32 %v1634_v49, %v1359_v4  ;;  %v2874_v24 = vrot.slane %v2147_v51, 1 }
 0x2b0   : > { %2636 = vmatmul.mubr.bf16.gmra.mrb[208].mxu1 %v10801_v26  ;;  %10384 = vmatmul.mubr.bf16.gmra.mrb[208].mxu0 %v12079_v11 }
 0x2b1   : > { %v1713_v35 = vadd.f32 %v1693_v19, %v1673_v20  ;;  %v1674_v1 = vadd.f32 %v1654_v58, %v12058_v15  ;;  %v2875_v28 = vsel %vm2869_vm0, %v2873_v43, %v2874_v24  ;;  %v12125_v30 = vadd.f32 %v2874_v24, %v2145_v8  ;;  %2645 = vmatprep.mubr.bf16.mxu1 %v11230_v3 }
 0x2b2   : > { %v12128_v44 = vadd.f32 %v2875_v28, %v2141_v7  ;;  %10387 = vmatprep.mubr.bf16.mxu0 %v12098_v17 }
 0x2b3   : > { %1733 = vst [vmem:[#allocation2 + $0x40] sm:$0xff] %v1713_v35  ;;  %v1714_v2 = vadd.f32 %v1694_v22, %v1674_v1  ;;  %v1363_v5 = vpop.f32.mrb[104].mxu0  ;;  %v2151_v9 = vpop.f32.mrb[104].mxu1  ;;  %v10803_v35 = vld [vmem:[%s11577_s9 + $0x70] sm:$0xff]  }
 0x2b4   : > { %v1637_v34 = vadd.f32 %v11948_v46, %v1363_v5  ;;  %v1365_v11 = vpop.f32.mrb[105].mxu0  ;;  %v2153_v49 = vpop.f32.mrb[105].mxu1 }
 0x2b5   : > { %1734 = vst [vmem:[#allocation2 + $0x48] sm:$0xff] %v1714_v2  ;;  %v1655_v15 = vadd.f32 %v1635_v62, %v1365_v11  ;;  %v1367_v38 = vpop.f32.mrb[106].mxu0  ;;  %v2155_v6 = vpop.f32.mrb[106].mxu1  ;;  %v2876_v31 = vrot.slane %v2153_v49, 1 }
 0x2b6   : > { %v1638_v41 = vadd.f32 %v11950_v63, %v1367_v38  ;;  %v1369_v42 = vpop.f32.mrb[107].mxu0  ;;  %v2157_v47 = vpop.f32.mrb[107].mxu1 }
 0x2b7   : > { %v1675_v17 = vadd.f32 %v12050_v55, %v1655_v15  ;;  %v1656_v54 = vadd.f32 %v1636_v16, %v1369_v42  ;;  %v2877_v40 = vrot.slane %v2157_v47, 1  ;;  %v1697_v16 = vld [vmem:[#allocation2 + $0x60] sm:$0xff] }
 0x2b8   : > { %2646 = vmatmul.mubr.bf16.gmra.mrb[212].mxu1 %v10802_v50  ;;  %10388 = vmatmul.mubr.bf16.gmra.mrb[212].mxu0 %v10800_v18 }
 0x2b9   : > { %v1715_v46 = vadd.f32 %v1695_v10, %v1675_v17  ;;  %v1676_v61 = vadd.f32 %v12055_v12, %v1656_v54  ;;  %v2878_v7 = vsel %vm2869_vm0, %v2876_v31, %v2877_v40  ;;  %v12137_v62 = vadd.f32 %v2877_v40, %v2155_v6  ;;  %2655 = vmatprep.mubr.bf16.mxu1 %v11230_v3  ;;  %v1699_v6 = vld [vmem:[#allocation2 + $0x70] sm:$0xff]  ;;  %v1700_v54 = vld [vmem:[#allocation2 + $0x78] sm:$0xff] }
 0x2ba   : > { %v12140_v63 = vadd.f32 %v2878_v7, %v2151_v9  ;;  %10391 = vmatprep.mubr.bf16.mxu0 %v10801_v26  ;;  %v1698_v26 = vld [vmem:[#allocation2 + $0x68] sm:$0xff]  ;;  %v10804_v40 = vld [vmem:[%s11577_s9 + $0x78] sm:$0xff]  }
 0x2bb   : > { %1735 = vst [vmem:[#allocation2 + $0x50] sm:$0xff] %v1715_v46  ;;  %v1716_v55 = vadd.f32 %v1696_v53, %v1676_v61  ;;  %v1373_v36 = vpop.f32.mrb[108].mxu0  ;;  %v2161_v32 = vpop.f32.mrb[108].mxu1 }
 0x2bc   : > { %v1639_v48 = vadd.f32 %v11956_v21, %v1373_v36  ;;  %v1375_v18 = vpop.f32.mrb[109].mxu0  ;;  %v2163_v13 = vpop.f32.mrb[109].mxu1 }
 0x2bd   : > { %1736 = vst [vmem:[#allocation2 + $0x58] sm:$0xff] %v1716_v55  ;;  %v1657_v12 = vadd.f32 %v1637_v34, %v1375_v18  ;;  %v1377_v8 = vpop.f32.mrb[110].mxu0  ;;  %v2165_v19 = vpop.f32.mrb[110].mxu1  ;;  %v2879_v58 = vrot.slane %v2163_v13, 1 }
 0x2be   : > { %v1640_v4 = vadd.f32 %v11958_v29, %v1377_v8  ;;  %v1379_v51 = vpop.f32.mrb[111].mxu0  ;;  %v2167_v20 = vpop.f32.mrb[111].mxu1 }
 0x2bf   : > { %v1677_v43 = vadd.f32 %v1657_v12, %v12070_v0  ;;  %v1658_v24 = vadd.f32 %v1638_v41, %v1379_v51  ;;  %v2880_v22 = vrot.slane %v2167_v20, 1  ;;  %v1701_v12 = vld [vmem:[#allocation2 + $0x80] sm:$0xff] }
 0x2c0   : > { %2656 = vmatmul.mubr.bf16.gmra.mrb[216].mxu1 %v10803_v35  ;;  %10392 = vmatmul.mubr.bf16.gmra.mrb[216].mxu0 %v10802_v50 }
 0x2c1   : > { %v1717_v21 = vadd.f32 %v1697_v16, %v1677_v43  ;;  %v1678_v1 = vadd.f32 %v1658_v24, %v12075_v39  ;;  %v2881_v28 = vsel %vm2869_vm0, %v2879_v58, %v2880_v22  ;;  %v12148_v2 = vadd.f32 %v2880_v22, %v2165_v19  ;;  %2665 = vmatprep.mubr.bf16.mxu1 %v11230_v3  ;;  %v1702_v43 = vld [vmem:[#allocation2 + $0x88] sm:$0xff] }
 0x2c2   : > { %v12151_v29 = vadd.f32 %v2881_v28, %v2161_v32  ;;  %10395 = vmatprep.mubr.bf16.mxu0 %v10803_v35 }
 0x2c3   : > { %1737 = vst [vmem:[#allocation2 + $0x60] sm:$0xff] %v1717_v21  ;;  %v1718_v0 = vadd.f32 %v1698_v26, %v1678_v1  ;;  %v1383_v5 = vpop.f32.mrb[112].mxu0  ;;  %v2171_v9 = vpop.f32.mrb[112].mxu1 }
 0x2c4   : > { %v1641_v34 = vadd.f32 %v11964_v37, %v1383_v5  ;;  %v1385_v11 = vpop.f32.mrb[113].mxu0  ;;  %v2173_v49 = vpop.f32.mrb[113].mxu1 }
 0x2c5   : > { %1738 = vst [vmem:[#allocation2 + $0x68] sm:$0xff] %v1718_v0  ;;  %v1659_v39 = vadd.f32 %v1639_v48, %v1385_v11  ;;  %v1387_v15 = vpop.f32.mrb[114].mxu0  ;;  %v2175_v38 = vpop.f32.mrb[114].mxu1  ;;  %v2882_v47 = vrot.slane %v2173_v49, 1 }
 0x2c6   : > { %v1642_v10 = vadd.f32 %v11966_v45, %v1387_v15  ;;  %v1389_v3 = vpop.f32.mrb[115].mxu0  ;;  %v2177_v41 = vpop.f32.mrb[115].mxu1 }
 0x2c7   : > { %v1679_v42 = vadd.f32 %v12067_v23, %v1659_v39  ;;  %v1660_v17 = vadd.f32 %v1640_v4, %v1389_v3  ;;  %v2883_v31 = vrot.slane %v2177_v41, 1 }
 0x2c8   : > { %2666 = vmatmul.mubr.bf16.gmra.mrb[220].mxu1 %v10804_v40  ;;  %10396 = vmatmul.mubr.bf16.gmra.mrb[220].mxu0 %v10804_v40 }
 0x2c9   : > { %v1719_v37 = vadd.f32 %v1699_v6, %v1679_v42  ;;  %v1680_v53 = vadd.f32 %v12072_v33, %v1660_v17  ;;  %v2884_v50 = vsel %vm2869_vm0, %v2882_v47, %v2883_v31  ;;  %v12159_v46 = vadd.f32 %v2883_v31, %v2175_v38  ;;  %v1704_v38 = vld [vmem:[#allocation2 + $0x98] sm:$0xff] }
 0x2ca   : > { %v12161_v61 = vadd.f32 %v2884_v50, %v2171_v9  ;;  %v1703_v9 = vld [vmem:[#allocation2 + $0x90] sm:$0xff] }
 0x2cb   : > { %1739 = vst [vmem:[#allocation2 + $0x70] sm:$0xff] %v1719_v37  ;;  %v1720_v45 = vadd.f32 %v1700_v54, %v1680_v53  ;;  %v1393_v7 = vpop.f32.mrb[116].mxu0  ;;  %v2181_v23 = vpop.f32.mrb[116].mxu1 }
 0x2cc   : > { %v1643_v55 = vadd.f32 %v11972_v52, %v1393_v7  ;;  %v1395_v36 = vpop.f32.mrb[117].mxu0  ;;  %v2183_v32 = vpop.f32.mrb[117].mxu1 }
 0x2cd   : > { %1740 = vst [vmem:[#allocation2 + $0x78] sm:$0xff] %v1720_v45  ;;  %v1661_v48 = vadd.f32 %v1641_v34, %v1395_v36  ;;  %v1397_v18 = vpop.f32.mrb[118].mxu0  ;;  %v2185_v13 = vpop.f32.mrb[118].mxu1  ;;  %v2885_v4 = vrot.slane %v2183_v32, 1 }
 0x2ce   : > { %v1644_v33 = vadd.f32 %v11974_v59, %v1397_v18  ;;  %v1399_v8 = vpop.f32.mrb[119].mxu0  ;;  %v2187_v19 = vpop.f32.mrb[119].mxu1 }
 0x2cf   : > { %v1681_v16 = vadd.f32 %v1661_v48, %v12089_v60  ;;  %v1662_v51 = vadd.f32 %v1642_v10, %v1399_v8  ;;  %v2886_v20 = vrot.slane %v2187_v19, 1 }
 0x2d1   : > { %v1721_v58 = vadd.f32 %v1701_v12, %v1681_v16  ;;  %v1682_v52 = vadd.f32 %v1662_v51, %v12094_v14  ;;  %v2887_v24 = vsel %vm2869_vm0, %v2885_v4, %v2886_v20  ;;  %v12168_v22 = vadd.f32 %v2886_v20, %v2185_v13 }
 0x2d2   : > { %v12170_v26 = vadd.f32 %v2887_v24, %v2181_v23 }
 0x2d3   : > { %1741 = vst [vmem:[#allocation2 + $0x80] sm:$0xff] %v1721_v58  ;;  %v1722_v35 = vadd.f32 %v1702_v43, %v1682_v52  ;;  %v1403_v59 = vpop.f32.mrb[120].mxu0  ;;  %v2191_v21 = vpop.f32.mrb[120].mxu1 }
 0x2d4   : > { %v1404_v1 = vpop.f32.mrb[121].mxu0  ;;  %v2193_v28 = vpop.f32.mrb[121].mxu1 }
 0x2d5   : > { %1742 = vst [vmem:[#allocation2 + $0x88] sm:$0xff] %v1722_v35  ;;  %v1663_v60 = vadd.f32 %v1643_v55, %v1404_v1  ;;  %v1406_v0 = vpop.f32.mrb[122].mxu0  ;;  %v2195_v5 = vpop.f32.mrb[122].mxu1  ;;  %v2888_v49 = vrot.slane %v2193_v28, 1 }
 0x2d6   : > { %v1407_v34 = vpop.f32.mrb[123].mxu0  ;;  %v2197_v11 = vpop.f32.mrb[123].mxu1 }
 0x2d7   : > { %v1683_v14 = vadd.f32 %v12086_v27, %v1663_v60  ;;  %v1664_v39 = vadd.f32 %v1644_v33, %v1407_v34  ;;  %v2889_v15 = vrot.slane %v2197_v11, 1 }
 0x2d9   : > { %v1723_v6 = vadd.f32 %v1703_v9, %v1683_v14  ;;  %v1684_v10 = vadd.f32 %v12091_v57, %v1664_v39  ;;  %v2890_v3 = vsel %vm2869_vm0, %v2888_v49, %v2889_v15  ;;  %v12175_v41 = vadd.f32 %v2889_v15, %v2195_v5 }
 0x2da   : > { %v12177_v42 = vadd.f32 %v2890_v3, %v2191_v21 }
 0x2db   : > { %1743 = vst [vmem:[#allocation2 + $0x90] sm:$0xff] %v1723_v6  ;;  %v1724_v47 = vadd.f32 %v1704_v38, %v1684_v10  ;;  %v2201_v17 = vpop.f32.mrb[124].mxu1  ;;  %v1411_v31 = vpop.f32.mrb[124].mxu0 }
 0x2dc   : > { %v2203_v54 = vpop.f32.mrb[125].mxu1  ;;  %v1412_v40 = vpop.f32.mrb[125].mxu0 }
 0x2dd   : > { %1744 = vst [vmem:[#allocation2 + $0x98] sm:$0xff] %v1724_v47  ;;  %v2205_v27 = vpop.f32.mrb[126].mxu1  ;;  %v1413_v37 = vpop.f32.mrb[126].mxu0  ;;  %v2891_v45 = vrot.slane %v2203_v54, 1 }
 0x2de   : > { %v2207_v53 = vpop.f32.mrb[127].mxu1  ;;  %v1414_v50 = vpop.f32.mrb[127].mxu0 }
 0x2df   : > { %v2892_v7 = vrot.slane %v2207_v53, 1 }
 0x2e1   : > { %v2893_v57 = vsel %vm2869_vm0, %v2891_v45, %v2892_v7  ;;  %v12180_v23 = vadd.f32 %v2892_v7, %v2205_v27 }
 0x2e2   : > { %v12182_v55 = vadd.f32 %v2893_v57, %v2201_v17 }
 0x2e3   : > { %v2211_v36 = vpop.f32.mrb[128].mxu1  ;;  %v2324_v32 = vpop.f32.mrb[128].mxu0 }
 0x2e4   : > { %v3015_v48 = vrot.slane %v2324_v32, 2  ;;  %v2213_v18 = vpop.f32.mrb[129].mxu1  ;;  %v2326_v13 = vpop.f32.mrb[129].mxu0 }
 0x2e5   : > { %v3160_v12 = vrot.slane %v2326_v13, 3  ;;  %v2215_v33 = vpop.f32.mrb[130].mxu1  ;;  %v2328_v8 = vpop.f32.mrb[130].mxu0  ;;  %v2894_v51 = vrot.slane %v2213_v18, 1 }
 0x2e6   : > { %v3016_v19 = vrot.slane %v2328_v8, 2  ;;  %v2217_v16 = vpop.f32.mrb[131].mxu1  ;;  %v2330_v4 = vpop.f32.mrb[131].mxu0 }
 0x2e7   : > { %v2895_v20 = vrot.slane %v2217_v16, 1  ;;  %v3161_v43 = vrot.slane %v2330_v4, 3 }
 0x2e8   : > { %v3017_v58 = vsel %vm3014_vm1, %v3015_v48, %v3016_v19  ;;  %v3096_v52 = vadd.f32 %v3016_v19, %v12112_v56 }
 0x2e9   : > { %v3095_v24 = vadd.f32 %v3017_v58, %v12115_v25  ;;  %v2896_v35 = vsel %vm2869_vm0, %v2894_v51, %v2895_v20  ;;  %v12188_v59 = vadd.f32 %v2895_v20, %v2215_v33  ;;  %v3162_v21 = vsel %vm3159_vm2, %v3160_v12, %v3161_v43 }
 0x2ea   : > { %v12191_v1 = vadd.f32 %v2896_v35, %v2211_v36  ;;  %v12193_v28 = vadd.f32 %v3161_v43, %v3096_v52 }
 0x2eb   : > { %v12195_v60 = vadd.f32 %v3162_v21, %v3095_v24  ;;  %v2221_v0 = vpop.f32.mrb[132].mxu1  ;;  %v2334_v5 = vpop.f32.mrb[132].mxu0 }
 0x2ec   : > { %v3018_v9 = vrot.slane %v2334_v5, 2  ;;  %v2223_v34 = vpop.f32.mrb[133].mxu1  ;;  %v2336_v11 = vpop.f32.mrb[133].mxu0 }
 0x2ed   : > { %v3163_v56 = vrot.slane %v2336_v11, 3  ;;  %v2225_v14 = vpop.f32.mrb[134].mxu1  ;;  %v2338_v25 = vpop.f32.mrb[134].mxu0  ;;  %v2897_v38 = vrot.slane %v2223_v34, 1 }
 0x2ee   : > { %v3019_v49 = vrot.slane %v2338_v25, 2  ;;  %v2227_v39 = vpop.f32.mrb[135].mxu1  ;;  %v2340_v15 = vpop.f32.mrb[135].mxu0 }
 0x2ef   : > { %v2898_v6 = vrot.slane %v2227_v39, 1  ;;  %v3164_v10 = vrot.slane %v2340_v15, 3 }
 0x2f0   : > { %v3020_v3 = vsel %vm3014_vm1, %v3018_v9, %v3019_v49  ;;  %v3098_v47 = vadd.f32 %v3019_v49, %v12125_v30 }
 0x2f1   : > { %v3097_v17 = vadd.f32 %v3020_v3, %v12128_v44  ;;  %v2899_v31 = vsel %vm2869_vm0, %v2897_v38, %v2898_v6  ;;  %v12201_v54 = vadd.f32 %v2898_v6, %v2225_v14  ;;  %v3165_v40 = vsel %vm3159_vm2, %v3163_v56, %v3164_v10 }
 0x2f2   : > { %v12204_v27 = vadd.f32 %v2899_v31, %v2221_v0  ;;  %v12206_v37 = vadd.f32 %v3164_v10, %v3098_v47 }
 0x2f3   : > { %v12208_v53 = vadd.f32 %v3165_v40, %v3097_v17  ;;  %v2231_v50 = vpop.f32.mrb[136].mxu1  ;;  %v2344_v45 = vpop.f32.mrb[136].mxu0 }
 0x2f4   : > { %v3021_v7 = vrot.slane %v2344_v45, 2  ;;  %v2233_v57 = vpop.f32.mrb[137].mxu1  ;;  %v2346_v36 = vpop.f32.mrb[137].mxu0 }
 0x2f5   : > { %v3166_v30 = vrot.slane %v2346_v36, 3  ;;  %v2235_v32 = vpop.f32.mrb[138].mxu1  ;;  %v2348_v44 = vpop.f32.mrb[138].mxu0  ;;  %v2900_v12 = vrot.slane %v2233_v57, 1 }
 0x2f6   : > { %v3022_v48 = vrot.slane %v2348_v44, 2  ;;  %v2237_v18 = vpop.f32.mrb[139].mxu1  ;;  %v2350_v13 = vpop.f32.mrb[139].mxu0 }
 0x2f7   : > { %v2901_v33 = vrot.slane %v2237_v18, 1  ;;  %v3167_v8 = vrot.slane %v2350_v13, 3 }
 0x2f8   : > { %v3023_v19 = vsel %vm3014_vm1, %v3021_v7, %v3022_v48  ;;  %v3100_v16 = vadd.f32 %v3022_v48, %v12137_v62 }
 0x2f9   : > { %v3099_v4 = vadd.f32 %v3023_v19, %v12140_v63  ;;  %v2902_v51 = vsel %vm2869_vm0, %v2900_v12, %v2901_v33  ;;  %v12214_v20 = vadd.f32 %v2901_v33, %v2235_v32  ;;  %v3168_v43 = vsel %vm3159_vm2, %v3166_v30, %v3167_v8 }
 0x2fa   : > { %v12217_v58 = vadd.f32 %v2902_v51, %v2231_v50  ;;  %v12219_v52 = vadd.f32 %v3167_v8, %v3100_v16 }
 0x2fb   : > { %v12221_v24 = vadd.f32 %v3168_v43, %v3099_v4  ;;  %v2241_v35 = vpop.f32.mrb[140].mxu1  ;;  %v2354_v21 = vpop.f32.mrb[140].mxu0 }
 0x2fc   : > { %v3024_v0 = vrot.slane %v2354_v21, 2  ;;  %v2243_v5 = vpop.f32.mrb[141].mxu1  ;;  %v2356_v9 = vpop.f32.mrb[141].mxu0 }
 0x2fd   : > { %v3169_v62 = vrot.slane %v2356_v9, 3  ;;  %v2245_v34 = vpop.f32.mrb[142].mxu1  ;;  %v2358_v63 = vpop.f32.mrb[142].mxu0  ;;  %v2903_v25 = vrot.slane %v2243_v5, 1 }
 0x2fe   : > { %v3025_v11 = vrot.slane %v2358_v63, 2  ;;  %v2247_v56 = vpop.f32.mrb[143].mxu1  ;;  %v2360_v14 = vpop.f32.mrb[143].mxu0 }
 0x2ff   : > { %v2904_v49 = vrot.slane %v2247_v56, 1  ;;  %v3170_v39 = vrot.slane %v2360_v14, 3 }
 0x300   : > { %v3026_v15 = vsel %vm3014_vm1, %v3024_v0, %v3025_v11  ;;  %v3102_v38 = vadd.f32 %v3025_v11, %v12148_v2 }
 0x301   : > { %v3101_v6 = vadd.f32 %v3026_v15, %v12151_v29  ;;  %v2905_v10 = vsel %vm2869_vm0, %v2903_v25, %v2904_v49  ;;  %v12227_v3 = vadd.f32 %v2904_v49, %v2245_v34  ;;  %v3171_v47 = vsel %vm3159_vm2, %v3169_v62, %v3170_v39 }
 0x302   : > { %v12230_v17 = vadd.f32 %v2905_v10, %v2241_v35  ;;  %v12232_v31 = vadd.f32 %v3170_v39, %v3102_v38 }
 0x303   : > { %v12234_v40 = vadd.f32 %v3171_v47, %v3101_v6  ;;  %v2251_v50 = vpop.f32.mrb[144].mxu1  ;;  %v2364_v45 = vpop.f32.mrb[144].mxu0 }
 0x304   : > { %v3027_v7 = vrot.slane %v2364_v45, 2  ;;  %v2253_v57 = vpop.f32.mrb[145].mxu1  ;;  %v2366_v36 = vpop.f32.mrb[145].mxu0 }
 0x305   : > { %v3172_v2 = vrot.slane %v2366_v36, 3  ;;  %v2255_v30 = vpop.f32.mrb[146].mxu1  ;;  %v2368_v29 = vpop.f32.mrb[146].mxu0  ;;  %v2906_v18 = vrot.slane %v2253_v57, 1 }
 0x306   : > { %v3028_v32 = vrot.slane %v2368_v29, 2  ;;  %v2257_v44 = vpop.f32.mrb[147].mxu1  ;;  %v2370_v48 = vpop.f32.mrb[147].mxu0 }
 0x307   : > { %v2907_v13 = vrot.slane %v2257_v44, 1  ;;  %v3173_v12 = vrot.slane %v2370_v48, 3 }
 0x308   : > { %v3029_v33 = vsel %vm3014_vm1, %v3027_v7, %v3028_v32  ;;  %v3104_v8 = vadd.f32 %v3028_v32, %v12159_v46 }
 0x309   : > { %v3103_v19 = vadd.f32 %v3029_v33, %v12161_v61  ;;  %v2908_v16 = vsel %vm2869_vm0, %v2906_v18, %v2907_v13  ;;  %v12240_v4 = vadd.f32 %v2907_v13, %v2255_v30  ;;  %v3174_v51 = vsel %vm3159_vm2, %v3172_v2, %v3173_v12 }
 0x30a   : > { %v12243_v43 = vadd.f32 %v2908_v16, %v2251_v50  ;;  %v12245_v35 = vadd.f32 %v3173_v12, %v3104_v8 }
 0x30b   : > { %v12247_v21 = vadd.f32 %v3174_v51, %v3103_v19  ;;  %v2261_v0 = vpop.f32.mrb[148].mxu1  ;;  %v2374_v5 = vpop.f32.mrb[148].mxu0 }
 0x30c   : > { %v3030_v9 = vrot.slane %v2374_v5, 2  ;;  %v2263_v62 = vpop.f32.mrb[149].mxu1  ;;  %v2376_v34 = vpop.f32.mrb[149].mxu0 }
 0x30d   : > { %v3175_v46 = vrot.slane %v2376_v34, 3  ;;  %v2265_v63 = vpop.f32.mrb[150].mxu1  ;;  %v2378_v61 = vpop.f32.mrb[150].mxu0  ;;  %v2909_v25 = vrot.slane %v2263_v62, 1 }
 0x30e   : > { %v3031_v11 = vrot.slane %v2378_v61, 2  ;;  %v2267_v56 = vpop.f32.mrb[151].mxu1  ;;  %v2380_v14 = vpop.f32.mrb[151].mxu0 }
 0x30f   : > { %v2910_v49 = vrot.slane %v2267_v56, 1  ;;  %v3176_v39 = vrot.slane %v2380_v14, 3 }
 0x310   : > { %v3032_v15 = vsel %vm3014_vm1, %v3030_v9, %v3031_v11  ;;  %v3106_v38 = vadd.f32 %v3031_v11, %v12168_v22 }
 0x311   : > { %v3105_v6 = vadd.f32 %v3032_v15, %v12170_v26  ;;  %v2911_v10 = vsel %vm2869_vm0, %v2909_v25, %v2910_v49  ;;  %v12253_v47 = vadd.f32 %v2910_v49, %v2265_v63  ;;  %v3177_v50 = vsel %vm3159_vm2, %v3175_v46, %v3176_v39 }
 0x312   : > { %v12256_v45 = vadd.f32 %v2911_v10, %v2261_v0  ;;  %v12258_v7 = vadd.f32 %v3176_v39, %v3106_v38 }
 0x313   : > { %v12260_v57 = vadd.f32 %v3177_v50, %v3105_v6  ;;  %v2271_v36 = vpop.f32.mrb[152].mxu1  ;;  %v2384_v2 = vpop.f32.mrb[152].mxu0 }
 0x314   : > { %v3033_v30 = vrot.slane %v2384_v2, 2  ;;  %v2273_v29 = vpop.f32.mrb[153].mxu1  ;;  %v2386_v32 = vpop.f32.mrb[153].mxu0 }
 0x315   : > { %v3178_v22 = vrot.slane %v2386_v32, 3  ;;  %v2275_v44 = vpop.f32.mrb[154].mxu1  ;;  %v2388_v26 = vpop.f32.mrb[154].mxu0  ;;  %v2912_v12 = vrot.slane %v2273_v29, 1 }
 0x316   : > { %v3034_v48 = vrot.slane %v2388_v26, 2  ;;  %v2277_v18 = vpop.f32.mrb[155].mxu1  ;;  %v2390_v13 = vpop.f32.mrb[155].mxu0 }
 0x317   : > { %v2913_v33 = vrot.slane %v2277_v18, 1  ;;  %v3179_v8 = vrot.slane %v2390_v13, 3 }
 0x318   : > { %v3035_v19 = vsel %vm3014_vm1, %v3033_v30, %v3034_v48  ;;  %v3108_v16 = vadd.f32 %v3034_v48, %v12175_v41 }
 0x319   : > { %v3107_v51 = vadd.f32 %v3035_v19, %v12177_v42  ;;  %v2914_v0 = vsel %vm2869_vm0, %v2912_v12, %v2913_v33  ;;  %v12266_v5 = vadd.f32 %v2913_v33, %v2275_v44  ;;  %v3180_v9 = vsel %vm3159_vm2, %v3178_v22, %v3179_v8 }
 0x31a   : > { %v12269_v62 = vadd.f32 %v2914_v0, %v2271_v36  ;;  %v12271_v34 = vadd.f32 %v3179_v8, %v3108_v16 }
 0x31b   : > { %v12273_v46 = vadd.f32 %v3180_v9, %v3107_v51  ;;  %v2281_v63 = vpop.f32.mrb[156].mxu1  ;;  %v2394_v61 = vpop.f32.mrb[156].mxu0 }
 0x31c   : > { %v3036_v11 = vrot.slane %v2394_v61, 2  ;;  %v2283_v56 = vpop.f32.mrb[157].mxu1  ;;  %v2396_v14 = vpop.f32.mrb[157].mxu0 }
 0x31d   : > { %v3181_v41 = vrot.slane %v2396_v14, 3  ;;  %v2285_v25 = vpop.f32.mrb[158].mxu1  ;;  %v2398_v42 = vpop.f32.mrb[158].mxu0  ;;  %v2915_v38 = vrot.slane %v2283_v56, 1 }
 0x31e   : > { %v3037_v49 = vrot.slane %v2398_v42, 2  ;;  %v2287_v39 = vpop.f32.mrb[159].mxu1  ;;  %v2400_v15 = vpop.f32.mrb[159].mxu0 }
 0x31f   : > { %v2916_v6 = vrot.slane %v2287_v39, 1  ;;  %v3182_v10 = vrot.slane %v2400_v15, 3 }
 0x320   : > { %v3038_v50 = vsel %vm3014_vm1, %v3036_v11, %v3037_v49  ;;  %v3110_v36 = vadd.f32 %v3037_v49, %v12180_v23 }
 0x321   : > { %v3109_v2 = vadd.f32 %v3038_v50, %v12182_v55  ;;  %v2917_v30 = vsel %vm2869_vm0, %v2915_v38, %v2916_v6  ;;  %v12279_v29 = vadd.f32 %v2916_v6, %v2285_v25  ;;  %v3183_v32 = vsel %vm3159_vm2, %v3181_v41, %v3182_v10 }
 0x322   : > { %v12282_v22 = vadd.f32 %v2917_v30, %v2281_v63  ;;  %v12284_v44 = vadd.f32 %v3182_v10, %v3110_v36 }
 0x323   : > { %v12286_v26 = vadd.f32 %v3183_v32, %v3109_v2  ;;  %v2404_v48 = vpop.f32.mrb[160].mxu0  ;;  %v2517_v18 = vpop.f32.mrb[160].mxu1 }
 0x324   : > { %v3039_v13 = vrot.slane %v2404_v48, 2  ;;  %v2406_v12 = vpop.f32.mrb[161].mxu0  ;;  %v2519_v33 = vpop.f32.mrb[161].mxu1  ;;  %v3305_v19 = vrot.slane %v2517_v18, 4 }
 0x325   : > { %v3184_v23 = vrot.slane %v2406_v12, 3  ;;  %v2408_v8 = vpop.f32.mrb[162].mxu0  ;;  %v2521_v55 = vpop.f32.mrb[162].mxu1  ;;  %v3450_v63 = vrot.slane %v2519_v33, 5 }
 0x326   : > { %v3040_v16 = vrot.slane %v2408_v8, 2  ;;  %v3306_v51 = vrot.slane %v2521_v55, 4  ;;  %v2523_v0 = vpop.f32.mrb[163].mxu1  ;;  %v2410_v9 = vpop.f32.mrb[163].mxu0 }
 0x327   : > { %v3451_v61 = vrot.slane %v2523_v0, 5  ;;  %v3185_v11 = vrot.slane %v2410_v9, 3 }
 0x328   : > { %v3041_v56 = vsel %vm3014_vm1, %v3039_v13, %v3040_v16  ;;  %v3112_v14 = vadd.f32 %v3040_v16, %v12188_v59  ;;  %v3307_v41 = vsel %vm3304_vm3, %v3305_v19, %v3306_v51  ;;  %v3386_v25 = vadd.f32 %v3306_v51, %v12193_v28 }
 0x329   : > { %v3111_v42 = vadd.f32 %v3041_v56, %v12191_v1  ;;  %v3385_v49 = vadd.f32 %v3307_v41, %v12195_v60  ;;  %v3452_v39 = vsel %vm3449_vm4, %v3450_v63, %v3451_v61  ;;  %v3186_v15 = vsel %vm3159_vm2, %v3184_v23, %v3185_v11 }
 0x32a   : > { %v12296_v38 = vadd.f32 %v3451_v61, %v3386_v25  ;;  %v12298_v6 = vadd.f32 %v3185_v11, %v3112_v14 }
 0x32b   : > { %v12300_v10 = vadd.f32 %v3452_v39, %v3385_v49  ;;  %v12302_v50 = vadd.f32 %v3186_v15, %v3111_v42  ;;  %v2414_v59 = vpop.f32.mrb[164].mxu0  ;;  %v2527_v36 = vpop.f32.mrb[164].mxu1 }
 0x32c   : > { %v3042_v2 = vrot.slane %v2414_v59, 2  ;;  %v2416_v28 = vpop.f32.mrb[165].mxu0  ;;  %v2529_v30 = vpop.f32.mrb[165].mxu1  ;;  %v3308_v48 = vrot.slane %v2527_v36, 4 }
 0x32d   : > { %v3187_v1 = vrot.slane %v2416_v28, 3  ;;  %v2418_v32 = vpop.f32.mrb[166].mxu0  ;;  %v2531_v60 = vpop.f32.mrb[166].mxu1  ;;  %v3453_v23 = vrot.slane %v2529_v30, 5 }
 0x32e   : > { %v3043_v18 = vrot.slane %v2418_v32, 2  ;;  %v3309_v13 = vrot.slane %v2531_v60, 4  ;;  %v2533_v12 = vpop.f32.mrb[167].mxu1  ;;  %v2420_v33 = vpop.f32.mrb[167].mxu0 }
 0x32f   : > { %v3454_v8 = vrot.slane %v2533_v12, 5  ;;  %v3188_v55 = vrot.slane %v2420_v33, 3 }
 0x330   : > { %v3044_v19 = vsel %vm3014_vm1, %v3042_v2, %v3043_v18  ;;  %v3114_v16 = vadd.f32 %v3043_v18, %v12201_v54  ;;  %v3310_v51 = vsel %vm3304_vm3, %v3308_v48, %v3309_v13  ;;  %v3388_v0 = vadd.f32 %v3309_v13, %v12206_v37 }
 0x331   : > { %v3113_v9 = vadd.f32 %v3044_v19, %v12204_v27  ;;  %v3387_v63 = vadd.f32 %v3310_v51, %v12208_v53  ;;  %v3455_v61 = vsel %vm3449_vm4, %v3453_v23, %v3454_v8  ;;  %v3189_v11 = vsel %vm3159_vm2, %v3187_v1, %v3188_v55 }
 0x332   : > { %v12312_v56 = vadd.f32 %v3454_v8, %v3388_v0  ;;  %v12314_v14 = vadd.f32 %v3188_v55, %v3114_v16 }
 0x333   : > { %v12316_v41 = vadd.f32 %v3455_v61, %v3387_v63  ;;  %v12318_v25 = vadd.f32 %v3189_v11, %v3113_v9  ;;  %v2424_v54 = vpop.f32.mrb[168].mxu0  ;;  %v2537_v42 = vpop.f32.mrb[168].mxu1 }
 0x334   : > { %v3045_v49 = vrot.slane %v2424_v54, 2  ;;  %v2426_v37 = vpop.f32.mrb[169].mxu0  ;;  %v2539_v39 = vpop.f32.mrb[169].mxu1  ;;  %v3311_v59 = vrot.slane %v2537_v42, 4 }
 0x335   : > { %v3190_v27 = vrot.slane %v2426_v37, 3  ;;  %v2428_v15 = vpop.f32.mrb[170].mxu0  ;;  %v2541_v53 = vpop.f32.mrb[170].mxu1  ;;  %v3456_v1 = vrot.slane %v2539_v39, 5 }
 0x336   : > { %v3046_v36 = vrot.slane %v2428_v15, 2  ;;  %v3312_v2 = vrot.slane %v2541_v53, 4  ;;  %v2543_v28 = vpop.f32.mrb[171].mxu1  ;;  %v2430_v30 = vpop.f32.mrb[171].mxu0 }
 0x337   : > { %v3457_v32 = vrot.slane %v2543_v28, 5  ;;  %v3191_v60 = vrot.slane %v2430_v30, 3 }
 0x338   : > { %v3047_v48 = vsel %vm3014_vm1, %v3045_v49, %v3046_v36  ;;  %v3116_v18 = vadd.f32 %v3046_v36, %v12214_v20  ;;  %v3313_v13 = vsel %vm3304_vm3, %v3311_v59, %v3312_v2  ;;  %v3390_v12 = vadd.f32 %v3312_v2, %v12219_v52 }
 0x339   : > { %v3115_v33 = vadd.f32 %v3047_v48, %v12217_v58  ;;  %v3389_v23 = vadd.f32 %v3313_v13, %v12221_v24  ;;  %v3458_v8 = vsel %vm3449_vm4, %v3456_v1, %v3457_v32  ;;  %v3192_v55 = vsel %vm3159_vm2, %v3190_v27, %v3191_v60 }
 0x33a   : > { %v12328_v19 = vadd.f32 %v3457_v32, %v3390_v12  ;;  %v12330_v16 = vadd.f32 %v3191_v60, %v3116_v18 }
 0x33b   : > { %v12332_v51 = vadd.f32 %v3458_v8, %v3389_v23  ;;  %v12334_v0 = vadd.f32 %v3192_v55, %v3115_v33  ;;  %v2434_v20 = vpop.f32.mrb[172].mxu0  ;;  %v2547_v9 = vpop.f32.mrb[172].mxu1 }
 0x33c   : > { %v3048_v63 = vrot.slane %v2434_v20, 2  ;;  %v2436_v52 = vpop.f32.mrb[173].mxu0  ;;  %v2549_v61 = vpop.f32.mrb[173].mxu1  ;;  %v3314_v54 = vrot.slane %v2547_v9, 4 }
 0x33d   : > { %v3193_v58 = vrot.slane %v2436_v52, 3  ;;  %v2438_v11 = vpop.f32.mrb[174].mxu0  ;;  %v2551_v24 = vpop.f32.mrb[174].mxu1  ;;  %v3459_v27 = vrot.slane %v2549_v61, 5 }
 0x33e   : > { %v3049_v42 = vrot.slane %v2438_v11, 2  ;;  %v3315_v49 = vrot.slane %v2551_v24, 4  ;;  %v2553_v37 = vpop.f32.mrb[175].mxu1  ;;  %v2440_v39 = vpop.f32.mrb[175].mxu0 }
 0x33f   : > { %v3460_v15 = vrot.slane %v2553_v37, 5  ;;  %v3194_v53 = vrot.slane %v2440_v39, 3 }
 0x340   : > { %v3050_v59 = vsel %vm3014_vm1, %v3048_v63, %v3049_v42  ;;  %v3118_v36 = vadd.f32 %v3049_v42, %v12227_v3  ;;  %v3316_v2 = vsel %vm3304_vm3, %v3314_v54, %v3315_v49  ;;  %v3392_v28 = vadd.f32 %v3315_v49, %v12232_v31 }
 0x341   : > { %v3117_v30 = vadd.f32 %v3050_v59, %v12230_v17  ;;  %v3391_v1 = vadd.f32 %v3316_v2, %v12234_v40  ;;  %v3461_v32 = vsel %vm3449_vm4, %v3459_v27, %v3460_v15  ;;  %v3195_v60 = vsel %vm3159_vm2, %v3193_v58, %v3194_v53 }
 0x342   : > { %v12344_v48 = vadd.f32 %v3460_v15, %v3392_v28  ;;  %v12346_v18 = vadd.f32 %v3194_v53, %v3118_v36 }
 0x343   : > { %v12348_v13 = vadd.f32 %v3461_v32, %v3391_v1  ;;  %v12350_v12 = vadd.f32 %v3195_v60, %v3117_v30  ;;  %v2444_v3 = vpop.f32.mrb[176].mxu0  ;;  %v2557_v33 = vpop.f32.mrb[176].mxu1 }
 0x344   : > { %v3051_v23 = vrot.slane %v2444_v3, 2  ;;  %v2446_v31 = vpop.f32.mrb[177].mxu0  ;;  %v2559_v8 = vpop.f32.mrb[177].mxu1  ;;  %v3317_v20 = vrot.slane %v2557_v33, 4 }
 0x345   : > { %v3196_v17 = vrot.slane %v2446_v31, 3  ;;  %v2448_v55 = vpop.f32.mrb[178].mxu0  ;;  %v2561_v40 = vpop.f32.mrb[178].mxu1  ;;  %v3462_v58 = vrot.slane %v2559_v8, 5 }
 0x346   : > { %v3052_v9 = vrot.slane %v2448_v55, 2  ;;  %v3318_v63 = vrot.slane %v2561_v40, 4  ;;  %v2563_v52 = vpop.f32.mrb[179].mxu1  ;;  %v2450_v61 = vpop.f32.mrb[179].mxu0 }
 0x347   : > { %v3463_v11 = vrot.slane %v2563_v52, 5  ;;  %v3197_v24 = vrot.slane %v2450_v61, 3 }
 0x348   : > { %v3053_v54 = vsel %vm3014_vm1, %v3051_v23, %v3052_v9  ;;  %v3120_v42 = vadd.f32 %v3052_v9, %v12240_v4  ;;  %v3319_v49 = vsel %vm3304_vm3, %v3317_v20, %v3318_v63  ;;  %v3394_v37 = vadd.f32 %v3318_v63, %v12245_v35 }
 0x349   : > { %v3119_v39 = vadd.f32 %v3053_v54, %v12243_v43  ;;  %v3393_v27 = vadd.f32 %v3319_v49, %v12247_v21  ;;  %v3464_v15 = vsel %vm3449_vm4, %v3462_v58, %v3463_v11  ;;  %v3198_v53 = vsel %vm3159_vm2, %v3196_v17, %v3197_v24 }
 0x34a   : > { %v12360_v59 = vadd.f32 %v3463_v11, %v3394_v37  ;;  %v12362_v36 = vadd.f32 %v3197_v24, %v3120_v42 }
 0x34b   : > { %v12364_v2 = vadd.f32 %v3464_v15, %v3393_v27  ;;  %v12366_v28 = vadd.f32 %v3198_v53, %v3119_v39  ;;  %v2454_v4 = vpop.f32.mrb[180].mxu0  ;;  %v2567_v30 = vpop.f32.mrb[180].mxu1 }
 0x34c   : > { %v3054_v1 = vrot.slane %v2454_v4, 2  ;;  %v2456_v35 = vpop.f32.mrb[181].mxu0  ;;  %v2569_v32 = vpop.f32.mrb[181].mxu1  ;;  %v3320_v3 = vrot.slane %v2567_v30, 4 }
 0x34d   : > { %v3199_v43 = vrot.slane %v2456_v35, 3  ;;  %v2458_v60 = vpop.f32.mrb[182].mxu0  ;;  %v2571_v21 = vpop.f32.mrb[182].mxu1  ;;  %v3465_v17 = vrot.slane %v2569_v32, 5 }
 0x34e   : > { %v3055_v33 = vrot.slane %v2458_v60, 2  ;;  %v3321_v23 = vrot.slane %v2571_v21, 4  ;;  %v2573_v31 = vpop.f32.mrb[183].mxu1  ;;  %v2460_v8 = vpop.f32.mrb[183].mxu0 }
 0x34f   : > { %v3466_v55 = vrot.slane %v2573_v31, 5  ;;  %v3200_v40 = vrot.slane %v2460_v8, 3 }
 0x350   : > { %v3056_v20 = vsel %vm3014_vm1, %v3054_v1, %v3055_v33  ;;  %v3122_v9 = vadd.f32 %v3055_v33, %v12253_v47  ;;  %v3322_v63 = vsel %vm3304_vm3, %v3320_v3, %v3321_v23  ;;  %v3396_v52 = vadd.f32 %v3321_v23, %v12258_v7 }
 0x351   : > { %v3121_v61 = vadd.f32 %v3056_v20, %v12256_v45  ;;  %v3395_v58 = vadd.f32 %v3322_v63, %v12260_v57  ;;  %v3467_v11 = vsel %vm3449_vm4, %v3465_v17, %v3466_v55  ;;  %v3201_v24 = vsel %vm3159_vm2, %v3199_v43, %v3200_v40 }
 0x352   : > { %v12376_v54 = vadd.f32 %v3466_v55, %v3396_v52  ;;  %v12378_v42 = vadd.f32 %v3200_v40, %v3122_v9 }
 0x353   : > { %v12380_v49 = vadd.f32 %v3467_v11, %v3395_v58  ;;  %v12382_v37 = vadd.f32 %v3201_v24, %v3121_v61  ;;  %v2464_v47 = vpop.f32.mrb[184].mxu0  ;;  %v2577_v39 = vpop.f32.mrb[184].mxu1 }
 0x354   : > { %v3057_v27 = vrot.slane %v2464_v47, 2  ;;  %v2466_v7 = vpop.f32.mrb[185].mxu0  ;;  %v2579_v15 = vpop.f32.mrb[185].mxu1  ;;  %v3323_v4 = vrot.slane %v2577_v39, 4 }
 0x355   : > { %v3202_v45 = vrot.slane %v2466_v7, 3  ;;  %v2468_v53 = vpop.f32.mrb[186].mxu0  ;;  %v2581_v57 = vpop.f32.mrb[186].mxu1  ;;  %v3468_v43 = vrot.slane %v2579_v15, 5 }
 0x356   : > { %v3058_v30 = vrot.slane %v2468_v53, 2  ;;  %v3324_v1 = vrot.slane %v2581_v57, 4  ;;  %v2583_v35 = vpop.f32.mrb[187].mxu1  ;;  %v2470_v32 = vpop.f32.mrb[187].mxu0 }
 0x357   : > { %v3469_v60 = vrot.slane %v2583_v35, 5  ;;  %v3203_v21 = vrot.slane %v2470_v32, 3 }
 0x358   : > { %v3059_v3 = vsel %vm3014_vm1, %v3057_v27, %v3058_v30  ;;  %v3124_v33 = vadd.f32 %v3058_v30, %v12266_v5  ;;  %v3325_v23 = vsel %vm3304_vm3, %v3323_v4, %v3324_v1  ;;  %v3398_v31 = vadd.f32 %v3324_v1, %v12271_v34 }
 0x359   : > { %v3123_v8 = vadd.f32 %v3059_v3, %v12269_v62  ;;  %v3397_v17 = vadd.f32 %v3325_v23, %v12273_v46  ;;  %v3470_v55 = vsel %vm3449_vm4, %v3468_v43, %v3469_v60  ;;  %v3204_v40 = vsel %vm3159_vm2, %v3202_v45, %v3203_v21 }
 0x35a   : > { %v12392_v20 = vadd.f32 %v3469_v60, %v3398_v31  ;;  %v12394_v9 = vadd.f32 %v3203_v21, %v3124_v33 }
 0x35b   : > { %v12396_v63 = vadd.f32 %v3470_v55, %v3397_v17  ;;  %v12398_v52 = vadd.f32 %v3204_v40, %v3123_v8  ;;  %v2474_v5 = vpop.f32.mrb[188].mxu0  ;;  %v2587_v61 = vpop.f32.mrb[188].mxu1 }
 0x35c   : > { %v3060_v58 = vrot.slane %v2474_v5, 2  ;;  %v2476_v34 = vpop.f32.mrb[189].mxu0  ;;  %v2589_v11 = vpop.f32.mrb[189].mxu1  ;;  %v3326_v47 = vrot.slane %v2587_v61, 4 }
 0x35d   : > { %v3205_v62 = vrot.slane %v2476_v34, 3  ;;  %v2478_v24 = vpop.f32.mrb[190].mxu0  ;;  %v2591_v46 = vpop.f32.mrb[190].mxu1  ;;  %v3471_v45 = vrot.slane %v2589_v11, 5 }
 0x35e   : > { %v3061_v39 = vrot.slane %v2478_v24, 2  ;;  %v3327_v27 = vrot.slane %v2591_v46, 4  ;;  %v2593_v7 = vpop.f32.mrb[191].mxu1  ;;  %v2480_v15 = vpop.f32.mrb[191].mxu0  ;;  %v3710_v24 = vld [vmem:[#allocation3 + $0x18] sm:$0x3] }
 0x35f   : > { %v3472_v53 = vrot.slane %v2593_v7, 5  ;;  %v3206_v57 = vrot.slane %v2480_v15, 3 }
 0x360   : > { %v3062_v4 = vsel %vm3014_vm1, %v3060_v58, %v3061_v39  ;;  %v3126_v30 = vadd.f32 %v3061_v39, %v12279_v29  ;;  %v3328_v1 = vsel %vm3304_vm3, %v3326_v47, %v3327_v27  ;;  %v3400_v35 = vadd.f32 %v3327_v27, %v12284_v44 }
 0x361   : > { %v3125_v32 = vadd.f32 %v3062_v4, %v12282_v22  ;;  %v3399_v43 = vadd.f32 %v3328_v1, %v12286_v26  ;;  %v3473_v60 = vsel %vm3449_vm4, %v3471_v45, %v3472_v53  ;;  %v3207_v21 = vsel %vm3159_vm2, %v3205_v62, %v3206_v57  ;;  %v3709_v45 = vld [vmem:[#allocation3 + $0x10] sm:$0xff]  ;;  %v3707_v1 = vld [vmem:[#allocation3] sm:$0xff] }
 0x362   : > { %v12408_v3 = vadd.f32 %v3472_v53, %v3400_v35  ;;  %v12410_v33 = vadd.f32 %v3206_v57, %v3126_v30  ;;  %v3708_v35 = vld [vmem:[#allocation3 + $0x8] sm:$0x3] }
 0x363   : > { %v12412_v23 = vadd.f32 %v3473_v60, %v3399_v43  ;;  %v12414_v31 = vadd.f32 %v3207_v21, %v3125_v32  ;;  %v2597_v29 = vpop.f32.mrb[192].mxu1  ;;  %v10369_v8 = vpop.f32.mrb[192].mxu0 }
 0x364   : > { %v3598_v17 = vrot.slane %v10369_v8, 6  ;;  %v2599_v44 = vpop.f32.mrb[193].mxu1  ;;  %v2710_v55 = vpop.f32.mrb[193].mxu0  ;;  %v3329_v5 = vrot.slane %v2597_v29, 4 }
 0x365   : > { %v3595_v22 = vrot.slane %v2710_v55, 6  ;;  %v2601_v40 = vpop.f32.mrb[194].mxu1  ;;  %v10370_v26 = vpop.f32.mrb[194].mxu0  ;;  %v3474_v62 = vrot.slane %v2599_v44, 5 }
 0x366   : > { %v3330_v61 = vrot.slane %v2601_v40, 4  ;;  %v3599_v58 = vrot.slane %v10370_v26, 6  ;;  %v2603_v34 = vpop.f32.mrb[195].mxu1  ;;  %v2713_v11 = vpop.f32.mrb[195].mxu0 }
 0x367   : > { %v3475_v46 = vrot.slane %v2603_v34, 5  ;;  %v3596_v47 = vrot.slane %v2713_v11, 6  ;;  %v3714_v11 = vld [vmem:[#allocation3 + $0x38] sm:$0x3] }
 0x368   : > { %v3331_v39 = vsel %vm3304_vm3, %v3329_v5, %v3330_v61  ;;  %v3402_v27 = vadd.f32 %v3330_v61, %v12298_v6  ;;  %v3600_v7 = vsel %vm3594_vm5, %v3598_v17, %v3599_v58  ;;  %v3678_v15 = vadd.f32 %v3599_v58, %v12312_v56 }
 0x369   : > { %v3401_v53 = vadd.f32 %v3331_v39, %v12302_v50  ;;  %v3677_v57 = vadd.f32 %v3600_v7, %v12316_v41  ;;  %v3476_v4 = vsel %vm3449_vm4, %v3474_v62, %v3475_v46  ;;  %v3597_v30 = vsel %vm3594_vm5, %v3595_v22, %v3596_v47  ;;  %v3713_v7 = vld [vmem:[#allocation3 + $0x30] sm:$0xff] }
 0x36a   : > { %v3742_v32 = vadd.f32 %v3710_v24, %v3678_v15  ;;  %v12424_v43 = vadd.f32 %v3475_v46, %v3402_v27  ;;  %v3675_v6 = vadd.f32 %v3597_v30, %v12300_v10  ;;  %v3676_v60 = vadd.f32 %v3596_v47, %v12296_v38  ;;  %v3712_v30 = vld [vmem:[#allocation3 + $0x28] sm:$0x3] }
 0x36b   : > { %v3741_v21 = vadd.f32 %v3709_v45, %v3677_v57  ;;  %v12428_v56 = vadd.f32 %v3476_v4, %v3401_v53  ;;  %v2607_v29 = vpop.f32.mrb[196].mxu1  ;;  %v10373_v50 = vpop.f32.mrb[196].mxu0  ;;  %v3711_v4 = vld [vmem:[#allocation3 + $0x20] sm:$0xff] }
 0x36c   : > { %3774 = vst [vmem:[#allocation3 + $0x18] sm:$0x3] %v3742_v32  ;;  %v3739_v41 = vadd.f32 %v3707_v1, %v3675_v6  ;;  %v3740_v8 = vadd.f32 %v3708_v35, %v3676_v60  ;;  %v3604_v17 = vrot.slane %v10373_v50, 6  ;;  %v2609_v44 = vpop.f32.mrb[197].mxu1  ;;  %v2726_v55 = vpop.f32.mrb[197].mxu0  ;;  %v3332_v10 = vrot.slane %v2607_v29, 4 }
 0x36d   : > { %3773 = vst [vmem:[#allocation3 + $0x10] sm:$0xff] %v3741_v21  ;;  %v3601_v22 = vrot.slane %v2726_v55, 6  ;;  %v2611_v40 = vpop.f32.mrb[198].mxu1  ;;  %v10374_v26 = vpop.f32.mrb[198].mxu0  ;;  %v3477_v34 = vrot.slane %v2609_v44, 5 }
 0x36e   : > { %3771 = vst [vmem:[#allocation3] sm:$0xff] %v3739_v41  ;;  %3772 = vst [vmem:[#allocation3 + $0x8] sm:$0x3] %v3740_v8  ;;  %v3333_v5 = vrot.slane %v2611_v40, 4  ;;  %v3605_v38 = vrot.slane %v10374_v26, 6  ;;  %v2613_v61 = vpop.f32.mrb[199].mxu1 }
 0x36f   : > { %v2729_v58 = vpop.f32.mrb[199].mxu0  ;;  %v3478_v62 = vrot.slane %v2613_v61, 5 }
 0x370   : > { %v3602_v24 = vrot.slane %v2729_v58, 6  ;;  %v3334_v46 = vsel %vm3304_vm3, %v3332_v10, %v3333_v5  ;;  %v3404_v47 = vadd.f32 %v3333_v5, %v12314_v14  ;;  %v3606_v39 = vsel %vm3594_vm5, %v3604_v17, %v3605_v38  ;;  %v3718_v10 = vld [vmem:[#allocation3 + $0x58] sm:$0x3] }
 0x371   : > { %v3682_v27 = vadd.f32 %v3605_v38, %v12344_v48  ;;  %v3403_v15 = vadd.f32 %v3334_v46, %v12318_v25  ;;  %v3681_v45 = vadd.f32 %v3606_v39, %v12348_v13  ;;  %v3479_v53 = vsel %vm3449_vm4, %v3477_v34, %v3478_v62 }
 0x372   : > { %v3603_v57 = vsel %vm3594_vm5, %v3601_v22, %v3602_v24  ;;  %v12438_v35 = vadd.f32 %v3478_v62, %v3404_v47  ;;  %v3680_v32 = vadd.f32 %v3602_v24, %v12328_v19  ;;  %v3717_v62 = vld [vmem:[#allocation3 + $0x50] sm:$0xff] }
 0x373   : > { %v3746_v1 = vadd.f32 %v3714_v11, %v3682_v27  ;;  %v3679_v14 = vadd.f32 %v3603_v57, %v12332_v51  ;;  %v3745_v6 = vadd.f32 %v3713_v7, %v3681_v45  ;;  %v12442_v48 = vadd.f32 %v3479_v53, %v3403_v15  ;;  %v2617_v60 = vpop.f32.mrb[200].mxu1  ;;  %v10377_v25 = vpop.f32.mrb[200].mxu0  ;;  %v3715_v27 = vld [vmem:[#allocation3 + $0x40] sm:$0xff]  ;;  %v3716_v7 = vld [vmem:[#allocation3 + $0x48] sm:$0x3] }
 0x374   : > { %v3744_v21 = vadd.f32 %v3712_v30, %v3680_v32  ;;  %v3610_v29 = vrot.slane %v10377_v25, 6  ;;  %v2619_v50 = vpop.f32.mrb[201].mxu1  ;;  %v2742_v41 = vpop.f32.mrb[201].mxu0  ;;  %v3335_v51 = vrot.slane %v2617_v60, 4 }
 0x375   : > { %3778 = vst [vmem:[#allocation3 + $0x38] sm:$0x3] %v3746_v1  ;;  %v3743_v13 = vadd.f32 %v3711_v4, %v3679_v14  ;;  %3777 = vst [vmem:[#allocation3 + $0x30] sm:$0xff] %v3745_v6  ;;  %v3607_v8 = vrot.slane %v2742_v41, 6  ;;  %v2621_v17 = vpop.f32.mrb[202].mxu1  ;;  %v10378_v44 = vpop.f32.mrb[202].mxu0 }
 0x376   : > { %3776 = vst [vmem:[#allocation3 + $0x28] sm:$0x3] %v3744_v21  ;;  %v3336_v55 = vrot.slane %v2621_v17, 4  ;;  %v3611_v19 = vrot.slane %v10378_v44, 6  ;;  %v2623_v22 = vpop.f32.mrb[203].mxu1  ;;  %v2745_v40 = vpop.f32.mrb[203].mxu0 }
 0x377   : > { %3775 = vst [vmem:[#allocation3 + $0x20] sm:$0xff] %v3743_v13  ;;  %v3480_v26 = vrot.slane %v2619_v50, 5  ;;  %v3481_v5 = vrot.slane %v2623_v22, 5  ;;  %v3608_v38 = vrot.slane %v2745_v40, 6  ;;  %v3722_v41 = vld [vmem:[#allocation3 + $0x78] sm:$0x3] }
 0x378   : > { %v3337_v61 = vsel %vm3304_vm3, %v3335_v51, %v3336_v55  ;;  %v3406_v58 = vadd.f32 %v3336_v55, %v12330_v16  ;;  %v3612_v34 = vsel %vm3594_vm5, %v3610_v29, %v3611_v19  ;;  %v3686_v11 = vadd.f32 %v3611_v19, %v12376_v54  ;;  %v3721_v22 = vld [vmem:[#allocation3 + $0x70] sm:$0xff] }
 0x379   : > { %v3405_v24 = vadd.f32 %v3337_v61, %v12334_v0  ;;  %v3685_v46 = vadd.f32 %v3612_v34, %v12380_v49  ;;  %v3482_v47 = vsel %vm3449_vm4, %v3480_v26, %v3481_v5  ;;  %v3609_v39 = vsel %vm3594_vm5, %v3607_v8, %v3608_v38  ;;  %v3720_v61 = vld [vmem:[#allocation3 + $0x68] sm:$0x3] }
 0x37a   : > { %v3750_v15 = vadd.f32 %v3718_v10, %v3686_v11  ;;  %v12452_v45 = vadd.f32 %v3481_v5, %v3406_v58  ;;  %v3683_v16 = vadd.f32 %v3609_v39, %v12364_v2  ;;  %v3684_v53 = vadd.f32 %v3608_v38, %v12360_v59  ;;  %v3719_v38 = vld [vmem:[#allocation3 + $0x60] sm:$0xff] }
 0x37b   : > { %v3749_v57 = vadd.f32 %v3717_v62, %v3685_v46  ;;  %v12456_v54 = vadd.f32 %v3482_v47, %v3405_v24  ;;  %v2627_v4 = vpop.f32.mrb[204].mxu1  ;;  %v10381_v0 = vpop.f32.mrb[204].mxu0 }
 0x37c   : > { %3782 = vst [vmem:[#allocation3 + $0x58] sm:$0x3] %v3750_v15  ;;  %v3747_v49 = vadd.f32 %v3715_v27, %v3683_v16  ;;  %v3748_v30 = vadd.f32 %v3716_v7, %v3684_v53  ;;  %v3616_v1 = vrot.slane %v10381_v0, 6  ;;  %v2629_v14 = vpop.f32.mrb[205].mxu1  ;;  %v2758_v32 = vpop.f32.mrb[205].mxu0  ;;  %v3338_v2 = vrot.slane %v2627_v4, 4 }
 0x37d   : > { %3781 = vst [vmem:[#allocation3 + $0x50] sm:$0xff] %v3749_v57  ;;  %v3613_v6 = vrot.slane %v2758_v32, 6  ;;  %v2631_v60 = vpop.f32.mrb[206].mxu1  ;;  %v10382_v25 = vpop.f32.mrb[206].mxu0  ;;  %v3483_v50 = vrot.slane %v2629_v14, 5 }
 0x37e   : > { %3779 = vst [vmem:[#allocation3 + $0x40] sm:$0xff] %v3747_v49  ;;  %3780 = vst [vmem:[#allocation3 + $0x48] sm:$0x3] %v3748_v30  ;;  %v3339_v13 = vrot.slane %v2631_v60, 4  ;;  %v3617_v59 = vrot.slane %v10382_v25, 6  ;;  %v2633_v21 = vpop.f32.mrb[207].mxu1 }
 0x37f   : > { %v2761_v29 = vpop.f32.mrb[207].mxu0  ;;  %v3484_v8 = vrot.slane %v2633_v21, 5  ;;  %v3726_v49 = vld [vmem:[#allocation3 + $0x98] sm:$0x3]  ;;  %v3725_v25 = vld [vmem:[#allocation3 + $0x90] sm:$0xff] }
 0x380   : > { %v3614_v17 = vrot.slane %v2761_v29, 6  ;;  %v3340_v44 = vsel %vm3304_vm3, %v3338_v2, %v3339_v13  ;;  %v3408_v51 = vadd.f32 %v3339_v13, %v12346_v18  ;;  %v3618_v55 = vsel %vm3594_vm5, %v3616_v1, %v3617_v59  ;;  %v3723_v29 = vld [vmem:[#allocation3 + $0x80] sm:$0xff] }
 0x381   : > { %v3690_v19 = vadd.f32 %v3617_v59, %v12408_v3  ;;  %v3407_v40 = vadd.f32 %v3340_v44, %v12350_v12  ;;  %v3689_v26 = vadd.f32 %v3618_v55, %v12412_v23  ;;  %v3485_v10 = vsel %vm3449_vm4, %v3483_v50, %v3484_v8  ;;  %v3724_v50 = vld [vmem:[#allocation3 + $0x88] sm:$0x3] }
 0x382   : > { %v3615_v5 = vsel %vm3594_vm5, %v3613_v6, %v3614_v17  ;;  %v12466_v34 = vadd.f32 %v3484_v8, %v3408_v51  ;;  %v3688_v11 = vadd.f32 %v3614_v17, %v12392_v20 }
 0x383   : > { %v3754_v58 = vadd.f32 %v3722_v41, %v3690_v19  ;;  %v3687_v18 = vadd.f32 %v3615_v5, %v12396_v63  ;;  %v3753_v62 = vadd.f32 %v3721_v22, %v3689_v26  ;;  %v12470_v3 = vadd.f32 %v3485_v10, %v3407_v40  ;;  %v2637_v24 = vpop.f32.mrb[208].mxu1  ;;  %v10385_v12 = vpop.f32.mrb[208].mxu0 }
 0x384   : > { %v3752_v46 = vadd.f32 %v3720_v61, %v3688_v11  ;;  %v3622_v47 = vrot.slane %v10385_v12, 6  ;;  %v2639_v39 = vpop.f32.mrb[209].mxu1  ;;  %v2774_v27 = vpop.f32.mrb[209].mxu0  ;;  %v3341_v63 = vrot.slane %v2637_v24, 4  ;;  %v3730_v11 = vld [vmem:[#allocation3 + $0xb8] sm:$0x3] }
 0x385   : > { %3786 = vst [vmem:[#allocation3 + $0x78] sm:$0x3] %v3754_v58  ;;  %v3751_v23 = vadd.f32 %v3719_v38, %v3687_v18  ;;  %3785 = vst [vmem:[#allocation3 + $0x70] sm:$0xff] %v3753_v62  ;;  %v3619_v7 = vrot.slane %v2774_v27, 6  ;;  %v2641_v15 = vpop.f32.mrb[210].mxu1  ;;  %v10386_v16 = vpop.f32.mrb[210].mxu0 }
 0x386   : > { %3784 = vst [vmem:[#allocation3 + $0x68] sm:$0x3] %v3752_v46  ;;  %v3342_v53 = vrot.slane %v2641_v15, 4  ;;  %v3623_v20 = vrot.slane %v10386_v16, 6  ;;  %v2643_v57 = vpop.f32.mrb[211].mxu1  ;;  %v2777_v4 = vpop.f32.mrb[211].mxu0 }
 0x387   : > { %3783 = vst [vmem:[#allocation3 + $0x60] sm:$0xff] %v3751_v23  ;;  %v3486_v0 = vrot.slane %v2639_v39, 5  ;;  %v3487_v30 = vrot.slane %v2643_v57, 5  ;;  %v3620_v1 = vrot.slane %v2777_v4, 6  ;;  %v3729_v39 = vld [vmem:[#allocation3 + $0xb0] sm:$0xff] }
 0x388   : > { %v3343_v14 = vsel %vm3304_vm3, %v3341_v63, %v3342_v53  ;;  %v3410_v32 = vadd.f32 %v3342_v53, %v12362_v36  ;;  %v3624_v6 = vsel %vm3594_vm5, %v3622_v47, %v3623_v20  ;;  %v3694_v60 = vadd.f32 %v3623_v20, %v12438_v35  ;;  %v3727_v63 = vld [vmem:[#allocation3 + $0xa0] sm:$0xff]  ;;  %v3728_v53 = vld [vmem:[#allocation3 + $0xa8] sm:$0x3] }
 0x389   : > { %v3409_v2 = vadd.f32 %v3343_v14, %v12366_v28  ;;  %v3693_v13 = vadd.f32 %v3624_v6, %v12442_v48  ;;  %v3488_v59 = vsel %vm3449_vm4, %v3486_v0, %v3487_v30  ;;  %v3621_v21 = vsel %vm3594_vm5, %v3619_v7, %v3620_v1 }
 0x38a   : > { %v3758_v41 = vadd.f32 %v3726_v49, %v3694_v60  ;;  %v12480_v8 = vadd.f32 %v3487_v30, %v3410_v32  ;;  %v3691_v36 = vadd.f32 %v3621_v21, %v12428_v56  ;;  %v3692_v17 = vadd.f32 %v3620_v1, %v12424_v43 }
 0x38b   : > { %v3757_v44 = vadd.f32 %v3725_v25, %v3693_v13  ;;  %v12484_v35 = vadd.f32 %v3488_v59, %v3409_v2  ;;  %v2647_v51 = vpop.f32.mrb[212].mxu1  ;;  %v10389_v28 = vpop.f32.mrb[212].mxu0 }
 0x38c   : > { %3790 = vst [vmem:[#allocation3 + $0x98] sm:$0x3] %v3758_v41  ;;  %v3755_v48 = vadd.f32 %v3723_v29, %v3691_v36  ;;  %v3756_v55 = vadd.f32 %v3724_v50, %v3692_v17  ;;  %v3628_v19 = vrot.slane %v10389_v28, 6  ;;  %v2649_v22 = vpop.f32.mrb[213].mxu1  ;;  %v2790_v40 = vpop.f32.mrb[213].mxu0  ;;  %v3344_v56 = vrot.slane %v2647_v51, 4 }
 0x38d   : > { %3789 = vst [vmem:[#allocation3 + $0x90] sm:$0xff] %v3757_v44  ;;  %v3625_v26 = vrot.slane %v2790_v40, 6  ;;  %v2651_v10 = vpop.f32.mrb[214].mxu1  ;;  %v10390_v5 = vpop.f32.mrb[214].mxu0  ;;  %v3489_v18 = vrot.slane %v2649_v22, 5  ;;  %v3733_v28 = vld [vmem:[#allocation3 + $0xd0] sm:$0xff] }
 0x38e   : > { %3787 = vst [vmem:[#allocation3 + $0x80] sm:$0xff] %v3755_v48  ;;  %3788 = vst [vmem:[#allocation3 + $0x88] sm:$0x3] %v3756_v55  ;;  %v3345_v38 = vrot.slane %v2651_v10, 4  ;;  %v3629_v43 = vrot.slane %v10390_v5, 6  ;;  %v2653_v61 = vpop.f32.mrb[215].mxu1 }
 0x38f   : > { %v2793_v58 = vpop.f32.mrb[215].mxu0  ;;  %v3490_v62 = vrot.slane %v2653_v61, 5  ;;  %v3734_v29 = vld [vmem:[#allocation3 + $0xd8] sm:$0x3]  ;;  %v3731_v40 = vld [vmem:[#allocation3 + $0xc0] sm:$0xff] }
 0x390   : > { %v3626_v24 = vrot.slane %v2793_v58, 6  ;;  %v3346_v12 = vsel %vm3304_vm3, %v3344_v56, %v3345_v38  ;;  %v3412_v23 = vadd.f32 %v3345_v38, %v12378_v42  ;;  %v3630_v46 = vsel %vm3594_vm5, %v3628_v19, %v3629_v43 }
 0x391   : > { %v3698_v47 = vadd.f32 %v3629_v43, %v12466_v34  ;;  %v3411_v27 = vadd.f32 %v3346_v12, %v12382_v37  ;;  %v3697_v7 = vadd.f32 %v3630_v46, %v12470_v3  ;;  %v3491_v15 = vsel %vm3449_vm4, %v3489_v18, %v3490_v62 }
 0x392   : > { %v3627_v16 = vsel %vm3594_vm5, %v3625_v26, %v3626_v24  ;;  %v3557_v57 = vadd.f32 %v3490_v62, %v3412_v23  ;;  %v3696_v42 = vadd.f32 %v3626_v24, %v12452_v45  ;;  %v3732_v26 = vld [vmem:[#allocation3 + $0xc8] sm:$0x3] }
 0x393   : > { %v3762_v20 = vadd.f32 %v3730_v11, %v3698_v47  ;;  %v3695_v4 = vadd.f32 %v3627_v16, %v12456_v54  ;;  %v3761_v0 = vadd.f32 %v3729_v39, %v3697_v7  ;;  %v3556_v49 = vadd.f32 %v3491_v15, %v3411_v27  ;;  %v2657_v34 = vpop.f32.mrb[216].mxu1  ;;  %v10393_v30 = vpop.f32.mrb[216].mxu0 }
 0x394   : > { %v3760_v1 = vadd.f32 %v3728_v53, %v3696_v42  ;;  %v3634_v3 = vrot.slane %v10393_v30, 6  ;;  %v2659_v14 = vpop.f32.mrb[217].mxu1  ;;  %v2806_v32 = vpop.f32.mrb[217].mxu0  ;;  %v3347_v2 = vrot.slane %v2657_v34, 4  ;;  %v3735_v34 = vld [vmem:[#allocation3 + $0xe0] sm:$0xff] }
 0x395   : > { %3794 = vst [vmem:[#allocation3 + $0xb8] sm:$0x3] %v3762_v20  ;;  %v3759_v37 = vadd.f32 %v3727_v63, %v3695_v4  ;;  %3793 = vst [vmem:[#allocation3 + $0xb0] sm:$0xff] %v3761_v0  ;;  %v3631_v6 = vrot.slane %v2806_v32, 6  ;;  %v2661_v60 = vpop.f32.mrb[218].mxu1  ;;  %v10394_v25 = vpop.f32.mrb[218].mxu0 }
 0x396   : > { %3792 = vst [vmem:[#allocation3 + $0xa8] sm:$0x3] %v3760_v1  ;;  %v3348_v54 = vrot.slane %v2661_v60, 4  ;;  %v3635_v13 = vrot.slane %v10394_v25, 6  ;;  %v2663_v45 = vpop.f32.mrb[219].mxu1  ;;  %v2809_v59 = vpop.f32.mrb[219].mxu0 }
 0x397   : > { %3791 = vst [vmem:[#allocation3 + $0xa0] sm:$0xff] %v3759_v37  ;;  %v3492_v21 = vrot.slane %v2659_v14, 5  ;;  %v3493_v50 = vrot.slane %v2663_v45, 5  ;;  %v3632_v41 = vrot.slane %v2809_v59, 6 }
 0x398   : > { %v3349_v36 = vsel %vm3304_vm3, %v3347_v2, %v3348_v54  ;;  %v3414_v17 = vadd.f32 %v3348_v54, %v12394_v9  ;;  %v3636_v44 = vsel %vm3594_vm5, %v3634_v3, %v3635_v13  ;;  %v3702_v51 = vadd.f32 %v3635_v13, %v3557_v57  ;;  %v3736_v57 = vld [vmem:[#allocation3 + $0xe8] sm:$0x3]  ;;  %v3738_v3 = vld [vmem:[#allocation3 + $0xf8] sm:$0x3] }
 0x399   : > { %v3413_v48 = vadd.f32 %v3349_v36, %v12398_v52  ;;  %v3701_v55 = vadd.f32 %v3636_v44, %v3556_v49  ;;  %v3494_v19 = vsel %vm3449_vm4, %v3492_v21, %v3493_v50  ;;  %v3633_v22 = vsel %vm3594_vm5, %v3631_v6, %v3632_v41  ;;  %v3737_v6 = vld [vmem:[#allocation3 + $0xf0] sm:$0xff] }
 0x39a   : > { %v3766_v10 = vadd.f32 %v3734_v29, %v3702_v51  ;;  %v3559_v5 = vadd.f32 %v3493_v50, %v3414_v17  ;;  %v3699_v56 = vadd.f32 %v3633_v22, %v12484_v35  ;;  %v3700_v38 = vadd.f32 %v3632_v41, %v12480_v8 }
 0x39b   : > { %v3765_v9 = vadd.f32 %v3733_v28, %v3701_v55  ;;  %v3558_v43 = vadd.f32 %v3494_v19, %v3413_v48  ;;  %v2667_v61 = vpop.f32.mrb[220].mxu1  ;;  %v10397_v58 = vpop.f32.mrb[220].mxu0 }
 0x39c   : > { %3798 = vst [vmem:[#allocation3 + $0xd8] sm:$0x3] %v3766_v10  ;;  %v3763_v18 = vadd.f32 %v3731_v40, %v3699_v56  ;;  %v3764_v52 = vadd.f32 %v3732_v26, %v3700_v38  ;;  %v3640_v11 = vrot.slane %v10397_v58, 6  ;;  %v2669_v62 = vpop.f32.mrb[221].mxu1  ;;  %v2822_v24 = vpop.f32.mrb[221].mxu0  ;;  %v3350_v47 = vrot.slane %v2667_v61, 4 }
 0x39d   : > { %3797 = vst [vmem:[#allocation3 + $0xd0] sm:$0xff] %v3765_v9  ;;  %v3637_v12 = vrot.slane %v2822_v24, 6  ;;  %v2671_v23 = vpop.f32.mrb[222].mxu1  ;;  %v10398_v46 = vpop.f32.mrb[222].mxu0  ;;  %v3495_v7 = vrot.slane %v2669_v62, 5 }
 0x39e   : > { %3795 = vst [vmem:[#allocation3 + $0xc0] sm:$0xff] %v3763_v18  ;;  %3796 = vst [vmem:[#allocation3 + $0xc8] sm:$0x3] %v3764_v52  ;;  %v3351_v35 = vrot.slane %v2671_v23, 4  ;;  %v3641_v39 = vrot.slane %v10398_v46, 6  ;;  %v2673_v8 = vpop.f32.mrb[223].mxu1 }
 0x39f   : > { %v2825_v27 = vpop.f32.mrb[223].mxu0  ;;  %v3496_v15 = vrot.slane %v2673_v8, 5 }
 0x3a0   : > { %v3638_v16 = vrot.slane %v2825_v27, 6  ;;  %v3352_v63 = vsel %vm3304_vm3, %v3350_v47, %v3351_v35  ;;  %v3416_v53 = vadd.f32 %v3351_v35, %v12410_v33  ;;  %v3642_v20 = vsel %vm3594_vm5, %v3640_v11, %v3641_v39 }
 0x3a1   : > { %v3415_v4 = vadd.f32 %v3352_v63, %v12414_v31  ;;  %v3497_v42 = vsel %vm3449_vm4, %v3495_v7, %v3496_v15 }
 0x3a2   : > { %v3639_v0 = vsel %vm3594_vm5, %v3637_v12, %v3638_v16  ;;  %v3704_v49 = vadd.f32 %v3638_v16, %v3559_v5  ;;  %v3561_v30 = vadd.f32 %v3496_v15, %v3416_v53 }
 0x3a3   : > { %v3703_v37 = vadd.f32 %v3639_v0, %v3558_v43  ;;  %v3560_v1 = vadd.f32 %v3497_v42, %v3415_v4  ;;  %3806 = sbr.rel (%p10080_p7) target bundleno = 1605 (0x645), region = 68 }
 0x3a4   : > { %v3768_v14 = vadd.f32 %v3736_v57, %v3704_v49  ;;  %v3706_v32 = vadd.f32 %v3641_v39, %v3561_v30 }
 0x3a5   : > { %v3767_v60 = vadd.f32 %v3735_v34, %v3703_v37  ;;  %v3705_v33 = vadd.f32 %v3642_v20, %v3560_v1 }
 0x3a6   : > { %3800 = vst [vmem:[#allocation3 + $0xe8] sm:$0x3] %v3768_v14  ;;  %v3770_v25 = vadd.f32 %v3738_v3, %v3706_v32 }
 0x3a7   : > { %3799 = vst [vmem:[#allocation3 + $0xe0] sm:$0xff] %v3767_v60  ;;  %v3769_v2 = vadd.f32 %v3737_v6, %v3705_v33 }
 0x3a8   : > { %3802 = vst [vmem:[#allocation3 + $0xf8] sm:$0x3] %v3770_v25 }
 0x3a9   : > { %3801 = vst [vmem:[#allocation3 + $0xf0] sm:$0xff] %v3769_v2 }
 0x3aa   : > { %v10805_v31 = vld [vmem:[#allocation8 + $0x4] ss:$28 sps:$4 sm:$0xff]   ;;  %v10807_v54 = vld [vmem:[#allocation8 + $0xc] ss:$28 sps:$4 sm:$0xff]   ;;  %v11231_v13 = vmov 0   ;;  %v3809_v7 = vld [vmem:[#allocation2 + $0x10] sm:$0xff] }
 0x3ab   : > { %4221 = vmatprep.mubr.bf16.mxu0 %v11231_v13  ;;  %4354 = vmatprep.mubr.bf16.mxu1 %v11231_v13  ;;  %v10809_v45 = vld [vmem:[#allocation8] ss:$28 sps:$4 sm:$0xff]   ;;  %v10810_v59 = vld [vmem:[#allocation8 + $0x8] ss:$28 sps:$4 sm:$0xff]   ;;  %v10815_v50 = vld [vmem:[#allocation8 + $0x38] ss:$28 sps:$4 sm:$0xff]  }
 0x3ac   : > { %4189 = vmatprep.subr.bf16.mxu0 %v10805_v31  ;;  %4322 = vmatprep.subr.bf16.mxu1 %v10807_v54  ;;  %v10811_v21 = vld [vmem:[#allocation8 + $0x3c] ss:$28 sps:$4 sm:$0xff]   ;;  %v10813_v29 = vld [vmem:[#allocation8 + $0x44] ss:$28 sps:$4 sm:$0xff]   ;;  %v10817_v36 = vld [vmem:[#allocation8 + $0x74] ss:$28 sps:$4 sm:$0xff]  }
 0x3ad   : > { %4190 = vmatpush1.bf16.msra.mxu0 %v10809_v45  ;;  %4323 = vmatpush1.bf16.msra.mxu1 %v10810_v59  ;;  %v10816_v41 = vld [vmem:[#allocation8 + $0x40] ss:$28 sps:$4 sm:$0xff]   ;;  %v10821_v44 = vld [vmem:[#allocation8 + $0x70] ss:$28 sps:$4 sm:$0xff]   ;;  %v10822_v51 = vld [vmem:[#allocation8 + $0x78] ss:$28 sps:$4 sm:$0xff]  }
 0x3ae   : > { %4191 = vmatprep.subr.bf16.mxu0 %v10811_v21  ;;  %4324 = vmatprep.subr.bf16.mxu1 %v10813_v29  ;;  %v10819_v17 = vld [vmem:[#allocation8 + $0x7c] ss:$28 sps:$4 sm:$0xff]   ;;  %v10823_v28 = vld [vmem:[#allocation8 + $0xac] ss:$28 sps:$4 sm:$0xff]   ;;  %v10825_v48 = vld [vmem:[#allocation8 + $0xb4] ss:$28 sps:$4 sm:$0xff]  }
 0x3af   : > { %v10827_v55 = vld [vmem:[#allocation8 + $0xa8] ss:$28 sps:$4 sm:$0xff]   ;;  %v10828_v19 = vld [vmem:[#allocation8 + $0xb0] ss:$28 sps:$4 sm:$0xff]   ;;  %v10833_v26 = vld [vmem:[#allocation8 + $0xe0] ss:$28 sps:$4 sm:$0xff]  }
 0x3b0   : > { %v10829_v22 = vld [vmem:[#allocation8 + $0xe4] ss:$28 sps:$4 sm:$0xff]   ;;  %v10831_v40 = vld [vmem:[#allocation8 + $0xec] ss:$28 sps:$4 sm:$0xff]   ;;  %v10835_v5 = vld [vmem:[#allocation8 + $0x11c] ss:$28 sps:$4 sm:$0xff]  }
 0x3b1   : > { %4192 = vmatpush1.bf16.msra.mxu0 %v10815_v50  ;;  %4325 = vmatpush1.bf16.msra.mxu1 %v10816_v41  ;;  %v10834_v10 = vld [vmem:[#allocation8 + $0xe8] ss:$28 sps:$4 sm:$0xff]   ;;  %v10839_v38 = vld [vmem:[#allocation8 + $0x118] ss:$28 sps:$4 sm:$0xff]   ;;  %v10840_v9 = vld [vmem:[#allocation8 + $0x120] ss:$28 sps:$4 sm:$0xff]  }
 0x3b2   : > { %4193 = vmatprep.subr.bf16.mxu0 %v10817_v36  ;;  %4326 = vmatprep.subr.bf16.mxu1 %v10819_v17  ;;  %v10837_v56 = vld [vmem:[#allocation8 + $0x124] ss:$28 sps:$4 sm:$0xff]   ;;  %v10841_v43 = vld [vmem:[#allocation8 + $0x154] ss:$28 sps:$4 sm:$0xff]   ;;  %v10843_v61 = vld [vmem:[#allocation8 + $0x15c] ss:$28 sps:$4 sm:$0xff]  }
 0x3b3   : > { %v10845_v58 = vld [vmem:[#allocation8 + $0x150] ss:$28 sps:$4 sm:$0xff]   ;;  %v10846_v18 = vld [vmem:[#allocation8 + $0x158] ss:$28 sps:$4 sm:$0xff]   ;;  %v10851_v62 = vld [vmem:[#allocation8 + $0x188] ss:$28 sps:$4 sm:$0xff]  }
 0x3b4   : > { %v10847_v52 = vld [vmem:[#allocation8 + $0x18c] ss:$28 sps:$4 sm:$0xff]   ;;  %v10849_v11 = vld [vmem:[#allocation8 + $0x194] ss:$28 sps:$4 sm:$0xff]   ;;  %v3807_v12 = vld [vmem:[#allocation2] sm:$0xff] }
 0x3b5   : > { %4194 = vmatpush1.bf16.msra.mxu0 %v10821_v44  ;;  %4327 = vmatpush1.bf16.msra.mxu1 %v10822_v51  ;;  %v10852_v24 = vld [vmem:[#allocation8 + $0x190] ss:$28 sps:$4 sm:$0xff]   ;;  %v10856_v47 = vld [vmem:[#allocation8 + $0x18] ss:$28 sps:$4 sm:$0xff]   ;;  %v10857_v16 = vld [vmem:[#allocation8 + $0x48] ss:$28 sps:$4 sm:$0xff]  }
 0x3b6   : > { %4195 = vmatprep.subr.bf16.mxu0 %v10823_v28  ;;  %4328 = vmatprep.subr.bf16.mxu1 %v10825_v48  ;;  %v3808_v23 = vld [vmem:[#allocation2 + $0x8] sm:$0xff]  ;;  %v10855_v46 = vld [vmem:[#allocation8 + $0x14] ss:$28 sps:$4 sm:$0xff]   ;;  %v3810_v15 = vld [vmem:[#allocation2 + $0x18] sm:$0xff] }
 0x3b7   : > { %v12513_v35 = vpack.c.bf16 %v3808_v23, %v3807_v12  ;;  %v10853_v39 = vld [vmem:[#allocation8 + $0x10] ss:$28 sps:$4 sm:$0xff]   ;;  %v10863_v63 = vld [vmem:[#allocation8 + $0x84] ss:$28 sps:$4 sm:$0xff]   ;;  %v12519_v20 = vpack.c.bf16 %v3810_v15, %v3809_v7  ;;  %v10867_v4 = vld [vmem:[#allocation8 + $0xbc] ss:$28 sps:$4 sm:$0xff]  }
 0x3b8   : > { %v10859_v8 = vld [vmem:[#allocation8 + $0x4c] ss:$28 sps:$4 sm:$0xff]   ;;  %v10861_v57 = vld [vmem:[#allocation8 + $0x80] ss:$28 sps:$4 sm:$0xff]   ;;  %v10865_v34 = vld [vmem:[#allocation8 + $0xb8] ss:$28 sps:$4 sm:$0xff]  }
 0x3b9   : > { %4196 = vmatpush1.bf16.msra.mxu0 %v10827_v55  ;;  %4329 = vmatpush1.bf16.msra.mxu1 %v10828_v19  ;;  %v10860_v27 = vld [vmem:[#allocation8 + $0x50] ss:$28 sps:$4 sm:$0xff]   ;;  %v10864_v53 = vld [vmem:[#allocation8 + $0x88] ss:$28 sps:$4 sm:$0xff]   ;;  %v10868_v42 = vld [vmem:[#allocation8 + $0xc0] ss:$28 sps:$4 sm:$0xff]  }
 0x3ba   : > { %4197 = vmatprep.subr.bf16.mxu0 %v10829_v22  ;;  %4330 = vmatprep.subr.bf16.mxu1 %v10831_v40  ;;  %v3811_v0 = vld [vmem:[#allocation2 + $0x20] sm:$0xff]  ;;  %v3812_v49 = vld [vmem:[#allocation2 + $0x28] sm:$0xff]  ;;  %v10871_v30 = vld [vmem:[#allocation8 + $0xf4] ss:$28 sps:$4 sm:$0xff]  }
 0x3bb   : > { %v10872_v37 = vld [vmem:[#allocation8 + $0xf8] ss:$28 sps:$4 sm:$0xff]   ;;  %v12525_v1 = vpack.c.bf16 %v3812_v49, %v3811_v0  ;;  %v10869_v3 = vld [vmem:[#allocation8 + $0xf0] ss:$28 sps:$4 sm:$0xff]   ;;  %v10873_v33 = vld [vmem:[#allocation8 + $0x128] ss:$28 sps:$4 sm:$0xff]  }
 0x3bc   : > { %v10875_v14 = vld [vmem:[#allocation8 + $0x12c] ss:$28 sps:$4 sm:$0xff]   ;;  %v3813_v6 = vld [vmem:[#allocation2 + $0x30] sm:$0xff]  ;;  %v3814_v60 = vld [vmem:[#allocation2 + $0x38] sm:$0xff] }
 0x3bd   : > { %4198 = vmatpush1.bf16.msra.mxu0 %v10833_v26  ;;  %4331 = vmatpush1.bf16.msra.mxu1 %v10834_v10  ;;  %v10876_v32 = vld [vmem:[#allocation8 + $0x130] ss:$28 sps:$4 sm:$0xff]   ;;  %v10879_v25 = vld [vmem:[#allocation8 + $0x164] ss:$28 sps:$4 sm:$0xff]   ;;  %v12531_v31 = vpack.c.bf16 %v3814_v60, %v3813_v6  ;;  %v10883_v45 = vld [vmem:[#allocation8 + $0x19c] ss:$28 sps:$4 sm:$0xff]  }
 0x3be   : > { %4199 = vmatprep.subr.bf16.mxu0 %v10835_v5  ;;  %4332 = vmatprep.subr.bf16.mxu1 %v10837_v56  ;;  %v10880_v2 = vld [vmem:[#allocation8 + $0x168] ss:$28 sps:$4 sm:$0xff]   ;;  %v10877_v54 = vld [vmem:[#allocation8 + $0x160] ss:$28 sps:$4 sm:$0xff]   ;;  %v10881_v50 = vld [vmem:[#allocation8 + $0x198] ss:$28 sps:$4 sm:$0xff]  }
 0x3bf   : > { %v10884_v59 = vld [vmem:[#allocation8 + $0x1a0] ss:$28 sps:$4 sm:$0xff]   ;;  %v3816_v29 = vld [vmem:[#allocation2 + $0x48] sm:$0xff]  ;;  %v3817_v44 = vld [vmem:[#allocation2 + $0x50] sm:$0xff] }
 0x3c0   : > { %v3815_v21 = vld [vmem:[#allocation2 + $0x40] sm:$0xff]  ;;  %v10887_v41 = vld [vmem:[#allocation11 + $0xc] ss:$28 sps:$4 sm:$0xff]   ;;  %v3818_v51 = vld [vmem:[#allocation2 + $0x58] sm:$0xff] }
 0x3c1   : > { %4200 = vmatpush1.bf16.msra.mxu0 %v10839_v38  ;;  %4333 = vmatpush1.bf16.msra.mxu1 %v10840_v9  ;;  %v10890_v36 = vld [vmem:[#allocation11 + $0x4] ss:$28 sps:$4 sm:$0xff]   ;;  %v12537_v17 = vpack.c.bf16 %v3816_v29, %v3815_v21  ;;  %v12543_v28 = vpack.c.bf16 %v3818_v51, %v3817_v44  ;;  %v3820_v55 = vld [vmem:[#allocation2 + $0x68] sm:$0xff]  ;;  %v3821_v22 = vld [vmem:[#allocation2 + $0x70] sm:$0xff] }
 0x3c2   : > { %4201 = vmatprep.subr.bf16.mxu0 %v10841_v43  ;;  %4334 = vmatprep.subr.bf16.mxu1 %v10843_v61  ;;  %v3819_v48 = vld [vmem:[#allocation2 + $0x60] sm:$0xff]  ;;  %v3822_v40 = vld [vmem:[#allocation2 + $0x78] sm:$0xff]  ;;  %v3824_v5 = vld [vmem:[#allocation2 + $0x88] sm:$0xff]  ;;  %v11232_v61 = vmov 1966171168  }
 0x3c3   : > { %v12549_v19 = vpack.c.bf16 %v3820_v55, %v3819_v48  ;;  %v12555_v26 = vpack.c.bf16 %v3822_v40, %v3821_v22  ;;  %v3823_v10 = vld [vmem:[#allocation2 + $0x80] sm:$0xff]  ;;  %v3825_v38 = vld [vmem:[#allocation2 + $0x90] sm:$0xff]  ;;  %v3826_v9 = vld [vmem:[#allocation2 + $0x98] sm:$0xff] }
 0x3c4   : > { %v12561_v56 = vpack.c.bf16 %v3824_v5, %v3823_v10  ;;  %v12567_v43 = vpack.c.bf16 %v3826_v9, %v3825_v38  ;;  %v5262_v12 = vld [vmem:[#allocation3 + $0x8] sm:$0x3]  ;;  %v10888_v23 = vld [vmem:[#allocation11] ss:$28 sps:$4 sm:$0xff]   ;;  %v10897_v0 = vld [vmem:[#allocation11 + $0x70] ss:$28 sps:$4 sm:$0xff]  }
 0x3c5   : > { %4202 = vmatpush1.bf16.msra.mxu0 %v10845_v58  ;;  %4335 = vmatpush1.bf16.msra.mxu1 %v10846_v18  ;;  %v5327_v58 = vunpack.c.l.s4 %v11232_v61  ;;  %v5329_v18 = vlaneseq  ;;  %v10902_v49 = vld [vmem:[#allocation11 + $0xac] ss:$28 sps:$4 sm:$0xff]   ;;  %v12595_v21 = vld [vmem:[#allocation3 + $0x38] sm:$0x3]  ;;  %v10906_v51 = vld [vmem:[#allocation11 + $0xe0] ss:$28 sps:$4 sm:$0xff]  }
 0x3c6   : > { %4203 = vmatprep.subr.bf16.mxu0 %v10847_v52  ;;  %4336 = vmatprep.subr.bf16.mxu1 %v10849_v11  ;;  %v10923_v48 = vld [vmem:[#allocation11 + $0xec] ss:$28 sps:$4 sm:$0xff]   ;;  %v10911_v40 = vld [vmem:[#allocation11 + $0x11c] ss:$28 sps:$4 sm:$0xff]  }
 0x3c7   : > { %v5328_v52 = vunpack.c.0.s8 %v5327_v58  ;;  %v12573_v11 = vshrl.u32 %v5329_v18, 7  ;;  %v10921_v38 = vld [vmem:[#allocation11 + $0xe8] ss:$28 sps:$4 sm:$0xff]  }
 0x3c8   : > { %v10929_v18 = vld [vmem:[#allocation11 + $0x124] ss:$28 sps:$4 sm:$0xff]  }
 0x3c9   : > { %4204 = vmatpush1.bf16.msra.mxu0 %v10851_v62  ;;  %4337 = vmatpush1.bf16.msra.mxu1 %v10852_v24  ;;  %v10885_v62 = vld [vmem:[#allocation11 + $0x8] ss:$28 sps:$4 sm:$0xff]   ;;  %v12578_v7 = vsub.s32 %v5328_v52, %v12573_v11 }
 0x3ca   : > { %4455 = vmatprep.subr.bf16.mxu0 %v10855_v46  ;;  %10399 = vmatprep.subr.bf16.mxu1 %v10856_v47  ;;  %v5261_v24 = vld [vmem:[#allocation3] sm:$0xff]  ;;  %v5263_v46 = vld [vmem:[#allocation3 + $0x10] sm:$0xff] }
 0x3cb   : > { %v5269_v52 = vld [vmem:[#allocation3 + $0x40] sm:$0xff] }
 0x3cc   : > { %4222 = vmatmul.mubr.bf16.vlgmr.msra.gmra.mrb[0].mxu0 %v12513_v35  ;;  %4355 = vmatmul.mubr.bf16.vlgmr.msra.gmra.mrb[0].mxu1 %v12513_v35 }
 0x3cd   : > { %4456 = vmatpush1.bf16.msra.mxu0 %v10853_v39  ;;  %10400 = vmatpush3.bf16.msra.mxu1 %v10856_v47  ;;  %v12575_v47 = vld [vmem:[#allocation3 + $0x18] sm:$0x3] }
 0x3ce   : > { %4231 = vmatprep.mubr.bf16.mxu0 %v11231_v13  ;;  %4364 = vmatprep.mubr.bf16.mxu1 %v11231_v13  ;;  %v10893_v39 = vld [vmem:[#allocation11 + $0x3c] ss:$28 sps:$4 sm:$0xff]   ;;  %v5294_v15 = vpack.c.bf16 %v12575_v47, %v5263_v46  ;;  %v5271_v46 = vld [vmem:[#allocation3 + $0x50] sm:$0xff] }
 0x3cf   : > { %4457 = vmatprep.subr.bf16.mxu0 %v10859_v8  ;;  %10401 = vmatprep.subr.bf16.mxu1 %v10860_v27  ;;  %v10896_v8 = vld [vmem:[#allocation11 + $0x44] ss:$28 sps:$4 sm:$0xff]  }
 0x3d1   : > { %4458 = vmatpush1.bf16.msra.mxu0 %v10857_v16  ;;  %10402 = vmatpush3.bf16.msra.mxu1 %v10860_v27  ;;  %v5293_v27 = vpack.c.bf16 %v5262_v12, %v5261_v24  ;;  %v10891_v16 = vld [vmem:[#allocation11 + $0x38] ss:$28 sps:$4 sm:$0xff]  }
 0x3d2   : > { %4459 = vmatprep.subr.bf16.mxu0 %v10863_v63  ;;  %10403 = vmatprep.subr.bf16.mxu1 %v10864_v53  ;;  %v10894_v63 = vld [vmem:[#allocation11 + $0x40] ss:$28 sps:$4 sm:$0xff]  }
 0x3d4   : > { %4232 = vmatmul.mubr.bf16.gmra.mrb[4].mxu0 %v12519_v20  ;;  %4365 = vmatmul.mubr.bf16.gmra.mrb[4].mxu1 %v12519_v20 }
 0x3d5   : > { %4241 = vmatprep.mubr.bf16.mxu0 %v11231_v13  ;;  %4374 = vmatprep.mubr.bf16.mxu1 %v11231_v13 }
 0x3d6   : > { %4460 = vmatpush1.bf16.msra.mxu0 %v10861_v57  ;;  %10404 = vmatpush3.bf16.msra.mxu1 %v10864_v53  ;;  %v10899_v53 = vld [vmem:[#allocation11 + $0x74] ss:$28 sps:$4 sm:$0xff]   ;;  %v10905_v57 = vld [vmem:[#allocation11 + $0x7c] ss:$28 sps:$4 sm:$0xff]  }
 0x3d7   : > { %4461 = vmatprep.subr.bf16.mxu0 %v10867_v4  ;;  %10405 = vmatprep.subr.bf16.mxu1 %v10868_v42  ;;  %v5332_v4 = vrot.slane %v5293_v27, %v12578_v7 }
 0x3da   : > { %4462 = vmatpush1.bf16.msra.mxu0 %v10865_v34  ;;  %10406 = vmatpush3.bf16.msra.mxu1 %v10868_v42  ;;  %v10137_v42 = vpack.c.bf16 %v5262_v12, %v5262_v12  ;;  %v5265_v34 = vld [vmem:[#allocation3 + $0x20] sm:$0xff]  ;;  %v10909_v12 = vld [vmem:[#allocation11 + $0x118] ss:$28 sps:$4 sm:$0xff]  }
 0x3db   : > { %4463 = vmatprep.subr.bf16.mxu0 %v10871_v30  ;;  %10407 = vmatprep.subr.bf16.mxu1 %v10872_v37  ;;  %v5266_v30 = vld [vmem:[#allocation3 + $0x28] sm:$0x3] }
 0x3dc   : > { %4242 = vmatmul.mubr.bf16.gmra.mrb[8].mxu0 %v12525_v1  ;;  %4375 = vmatmul.mubr.bf16.gmra.mrb[8].mxu1 %v12525_v1  ;;  %v10139_v22 = vpack.c.bf16 %v5266_v30, %v5266_v30 }
 0x3dd   : > { %4251 = vmatprep.mubr.bf16.mxu0 %v11231_v13  ;;  %4384 = vmatprep.mubr.bf16.mxu1 %v11231_v13 }
 0x3de   : > { %4464 = vmatpush1.bf16.msra.mxu0 %v10869_v3  ;;  %10408 = vmatpush3.bf16.msra.mxu1 %v10872_v37  ;;  %v10903_v37 = vld [vmem:[#allocation11 + $0x78] ss:$28 sps:$4 sm:$0xff]   ;;  %v5340_v3 = vcombine.high %v5332_v4, %v5332_v4 }
 0x3df   : > { %4465 = vmatprep.subr.bf16.mxu0 %v10875_v14  ;;  %10409 = vmatprep.subr.bf16.mxu1 %v10876_v32  ;;  %v10914_v14 = vld [vmem:[#allocation11 + $0xb4] ss:$28 sps:$4 sm:$0xff]  }
 0x3e2   : > { %4466 = vmatpush1.bf16.msra.mxu0 %v10873_v33  ;;  %10410 = vmatpush3.bf16.msra.mxu1 %v10876_v32  ;;  %v5339_v32 = vrot.slane %v10137_v42, %v12578_v7  ;;  %v10900_v33 = vld [vmem:[#allocation11 + $0xa8] ss:$28 sps:$4 sm:$0xff]  }
 0x3e3   : > { %4467 = vmatprep.subr.bf16.mxu0 %v10879_v25  ;;  %10411 = vmatprep.subr.bf16.mxu1 %v10880_v2  ;;  %v5295_v25 = vpack.c.bf16 %v5266_v30, %v5265_v34  ;;  %v10915_v30 = vld [vmem:[#allocation11 + $0x150] ss:$28 sps:$4 sm:$0xff]  }
 0x3e4   : > { %4252 = vmatmul.mubr.bf16.gmra.mrb[12].mxu0 %v12531_v31  ;;  %4385 = vmatmul.mubr.bf16.gmra.mrb[12].mxu1 %v12531_v31  ;;  %v5354_v29 = vrot.slane %v5339_v32, %v12578_v7  ;;  %v10935_v32 = vld [vmem:[#allocation11 + $0x15c] ss:$28 sps:$4 sm:$0xff]  }
 0x3e5   : > { %4261 = vmatprep.mubr.bf16.mxu0 %v11231_v13  ;;  %4394 = vmatprep.mubr.bf16.mxu1 %v11231_v13  ;;  %v5410_v44 = vrot.slane %v5295_v25, %v12578_v7 }
 0x3e6   : > { %4468 = vmatpush1.bf16.msra.mxu0 %v10877_v54  ;;  %10412 = vmatpush3.bf16.msra.mxu1 %v10880_v2  ;;  %v10908_v2 = vld [vmem:[#allocation11 + $0xe4] ss:$28 sps:$4 sm:$0xff]   ;;  %v10912_v54 = vld [vmem:[#allocation11 + $0xb0] ss:$28 sps:$4 sm:$0xff]  }
 0x3e7   : > { %4469 = vmatprep.subr.bf16.mxu0 %v10883_v45  ;;  %10413 = vmatprep.subr.bf16.mxu1 %v10884_v59  ;;  %v5361_v45 = vrot.slane %v5340_v3, %v12578_v7  ;;  %v5418_v24 = vcombine.high %v5410_v44, %v5410_v44  ;;  %v5425_v42 = vrot.slane %v5410_v44, %v12578_v7 }
 0x3ea   : > { %4470 = vmatpush1.bf16.msra.mxu0 %v10881_v50  ;;  %10414 = vmatpush3.bf16.msra.mxu1 %v10884_v59  ;;  %v5267_v59 = vld [vmem:[#allocation3 + $0x30] sm:$0xff] }
 0x3eb   : > { %6928 = vmatprep.subr.bf16.mxu0 %v10887_v41  ;;  %6801 = vmatprep.subr.bf16.mxu1 %v10890_v36  ;;  %v10138_v36 = vpack.c.bf16 %v12575_v47, %v12575_v47  ;;  %v5296_v55 = vpack.c.bf16 %v12595_v21, %v5267_v59  ;;  %v12615_v47 = vld [vmem:[#allocation3 + $0x58] sm:$0x3]  ;;  %v10941_v59 = vld [vmem:[#allocation11 + $0x194] ss:$28 sps:$4 sm:$0xff]  }
 0x3ec   : > { %4262 = vmatmul.mubr.bf16.gmra.mrb[16].mxu0 %v12537_v17  ;;  %4395 = vmatmul.mubr.bf16.gmra.mrb[16].mxu1 %v12537_v17  ;;  %v5298_v34 = vpack.c.bf16 %v12615_v47, %v5271_v46  ;;  %v12663_v46 = vld [vmem:[#allocation11 + $0x18] ss:$28 sps:$4 sm:$0xff]  }
 0x3ed   : > { %4271 = vmatprep.mubr.bf16.mxu0 %v11231_v13  ;;  %4404 = vmatprep.mubr.bf16.mxu1 %v11231_v13  ;;  %v5378_v58 = vrot.slane %v10138_v36, %v12578_v7  ;;  %v10926_v36 = vld [vmem:[#allocation11 + $0x14] ss:$28 sps:$4 sm:$0xff]  }
 0x3f4   : > { %4272 = vmatmul.mubr.bf16.gmra.mrb[20].mxu0 %v12543_v28  ;;  %4405 = vmatmul.mubr.bf16.gmra.mrb[20].mxu1 %v12543_v28 }
 0x3f5   : > { %4281 = vmatprep.mubr.bf16.mxu0 %v11231_v13  ;;  %4414 = vmatprep.mubr.bf16.mxu1 %v11231_v13 }
 0x3fc   : > { %4282 = vmatmul.mubr.bf16.gmra.mrb[24].mxu0 %v12549_v19  ;;  %4415 = vmatmul.mubr.bf16.gmra.mrb[24].mxu1 %v12549_v19 }
 0x3fd   : > { %4291 = vmatprep.mubr.bf16.mxu0 %v11231_v13  ;;  %4424 = vmatprep.mubr.bf16.mxu1 %v11231_v13 }
 0x404   : > { %4292 = vmatmul.mubr.bf16.gmra.mrb[28].mxu0 %v12555_v26  ;;  %4425 = vmatmul.mubr.bf16.gmra.mrb[28].mxu1 %v12555_v26 }
 0x405   : > { %4301 = vmatprep.mubr.bf16.mxu0 %v11231_v13  ;;  %4434 = vmatprep.mubr.bf16.mxu1 %v11231_v13 }
 0x40c   : > { %4302 = vmatmul.mubr.bf16.gmra.mrb[32].mxu0 %v12561_v56  ;;  %4435 = vmatmul.mubr.bf16.gmra.mrb[32].mxu1 %v12561_v56 }
 0x40d   : > { %4311 = vmatprep.mubr.bf16.mxu0 %v11231_v13  ;;  %4444 = vmatprep.mubr.bf16.mxu1 %v11231_v13 }
 0x414   : > { %4312 = vmatmul.mubr.bf16.gmra.mrb[36].mxu0 %v12567_v43  ;;  %4445 = vmatmul.mubr.bf16.gmra.mrb[36].mxu1 %v12567_v43 }
 0x415   : > { %4487 = vmatprep.mubr.bf16.mxu0 %v11231_v13  ;;  %10415 = vmatprep.mubr.bf16.mxu1 %v12513_v35 }
 0x41c   : > { %4488 = vmatmul.mubr.bf16.vlgmr.msra.gmra.mrb[40].mxu0 %v12513_v35  ;;  %10416 = vmatmul.mubr.bf16.vlgmr.msra.gmra.mrb[40].mxu1 %v12519_v20  ;;  %v5371_v35 = vrot.slane %v5294_v15, %v12578_v7  ;;  %v10927_v15 = vld [vmem:[#allocation11 + $0x120] ss:$28 sps:$4 sm:$0xff]  }
 0x41d   : > { %6929 = vmatpush1.bf16.msra.mxu0 %v10885_v62  ;;  %6802 = vmatpush1.bf16.msra.mxu1 %v10888_v23  ;;  %v12609_v62 = vld [vmem:[#allocation3 + $0x48] sm:$0x3]  ;;  %v5449_v23 = vrot.slane %v5296_v55, %v12578_v7 }
 0x41e   : > { %4497 = vmatprep.mubr.bf16.mxu0 %v11231_v13  ;;  %10419 = vmatprep.mubr.bf16.mxu1 %v12525_v1  ;;  %v5379_v6 = vcombine.high %v5371_v35, %v5371_v35  ;;  %v5386_v60 = vrot.slane %v5371_v35, %v12578_v7  ;;  %v5439_v35 = vrot.slane %v5418_v24, %v12578_v7 }
 0x41f   : > { %6803 = vmatprep.subr.bf16.mxu1 %v10893_v39  ;;  %6930 = vmatprep.subr.bf16.mxu0 %v10896_v8  ;;  %v10917_v39 = vld [vmem:[#allocation11 + $0x154] ss:$28 sps:$4 sm:$0xff]   ;;  %v12632_v3 = vrot.slane %v5449_v23, %v12578_v7 }
 0x420   : > { %v12599_v50 = vrot.slane %v5379_v6, %v12578_v7  ;;  %v5401_v41 = vcombine.high %v5386_v60, %v5386_v60  ;;  %v6015_v9 = vcombine.low %v5354_v29, %v5386_v60  ;;  %v10920_v6 = vld [vmem:[#allocation11 + $0x18c] ss:$28 sps:$4 sm:$0xff]   ;;  %v10154_v29 = vcombine.high %v5425_v42, %v5439_v35 }
 0x421   : > { %6804 = vmatpush1.bf16.msra.mxu1 %v10891_v16  ;;  %6931 = vmatpush1.bf16.msra.mxu0 %v10894_v63  ;;  %v5297_v16 = vpack.c.bf16 %v12609_v62, %v5269_v52  ;;  %v10142_v52 = vpack.c.bf16 %v12615_v47, %v12615_v47 }
 0x422   : > { %6805 = vmatprep.subr.bf16.mxu1 %v10899_v53  ;;  %6932 = vmatprep.subr.bf16.mxu0 %v10905_v57  ;;  %v6016_v61 = vcombine.low %v12599_v50, %v5401_v41  ;;  %v6037_v63 = vrot.slane %v6015_v9, %v12578_v7  ;;  %v5393_v57 = vrot.slane %v5378_v58, %v12578_v7  ;;  %v10918_v41 = vld [vmem:[#allocation11 + $0x188] ss:$28 sps:$4 sm:$0xff]  }
 0x423   : > { %v5488_v25 = vrot.slane %v5297_v16, %v12578_v7  ;;  %v10141_v9 = vpack.c.bf16 %v12609_v62, %v12609_v62 }
 0x424   : > { %4498 = vmatmul.mubr.bf16.gmra.mrb[44].mxu0 %v12519_v20  ;;  %10420 = vmatmul.mubr.bf16.gmra.mrb[44].mxu1 %v12531_v31  ;;  %v5347_v20 = vrot.slane %v5332_v4, %v12578_v7  ;;  %v6044_v53 = vrot.slane %v6016_v61, %v12578_v7  ;;  %v5402_v4 = vcombine.high %v12599_v50, %v12599_v50 }
 0x425   : > { %6806 = vmatpush1.bf16.msra.mxu1 %v10897_v0  ;;  %4507 = vmatprep.mubr.bf16.mxu0 %v11231_v13  ;;  %v5273_v0 = vld [vmem:[#allocation3 + $0x60] sm:$0xff]  ;;  %v5527_v50 = vrot.slane %v5298_v34, %v12578_v7  ;;  %v5496_v55 = vcombine.high %v5488_v25, %v5488_v25  ;;  %v5495_v47 = vrot.slane %v10141_v9, %v12578_v7 }
 0x426   : > { %10423 = vmatprep.mubr.bf16.mxu1 %v12537_v17  ;;  %6807 = vmatprep.subr.bf16.mxu1 %v10902_v49  ;;  %v6013_v10 = vcombine.low %v5347_v20, %v5361_v45  ;;  %v10153_v5 = vcombine.high %v5347_v20, %v5361_v45  ;;  %v12627_v49 = vld [vmem:[#allocation3 + $0x68] sm:$0x3]  ;;  %v6062_v20 = vcombine.low %v5402_v4, %v5393_v57 }
 0x427   : > { %6933 = vmatpush1.bf16.msra.mxu0 %v10903_v37  ;;  %v5299_v45 = vpack.c.bf16 %v12627_v49, %v5273_v0  ;;  %v5535_v24 = vcombine.high %v5527_v50, %v5527_v50 }
 0x428   : > { %6934 = vmatprep.subr.bf16.mxu0 %v10914_v14  ;;  %v6023_v8 = vrot.slane %v6013_v10, %v12578_v7  ;;  %v6030_v27 = vrot.slane %v10153_v5, %v12578_v7  ;;  %v10140_v14 = vpack.c.bf16 %v12595_v21, %v12595_v21  ;;  %v6063_v21 = vcombine.low %v5425_v42, %v5439_v35  ;;  %v12647_v10 = vld [vmem:[#allocation3 + $0x78] sm:$0x3] }
 0x429   : > { %6808 = vmatpush1.bf16.msra.mxu1 %v10900_v33  ;;  %v5457_v33 = vcombine.high %v5449_v23, %v5449_v23  ;;  %v5566_v61 = vrot.slane %v5299_v45, %v12578_v7  ;;  %v5479_v23 = vcombine.high %v12632_v3, %v12632_v3  ;;  %v10932_v45 = vld [vmem:[#allocation11 + $0x4c] ss:$28 sps:$4 sm:$0xff]  }
 0x42a   : > { %6809 = vmatprep.subr.bf16.mxu1 %v10908_v2  ;;  %v6045_v60 = vcombine.low %v6023_v8, %v6030_v27  ;;  %v10933_v2 = vld [vmem:[#allocation11 + $0x158] ss:$28 sps:$4 sm:$0xff]   ;;  %v5456_v44 = vrot.slane %v10140_v14, %v12578_v7  ;;  %v6079_v58 = vrot.slane %v6063_v21, %v12578_v7  ;;  %v5503_v8 = vrot.slane %v5488_v25, %v12578_v7 }
 0x42b   : > { %6935 = vmatpush1.bf16.msra.mxu0 %v10912_v54  ;;  %v6046_v54 = vcombine.low %v6037_v63, %v6044_v53  ;;  %v5517_v27 = vrot.slane %v5496_v55, %v12578_v7  ;;  %v5574_v16 = vcombine.high %v5566_v61, %v5566_v61  ;;  %v5534_v63 = vrot.slane %v10142_v52, %v12578_v7  ;;  %v12701_v55 = vld [vmem:[#allocation3 + $0x98] sm:$0x3] }
 0x42c   : > { %4508 = vmatmul.mubr.bf16.gmra.mrb[48].mxu0 %v12525_v1  ;;  %10424 = vmatmul.mubr.bf16.gmra.mrb[48].mxu1 %v12543_v28  ;;  %v5417_v1 = vrot.slane %v10139_v22, %v12578_v7  ;;  %v10939_v22 = vld [vmem:[#allocation11 + $0x190] ss:$28 sps:$4 sm:$0xff]   ;;  %v5556_v53 = vrot.slane %v5535_v24, %v12578_v7  ;;  %v12681_v14 = vrot.slane %v5566_v61, %v12578_v7 }
 0x42d   : > { %4517 = vmatprep.mubr.bf16.mxu0 %v11231_v13  ;;  %10427 = vmatprep.mubr.bf16.mxu1 %v12549_v19  ;;  %v6060_v5 = vrot.slane %v6046_v54, %v12578_v7  ;;  %v6113_v34 = vcombine.low %v5503_v8, %v5517_v27  ;;  %v10143_v25 = vpack.c.bf16 %v12627_v49, %v12627_v49 }
 0x42e   : > { %6810 = vmatpush1.bf16.msra.mxu1 %v10906_v51  ;;  %6936 = vmatprep.subr.bf16.mxu0 %v10923_v48  ;;  %v5432_v37 = vrot.slane %v5417_v1, %v12578_v7  ;;  %v6053_v51 = vrot.slane %v6045_v60, %v12578_v7  ;;  %v5478_v48 = vrot.slane %v5457_v33, %v12578_v7 }
 0x42f   : > { %6811 = vmatprep.subr.bf16.mxu1 %v10911_v40  ;;  %6937 = vmatpush1.bf16.msra.mxu0 %v10921_v38  ;;  %v5275_v40 = vld [vmem:[#allocation3 + $0x70] sm:$0xff]  ;;  %v6072_v38 = vrot.slane %v6062_v20, %v12578_v7  ;;  %v5471_v1 = vrot.slane %v5456_v44, %v12578_v7  ;;  %v5549_v60 = vrot.slane %v5534_v63, %v12578_v7 }
 0x430   : > { %6938 = vmatprep.subr.bf16.mxu0 %v10929_v18  ;;  %v6086_v18 = vrot.slane %v10154_v29, %v12578_v7  ;;  %v5300_v62 = vpack.c.bf16 %v12647_v10, %v5275_v40  ;;  %v12675_v57 = vcombine.low %v6053_v51, %v6060_v5  ;;  %v6111_v35 = vcombine.low %v5478_v48, %v5479_v23 }
 0x431   : > { %v6094_v4 = vcombine.low %v6072_v38, %v6079_v58  ;;  %v5558_v33 = vcombine.high %v5556_v53, %v5556_v53 }
 0x432   : > { %6812 = vmatpush1.bf16.msra.mxu1 %v10909_v12  ;;  %v6121_v21 = vrot.slane %v6111_v35, %v12578_v7 }
 0x433   : > { %6813 = vmatprep.subr.bf16.mxu1 %v10917_v39  ;;  %6939 = vmatpush1.bf16.msra.mxu0 %v10927_v15  ;;  %v5480_v39 = vcombine.high %v5478_v48, %v5478_v48  ;;  %v5542_v15 = vrot.slane %v5527_v50, %v12578_v7  ;;  %v6102_v54 = vrot.slane %v6094_v4, %v12578_v7  ;;  %v5279_v48 = vld [vmem:[#allocation3 + $0x90] sm:$0xff] }
 0x434   : > { %4518 = vmatmul.mubr.bf16.gmra.mrb[52].mxu0 %v12531_v31  ;;  %10428 = vmatmul.mubr.bf16.gmra.mrb[52].mxu1 %v12555_v26  ;;  %v6065_v31 = vcombine.low %v5432_v37, %v12632_v3  ;;  %v5510_v37 = vrot.slane %v5495_v47, %v12578_v7  ;;  %v6135_v50 = vrot.slane %v6113_v34, %v12578_v7  ;;  %v10936_v47 = vld [vmem:[#allocation11 + $0x80] ss:$28 sps:$4 sm:$0xff]  }
 0x435   : > { %4527 = vmatprep.mubr.bf16.mxu0 %v11231_v13  ;;  %10431 = vmatprep.mubr.bf16.mxu1 %v12561_v56  ;;  %v6112_v0 = vcombine.low %v5480_v39, %v5471_v1  ;;  %v5557_v3 = vcombine.high %v5542_v15, %v5542_v15  ;;  %v6162_v40 = vcombine.low %v5558_v33, %v5549_v60 }
 0x436   : > { %6814 = vmatpush1.bf16.msra.mxu1 %v10915_v30  ;;  %6940 = vmatprep.subr.bf16.mxu0 %v10935_v32  ;;  %v6093_v12 = vrot.slane %v6065_v31, %v12578_v7  ;;  %v10155_v30 = vcombine.high %v5503_v8, %v5517_v27  ;;  %v12684_v32 = vrot.slane %v5574_v16, %v12578_v7  ;;  %v5278_v31 = vld [vmem:[#allocation3 + $0x88] sm:$0x3]  ;;  %v5281_v8 = vld [vmem:[#allocation3 + $0xa0] sm:$0xff] }
 0x437   : > { %6815 = vmatprep.subr.bf16.mxu1 %v10920_v6  ;;  %6941 = vmatpush1.bf16.msra.mxu0 %v10933_v2  ;;  %v10924_v6 = vld [vmem:[#allocation11 + $0x10] ss:$28 sps:$4 sm:$0xff]   ;;  %v10144_v2 = vpack.c.bf16 %v12647_v10, %v12647_v10  ;;  %v6128_v29 = vrot.slane %v6112_v0, %v12578_v7  ;;  %v6160_v49 = vcombine.low %v5510_v37, %v5542_v15  ;;  %v12717_v27 = vld [vmem:[#allocation3 + $0xa8] sm:$0x3] }
 0x438   : > { %6942 = vmatprep.subr.bf16.mxu0 %v10941_v59  ;;  %v6095_v42 = vcombine.low %v6086_v18, %v6093_v12  ;;  %v6161_v44 = vcombine.low %v5556_v53, %v5557_v3  ;;  %v6163_v51 = vcombine.low %v12681_v14, %v12684_v32  ;;  %v5573_v10 = vrot.slane %v10143_v25, %v12578_v7 }
 0x439   : > { %v5612_v5 = vrot.slane %v10144_v2, %v12578_v7  ;;  %v6143_v58 = vcombine.low %v6121_v21, %v6128_v29  ;;  %v5302_v18 = vpack.c.bf16 %v12701_v55, %v5279_v48  ;;  %v6170_v12 = vrot.slane %v6160_v49, %v12578_v7  ;;  %v5283_v21 = vld [vmem:[#allocation3 + $0xb0] sm:$0xff]  ;;  %v12735_v29 = vld [vmem:[#allocation3 + $0xb8] sm:$0x3] }
 0x43a   : > { %6816 = vmatpush1.bf16.msra.mxu1 %v10918_v41  ;;  %v6109_v20 = vrot.slane %v6095_v42, %v12578_v7  ;;  %v6142_v41 = vrot.slane %v10155_v30, %v12578_v7  ;;  %v6177_v1 = vrot.slane %v6161_v44, %v12578_v7  ;;  %v6184_v23 = vrot.slane %v6162_v40, %v12578_v7  ;;  %v10944_v42 = vld [vmem:[#allocation11 + $0xbc] ss:$28 sps:$4 sm:$0xff]   ;;  %v12748_v40 = vld [vmem:[#allocation3 + $0xc8] sm:$0x3] }
 0x43b   : > { %7055 = vmatprep.subr.bf16.mxu1 %v10926_v36  ;;  %6943 = vmatpush1.bf16.msra.mxu0 %v10939_v22  ;;  %v5277_v36 = vld [vmem:[#allocation3 + $0x80] sm:$0xff]  ;;  %v5588_v39 = vrot.slane %v5573_v10, %v12578_v7  ;;  %v5627_v15 = vrot.slane %v5612_v5, %v12578_v7  ;;  %v6151_v4 = vrot.slane %v6143_v58, %v12578_v7 }
 0x43c   : > { %4528 = vmatmul.mubr.bf16.gmra.mrb[56].mxu0 %v12537_v17  ;;  %10432 = vmatmul.mubr.bf16.gmra.mrb[56].mxu1 %v12567_v43  ;;  %v5605_v17 = vrot.slane %v5300_v62, %v12578_v7  ;;  %v10930_v22 = vld [vmem:[#allocation11 + $0x48] ss:$28 sps:$4 sm:$0xff]   ;;  %v5301_v61 = vpack.c.bf16 %v5278_v31, %v5277_v36  ;;  %v12710_v52 = vcombine.low %v6102_v54, %v6109_v20 }
 0x43d   : > { %4537 = vmatprep.mubr.bf16.mxu0 %v11231_v13  ;;  %6833 = vmatprep.mubr.bf16.mxu1 %v11231_v13  ;;  %v6144_v24 = vcombine.low %v6135_v50, %v6142_v41  ;;  %v6191_v62 = vrot.slane %v6163_v51, %v12578_v7  ;;  %v5683_v35 = vrot.slane %v5302_v18, %v12578_v7 }
 0x43e   : > { %10435 = vmatprep.subr.bf16.mxu0 %v12663_v46  ;;  %v5613_v59 = vcombine.high %v5605_v17, %v5605_v17  ;;  %v5620_v38 = vrot.slane %v5605_v17, %v12578_v7  ;;  %v5644_v53 = vrot.slane %v5301_v61, %v12578_v7  ;;  %v10145_v17 = vpack.c.bf16 %v5278_v31, %v5278_v31 }
 0x43f   : > { %v6158_v0 = vrot.slane %v6144_v24, %v12578_v7  ;;  %v6192_v34 = vcombine.low %v6170_v12, %v6177_v1  ;;  %v5303_v30 = vpack.c.bf16 %v12717_v27, %v5281_v8  ;;  %v6193_v37 = vcombine.low %v6184_v23, %v6191_v62 }
 0x440   : > { %v5634_v9 = vrot.slane %v5613_v59, %v12578_v7  ;;  %v5635_v16 = vcombine.high %v5620_v38, %v5620_v38  ;;  %v10156_v3 = vcombine.high %v12681_v14, %v12684_v32  ;;  %v5652_v25 = vcombine.high %v5644_v53, %v5644_v53 }
 0x441   : > { %v5651_v2 = vrot.slane %v10145_v17, %v12578_v7  ;;  %v5691_v54 = vcombine.high %v5683_v35, %v5683_v35  ;;  %v5698_v20 = vrot.slane %v5683_v35, %v12578_v7  ;;  %v12733_v59 = vcombine.low %v6151_v4, %v6158_v0  ;;  %v5287_v17 = vld [vmem:[#allocation3 + $0xd0] sm:$0xff]  ;;  %v12768_v35 = vld [vmem:[#allocation3 + $0xd8] sm:$0x3] }
 0x442   : > { %v5636_v63 = vcombine.high %v5634_v9, %v5634_v9  ;;  %v6211_v60 = vcombine.low %v5634_v9, %v5635_v16  ;;  %v10146_v14 = vpack.c.bf16 %v12701_v55, %v12701_v55  ;;  %v5722_v32 = vrot.slane %v5303_v30, %v12578_v7  ;;  %v10946_v55 = vld [vmem:[#allocation11 + $0xf0] ss:$28 sps:$4 sm:$0xff]   ;;  %v10956_v16 = vld [vmem:[#allocation11 + $0x164] ss:$28 sps:$4 sm:$0xff]  }
 0x443   : > { %v6200_v50 = vrot.slane %v6192_v34, %v12578_v7  ;;  %v6207_v41 = vrot.slane %v6193_v37, %v12578_v7  ;;  %v6219_v36 = vrot.slane %v10156_v3, %v12578_v7  ;;  %v5659_v51 = vrot.slane %v5644_v53, %v12578_v7  ;;  %v10952_v9 = vld [vmem:[#allocation11 + $0x12c] ss:$28 sps:$4 sm:$0xff]  }
 0x444   : > { %4538 = vmatmul.mubr.bf16.gmra.mrb[60].mxu0 %v12543_v28  ;;  %6834 = vmatmul.mubr.bf16.vlgmr.msra.gmra.mrb[60].mxu1 %v12675_v57  ;;  %v10938_v28 = vld [vmem:[#allocation11 + $0x84] ss:$28 sps:$4 sm:$0xff]   ;;  %v6212_v33 = vcombine.low %v5636_v63, %v5627_v15  ;;  %v6233_v49 = vrot.slane %v6211_v60, %v12578_v7  ;;  %v5673_v48 = vrot.slane %v5652_v25, %v12578_v7 }
 0x445   : > { %7056 = vmatpush1.bf16.msra.mxu1 %v10924_v6  ;;  %4547 = vmatprep.mubr.bf16.mxu0 %v11231_v13  ;;  %v6210_v6 = vcombine.low %v5588_v39, %v5620_v38  ;;  %v5666_v10 = vrot.slane %v5651_v2, %v12578_v7  ;;  %v5712_v5 = vrot.slane %v5691_v54, %v12578_v7  ;;  %v10950_v39 = vld [vmem:[#allocation11 + $0x128] ss:$28 sps:$4 sm:$0xff]  }
 0x446   : > { %6843 = vmatprep.mubr.bf16.mxu1 %v11231_v13  ;;  %7057 = vmatprep.subr.bf16.mxu1 %v10932_v45  ;;  %v10948_v45 = vld [vmem:[#allocation11 + $0xf4] ss:$28 sps:$4 sm:$0xff]   ;;  %v6240_v44 = vrot.slane %v6212_v33, %v12578_v7  ;;  %v5304_v38 = vpack.c.bf16 %v12735_v29, %v5283_v21  ;;  %v5690_v61 = vrot.slane %v10146_v14, %v12578_v7  ;;  %v10954_v33 = vld [vmem:[#allocation11 + $0x160] ss:$28 sps:$4 sm:$0xff]  }
 0x447   : > { %v6226_v31 = vrot.slane %v6210_v6, %v12578_v7  ;;  %v10147_v58 = vpack.c.bf16 %v12717_v27, %v12717_v27  ;;  %v5730_v18 = vcombine.high %v5722_v32, %v5722_v32  ;;  %v12760_v24 = vcombine.low %v6200_v50, %v6207_v41  ;;  %v5289_v14 = vld [vmem:[#allocation3 + $0xe0] sm:$0xff] }
 0x448   : > { %v6242_v23 = vcombine.low %v6233_v49, %v6240_v44  ;;  %v6258_v62 = vcombine.low %v5659_v51, %v5673_v48  ;;  %v6260_v8 = vcombine.low %v5666_v10, %v5698_v20  ;;  %v5714_v15 = vcombine.high %v5712_v5, %v5712_v5  ;;  %v10958_v49 = vld [vmem:[#allocation11 + $0x198] ss:$28 sps:$4 sm:$0xff]  }
 0x449   : > { %7058 = vmatpush1.bf16.msra.mxu1 %v10930_v22  ;;  %v5285_v22 = vld [vmem:[#allocation3 + $0xc0] sm:$0xff]  ;;  %v6241_v1 = vcombine.low %v6219_v36, %v6226_v31  ;;  %v5761_v27 = vrot.slane %v5304_v38, %v12578_v7  ;;  %v5705_v63 = vrot.slane %v5690_v61, %v12578_v7  ;;  %v5729_v53 = vrot.slane %v10147_v58, %v12578_v7 }
 0x44a   : > { %7059 = vmatprep.subr.bf16.mxu1 %v10938_v28  ;;  %v5713_v28 = vcombine.high %v5698_v20, %v5698_v20  ;;  %v5305_v12 = vpack.c.bf16 %v12748_v40, %v5285_v22  ;;  %v5737_v4 = vrot.slane %v5722_v32, %v12578_v7  ;;  %v10148_v0 = vpack.c.bf16 %v12735_v29, %v12735_v29  ;;  %v10960_v20 = vld [vmem:[#allocation11 + $0x19c] ss:$28 sps:$4 sm:$0xff]   ;;  %v12784_v32 = vld [vmem:[#allocation3 + $0xe8] sm:$0x3] }
 0x44b   : > { %v5769_v34 = vcombine.high %v5761_v27, %v5761_v27  ;;  %v6249_v37 = vrot.slane %v6241_v1, %v12578_v7  ;;  %v6256_v3 = vrot.slane %v6242_v23, %v12578_v7  ;;  %v6268_v6 = vrot.slane %v6258_v62, %v12578_v7 }
 0x44c   : > { %4548 = vmatmul.mubr.bf16.gmra.mrb[64].mxu0 %v12549_v19  ;;  %6844 = vmatmul.mubr.bf16.gmra.mrb[64].mxu1 %v12710_v52  ;;  %v10942_v19 = vld [vmem:[#allocation11 + $0xb8] ss:$28 sps:$4 sm:$0xff]   ;;  %v5800_v30 = vrot.slane %v5305_v12, %v12578_v7  ;;  %v5776_v2 = vrot.slane %v5761_v27, %v12578_v7  ;;  %v5306_v54 = vpack.c.bf16 %v12768_v35, %v5287_v17 }
 0x44d   : > { %4557 = vmatprep.mubr.bf16.mxu0 %v11231_v13  ;;  %6853 = vmatprep.mubr.bf16.mxu1 %v11231_v13  ;;  %v6307_v21 = vcombine.low %v5714_v15, %v5705_v63  ;;  %v5768_v50 = vrot.slane %v10148_v0, %v12578_v7  ;;  %v5790_v41 = vrot.slane %v5769_v34, %v12578_v7  ;;  %v5292_v12 = vld [vmem:[#allocation3 + $0xf8] sm:$0x3] }
 0x44e   : > { %7060 = vmatpush1.bf16.msra.mxu1 %v10936_v47  ;;  %v6261_v47 = vcombine.low %v5712_v5, %v5713_v28  ;;  %v5808_v36 = vcombine.high %v5800_v30, %v5800_v30  ;;  %v12790_v31 = vcombine.low %v6249_v37, %v6256_v3  ;;  %v5791_v28 = vcombine.high %v5776_v2, %v5776_v2 }
 0x44f   : > { %7061 = vmatprep.subr.bf16.mxu1 %v10944_v42  ;;  %v5751_v42 = vrot.slane %v5730_v18, %v12578_v7  ;;  %v6317_v10 = vrot.slane %v6307_v21, %v12578_v7  ;;  %v5783_v38 = vrot.slane %v5768_v50, %v12578_v7  ;;  %v5815_v61 = vrot.slane %v5800_v30, %v12578_v7  ;;  %v5291_v18 = vld [vmem:[#allocation3 + $0xf0] sm:$0xff] }
 0x450   : > { %v6289_v25 = vrot.slane %v6261_v47, %v12578_v7  ;;  %v5829_v58 = vrot.slane %v5808_v36, %v12578_v7  ;;  %v10149_v23 = vpack.c.bf16 %v12748_v40, %v12748_v40  ;;  %v10150_v62 = vpack.c.bf16 %v12768_v35, %v12768_v35 }
 0x451   : > { %v6308_v29 = vcombine.low %v5737_v4, %v5751_v42  ;;  %v6356_v40 = vcombine.low %v5790_v41, %v5791_v28 }
 0x452   : > { %7062 = vmatpush1.bf16.msra.mxu1 %v10942_v19  ;;  %v6282_v19 = vrot.slane %v6260_v8, %v12578_v7  ;;  %v5846_v17 = vrot.slane %v10150_v62, %v12578_v7 }
 0x453   : > { %7063 = vmatprep.subr.bf16.mxu1 %v10948_v45  ;;  %v5744_v45 = vrot.slane %v5729_v53, %v12578_v7  ;;  %v6324_v5 = vrot.slane %v6308_v29, %v12578_v7  ;;  %v6358_v53 = vcombine.low %v5815_v61, %v5829_v58 }
 0x454   : > { %4558 = vmatmul.mubr.bf16.gmra.mrb[68].mxu0 %v12555_v26  ;;  %6854 = vmatmul.mubr.bf16.gmra.mrb[68].mxu1 %v12733_v59  ;;  %v10157_v26 = vcombine.high %v5659_v51, %v5673_v48  ;;  %v6291_v44 = vcombine.low %v6282_v19, %v6289_v25  ;;  %v10158_v51 = vcombine.high %v5737_v4, %v5751_v42  ;;  %v10949_v19 = vld [vmem:[#allocation11 + $0x50] ss:$28 sps:$4 sm:$0xff]  }
 0x455   : > { %4567 = vmatprep.mubr.bf16.mxu0 %v11231_v13  ;;  %6863 = vmatprep.mubr.bf16.mxu1 %v11231_v13  ;;  %v5307_v48 = vpack.c.bf16 %v12784_v32, %v5289_v14  ;;  %v6310_v22 = vcombine.low %v5744_v45, %v5776_v2  ;;  %v6339_v27 = vcombine.low %v6317_v10, %v6324_v5 }
 0x456   : > { %7064 = vmatpush1.bf16.msra.mxu1 %v10946_v55  ;;  %v6275_v60 = vrot.slane %v10157_v26, %v12578_v7  ;;  %v5839_v55 = vrot.slane %v5306_v54, %v12578_v7  ;;  %v6305_v26 = vrot.slane %v6291_v44, %v12578_v7  ;;  %v10159_v4 = vcombine.high %v5815_v61, %v5829_v58  ;;  %v10953_v44 = vld [vmem:[#allocation11 + $0x88] ss:$28 sps:$4 sm:$0xff]  }
 0x457   : > { %7065 = vmatprep.subr.bf16.mxu1 %v10952_v9  ;;  %v5792_v9 = vcombine.high %v5790_v41, %v5790_v41  ;;  %v5878_v47 = vrot.slane %v5307_v48, %v12578_v7  ;;  %v6338_v15 = vrot.slane %v6310_v22, %v12578_v7  ;;  %v5807_v42 = vrot.slane %v10149_v23, %v12578_v7 }
 0x458   : > { %v5847_v8 = vcombine.high %v5839_v55, %v5839_v55  ;;  %v6347_v3 = vrot.slane %v6339_v27, %v12578_v7  ;;  %v6387_v25 = vrot.slane %v10159_v4, %v12578_v7  ;;  %v5861_v54 = vrot.slane %v5846_v17, %v12578_v7  ;;  %v10961_v27 = vld [vmem:[#allocation11 + $0xf8] ss:$28 sps:$4 sm:$0xff]  }
 0x459   : > { %v6357_v63 = vcombine.low %v5792_v9, %v5783_v38  ;;  %v5886_v0 = vcombine.high %v5878_v47, %v5878_v47  ;;  %v5822_v2 = vrot.slane %v5807_v42, %v12578_v7  ;;  %v5893_v21 = vrot.slane %v5878_v47, %v12578_v7 }
 0x45a   : > { %7066 = vmatpush1.bf16.msra.mxu1 %v10950_v39  ;;  %v6331_v39 = vrot.slane %v10158_v51, %v12578_v7  ;;  %v5868_v35 = vrot.slane %v5847_v8, %v12578_v7  ;;  %v10151_v14 = vpack.c.bf16 %v12784_v32, %v12784_v32  ;;  %v10152_v41 = vpack.c.bf16 %v5292_v12, %v5292_v12 }
 0x45b   : > { %7067 = vmatprep.subr.bf16.mxu1 %v10956_v16  ;;  %v5308_v16 = vpack.c.bf16 %v5292_v12, %v5291_v18  ;;  %v5907_v29 = vrot.slane %v5886_v0, %v12578_v7 }
 0x45c   : > { %4568 = vmatmul.mubr.bf16.gmra.mrb[72].mxu0 %v12561_v56  ;;  %6864 = vmatmul.mubr.bf16.gmra.mrb[72].mxu1 %v12760_v24  ;;  %v6290_v56 = vcombine.low %v6268_v6, %v6275_v60  ;;  %v6340_v30 = vcombine.low %v6331_v39, %v6338_v15  ;;  %v6366_v6 = vrot.slane %v6356_v40, %v12578_v7 }
 0x45d   : > { %4577 = vmatprep.mubr.bf16.mxu0 %v11231_v13  ;;  %6873 = vmatprep.mubr.bf16.mxu1 %v11231_v13  ;;  %v5917_v37 = vrot.slane %v5308_v16, %v12578_v7  ;;  %v6373_v60 = vrot.slane %v6357_v63, %v12578_v7  ;;  %v5870_v45 = vcombine.high %v5868_v35, %v5868_v35 }
 0x45e   : > { %7068 = vmatpush1.bf16.msra.mxu1 %v10954_v33  ;;  %v6298_v1 = vrot.slane %v6290_v56, %v12578_v7  ;;  %v6380_v33 = vrot.slane %v6358_v53, %v12578_v7  ;;  %v6354_v50 = vrot.slane %v6340_v30, %v12578_v7  ;;  %v5885_v22 = vrot.slane %v10151_v14, %v12578_v7 }
 0x45f   : > { %7069 = vmatprep.subr.bf16.mxu1 %v10960_v20  ;;  %v5925_v36 = vcombine.high %v5917_v37, %v5917_v37  ;;  %v6388_v56 = vcombine.low %v6366_v6, %v6373_v60  ;;  %v6407_v48 = vcombine.low %v5870_v45, %v5861_v54  ;;  %v5924_v5 = vrot.slane %v10152_v41, %v12578_v7 }
 0x460   : > { %v12816_v34 = vcombine.low %v6298_v1, %v6305_v26  ;;  %v12837_v10 = vcombine.low %v6347_v3, %v6354_v50  ;;  %v10957_v1 = vld [vmem:[#allocation11 + $0xc0] ss:$28 sps:$4 sm:$0xff]   ;;  %v5900_v23 = vrot.slane %v5885_v22, %v12578_v7  ;;  %v10160_v15 = vcombine.high %v5893_v21, %v5907_v29 }
 0x461   : > { %v5946_v28 = vrot.slane %v5925_v36, %v12578_v7  ;;  %v6396_v38 = vrot.slane %v6388_v56, %v12578_v7  ;;  %v6429_v18 = vrot.slane %v6407_v48, %v12578_v7  ;;  %v5939_v62 = vrot.slane %v5924_v5, %v12578_v7 }
 0x462   : > { %7070 = vmatpush1.bf16.msra.mxu1 %v10958_v49  ;;  %v6389_v49 = vcombine.low %v6380_v33, %v6387_v25  ;;  %v6464_v17 = vrot.slane %v10160_v15, %v12578_v7  ;;  %v10964_v33 = vld [vmem:[#allocation11 + $0x1a0] ss:$28 sps:$4 sm:$0xff]  }
 0x463   : > { %v5948_v39 = vcombine.high %v5946_v28, %v5946_v28 }
 0x464   : > { %4578 = vmatmul.mubr.bf16.gmra.mrb[76].mxu0 %v12567_v43  ;;  %6874 = vmatmul.mubr.bf16.gmra.mrb[76].mxu1 %v12790_v31  ;;  %v5854_v43 = vrot.slane %v5839_v55, %v12578_v7  ;;  %v6408_v55 = vcombine.low %v5893_v21, %v5907_v29  ;;  %v6403_v9 = vrot.slane %v6389_v49, %v12578_v7 }
 0x465   : > { %6883 = vmatprep.mubr.bf16.mxu1 %v11231_v13  ;;  %6960 = vmatprep.mubr.bf16.mxu0 %v11231_v13  ;;  %v6457_v53 = vcombine.low %v5948_v39, %v5939_v62 }
 0x466   : > { %v5869_v20 = vcombine.high %v5854_v43, %v5854_v43  ;;  %v6405_v51 = vcombine.low %v5822_v2, %v5854_v43  ;;  %v6436_v12 = vrot.slane %v6408_v55, %v12578_v7  ;;  %v12854_v16 = vcombine.low %v6396_v38, %v6403_v9  ;;  %v10962_v43 = vld [vmem:[#allocation11 + $0x130] ss:$28 sps:$4 sm:$0xff]  }
 0x467   : > { %v6485_v30 = vrot.slane %v6457_v53, %v12578_v7 }
 0x468   : > { %v6406_v32 = vcombine.low %v5868_v35, %v5869_v20  ;;  %v6415_v61 = vrot.slane %v6405_v51, %v12578_v7  ;;  %v6438_v47 = vcombine.low %v6429_v18, %v6436_v12 }
 0x46a   : > { %v6422_v58 = vrot.slane %v6406_v32, %v12578_v7  ;;  %v6452_v42 = vrot.slane %v6438_v47, %v12578_v7 }
 0x46c   : > { %6884 = vmatmul.mubr.bf16.gmra.mrb[80].mxu1 %v12816_v34  ;;  %6961 = vmatmul.mubr.bf16.vlgmr.msra.gmra.mrb[80].mxu0 %v12675_v57  ;;  %v6437_v8 = vcombine.low %v6415_v61, %v6422_v58 }
 0x46d   : > { %10436 = vmatpush3.bf16.msra.mxu0 %v12663_v46  ;;  %6893 = vmatprep.mubr.bf16.mxu1 %v11231_v13  ;;  %v5932_v46 = vrot.slane %v5917_v37, %v12578_v7  ;;  %v10963_v37 = vld [vmem:[#allocation11 + $0x168] ss:$28 sps:$4 sm:$0xff]  }
 0x46e   : > { %6970 = vmatprep.mubr.bf16.mxu0 %v11231_v13  ;;  %10437 = vmatprep.subr.bf16.mxu0 %v10949_v19  ;;  %v6445_v4 = vrot.slane %v6437_v8, %v12578_v7 }
 0x46f   : > { %v5947_v26 = vcombine.high %v5932_v46, %v5932_v46  ;;  %v6455_v40 = vcombine.low %v5900_v23, %v5932_v46 }
 0x470   : > { %v12866_v3 = vcombine.low %v6445_v4, %v6452_v42 }
 0x471   : > { %10438 = vmatpush3.bf16.msra.mxu0 %v10949_v19  ;;  %v6456_v63 = vcombine.low %v5946_v28, %v5947_v26  ;;  %v6471_v35 = vrot.slane %v6455_v40, %v12578_v7 }
 0x472   : > { %10439 = vmatprep.subr.bf16.mxu0 %v10953_v44 }
 0x473   : > { %v6478_v0 = vrot.slane %v6456_v63, %v12578_v7  ;;  %v6486_v6 = vcombine.low %v6464_v17, %v6471_v35 }
 0x474   : > { %6894 = vmatmul.mubr.bf16.gmra.mrb[84].mxu1 %v12837_v10  ;;  %6971 = vmatmul.mubr.bf16.gmra.mrb[84].mxu0 %v12710_v52 }
 0x475   : > { %6903 = vmatprep.mubr.bf16.mxu1 %v11231_v13  ;;  %6980 = vmatprep.mubr.bf16.mxu0 %v11231_v13  ;;  %v6487_v60 = vcombine.low %v6478_v0, %v6485_v30  ;;  %v6494_v19 = vrot.slane %v6486_v6, %v12578_v7 }
 0x476   : > { %10440 = vmatpush3.bf16.msra.mxu0 %v10953_v44 }
 0x477   : > { %10441 = vmatprep.subr.bf16.mxu0 %v10957_v1  ;;  %v6501_v25 = vrot.slane %v6487_v60, %v12578_v7 }
 0x479   : > { %v12874_v2 = vcombine.low %v6494_v19, %v6501_v25 }
 0x47a   : > { %10442 = vmatpush3.bf16.msra.mxu0 %v10957_v1 }
 0x47b   : > { %10443 = vmatprep.subr.bf16.mxu0 %v10961_v27 }
 0x47c   : > { %6904 = vmatmul.mubr.bf16.gmra.mrb[88].mxu1 %v12854_v16  ;;  %6981 = vmatmul.mubr.bf16.gmra.mrb[88].mxu0 %v12733_v59 }
 0x47d   : > { %6913 = vmatprep.mubr.bf16.mxu1 %v11231_v13  ;;  %6990 = vmatprep.mubr.bf16.mxu0 %v11231_v13 }
 0x47e   : > { %10444 = vmatpush3.bf16.msra.mxu0 %v10961_v27 }
 0x47f   : > { %10445 = vmatprep.subr.bf16.mxu0 %v10962_v43 }
 0x482   : > { %10446 = vmatpush3.bf16.msra.mxu0 %v10962_v43 }
 0x483   : > { %10447 = vmatprep.subr.bf16.mxu0 %v10963_v37 }
 0x484   : > { %6914 = vmatmul.mubr.bf16.gmra.mrb[92].mxu1 %v12866_v3  ;;  %6991 = vmatmul.mubr.bf16.gmra.mrb[92].mxu0 %v12760_v24 }
 0x485   : > { %6921 = vmatprep.mubr.bf16.mxu1 %v11231_v13  ;;  %7000 = vmatprep.mubr.bf16.mxu0 %v11231_v13 }
 0x486   : > { %10448 = vmatpush3.bf16.msra.mxu0 %v10963_v37 }
 0x487   : > { %10449 = vmatprep.subr.bf16.mxu0 %v10964_v33 }
 0x48a   : > { %10450 = vmatpush3.bf16.msra.mxu0 %v10964_v33 }
 0x48c   : > { %6922 = vmatmul.mubr.bf16.gmra.mrb[96].mxu1 %v12874_v2  ;;  %7001 = vmatmul.mubr.bf16.gmra.mrb[96].mxu0 %v12790_v31 }
 0x48d   : > { %7010 = vmatprep.mubr.bf16.mxu0 %v11231_v13  ;;  %7087 = vmatprep.mubr.bf16.mxu1 %v11231_v13 }
 0x494   : > { %7011 = vmatmul.mubr.bf16.gmra.mrb[100].mxu0 %v12816_v34  ;;  %7088 = vmatmul.mubr.bf16.vlgmr.msra.gmra.mrb[100].mxu1 %v12675_v57 }
 0x495   : > { %7020 = vmatprep.mubr.bf16.mxu0 %v11231_v13  ;;  %7093 = vmatprep.mubr.bf16.mxu1 %v11231_v13 }
 0x49c   : > { %7021 = vmatmul.mubr.bf16.gmra.mrb[104].mxu0 %v12837_v10  ;;  %7094 = vmatmul.mubr.bf16.gmra.mrb[104].mxu1 %v12710_v52 }
 0x49d   : > { %7030 = vmatprep.mubr.bf16.mxu0 %v11231_v13  ;;  %7099 = vmatprep.mubr.bf16.mxu1 %v11231_v13 }
 0x49f   : > { %v4223_v7 = vpop.f32.mrb[0].mxu0  ;;  %v4356_v54 = vpop.f32.mrb[0].mxu1 }
 0x4a0   : > { %v4811_v20 = vrot.slane %v4356_v54, 2  ;;  %v4225_v45 = vpop.f32.mrb[1].mxu0  ;;  %v4358_v21 = vpop.f32.mrb[1].mxu1 }
 0x4a1   : > { %v4901_v29 = vrot.slane %v4358_v21, 3  ;;  %v4227_v14 = vpop.f32.mrb[2].mxu0  ;;  %v4360_v50 = vpop.f32.mrb[2].mxu1  ;;  %v4721_v49 = vrot.slane %v4225_v45, 1 }
 0x4a2   : > { %v4812_v41 = vrot.slane %v4360_v50, 2  ;;  %v4229_v36 = vpop.f32.mrb[3].mxu0  ;;  %v4362_v56 = vpop.f32.mrb[3].mxu1 }
 0x4a3   : > { %v4722_v44 = vrot.slane %v4229_v36, 1  ;;  %v4902_v51 = vrot.slane %v4362_v56, 3 }
 0x4a4   : > { %v4813_v32 = vsel %vm3014_vm1, %v4811_v20, %v4812_v41  ;;  %7031 = vmatmul.mubr.bf16.gmra.mrb[108].mxu0 %v12854_v16  ;;  %7100 = vmatmul.mubr.bf16.gmra.mrb[108].mxu1 %v12733_v59 }
 0x4a5   : > { %v4723_v48 = vsel %vm2869_vm0, %v4721_v49, %v4722_v44  ;;  %v4772_v55 = vadd.f32 %v4722_v44, %v4227_v14  ;;  %v4903_v22 = vsel %vm3159_vm2, %v4901_v29, %v4902_v51  ;;  %7040 = vmatprep.mubr.bf16.mxu0 %v11231_v13  ;;  %7107 = vmatprep.mubr.bf16.mxu1 %v11231_v13 }
 0x4a6   : > { %v4771_v5 = vadd.f32 %v4723_v48, %v4223_v7 }
 0x4a7   : > { %v4862_v46 = vadd.f32 %v4812_v41, %v4772_v55  ;;  %v4233_v28 = vpop.f32.mrb[4].mxu0  ;;  %v4366_v38 = vpop.f32.mrb[4].mxu1 }
 0x4a8   : > { %v4861_v9 = vadd.f32 %v4813_v32, %v4771_v5  ;;  %v4814_v61 = vrot.slane %v4366_v38, 2  ;;  %v4235_v58 = vpop.f32.mrb[5].mxu0  ;;  %v4368_v18 = vpop.f32.mrb[5].mxu1 }
 0x4a9   : > { %v12895_v12 = vadd.f32 %v4902_v51, %v4862_v46  ;;  %v4904_v1 = vrot.slane %v4368_v18, 3  ;;  %v4237_v23 = vpop.f32.mrb[6].mxu0  ;;  %v4370_v62 = vpop.f32.mrb[6].mxu1  ;;  %v4724_v15 = vrot.slane %v4235_v58, 1 }
 0x4aa   : > { %v12897_v26 = vadd.f32 %v4903_v22, %v4861_v9  ;;  %v4815_v39 = vrot.slane %v4370_v62, 2  ;;  %v4239_v8 = vpop.f32.mrb[7].mxu0  ;;  %v4372_v47 = vpop.f32.mrb[7].mxu1 }
 0x4ab   : > { %v4725_v27 = vrot.slane %v4239_v8, 1  ;;  %v4905_v40 = vrot.slane %v4372_v47, 3 }
 0x4ac   : > { %v4816_v63 = vsel %vm3014_vm1, %v4814_v61, %v4815_v39  ;;  %7041 = vmatmul.mubr.bf16.gmra.mrb[112].mxu0 %v12866_v3  ;;  %7108 = vmatmul.mubr.bf16.gmra.mrb[112].mxu1 %v12760_v24 }
 0x4ad   : > { %v4726_v53 = vsel %vm2869_vm0, %v4724_v15, %v4725_v27  ;;  %v4774_v4 = vadd.f32 %v4725_v27, %v4237_v23  ;;  %v4906_v42 = vsel %vm3159_vm2, %v4904_v1, %v4905_v40  ;;  %7048 = vmatprep.mubr.bf16.mxu0 %v11231_v13  ;;  %7117 = vmatprep.mubr.bf16.mxu1 %v11231_v13 }
 0x4ae   : > { %v4773_v17 = vadd.f32 %v4726_v53, %v4233_v28 }
 0x4af   : > { %v4864_v43 = vadd.f32 %v4815_v39, %v4774_v4  ;;  %v4243_v35 = vpop.f32.mrb[8].mxu0  ;;  %v4376_v0 = vpop.f32.mrb[8].mxu1 }
 0x4b0   : > { %v4863_v30 = vadd.f32 %v4816_v63, %v4773_v17  ;;  %v4817_v37 = vrot.slane %v4376_v0, 2  ;;  %v4245_v6 = vpop.f32.mrb[9].mxu0  ;;  %v4378_v60 = vpop.f32.mrb[9].mxu1 }
 0x4b1   : > { %v12906_v33 = vadd.f32 %v4905_v40, %v4864_v43  ;;  %v4907_v19 = vrot.slane %v4378_v60, 3  ;;  %v4247_v25 = vpop.f32.mrb[10].mxu0  ;;  %v4380_v7 = vpop.f32.mrb[10].mxu1  ;;  %v4727_v29 = vrot.slane %v4245_v6, 1 }
 0x4b2   : > { %v12908_v54 = vadd.f32 %v4906_v42, %v4863_v30  ;;  %v4818_v20 = vrot.slane %v4380_v7, 2  ;;  %v4249_v45 = vpop.f32.mrb[11].mxu0  ;;  %v4382_v21 = vpop.f32.mrb[11].mxu1 }
 0x4b3   : > { %v4728_v14 = vrot.slane %v4249_v45, 1  ;;  %v4908_v50 = vrot.slane %v4382_v21, 3 }
 0x4b4   : > { %v4819_v41 = vsel %vm3014_vm1, %v4817_v37, %v4818_v20  ;;  %7049 = vmatmul.mubr.bf16.gmra.mrb[116].mxu0 %v12874_v2  ;;  %7118 = vmatmul.mubr.bf16.gmra.mrb[116].mxu1 %v12790_v31 }
 0x4b5   : > { %v4729_v36 = vsel %vm2869_vm0, %v4727_v29, %v4728_v14  ;;  %v4776_v56 = vadd.f32 %v4728_v14, %v4247_v25  ;;  %v4909_v49 = vsel %vm3159_vm2, %v4907_v19, %v4908_v50  ;;  %7127 = vmatprep.mubr.bf16.mxu1 %v11231_v13  ;;  %10451 = vmatprep.mubr.bf16.mxu0 %v12675_v57 }
 0x4b6   : > { %v4775_v44 = vadd.f32 %v4729_v36, %v4243_v35 }
 0x4b7   : > { %v4866_v51 = vadd.f32 %v4818_v20, %v4776_v56  ;;  %v4253_v32 = vpop.f32.mrb[12].mxu0  ;;  %v4386_v48 = vpop.f32.mrb[12].mxu1 }
 0x4b8   : > { %v4865_v55 = vadd.f32 %v4819_v41, %v4775_v44  ;;  %v4820_v22 = vrot.slane %v4386_v48, 2  ;;  %v4255_v5 = vpop.f32.mrb[13].mxu0  ;;  %v4388_v46 = vpop.f32.mrb[13].mxu1 }
 0x4b9   : > { %v12917_v28 = vadd.f32 %v4908_v50, %v4866_v51  ;;  %v4910_v38 = vrot.slane %v4388_v46, 3  ;;  %v4257_v9 = vpop.f32.mrb[14].mxu0  ;;  %v4390_v61 = vpop.f32.mrb[14].mxu1  ;;  %v4730_v62 = vrot.slane %v4255_v5, 1 }
 0x4ba   : > { %v12919_v58 = vadd.f32 %v4909_v49, %v4865_v55  ;;  %v4821_v18 = vrot.slane %v4390_v61, 2  ;;  %v4259_v1 = vpop.f32.mrb[15].mxu0  ;;  %v4392_v23 = vpop.f32.mrb[15].mxu1 }
 0x4bb   : > { %v4731_v57 = vrot.slane %v4259_v1, 1  ;;  %v4911_v39 = vrot.slane %v4392_v23, 3 }
 0x4bc   : > { %v4822_v8 = vsel %vm3014_vm1, %v4820_v22, %v4821_v18  ;;  %7128 = vmatmul.mubr.bf16.gmra.mrb[120].mxu1 %v12816_v34  ;;  %10452 = vmatmul.mubr.bf16.vlgmr.msra.gmra.mrb[120].mxu0 %v12710_v52 }
 0x4bd   : > { %v4732_v47 = vsel %vm2869_vm0, %v4730_v62, %v4731_v57  ;;  %v4778_v15 = vadd.f32 %v4731_v57, %v4257_v9  ;;  %v4912_v27 = vsel %vm3159_vm2, %v4910_v38, %v4911_v39  ;;  %7137 = vmatprep.mubr.bf16.mxu1 %v11231_v13  ;;  %10455 = vmatprep.mubr.bf16.mxu0 %v12733_v59 }
 0x4be   : > { %v4777_v40 = vadd.f32 %v4732_v47, %v4253_v32 }
 0x4bf   : > { %v4868_v63 = vadd.f32 %v4821_v18, %v4778_v15  ;;  %v4263_v53 = vpop.f32.mrb[16].mxu0  ;;  %v4396_v4 = vpop.f32.mrb[16].mxu1 }
 0x4c0   : > { %v4867_v42 = vadd.f32 %v4822_v8, %v4777_v40  ;;  %v4823_v17 = vrot.slane %v4396_v4, 2  ;;  %v4265_v43 = vpop.f32.mrb[17].mxu0  ;;  %v4398_v35 = vpop.f32.mrb[17].mxu1 }
 0x4c1   : > { %v12928_v0 = vadd.f32 %v4911_v39, %v4868_v63  ;;  %v4913_v52 = vrot.slane %v4398_v35, 3  ;;  %v4267_v30 = vpop.f32.mrb[18].mxu0  ;;  %v4400_v37 = vpop.f32.mrb[18].mxu1  ;;  %v4733_v7 = vrot.slane %v4265_v43, 1 }
 0x4c2   : > { %v12930_v6 = vadd.f32 %v4912_v27, %v4867_v42  ;;  %v4824_v60 = vrot.slane %v4400_v37, 2  ;;  %v4269_v19 = vpop.f32.mrb[19].mxu0  ;;  %v4402_v25 = vpop.f32.mrb[19].mxu1 }
 0x4c3   : > { %v4734_v59 = vrot.slane %v4269_v19, 1  ;;  %v4914_v20 = vrot.slane %v4402_v25, 3 }
 0x4c4   : > { %v4825_v45 = vsel %vm3014_vm1, %v4823_v17, %v4824_v60  ;;  %7138 = vmatmul.mubr.bf16.gmra.mrb[124].mxu1 %v12837_v10  ;;  %10456 = vmatmul.mubr.bf16.gmra.mrb[124].mxu0 %v12760_v24 }
 0x4c5   : > { %v4735_v21 = vsel %vm2869_vm0, %v4733_v7, %v4734_v59  ;;  %v4780_v29 = vadd.f32 %v4734_v59, %v4267_v30  ;;  %v4915_v14 = vsel %vm3159_vm2, %v4913_v52, %v4914_v20  ;;  %7147 = vmatprep.mubr.bf16.mxu1 %v11231_v13  ;;  %10459 = vmatprep.mubr.bf16.mxu0 %v12790_v31 }
 0x4c6   : > { %v4779_v50 = vadd.f32 %v4735_v21, %v4263_v53 }
 0x4c7   : > { %v4870_v41 = vadd.f32 %v4824_v60, %v4780_v29  ;;  %v4273_v36 = vpop.f32.mrb[20].mxu0  ;;  %v4406_v56 = vpop.f32.mrb[20].mxu1 }
 0x4c8   : > { %v4869_v49 = vadd.f32 %v4825_v45, %v4779_v50  ;;  %v4826_v44 = vrot.slane %v4406_v56, 2  ;;  %v4275_v51 = vpop.f32.mrb[21].mxu0  ;;  %v4408_v32 = vpop.f32.mrb[21].mxu1 }
 0x4c9   : > { %v12939_v48 = vadd.f32 %v4914_v20, %v4870_v41  ;;  %v4916_v24 = vrot.slane %v4408_v32, 3  ;;  %v4277_v55 = vpop.f32.mrb[22].mxu0  ;;  %v4410_v22 = vpop.f32.mrb[22].mxu1  ;;  %v4736_v61 = vrot.slane %v4275_v51, 1 }
 0x4ca   : > { %v12941_v5 = vadd.f32 %v4915_v14, %v4869_v49  ;;  %v4827_v46 = vrot.slane %v4410_v22, 2  ;;  %v4279_v38 = vpop.f32.mrb[23].mxu0  ;;  %v4412_v9 = vpop.f32.mrb[23].mxu1 }
 0x4cb   : > { %v4737_v31 = vrot.slane %v4279_v38, 1  ;;  %v4917_v18 = vrot.slane %v4412_v9, 3 }
 0x4cc   : > { %v4828_v1 = vsel %vm3014_vm1, %v4826_v44, %v4827_v46  ;;  %7148 = vmatmul.mubr.bf16.gmra.mrb[128].mxu1 %v12854_v16  ;;  %10460 = vmatmul.mubr.bf16.gmra.mrb[128].mxu0 %v12816_v34 }
 0x4cd   : > { %v4738_v23 = vsel %vm2869_vm0, %v4736_v61, %v4737_v31  ;;  %v4782_v62 = vadd.f32 %v4737_v31, %v4277_v55  ;;  %v4918_v57 = vsel %vm3159_vm2, %v4916_v24, %v4917_v18  ;;  %7157 = vmatprep.mubr.bf16.mxu1 %v11231_v13  ;;  %10463 = vmatprep.mubr.bf16.mxu0 %v12837_v10 }
 0x4ce   : > { %v4781_v39 = vadd.f32 %v4738_v23, %v4273_v36 }
 0x4cf   : > { %v4872_v8 = vadd.f32 %v4827_v46, %v4782_v62  ;;  %v4283_v47 = vpop.f32.mrb[24].mxu0  ;;  %v4416_v15 = vpop.f32.mrb[24].mxu1 }
 0x4d0   : > { %v4871_v27 = vadd.f32 %v4828_v1, %v4781_v39  ;;  %v4829_v40 = vrot.slane %v4416_v15, 2  ;;  %v4285_v63 = vpop.f32.mrb[25].mxu0  ;;  %v4418_v53 = vpop.f32.mrb[25].mxu1 }
 0x4d1   : > { %v12950_v4 = vadd.f32 %v4917_v18, %v4872_v8  ;;  %v4919_v34 = vrot.slane %v4418_v53, 3  ;;  %v4287_v42 = vpop.f32.mrb[26].mxu0  ;;  %v4420_v17 = vpop.f32.mrb[26].mxu1  ;;  %v4739_v37 = vrot.slane %v4285_v63, 1 }
 0x4d2   : > { %v12952_v43 = vadd.f32 %v4918_v57, %v4871_v27  ;;  %v4830_v35 = vrot.slane %v4420_v17, 2  ;;  %v4289_v52 = vpop.f32.mrb[27].mxu0  ;;  %v4422_v30 = vpop.f32.mrb[27].mxu1 }
 0x4d3   : > { %v4740_v10 = vrot.slane %v4289_v52, 1  ;;  %v4920_v60 = vrot.slane %v4422_v30, 3 }
 0x4d4   : > { %v4831_v19 = vsel %vm3014_vm1, %v4829_v40, %v4830_v35  ;;  %7158 = vmatmul.mubr.bf16.gmra.mrb[132].mxu1 %v12866_v3  ;;  %10464 = vmatmul.mubr.bf16.gmra.mrb[132].mxu0 %v12854_v16 }
 0x4d5   : > { %v4741_v25 = vsel %vm2869_vm0, %v4739_v37, %v4740_v10  ;;  %v4784_v7 = vadd.f32 %v4740_v10, %v4287_v42  ;;  %v4921_v59 = vsel %vm3159_vm2, %v4919_v34, %v4920_v60  ;;  %7167 = vmatprep.mubr.bf16.mxu1 %v11231_v13  ;;  %10467 = vmatprep.mubr.bf16.mxu0 %v12866_v3 }
 0x4d6   : > { %v4783_v20 = vadd.f32 %v4741_v25, %v4283_v47 }
 0x4d7   : > { %v4874_v45 = vadd.f32 %v4830_v35, %v4784_v7  ;;  %v4293_v21 = vpop.f32.mrb[28].mxu0  ;;  %v4426_v29 = vpop.f32.mrb[28].mxu1 }
 0x4d8   : > { %v4873_v14 = vadd.f32 %v4831_v19, %v4783_v20  ;;  %v4832_v50 = vrot.slane %v4426_v29, 2  ;;  %v4295_v41 = vpop.f32.mrb[29].mxu0  ;;  %v4428_v36 = vpop.f32.mrb[29].mxu1 }
 0x4d9   : > { %v12961_v56 = vadd.f32 %v4920_v60, %v4874_v45  ;;  %v4922_v16 = vrot.slane %v4428_v36, 3  ;;  %v4297_v49 = vpop.f32.mrb[30].mxu0  ;;  %v4430_v44 = vpop.f32.mrb[30].mxu1  ;;  %v4742_v55 = vrot.slane %v4295_v41, 1 }
 0x4da   : > { %v12963_v51 = vadd.f32 %v4921_v59, %v4873_v14  ;;  %v4833_v32 = vrot.slane %v4430_v44, 2  ;;  %v4299_v24 = vpop.f32.mrb[31].mxu0  ;;  %v4432_v13 = vpop.f32.mrb[31].mxu1 }
 0x4db   : > { %v4743_v3 = vrot.slane %v4299_v24, 1  ;;  %v4923_v22 = vrot.slane %v4432_v13, 3 }
 0x4dc   : > { %v4834_v46 = vsel %vm3014_vm1, %v4832_v50, %v4833_v32  ;;  %7168 = vmatmul.mubr.bf16.gmra.mrb[136].mxu1 %v12874_v2  ;;  %10468 = vmatmul.mubr.bf16.gmra.mrb[136].mxu0 %v12874_v2 }
 0x4dd   : > { %v4744_v38 = vsel %vm2869_vm0, %v4742_v55, %v4743_v3  ;;  %v4786_v9 = vadd.f32 %v4743_v3, %v4297_v49  ;;  %v4924_v61 = vsel %vm3159_vm2, %v4922_v16, %v4923_v22 }
 0x4de   : > { %v4785_v31 = vadd.f32 %v4744_v38, %v4293_v21 }
 0x4df   : > { %v4876_v18 = vadd.f32 %v4833_v32, %v4786_v9  ;;  %v4303_v1 = vpop.f32.mrb[32].mxu0  ;;  %v4436_v23 = vpop.f32.mrb[32].mxu1 }
 0x4e0   : > { %v4875_v62 = vadd.f32 %v4834_v46, %v4785_v31  ;;  %v4835_v57 = vrot.slane %v4436_v23, 2  ;;  %v4305_v39 = vpop.f32.mrb[33].mxu0  ;;  %v4438_v8 = vpop.f32.mrb[33].mxu1 }
 0x4e1   : > { %v12970_v47 = vadd.f32 %v4923_v22, %v4876_v18  ;;  %v4925_v15 = vrot.slane %v4438_v8, 3  ;;  %v4307_v27 = vpop.f32.mrb[34].mxu0  ;;  %v4440_v40 = vpop.f32.mrb[34].mxu1  ;;  %v4745_v42 = vrot.slane %v4305_v39, 1 }
 0x4e2   : > { %v12972_v63 = vadd.f32 %v4924_v61, %v4875_v62  ;;  %v4836_v2 = vrot.slane %v4440_v40, 2  ;;  %v4309_v53 = vpop.f32.mrb[35].mxu0  ;;  %v4442_v34 = vpop.f32.mrb[35].mxu1 }
 0x4e3   : > { %v4746_v17 = vrot.slane %v4309_v53, 1  ;;  %v4926_v35 = vrot.slane %v4442_v34, 3 }
 0x4e4   : > { %v4837_v52 = vsel %vm3014_vm1, %v4835_v57, %v4836_v2 }
 0x4e5   : > { %v4747_v30 = vsel %vm2869_vm0, %v4745_v42, %v4746_v17  ;;  %v4788_v37 = vadd.f32 %v4746_v17, %v4307_v27  ;;  %v4927_v10 = vsel %vm3159_vm2, %v4925_v15, %v4926_v35 }
 0x4e6   : > { %v4787_v60 = vadd.f32 %v4747_v30, %v4303_v1 }
 0x4e7   : > { %v4878_v19 = vadd.f32 %v4836_v2, %v4788_v37  ;;  %v4313_v25 = vpop.f32.mrb[36].mxu0  ;;  %v4446_v7 = vpop.f32.mrb[36].mxu1 }
 0x4e8   : > { %v4877_v59 = vadd.f32 %v4837_v52, %v4787_v60  ;;  %v4838_v20 = vrot.slane %v4446_v7, 2  ;;  %v4315_v45 = vpop.f32.mrb[37].mxu0  ;;  %v4448_v21 = vpop.f32.mrb[37].mxu1 }
 0x4e9   : > { %v12977_v29 = vadd.f32 %v4926_v35, %v4878_v19  ;;  %v4928_v14 = vrot.slane %v4448_v21, 3  ;;  %v4317_v50 = vpop.f32.mrb[38].mxu0  ;;  %v4450_v41 = vpop.f32.mrb[38].mxu1  ;;  %v4748_v32 = vrot.slane %v4315_v45, 1 }
 0x4ea   : > { %v12979_v36 = vadd.f32 %v4927_v10, %v4877_v59  ;;  %v4839_v16 = vrot.slane %v4450_v41, 2  ;;  %v4319_v49 = vpop.f32.mrb[39].mxu0  ;;  %v4452_v44 = vpop.f32.mrb[39].mxu1 }
 0x4eb   : > { %v4749_v24 = vrot.slane %v4319_v49, 1  ;;  %v4929_v13 = vrot.slane %v4452_v44, 3 }
 0x4ec   : > { %v4840_v55 = vsel %vm3014_vm1, %v4838_v20, %v4839_v16 }
 0x4ed   : > { %v4750_v3 = vsel %vm2869_vm0, %v4748_v32, %v4749_v24  ;;  %v4790_v22 = vadd.f32 %v4749_v24, %v4317_v50  ;;  %v4930_v46 = vsel %vm3159_vm2, %v4928_v14, %v4929_v13 }
 0x4ee   : > { %v4789_v38 = vadd.f32 %v4750_v3, %v4313_v25 }
 0x4ef   : > { %v4880_v9 = vadd.f32 %v4839_v16, %v4790_v22  ;;  %v4489_v61 = vpop.f32.mrb[40].mxu0  ;;  %v10417_v31 = vpop.f32.mrb[40].mxu1 }
 0x4f0   : > { %v4879_v18 = vadd.f32 %v4840_v55, %v4789_v38  ;;  %v5174_v1 = vrot.slane %v10417_v31, 6  ;;  %v4491_v23 = vpop.f32.mrb[41].mxu0  ;;  %v4622_v62 = vpop.f32.mrb[41].mxu1  ;;  %v4991_v40 = vrot.slane %v4489_v61, 4 }
 0x4f1   : > { %v12984_v57 = vadd.f32 %v4929_v13, %v4880_v9  ;;  %v5171_v39 = vrot.slane %v4622_v62, 6  ;;  %v4493_v8 = vpop.f32.mrb[42].mxu0  ;;  %v10418_v15 = vpop.f32.mrb[42].mxu1  ;;  %v5081_v17 = vrot.slane %v4491_v23, 5 }
 0x4f2   : > { %v12986_v27 = vadd.f32 %v4930_v46, %v4879_v18  ;;  %v4992_v2 = vrot.slane %v4493_v8, 4  ;;  %v5175_v53 = vrot.slane %v10418_v15, 6  ;;  %v4495_v34 = vpop.f32.mrb[43].mxu0  ;;  %v4625_v42 = vpop.f32.mrb[43].mxu1 }
 0x4f3   : > { %v5082_v35 = vrot.slane %v4495_v34, 5  ;;  %v5172_v52 = vrot.slane %v4625_v42, 6 }
 0x4f4   : > { %v4993_v30 = vsel %vm3304_vm3, %v4991_v40, %v4992_v2  ;;  %v5042_v37 = vadd.f32 %v4992_v2, %v12895_v12  ;;  %v5176_v10 = vsel %vm3594_vm5, %v5174_v1, %v5175_v53 }
 0x4f5   : > { %v5041_v60 = vadd.f32 %v4993_v30, %v12897_v26  ;;  %v5083_v19 = vsel %vm3449_vm4, %v5081_v17, %v5082_v35  ;;  %v5173_v25 = vsel %vm3594_vm5, %v5171_v39, %v5172_v52 }
 0x4f6   : > { %v5132_v7 = vadd.f32 %v5082_v35, %v5042_v37 }
 0x4f7   : > { %v5131_v59 = vadd.f32 %v5083_v19, %v5041_v60  ;;  %v4499_v20 = vpop.f32.mrb[44].mxu0  ;;  %v10421_v45 = vpop.f32.mrb[44].mxu1 }
 0x4f8   : > { %v5222_v21 = vadd.f32 %v5172_v52, %v5132_v7  ;;  %v5180_v14 = vrot.slane %v10421_v45, 6  ;;  %v4501_v50 = vpop.f32.mrb[45].mxu0  ;;  %v4638_v41 = vpop.f32.mrb[45].mxu1  ;;  %v4994_v26 = vrot.slane %v4499_v20, 4 }
 0x4f9   : > { %v5221_v16 = vadd.f32 %v5173_v25, %v5131_v59  ;;  %v5177_v12 = vrot.slane %v4638_v41, 6  ;;  %v4503_v49 = vpop.f32.mrb[46].mxu0  ;;  %v12994_v44 = vpop.f32.mrb[46].mxu1  ;;  %v5084_v3 = vrot.slane %v4501_v50, 5 }
 0x4fa   : > { %5242 = vst [vmem:[%s11611_s5 + $0x8] sm:$0x3] %v5222_v21  ;;  %v4995_v32 = vrot.slane %v4503_v49, 4  ;;  %v5181_v24 = vrot.slane %v12994_v44, 6  ;;  %v4505_v13 = vpop.f32.mrb[47].mxu0  ;;  %v4641_v55 = vpop.f32.mrb[47].mxu1 }
 0x4fb   : > { %5241 = vst [vmem:[%s11611_s5] sm:$0xff] %v5221_v16  ;;  %v5085_v22 = vrot.slane %v4505_v13, 5  ;;  %v5178_v46 = vrot.slane %v4641_v55, 6 }
 0x4fc   : > { %v4996_v38 = vsel %vm3304_vm3, %v4994_v26, %v4995_v32  ;;  %v5044_v9 = vadd.f32 %v4995_v32, %v12906_v33  ;;  %v13004_v61 = vsel %vm3594_vm5, %v5180_v14, %v5181_v24 }
 0x4fd   : > { %v5043_v31 = vadd.f32 %v4996_v38, %v12908_v54  ;;  %v5086_v18 = vsel %vm3449_vm4, %v5084_v3, %v5085_v22  ;;  %v5179_v1 = vsel %vm3594_vm5, %v5177_v12, %v5178_v46 }
 0x4fe   : > { %v5134_v23 = vadd.f32 %v5085_v22, %v5044_v9 }
 0x4ff   : > { %v5133_v62 = vadd.f32 %v5086_v18, %v5043_v31  ;;  %v4509_v39 = vpop.f32.mrb[48].mxu0  ;;  %v10425_v8 = vpop.f32.mrb[48].mxu1 }
 0x500   : > { %v5224_v15 = vadd.f32 %v5175_v53, %v5134_v23  ;;  %v5186_v40 = vrot.slane %v10425_v8, 6  ;;  %v4511_v33 = vpop.f32.mrb[49].mxu0  ;;  %v4654_v2 = vpop.f32.mrb[49].mxu1  ;;  %v4997_v54 = vrot.slane %v4509_v39, 4 }
 0x501   : > { %v5223_v34 = vadd.f32 %v5176_v10, %v5133_v62  ;;  %v5183_v42 = vrot.slane %v4654_v2, 6  ;;  %v4513_v17 = vpop.f32.mrb[50].mxu0  ;;  %v13009_v35 = vpop.f32.mrb[50].mxu1  ;;  %v5087_v19 = vrot.slane %v4511_v33, 5 }
 0x502   : > { %5244 = vst [vmem:[%s11611_s5 + $0x18] sm:$0x3] %v5224_v15  ;;  %v4998_v52 = vrot.slane %v4513_v17, 4  ;;  %v5187_v30 = vrot.slane %v13009_v35, 6  ;;  %v4515_v37 = vpop.f32.mrb[51].mxu0  ;;  %v13013_v60 = vpop.f32.mrb[51].mxu1 }
 0x503   : > { %5243 = vst [vmem:[%s11611_s5 + $0x10] sm:$0xff] %v5223_v34  ;;  %v5088_v25 = vrot.slane %v4515_v37, 5  ;;  %v5184_v53 = vrot.slane %v13013_v60, 6 }
 0x504   : > { %v4999_v7 = vsel %vm3304_vm3, %v4997_v54, %v4998_v52  ;;  %v5046_v10 = vadd.f32 %v4998_v52, %v12917_v28  ;;  %v13022_v59 = vsel %vm3594_vm5, %v5186_v40, %v5187_v30 }
 0x505   : > { %v5045_v20 = vadd.f32 %v4999_v7, %v12919_v58  ;;  %v5089_v45 = vsel %vm3449_vm4, %v5087_v19, %v5088_v25  ;;  %v13029_v21 = vsel %vm3594_vm5, %v5183_v42, %v5184_v53 }
 0x506   : > { %v5136_v14 = vadd.f32 %v5088_v25, %v5046_v10 }
 0x507   : > { %v5135_v50 = vadd.f32 %v5089_v45, %v5045_v20  ;;  %v4519_v41 = vpop.f32.mrb[52].mxu0  ;;  %v10429_v28 = vpop.f32.mrb[52].mxu1 }
 0x508   : > { %v5226_v16 = vadd.f32 %v5178_v46, %v5136_v14  ;;  %v5192_v12 = vrot.slane %v10429_v28, 6  ;;  %v4521_v49 = vpop.f32.mrb[53].mxu0  ;;  %v4670_v26 = vpop.f32.mrb[53].mxu1  ;;  %v5000_v3 = vrot.slane %v4519_v41, 4 }
 0x509   : > { %v5225_v32 = vadd.f32 %v5179_v1, %v5135_v50  ;;  %v5189_v13 = vrot.slane %v4670_v26, 6  ;;  %v4523_v55 = vpop.f32.mrb[54].mxu0  ;;  %v13031_v58 = vpop.f32.mrb[54].mxu1  ;;  %v5090_v18 = vrot.slane %v4521_v49, 5 }
 0x50a   : > { %5246 = vst [vmem:[%s11611_s5 + $0x28] sm:$0x3] %v5226_v16  ;;  %v5001_v22 = vrot.slane %v4523_v55, 4  ;;  %v5193_v38 = vrot.slane %v13031_v58, 6  ;;  %v4525_v9 = vpop.f32.mrb[55].mxu0  ;;  %v13035_v31 = vpop.f32.mrb[55].mxu1 }
 0x50b   : > { %5245 = vst [vmem:[%s11611_s5 + $0x20] sm:$0xff] %v5225_v32  ;;  %v5091_v23 = vrot.slane %v4525_v9, 5  ;;  %v5190_v46 = vrot.slane %v13035_v31, 6 }
 0x50c   : > { %v5002_v62 = vsel %vm3304_vm3, %v5000_v3, %v5001_v22  ;;  %v5048_v1 = vadd.f32 %v5001_v22, %v12928_v0  ;;  %v13044_v39 = vsel %vm3594_vm5, %v5192_v12, %v5193_v38 }
 0x50d   : > { %v5047_v8 = vadd.f32 %v5002_v62, %v12930_v6  ;;  %v5092_v15 = vsel %vm3449_vm4, %v5090_v18, %v5091_v23  ;;  %v13051_v40 = vsel %vm3594_vm5, %v5189_v13, %v5190_v46 }
 0x50e   : > { %v5138_v33 = vadd.f32 %v5091_v23, %v5048_v1 }
 0x50f   : > { %v5137_v2 = vadd.f32 %v5092_v15, %v5047_v8  ;;  %v4529_v34 = vpop.f32.mrb[56].mxu0  ;;  %v10433_v0 = vpop.f32.mrb[56].mxu1 }
 0x510   : > { %v5228_v42 = vadd.f32 %v5181_v24, %v5138_v33  ;;  %v5198_v17 = vrot.slane %v10433_v0, 6  ;;  %v4531_v54 = vpop.f32.mrb[57].mxu0  ;;  %v4686_v52 = vpop.f32.mrb[57].mxu1  ;;  %v5003_v7 = vrot.slane %v4529_v34, 4 }
 0x511   : > { %v5227_v6 = vadd.f32 %v13004_v61, %v5137_v2  ;;  %v5195_v37 = vrot.slane %v4686_v52, 6  ;;  %v4533_v19 = vpop.f32.mrb[58].mxu0  ;;  %v13056_v25 = vpop.f32.mrb[58].mxu1  ;;  %v5093_v44 = vrot.slane %v4531_v54, 5 }
 0x512   : > { %5248 = vst [vmem:[%s11611_s5 + $0x38] sm:$0x3] %v5228_v42  ;;  %v5004_v10 = vrot.slane %v4533_v19, 4  ;;  %v5199_v20 = vrot.slane %v13056_v25, 6  ;;  %v4535_v45 = vpop.f32.mrb[59].mxu0  ;;  %v13060_v14 = vpop.f32.mrb[59].mxu1 }
 0x513   : > { %5247 = vst [vmem:[%s11611_s5 + $0x30] sm:$0xff] %v5227_v6  ;;  %v5094_v24 = vrot.slane %v4535_v45, 5  ;;  %v5196_v50 = vrot.slane %v13060_v14, 6 }
 0x514   : > { %v5005_v41 = vsel %vm3304_vm3, %v5003_v7, %v5004_v10  ;;  %v5050_v61 = vadd.f32 %v5004_v10, %v12939_v48  ;;  %v13069_v28 = vsel %vm3594_vm5, %v5198_v17, %v5199_v20 }
 0x515   : > { %v5049_v16 = vadd.f32 %v5005_v41, %v12941_v5  ;;  %v5095_v12 = vsel %vm3449_vm4, %v5093_v44, %v5094_v24  ;;  %v13076_v49 = vsel %vm3594_vm5, %v5195_v37, %v5196_v50 }
 0x516   : > { %v5140_v26 = vadd.f32 %v5094_v24, %v5050_v61 }
 0x517   : > { %v5139_v32 = vadd.f32 %v5095_v12, %v5049_v16  ;;  %v4539_v13 = vpop.f32.mrb[60].mxu0  ;;  %v13078_v48 = vpop.f32.mrb[60].mxu1 }
 0x518   : > { %v5230_v55 = vadd.f32 %v5184_v53, %v5140_v26  ;;  %v4541_v3 = vpop.f32.mrb[61].mxu0  ;;  %v13082_v22 = vpop.f32.mrb[61].mxu1  ;;  %v5006_v1 = vrot.slane %v4539_v13, 4 }
 0x519   : > { %v5229_v5 = vadd.f32 %v13029_v21, %v5139_v32  ;;  %v7399_v9 = vcombine.low %v13078_v48, %v13082_v22  ;;  %v7400_v18 = vcombine.high %v13078_v48, %v13082_v22  ;;  %v4543_v23 = vpop.f32.mrb[62].mxu0  ;;  %v13089_v62 = vpop.f32.mrb[62].mxu1  ;;  %v5096_v53 = vrot.slane %v4541_v3, 5 }
 0x51a   : > { %5250 = vst [vmem:[%s11611_s5 + $0x48] sm:$0x3] %v5230_v55  ;;  %v5007_v8 = vrot.slane %v4543_v23, 4  ;;  %v4545_v15 = vpop.f32.mrb[63].mxu0  ;;  %v13092_v60 = vpop.f32.mrb[63].mxu1 }
 0x51b   : > { %5249 = vst [vmem:[%s11611_s5 + $0x40] sm:$0xff] %v5229_v5  ;;  %v5097_v33 = vrot.slane %v4545_v15, 5  ;;  %v7435_v21 = vcombine.low %v13089_v62, %v13092_v60  ;;  %v7436_v0 = vcombine.high %v13089_v62, %v13092_v60 }
 0x51c   : > { %v5008_v2 = vsel %vm3304_vm3, %v5006_v1, %v5007_v8  ;;  %v5052_v34 = vadd.f32 %v5007_v8, %v12950_v4 }
 0x51d   : > { %v5051_v42 = vadd.f32 %v5008_v2, %v12952_v43  ;;  %v5098_v17 = vsel %vm3449_vm4, %v5096_v53, %v5097_v33 }
 0x51e   : > { %v5142_v54 = vadd.f32 %v5097_v33, %v5052_v34 }
 0x51f   : > { %v5141_v52 = vadd.f32 %v5098_v17, %v5051_v42  ;;  %v4549_v6 = vpop.f32.mrb[64].mxu0  ;;  %v13103_v37 = vpop.f32.mrb[64].mxu1 }
 0x520   : > { %v5232_v19 = vadd.f32 %v5187_v30, %v5142_v54  ;;  %v4551_v7 = vpop.f32.mrb[65].mxu0  ;;  %v13107_v10 = vpop.f32.mrb[65].mxu1  ;;  %v5009_v41 = vrot.slane %v4549_v6, 4 }
 0x521   : > { %v5231_v4 = vadd.f32 %v13022_v59, %v5141_v52  ;;  %v7471_v45 = vcombine.low %v13103_v37, %v13107_v10  ;;  %v7472_v43 = vcombine.high %v13103_v37, %v13107_v10  ;;  %v4553_v44 = vpop.f32.mrb[66].mxu0  ;;  %v13114_v24 = vpop.f32.mrb[66].mxu1  ;;  %v5099_v30 = vrot.slane %v4551_v7, 5 }
 0x522   : > { %5252 = vst [vmem:[%s11611_s5 + $0x58] sm:$0x3] %v5232_v19  ;;  %v5010_v61 = vrot.slane %v4553_v44, 4  ;;  %v4555_v16 = vpop.f32.mrb[67].mxu0  ;;  %v13117_v35 = vpop.f32.mrb[67].mxu1 }
 0x523   : > { %5251 = vst [vmem:[%s11611_s5 + $0x50] sm:$0xff] %v5231_v4  ;;  %v5100_v12 = vrot.slane %v4555_v16, 5  ;;  %v7507_v59 = vcombine.low %v13114_v24, %v13117_v35  ;;  %v7508_v13 = vcombine.high %v13114_v24, %v13117_v35 }
 0x524   : > { %v5011_v26 = vsel %vm3304_vm3, %v5009_v41, %v5010_v61  ;;  %v5054_v32 = vadd.f32 %v5010_v61, %v12961_v56 }
 0x525   : > { %v5053_v55 = vadd.f32 %v5011_v26, %v12963_v51  ;;  %v5101_v3 = vsel %vm3449_vm4, %v5099_v30, %v5100_v12 }
 0x526   : > { %v5144_v5 = vadd.f32 %v5100_v12, %v5054_v32 }
 0x527   : > { %v5143_v23 = vadd.f32 %v5101_v3, %v5053_v55  ;;  %v4559_v1 = vpop.f32.mrb[68].mxu0  ;;  %v13128_v8 = vpop.f32.mrb[68].mxu1 }
 0x528   : > { %v5234_v15 = vadd.f32 %v5190_v46, %v5144_v5  ;;  %v4561_v53 = vpop.f32.mrb[69].mxu0  ;;  %v13132_v33 = vpop.f32.mrb[69].mxu1  ;;  %v5012_v17 = vrot.slane %v4559_v1, 4 }
 0x529   : > { %v5233_v56 = vadd.f32 %v13051_v40, %v5143_v23  ;;  %v7543_v2 = vcombine.low %v13128_v8, %v13132_v33  ;;  %v7544_v51 = vcombine.high %v13128_v8, %v13132_v33  ;;  %v4563_v34 = vpop.f32.mrb[70].mxu0  ;;  %v13139_v42 = vpop.f32.mrb[70].mxu1  ;;  %v5102_v46 = vrot.slane %v4561_v53, 5 }
 0x52a   : > { %5254 = vst [vmem:[%s11611_s5 + $0x68] sm:$0x3] %v5234_v15  ;;  %v5013_v54 = vrot.slane %v4563_v34, 4  ;;  %v4565_v52 = vpop.f32.mrb[71].mxu0  ;;  %v13142_v31 = vpop.f32.mrb[71].mxu1 }
 0x52b   : > { %5253 = vst [vmem:[%s11611_s5 + $0x60] sm:$0xff] %v5233_v56  ;;  %v5103_v6 = vrot.slane %v4565_v52, 5  ;;  %v7579_v40 = vcombine.low %v13139_v42, %v13142_v31  ;;  %v7580_v4 = vcombine.high %v13139_v42, %v13142_v31 }
 0x52c   : > { %v5014_v19 = vsel %vm3304_vm3, %v5012_v17, %v5013_v54  ;;  %v5056_v7 = vadd.f32 %v5013_v54, %v12970_v47  ;;  %v11233_v47 = vmov 1983009808  }
 0x52d   : > { %v5055_v44 = vadd.f32 %v5014_v19, %v12972_v63  ;;  %v5104_v41 = vsel %vm3449_vm4, %v5102_v46, %v5103_v6  ;;  %v7404_v3 = vunpack.c.l.s4 %v11233_v47 }
 0x52e   : > { %v5146_v61 = vadd.f32 %v5103_v6, %v5056_v7 }
 0x52f   : > { %v5145_v16 = vadd.f32 %v5104_v41, %v5055_v44  ;;  %v4569_v30 = vpop.f32.mrb[72].mxu0  ;;  %v13153_v12 = vpop.f32.mrb[72].mxu1  ;;  %v7405_v6 = vunpack.c.0.s8 %v7404_v3 }
 0x530   : > { %v5236_v26 = vadd.f32 %v5193_v38, %v5146_v61  ;;  %v4571_v32 = vpop.f32.mrb[73].mxu0  ;;  %v13157_v55 = vpop.f32.mrb[73].mxu1  ;;  %v5015_v58 = vrot.slane %v4569_v30, 4 }
 0x531   : > { %v5235_v5 = vadd.f32 %v13044_v39, %v5145_v16  ;;  %v7650_v63 = vcombine.low %v13153_v12, %v13157_v55  ;;  %v7651_v23 = vcombine.high %v13153_v12, %v13157_v55  ;;  %v4573_v1 = vpop.f32.mrb[74].mxu0  ;;  %v13164_v15 = vpop.f32.mrb[74].mxu1  ;;  %v5105_v34 = vrot.slane %v4571_v32, 5 }
 0x532   : > { %5256 = vst [vmem:[%s11611_s5 + $0x78] sm:$0x3] %v5236_v26  ;;  %v5016_v53 = vrot.slane %v4573_v1, 4  ;;  %v4575_v38 = vpop.f32.mrb[75].mxu0  ;;  %v13167_v56 = vpop.f32.mrb[75].mxu1  ;;  %v13185_v32 = vsub.s32 %v7405_v6, %v12573_v11 }
 0x533   : > { %5255 = vst [vmem:[%s11611_s5 + $0x70] sm:$0xff] %v5235_v5  ;;  %v5106_v17 = vrot.slane %v4575_v38, 5  ;;  %v7721_v39 = vcombine.low %v13164_v15, %v13167_v56  ;;  %v7722_v46 = vcombine.high %v13164_v15, %v13167_v56 }
 0x534   : > { %v5017_v54 = vsel %vm3304_vm3, %v5015_v58, %v5016_v53  ;;  %v5058_v52 = vadd.f32 %v5016_v53, %v12977_v29  ;;  %v13234_v48 = vrot.slane %v7472_v43, %v13185_v32  ;;  %v13240_v22 = vrot.slane %v7507_v59, %v13185_v32 }
 0x535   : > { %v5057_v19 = vadd.f32 %v5017_v54, %v12979_v36  ;;  %v5107_v7 = vsel %vm3449_vm4, %v5105_v34, %v5106_v17  ;;  %v13258_v37 = vrot.slane %v7544_v51, %v13185_v32  ;;  %v13267_v8 = vrot.slane %v7579_v40, %v13185_v32 }
 0x536   : > { %v5148_v44 = vadd.f32 %v5106_v17, %v5058_v52  ;;  %v13204_v52 = vrot.slane %v7399_v9, %v13185_v32  ;;  %v7452_v9 = vrot.slane %v7436_v0, %v13185_v32  ;;  %v13252_v0 = vrot.slane %v7543_v2, %v13185_v32 }
 0x537   : > { %v5147_v41 = vadd.f32 %v5107_v7, %v5057_v19  ;;  %v4579_v61 = vpop.f32.mrb[76].mxu0  ;;  %v13178_v16 = vpop.f32.mrb[76].mxu1  ;;  %v13212_v7 = vrot.slane %v7400_v18, %v13185_v32  ;;  %v13273_v25 = vrot.slane %v7580_v4, %v13185_v32  ;;  %v13286_v40 = vrot.slane %v7651_v23, %v13185_v32 }
 0x538   : > { %v5238_v30 = vadd.f32 %v5196_v50, %v5148_v44  ;;  %v4581_v26 = vpop.f32.mrb[77].mxu0  ;;  %v13182_v29 = vpop.f32.mrb[77].mxu1  ;;  %v5018_v14 = vrot.slane %v4579_v61, 4  ;;  %v13228_v44 = vrot.slane %v7471_v45, %v13185_v32  ;;  %v13292_v42 = vrot.slane %v7721_v39, %v13185_v32 }
 0x539   : > { %v5237_v47 = vadd.f32 %v13076_v49, %v5147_v41  ;;  %v7792_v36 = vcombine.low %v13178_v16, %v13182_v29  ;;  %v7793_v3 = vcombine.high %v13178_v16, %v13182_v29  ;;  %v4583_v5 = vpop.f32.mrb[78].mxu0  ;;  %v13192_v1 = vpop.f32.mrb[78].mxu1  ;;  %v5108_v38 = vrot.slane %v4581_v26, 5 }
 0x53a   : > { %5258 = vst [vmem:[%s11611_s5 + $0x88] sm:$0x3] %v5238_v30  ;;  %v5019_v50 = vrot.slane %v4583_v5, 4  ;;  %v4585_v58 = vpop.f32.mrb[79].mxu0  ;;  %v6881_v53 = vpop.f32.mrb[79].mxu1  ;;  %v13303_v12 = vrot.slane %v7722_v46, %v13185_v32 }
 0x53b   : > { %5257 = vst [vmem:[%s11611_s5 + $0x80] sm:$0xff] %v5237_v47  ;;  %v5109_v11 = vrot.slane %v4585_v58, 5  ;;  %v7863_v34 = vcombine.low %v13192_v1, %v6881_v53  ;;  %v7864_v54 = vcombine.high %v13192_v1, %v6881_v53  ;;  %v13306_v55 = vrot.slane %v7792_v36, %v13185_v32 }
 0x53c   : > { %v5020_v49 = vsel %vm3304_vm3, %v5018_v14, %v5019_v50  ;;  %v5060_v17 = vadd.f32 %v5019_v50, %v12984_v57  ;;  %v13218_v57 = vrot.slane %v7435_v21, %v13185_v32  ;;  %v13246_v21 = vrot.slane %v7508_v13, %v13185_v32 }
 0x53d   : > { %v5059_v6 = vadd.f32 %v5020_v49, %v12986_v27  ;;  %v5110_v19 = vsel %vm3449_vm4, %v5108_v38, %v5109_v11  ;;  %v13311_v26 = vrot.slane %v7793_v3, %v13185_v32  ;;  %v13319_v56 = vrot.slane %v7863_v34, %v13185_v32 }
 0x53e   : > { %v5150_v27 = vadd.f32 %v5109_v11, %v5060_v17  ;;  %v13322_v46 = vrot.slane %v7864_v54, %v13185_v32 }
 0x53f   : > { %v5149_v18 = vadd.f32 %v5110_v19, %v5059_v6  ;;  %v6885_v62 = vpop.f32.mrb[80].mxu1  ;;  %v6962_v60 = vpop.f32.mrb[80].mxu0 }
 0x540   : > { %v5240_v10 = vadd.f32 %v5199_v20, %v5150_v27  ;;  %v6887_v45 = vpop.f32.mrb[81].mxu1  ;;  %v6964_v43 = vpop.f32.mrb[81].mxu0  ;;  %v13279_v20 = vrot.slane %v7650_v63, %v13185_v32 }
 0x541   : > { %v5239_v24 = vadd.f32 %v13069_v28, %v5149_v18  ;;  %v7934_v35 = vcombine.low %v6885_v62, %v6887_v45  ;;  %v7935_v59 = vcombine.high %v6885_v62, %v6887_v45  ;;  %v7401_v13 = vcombine.low %v6962_v60, %v6964_v43  ;;  %v6889_v41 = vpop.f32.mrb[82].mxu1  ;;  %v6966_v2 = vpop.f32.mrb[82].mxu0 }
 0x542   : > { %5260 = vst [vmem:[%s11611_s5 + $0x98] sm:$0x3] %v5240_v10  ;;  %v7402_v28 = vcombine.high %v6962_v60, %v6964_v43  ;;  %v6891_v33 = vpop.f32.mrb[83].mxu1  ;;  %v6968_v51 = vpop.f32.mrb[83].mxu0 }
 0x543   : > { %5259 = vst [vmem:[%s11611_s5 + $0x90] sm:$0xff] %v5239_v24  ;;  %v7423_v31 = vrot.slane %v7401_v13, %v13185_v32  ;;  %v8005_v4 = vcombine.low %v6889_v41, %v6891_v33  ;;  %v8006_v61 = vcombine.high %v6889_v41, %v6891_v33  ;;  %v7437_v16 = vcombine.low %v6966_v2, %v6968_v51 }
 0x544   : > { %v13297_v63 = vrot.slane %v7402_v28, %v13185_v32  ;;  %v7438_v30 = vcombine.high %v6966_v2, %v6968_v51  ;;  %v13325_v36 = vrot.slane %v7934_v35, %v13185_v32  ;;  %v13329_v14 = vrot.slane %v7935_v59, %v13185_v32 }
 0x545   : > { %v7431_v23 = vcombine.low %v13204_v52, %v7423_v31  ;;  %v7432_v39 = vcombine.high %v13204_v52, %v7423_v31  ;;  %v7459_v15 = vrot.slane %v7437_v16, %v13185_v32  ;;  %v13332_v50 = vrot.slane %v8005_v4, %v13185_v32 }
 0x546   : > { %v7433_v29 = vcombine.low %v13212_v7, %v13297_v63  ;;  %v7434_v47 = vcombine.high %v13212_v7, %v13297_v63  ;;  %v7466_v3 = vrot.slane %v7438_v30, %v13185_v32  ;;  %v13339_v19 = vrot.slane %v8006_v61, %v13185_v32 }
 0x547   : > { %v6895_v5 = vpop.f32.mrb[84].mxu1  ;;  %v6972_v1 = vpop.f32.mrb[84].mxu0  ;;  %v7467_v58 = vcombine.low %v13218_v57, %v7459_v15  ;;  %v13336_v53 = vcombine.high %v13218_v57, %v7459_v15 }
 0x548   : > { %v6897_v38 = vpop.f32.mrb[85].mxu1  ;;  %v6974_v11 = vpop.f32.mrb[85].mxu0  ;;  %v7469_v34 = vcombine.low %v7452_v9, %v7466_v3  ;;  %v7470_v49 = vcombine.high %v7452_v9, %v7466_v3 }
 0x549   : > { %v8076_v17 = vcombine.low %v6895_v5, %v6897_v38  ;;  %v8077_v54 = vcombine.high %v6895_v5, %v6897_v38  ;;  %v6899_v52 = vpop.f32.mrb[86].mxu1  ;;  %v6976_v6 = vpop.f32.mrb[86].mxu0  ;;  %v8617_v7 = vrot.slane %v13336_v53, 2  ;;  %v7473_v27 = vcombine.low %v6972_v1, %v6974_v11 }
 0x54a   : > { %v7474_v18 = vcombine.high %v6972_v1, %v6974_v11  ;;  %v6901_v62 = vpop.f32.mrb[87].mxu1  ;;  %v6978_v60 = vpop.f32.mrb[87].mxu0  ;;  %v8618_v10 = vrot.slane %v7469_v34, 2  ;;  %v8619_v57 = vrot.slane %v7470_v49, 2 }
 0x54b   : > { %v13343_v45 = vrot.slane %v8076_v17, %v13185_v32  ;;  %v13346_v9 = vrot.slane %v8077_v54, %v13185_v32  ;;  %v13348_v43 = vadd.f32 %v8617_v7, %v7431_v23  ;;  %v7495_v24 = vrot.slane %v7473_v27, %v13185_v32 }
 0x54c   : > { %v7502_v35 = vrot.slane %v7474_v18, %v13185_v32  ;;  %v8147_v59 = vcombine.low %v6899_v52, %v6901_v62  ;;  %v13352_v13 = vadd.f32 %v8618_v10, %v7432_v39  ;;  %v13354_v41 = vadd.f32 %v8619_v57, %v7433_v29 }
 0x54d   : > { %14970 = vst [vmem:[#allocation22_spill] sm:$0xff] %v13348_v43  ;;  %v8148_v2 = vcombine.high %v6899_v52, %v6901_v62  ;;  %v7509_v28 = vcombine.low %v6976_v6, %v6978_v60  ;;  %v13357_v33 = vcombine.low %v13228_v44, %v7495_v24  ;;  %v13360_v51 = vcombine.high %v13228_v44, %v7495_v24 }
 0x54e   : > { %14971 = vst [vmem:[#allocation23_spill] sm:$0xff] %v13352_v13  ;;  %14972 = vst [vmem:[#allocation24_spill] sm:$0xff] %v13354_v41  ;;  %v13363_v31 = vcombine.low %v13234_v48, %v7502_v35  ;;  %v13366_v4 = vcombine.high %v13234_v48, %v7502_v35  ;;  %v13369_v63 = vrot.slane %v8147_v59, %v13185_v32 }
 0x54f   : > { %14973 = vst [vmem:[#allocation25_spill] sm:$0xff] %v13357_v33  ;;  %14974 = vst [vmem:[#allocation26_spill] sm:$0xff] %v13360_v51  ;;  %v13372_v61 = vrot.slane %v8148_v2, %v13185_v32  ;;  %v7510_v16 = vcombine.high %v6976_v6, %v6978_v60  ;;  %v7531_v30 = vrot.slane %v7509_v28, %v13185_v32  ;;  %v6905_v23 = vpop.f32.mrb[88].mxu1  ;;  %v6982_v39 = vpop.f32.mrb[88].mxu0  ;;  %v8620_v44 = vrot.slane %v13357_v33, 2 }
 0x550   : > { %14975 = vst [vmem:[#allocation27_spill] sm:$0xff] %v13363_v31  ;;  %14976 = vst [vmem:[#allocation28_spill] sm:$0xff] %v13366_v4  ;;  %v8621_v29 = vrot.slane %v13360_v51, 2  ;;  %v8622_v15 = vrot.slane %v13363_v31, 2  ;;  %v8623_v48 = vrot.slane %v13366_v4, 2  ;;  %v6907_v3 = vpop.f32.mrb[89].mxu1 }
 0x551   : > { %v6984_v5 = vpop.f32.mrb[89].mxu0  ;;  %v7538_v11 = vrot.slane %v7510_v16, %v13185_v32  ;;  %v13383_v17 = vcombine.low %v13240_v22, %v7531_v30  ;;  %v6909_v54 = vpop.f32.mrb[90].mxu1  ;;  %v13385_v6 = vadd.f32 %v8620_v44, %v7434_v47  ;;  %v13392_v18 = vcombine.high %v13240_v22, %v7531_v30 }
 0x552   : > { %v6986_v52 = vpop.f32.mrb[90].mxu0  ;;  %v13387_v7 = vadd.f32 %v8621_v29, %v7467_v58  ;;  %v13389_v27 = vadd.f32 %v8623_v48, %v7469_v34  ;;  %v6911_v62 = vpop.f32.mrb[91].mxu1  ;;  %v8218_v35 = vcombine.low %v6905_v23, %v6907_v3  ;;  %v8219_v59 = vcombine.high %v6905_v23, %v6907_v3 }
 0x553   : > { %14977 = vst [vmem:[#allocation29_spill] sm:$0xff] %v13383_v17  ;;  %14978 = vst [vmem:[#allocation30_spill] sm:$0xff] %v13385_v6  ;;  %v6988_v60 = vpop.f32.mrb[91].mxu0  ;;  %v13395_v10 = vcombine.low %v13246_v21, %v7538_v11  ;;  %v13398_v57 = vcombine.high %v13246_v21, %v7538_v11  ;;  %v8624_v24 = vrot.slane %v13383_v17, 2  ;;  %v7545_v44 = vcombine.low %v6982_v39, %v6984_v5 }
 0x554   : > { %14979 = vst [vmem:[#allocation31_spill] sm:$0xff] %v13392_v18  ;;  %v13410_v21 = vrot.slane %v8218_v35, %v13185_v32  ;;  %v13413_v30 = vrot.slane %v8219_v59, %v13185_v32  ;;  %v7546_v29 = vcombine.high %v6982_v39, %v6984_v5  ;;  %v8289_v23 = vcombine.low %v6909_v54, %v6911_v62 }
 0x555   : > { %v8627_v2 = vrot.slane %v13398_v57, 2  ;;  %v13406_v28 = vadd.f32 %v8624_v24, %v7470_v49  ;;  %v8290_v3 = vcombine.high %v6909_v54, %v6911_v62  ;;  %v7581_v11 = vcombine.low %v6986_v52, %v6988_v60 }
 0x556   : > { %v7567_v49 = vrot.slane %v7545_v44, %v13185_v32  ;;  %v7574_v24 = vrot.slane %v7546_v29, %v13185_v32  ;;  %v7582_v38 = vcombine.high %v6986_v52, %v6988_v60  ;;  %v13421_v59 = vadd.f32 %v8622_v15, %v13336_v53 }
 0x557   : > { %14980 = vst [vmem:[#allocation32_spill] sm:$0xff] %v13406_v28  ;;  %v13416_v48 = vadd.f32 %v8627_v2, %v13363_v31  ;;  %v6915_v34 = vpop.f32.mrb[92].mxu1  ;;  %v6992_v47 = vpop.f32.mrb[92].mxu0  ;;  %v13424_v39 = vrot.slane %v8289_v23, %v13185_v32  ;;  %v13427_v5 = vrot.slane %v8290_v3, %v13185_v32  ;;  %v7603_v54 = vrot.slane %v7581_v11, %v13185_v32 }
 0x558   : > { %v6917_v35 = vpop.f32.mrb[93].mxu1  ;;  %v6994_v1 = vpop.f32.mrb[93].mxu0  ;;  %v13431_v44 = vcombine.low %v13252_v0, %v7567_v49  ;;  %v13434_v52 = vcombine.high %v13252_v0, %v7567_v49  ;;  %v13437_v53 = vcombine.low %v13258_v37, %v7574_v24  ;;  %v13440_v15 = vcombine.high %v13258_v37, %v7574_v24 }
 0x559   : > { %14981 = vst [vmem:[#allocation33_spill] sm:$0xff] %v13416_v48  ;;  %v8360_v62 = vcombine.low %v6915_v34, %v6917_v35  ;;  %v6919_v2 = vpop.f32.mrb[94].mxu1  ;;  %v6996_v22 = vpop.f32.mrb[94].mxu0  ;;  %v7610_v23 = vrot.slane %v7582_v38, %v13185_v32  ;;  %v13444_v34 = vcombine.low %v13267_v8, %v7603_v54  ;;  %v13447_v3 = vcombine.high %v13267_v8, %v7603_v54 }
 0x55a   : > { %14982 = vst [vmem:[#allocation34_spill] sm:$0xff] %v13431_v44  ;;  %14983 = vst [vmem:[#allocation35_spill] sm:$0xff] %v13437_v53  ;;  %v6920_v60 = vpop.f32.mrb[95].mxu1  ;;  %v6998_v29 = vpop.f32.mrb[95].mxu0  ;;  %v8628_v0 = vrot.slane %v13431_v44, 2  ;;  %v8631_v24 = vrot.slane %v13440_v15, 2  ;;  %v7652_v6 = vcombine.low %v6992_v47, %v6994_v1 }
 0x55b   : > { %14984 = vst [vmem:[#allocation36_spill] sm:$0xff] %v13440_v15  ;;  %14985 = vst [vmem:[#allocation37_spill] sm:$0xff] %v13444_v34  ;;  %v13450_v11 = vrot.slane %v8360_v62, %v13185_v32  ;;  %v13457_v35 = vcombine.low %v13273_v25, %v7610_v23  ;;  %v13460_v38 = vcombine.high %v13273_v25, %v7610_v23  ;;  %v8632_v8 = vrot.slane %v13444_v34, 2 }
 0x55c   : > { %14986 = vst [vmem:[#allocation38_spill] sm:$0xff] %v13447_v3  ;;  %v13465_v62 = vadd.f32 %v8628_v0, %v13366_v4  ;;  %v13468_v2 = vadd.f32 %v8631_v24, %v13395_v10  ;;  %v7653_v24 = vcombine.high %v6992_v47, %v6994_v1  ;;  %v7724_v49 = vcombine.high %v6996_v22, %v6998_v29 }
 0x55d   : > { %14987 = vst [vmem:[#allocation39_spill] sm:$0xff] %v13457_v35  ;;  %14988 = vst [vmem:[#allocation40_spill] sm:$0xff] %v13460_v38  ;;  %v8635_v58 = vrot.slane %v13460_v38, 2  ;;  %v13475_v25 = vadd.f32 %v8632_v8, %v13398_v57  ;;  %v7674_v23 = vrot.slane %v7652_v6, %v13185_v32 }
 0x55e   : > { %14989 = vst [vmem:[#allocation41_spill] sm:$0xff] %v13465_v62  ;;  %14990 = vst [vmem:[#allocation42_spill] sm:$0xff] %v13468_v2  ;;  %v7723_v2 = vcombine.low %v6996_v22, %v6998_v29  ;;  %v7752_v47 = vrot.slane %v7724_v49, %v13185_v32 }
 0x55f   : > { %14991 = vst [vmem:[#allocation43_spill] sm:$0xff] %v13475_v25  ;;  %v6923_v54 = vpop.f32.mrb[96].mxu1  ;;  %v7002_v16 = vpop.f32.mrb[96].mxu0  ;;  %v13480_v37 = vadd.f32 %v8635_v58, %v13437_v53  ;;  %v13496_v6 = vcombine.low %v13279_v20, %v7674_v23 }
 0x560   : > { %v6924_v17 = vpop.f32.mrb[97].mxu1  ;;  %v7004_v60 = vpop.f32.mrb[97].mxu0  ;;  %v7681_v54 = vrot.slane %v7653_v24, %v13185_v32  ;;  %v7745_v0 = vrot.slane %v7723_v2, %v13185_v32 }
 0x561   : > { %14992 = vst [vmem:[#allocation44_spill] sm:$0xff] %v13480_v37  ;;  %v7794_v41 = vcombine.low %v7002_v16, %v7004_v60  ;;  %v7795_v4 = vcombine.high %v7002_v16, %v7004_v60  ;;  %v6925_v13 = vpop.f32.mrb[98].mxu1  ;;  %v13482_v8 = vpop.f32.mrb[98].mxu0  ;;  %14993 = vst [vmem:[#allocation45_spill] sm:$0xff] %v13496_v6  ;;  %v13499_v16 = vcombine.high %v13279_v20, %v7674_v23  ;;  %v8636_v20 = vrot.slane %v13496_v6, 2 }
 0x562   : > { %v6926_v25 = vpop.f32.mrb[99].mxu1  ;;  %v13487_v1 = vpop.f32.mrb[99].mxu0  ;;  %v13502_v29 = vcombine.low %v13286_v40, %v7681_v54  ;;  %v13505_v2 = vcombine.high %v13286_v40, %v7681_v54  ;;  %v13508_v49 = vcombine.low %v13292_v42, %v7745_v0  ;;  %v13517_v60 = vcombine.high %v13303_v12, %v7752_v47 }
 0x563   : > { %v7816_v58 = vrot.slane %v7794_v41, %v13185_v32  ;;  %v7823_v22 = vrot.slane %v7795_v4, %v13185_v32  ;;  %v7865_v13 = vcombine.low %v13482_v8, %v13487_v1  ;;  %14994 = vst [vmem:[#allocation46_spill] sm:$0xff] %v13499_v16  ;;  %v13511_v41 = vcombine.high %v13292_v42, %v7745_v0 }
 0x564   : > { %14995 = vst [vmem:[#allocation47_spill] sm:$0xff] %v13502_v29  ;;  %14996 = vst [vmem:[#allocation48_spill] sm:$0xff] %v13505_v2  ;;  %v13514_v4 = vcombine.low %v13303_v12, %v7752_v47  ;;  %v8639_v40 = vrot.slane %v13505_v2, 2  ;;  %v13528_v12 = vadd.f32 %v8636_v20, %v13440_v15  ;;  %v8640_v54 = vrot.slane %v13508_v49, 2 }
 0x565   : > { %14997 = vst [vmem:[#allocation49_spill] sm:$0xff] %v13508_v49  ;;  %14998 = vst [vmem:[#allocation50_spill] sm:$0xff] %v13511_v41  ;;  %v13562_v25 = vcombine.low %v13311_v26, %v7823_v22 }
 0x566   : > { %14999 = vst [vmem:[#allocation51_spill] sm:$0xff] %v13514_v4  ;;  %15000 = vst [vmem:[#allocation52_spill] sm:$0xff] %v13517_v60  ;;  %v13531_v47 = vadd.f32 %v8639_v40, %v13457_v35  ;;  %v13548_v42 = vadd.f32 %v8640_v54, %v13460_v38  ;;  %v13556_v40 = vcombine.low %v13306_v55, %v7816_v58 }
 0x567   : > { %v7012_v17 = vpop.f32.mrb[100].mxu0  ;;  %v7089_v37 = vpop.f32.mrb[100].mxu1  ;;  %15001 = vst [vmem:[#allocation53_spill] sm:$0xff] %v13528_v12  ;;  %v13559_v12 = vcombine.high %v13306_v55, %v7816_v58  ;;  %15007 = vst [vmem:[#allocation59_spill] sm:$0xff] %v13562_v25  ;;  %v7866_v54 = vcombine.high %v13482_v8, %v13487_v1 }
 0x568   : > { %15002 = vst [vmem:[#allocation54_spill] sm:$0xff] %v13531_v47  ;;  %v7014_v31 = vpop.f32.mrb[101].mxu0  ;;  %v7090_v24 = vpop.f32.mrb[101].mxu1  ;;  %v8643_v37 = vrot.slane %v13517_v60, 2  ;;  %15003 = vst [vmem:[#allocation55_spill] sm:$0xff] %v13548_v42 }
 0x569   : > { %v13539_v43 = vpop.f32.mrb[102].mxu0  ;;  %v7091_v20 = vpop.f32.mrb[102].mxu1  ;;  %15005 = vst [vmem:[#allocation57_spill] sm:$0xff] %v13556_v40  ;;  %15006 = vst [vmem:[#allocation58_spill] sm:$0xff] %v13559_v12  ;;  %v7936_v16 = vcombine.low %v7012_v17, %v7014_v31  ;;  %v7937_v23 = vcombine.high %v7012_v17, %v7014_v31 }
 0x56a   : > { %v13545_v24 = vpop.f32.mrb[103].mxu0  ;;  %v7092_v47 = vpop.f32.mrb[103].mxu1  ;;  %v13551_v0 = vadd.f32 %v8643_v37, %v13502_v29  ;;  %v7887_v37 = vrot.slane %v7865_v13, %v13185_v32  ;;  %v8644_v20 = vrot.slane %v13556_v40, 2 }
 0x56b   : > { %v13565_v47 = vcombine.high %v13311_v26, %v7823_v22  ;;  %v7894_v22 = vrot.slane %v7866_v54, %v13185_v32  ;;  %v7965_v55 = vrot.slane %v7937_v23, %v13185_v32 }
 0x56c   : > { %15004 = vst [vmem:[#allocation56_spill] sm:$0xff] %v13551_v0  ;;  %v13581_v31 = vadd.f32 %v8644_v20, %v13505_v2  ;;  %v13592_v8 = vcombine.low %v13319_v56, %v7887_v37  ;;  %v7958_v20 = vrot.slane %v7936_v16, %v13185_v32  ;;  %v8007_v0 = vcombine.low %v13539_v43, %v13545_v24 }
 0x56d   : > { %15008 = vst [vmem:[#allocation60_spill] sm:$0xff] %v13565_v47  ;;  %v8647_v58 = vrot.slane %v13565_v47, 2  ;;  %v13613_v16 = vcombine.high %v13322_v46, %v7894_v22 }
 0x56e   : > { %15009 = vst [vmem:[#allocation61_spill] sm:$0xff] %v13581_v31  ;;  %15011 = vst [vmem:[#allocation63_spill] sm:$0xff] %v13592_v8  ;;  %v8648_v23 = vrot.slane %v13592_v8, 2  ;;  %v13621_v2 = vcombine.low %v13325_v36, %v7958_v20  ;;  %v8029_v8 = vrot.slane %v8007_v0, %v13185_v32 }
 0x56f   : > { %v13578_v1 = vpop.f32.mrb[104].mxu0  ;;  %v7095_v13 = vpop.f32.mrb[104].mxu1  ;;  %v13584_v17 = vadd.f32 %v8647_v58, %v13514_v4  ;;  %15014 = vst [vmem:[#allocation66_spill] sm:$0xff] %v13613_v16  ;;  %v8651_v12 = vrot.slane %v13613_v16, 2 }
 0x570   : > { %v13588_v41 = vpop.f32.mrb[105].mxu0  ;;  %v7096_v26 = vpop.f32.mrb[105].mxu1  ;;  %v13595_v13 = vcombine.high %v13319_v56, %v7887_v37  ;;  %v13610_v37 = vcombine.low %v13322_v46, %v7894_v22  ;;  %15015 = vst [vmem:[#allocation67_spill] sm:$0xff] %v13621_v2  ;;  %v13626_v46 = vadd.f32 %v8648_v23, %v13517_v60  ;;  %v8652_v23 = vrot.slane %v13621_v2, 2 }
 0x571   : > { %15010 = vst [vmem:[#allocation62_spill] sm:$0xff] %v13584_v17  ;;  %v13598_v31 = vpop.f32.mrb[106].mxu0  ;;  %v7097_v58 = vpop.f32.mrb[106].mxu1  ;;  %v8008_v26 = vcombine.high %v13539_v43, %v13545_v24  ;;  %v8078_v54 = vcombine.low %v13578_v1, %v13588_v41  ;;  %v13632_v43 = vcombine.high %v13325_v36, %v7958_v20  ;;  %v13635_v24 = vcombine.low %v13329_v14, %v7965_v55 }
 0x572   : > { %15012 = vst [vmem:[#allocation64_spill] sm:$0xff] %v13595_v13  ;;  %v13607_v17 = vpop.f32.mrb[107].mxu0  ;;  %v7098_v56 = vpop.f32.mrb[107].mxu1  ;;  %15013 = vst [vmem:[#allocation65_spill] sm:$0xff] %v13610_v37  ;;  %v13638_v13 = vadd.f32 %v8651_v12, %v13562_v25 }
 0x573   : > { %15016 = vst [vmem:[#allocation68_spill] sm:$0xff] %v13626_v46  ;;  %15017 = vst [vmem:[#allocation69_spill] sm:$0xff] %v13632_v43  ;;  %v13641_v56 = vcombine.high %v13329_v14, %v7965_v55  ;;  %v13655_v55 = vadd.f32 %v8652_v23, %v13565_v47  ;;  %v8036_v36 = vrot.slane %v8008_v26, %v13185_v32 }
 0x574   : > { %15018 = vst [vmem:[#allocation70_spill] sm:$0xff] %v13635_v24  ;;  %15019 = vst [vmem:[#allocation71_spill] sm:$0xff] %v13638_v13  ;;  %v8150_v0 = vcombine.high %v13598_v31, %v13607_v17  ;;  %v13681_v26 = vcombine.low %v13332_v50, %v8029_v8 }
 0x575   : > { %15020 = vst [vmem:[#allocation72_spill] sm:$0xff] %v13641_v56  ;;  %v8655_v14 = vrot.slane %v13641_v56, 2  ;;  %15021 = vst [vmem:[#allocation73_spill] sm:$0xff] %v13655_v55  ;;  %v8149_v55 = vcombine.low %v13598_v31, %v13607_v17 }
 0x576   : > { %15023 = vst [vmem:[#allocation75_spill] sm:$0xff] %v13681_v26  ;;  %v8656_v17 = vrot.slane %v13681_v26, 2  ;;  %v8178_v53 = vrot.slane %v8150_v0, %v13185_v32 }
 0x577   : > { %v13645_v46 = vpop.f32.mrb[108].mxu0  ;;  %v7101_v58 = vpop.f32.mrb[108].mxu1  ;;  %v13673_v22 = vadd.f32 %v8655_v14, %v13610_v37  ;;  %v13690_v14 = vcombine.high %v13339_v19, %v8036_v36  ;;  %v8171_v31 = vrot.slane %v8149_v55, %v13185_v32 }
 0x578   : > { %v13651_v12 = vpop.f32.mrb[109].mxu0  ;;  %v7102_v13 = vpop.f32.mrb[109].mxu1  ;;  %v8100_v58 = vrot.slane %v8078_v54, %v13185_v32  ;;  %v13713_v55 = vadd.f32 %v8656_v17, %v13613_v16  ;;  %v13757_v0 = vcombine.low %v13372_v61, %v8178_v53 }
 0x579   : > { %v13659_v25 = vpop.f32.mrb[110].mxu0  ;;  %v13661_v49 = vpop.f32.mrb[110].mxu1  ;;  %v8079_v13 = vcombine.high %v13578_v1, %v13588_v41  ;;  %15022 = vst [vmem:[#allocation74_spill] sm:$0xff] %v13673_v22  ;;  %v13684_v41 = vcombine.high %v13332_v50, %v8029_v8  ;;  %v13687_v1 = vcombine.low %v13339_v19, %v8036_v36  ;;  %15026 = vst [vmem:[#allocation78_spill] sm:$0xff] %v13690_v14  ;;  %v8659_v37 = vrot.slane %v13690_v14, 2 }
 0x57a   : > { %v13668_v42 = vpop.f32.mrb[111].mxu0  ;;  %v13670_v23 = vpop.f32.mrb[111].mxu1  ;;  %v13694_v20 = vcombine.low %v13343_v45, %v8100_v58  ;;  %v13697_v22 = vcombine.high %v13343_v45, %v8100_v58  ;;  %15029 = vst [vmem:[#allocation81_spill] sm:$0xff] %v13713_v55  ;;  %v13744_v51 = vcombine.low %v13369_v63, %v8171_v31  ;;  %v13747_v16 = vcombine.high %v13369_v63, %v8171_v31 }
 0x57b   : > { %15024 = vst [vmem:[#allocation76_spill] sm:$0xff] %v13684_v41  ;;  %15025 = vst [vmem:[#allocation77_spill] sm:$0xff] %v13687_v1  ;;  %v8107_v54 = vrot.slane %v8079_v13, %v13185_v32  ;;  %v8657_v50 = vrot.slane %v13684_v41, 2  ;;  %v8658_v8 = vrot.slane %v13687_v1, 2  ;;  %v8220_v18 = vcombine.low %v13645_v46, %v13651_v12 }
 0x57c   : > { %15027 = vst [vmem:[#allocation79_spill] sm:$0xff] %v13694_v20  ;;  %15028 = vst [vmem:[#allocation80_spill] sm:$0xff] %v13697_v22  ;;  %v8660_v13 = vrot.slane %v13694_v20, 2  ;;  %v8661_v29 = vrot.slane %v13697_v22, 2  ;;  %v8221_v17 = vcombine.high %v13645_v46, %v13651_v12  ;;  %v8664_v63 = vrot.slane %v13744_v51, 2 }
 0x57d   : > { %v13718_v4 = vcombine.low %v13346_v9, %v8107_v54  ;;  %v13725_v47 = vcombine.high %v13346_v9, %v8107_v54  ;;  %15032 = vst [vmem:[#allocation84_spill] sm:$0xff] %v13744_v51  ;;  %15033 = vst [vmem:[#allocation85_spill] sm:$0xff] %v13747_v16  ;;  %v8665_v31 = vrot.slane %v13747_v16, 2  ;;  %v8759_v12 = vadd.f32 %v8659_v37, %v13635_v24 }
 0x57e   : > { %15034 = vst [vmem:[#allocation86_spill] sm:$0xff] %v13757_v0  ;;  %v8760_v34 = vadd.f32 %v8660_v13, %v13641_v56  ;;  %v8764_v37 = vadd.f32 %v8664_v63, %v13690_v14 }
 0x57f   : > { %v13708_v45 = vpop.f32.mrb[112].mxu0  ;;  %v13710_v58 = vpop.f32.mrb[112].mxu1  ;;  %15030 = vst [vmem:[#allocation82_spill] sm:$0xff] %v13718_v4  ;;  %15031 = vst [vmem:[#allocation83_spill] sm:$0xff] %v13725_v47  ;;  %v8662_v60 = vrot.slane %v13718_v4, 2  ;;  %v8807_v6 = vrot.slane %v13718_v4, 4  ;;  %v8182_v4 = vcombine.high %v13372_v61, %v8178_v53  ;;  %v8765_v13 = vadd.f32 %v8665_v31, %v13694_v20 }
 0x580   : > { %v13720_v19 = vpop.f32.mrb[113].mxu0  ;;  %v13722_v36 = vpop.f32.mrb[113].mxu1  ;;  %v8663_v54 = vrot.slane %v13725_v47, 2  ;;  %v8808_v48 = vrot.slane %v13725_v47, 4  ;;  %v8291_v31 = vcombine.low %v13659_v25, %v13668_v42 }
 0x581   : > { %v7046_v55 = vpop.f32.mrb[114].mxu0  ;;  %v13730_v40 = vpop.f32.mrb[114].mxu1  ;;  %v8762_v38 = vadd.f32 %v8662_v60, %v13684_v41  ;;  %v8810_v60 = vrot.slane %v13747_v16, 4  ;;  %v8957_v3 = vrot.slane %v8182_v4, 6 }
 0x582   : > { %v7047_v62 = vpop.f32.mrb[115].mxu0  ;;  %v13736_v9 = vpop.f32.mrb[115].mxu1  ;;  %v8758_v55 = vadd.f32 %v8658_v8, %v13632_v43  ;;  %v8811_v8 = vrot.slane %v13757_v0, 4  ;;  %v8812_v43 = vrot.slane %v8182_v4, 4 }
 0x583   : > { %v8757_v62 = vadd.f32 %v8657_v50, %v13621_v2  ;;  %v8809_v50 = vrot.slane %v13744_v51, 4 }
 0x584   : > { %v13777_v51 = vadd.f32 %v8812_v43, %v8762_v38  ;;  %v8763_v43 = vadd.f32 %v8663_v54, %v13687_v1 }
 0x585   : > { %v8907_v41 = vadd.f32 %v8807_v6, %v8757_v62  ;;  %v8242_v6 = vrot.slane %v8220_v18, %v13185_v32  ;;  %v8249_v62 = vrot.slane %v8221_v17, %v13185_v32 }
 0x587   : > { %v7050_v2 = vpop.f32.mrb[116].mxu0  ;;  %v13765_v46 = vpop.f32.mrb[116].mxu1  ;;  %v13784_v35 = vadd.f32 %v8957_v3, %v8907_v41  ;;  %v8250_v18 = vcombine.low %v13410_v21, %v8242_v6  ;;  %v8251_v4 = vcombine.high %v13410_v21, %v8242_v6  ;;  %v8252_v17 = vcombine.low %v13413_v30, %v8249_v62 }
 0x588   : > { %v7051_v53 = vpop.f32.mrb[117].mxu0  ;;  %v13770_v33 = vpop.f32.mrb[117].mxu1  ;;  %v8253_v38 = vcombine.high %v13413_v30, %v8249_v62  ;;  %v8909_v41 = vadd.f32 %v8809_v50, %v8759_v12  ;;  %v7615_v50 = vcombine.low %v13661_v49, %v13670_v23 }
 0x589   : > { %v7052_v2 = vpop.f32.mrb[118].mxu0  ;;  %v13775_v47 = vpop.f32.mrb[118].mxu1  ;;  %v8761_v53 = vadd.f32 %v8661_v29, %v13681_v26  ;;  %15035 = vst [vmem:[#allocation87_spill] sm:$0xff] %v13784_v35  ;;  %v8813_v29 = vrot.slane %v8250_v18, 4  ;;  %v8908_v26 = vadd.f32 %v8808_v48, %v8758_v55  ;;  %v8910_v35 = vadd.f32 %v8810_v60, %v8760_v34 }
 0x58a   : > { %v7053_v61 = vpop.f32.mrb[119].mxu0  ;;  %v13782_v16 = vpop.f32.mrb[119].mxu1  ;;  %v8815_v2 = vrot.slane %v8252_v17, 4  ;;  %v8816_v3 = vrot.slane %v8253_v38, 4  ;;  %v8958_v15 = vrot.slane %v8250_v18, 6  ;;  %v8959_v54 = vrot.slane %v8251_v4, 6 }
 0x58b   : > { %v8814_v61 = vrot.slane %v8251_v4, 4  ;;  %v8911_v56 = vadd.f32 %v8811_v8, %v8761_v53  ;;  %v8913_v24 = vadd.f32 %v8813_v29, %v8763_v43  ;;  %v8960_v62 = vrot.slane %v8252_v17, 6 }
 0x58c   : > { %v8915_v6 = vadd.f32 %v8815_v2, %v8765_v13  ;;  %v8961_v63 = vrot.slane %v8253_v38, 6  ;;  %v13799_v55 = vadd.f32 %v8958_v15, %v8908_v26  ;;  %v8292_v34 = vcombine.high %v13659_v25, %v13668_v42 }
 0x58d   : > { %v8914_v21 = vadd.f32 %v8814_v61, %v8764_v37  ;;  %v7616_v60 = vcombine.high %v13661_v49, %v13670_v23  ;;  %v13809_v53 = vadd.f32 %v8959_v54, %v8909_v41  ;;  %v13811_v18 = vadd.f32 %v8960_v62, %v8910_v35 }
 0x58e   : > { %15036 = vst [vmem:[#allocation88_spill] sm:$0xff] %v13799_v55  ;;  %v13813_v4 = vadd.f32 %v8961_v63, %v8911_v56  ;;  %v8313_v15 = vrot.slane %v8291_v31, %v13185_v32  ;;  %v8320_v25 = vrot.slane %v8292_v34, %v13185_v32  ;;  %v13818_v42 = vrot.slane %v7615_v50, %v13185_v32 }
 0x58f   : > { %v13793_v28 = vpop.f32.mrb[120].mxu1  ;;  %v10453_v30 = vpop.f32.mrb[120].mxu0  ;;  %15037 = vst [vmem:[#allocation89_spill] sm:$0xff] %v13809_v53  ;;  %15038 = vst [vmem:[#allocation90_spill] sm:$0xff] %v13811_v18  ;;  %v13821_v49 = vrot.slane %v7616_v60, %v13185_v32  ;;  %v8361_v23 = vcombine.low %v13708_v45, %v13720_v19  ;;  %v15040_v38 = vrot.slane %v13757_v0, 2  ;;  %v7686_v37 = vcombine.low %v13710_v58, %v13722_v36  ;;  %v15066_v18 = vld [vmem:[#allocation33_spill] sm:$0xff] }
 0x590   : > { %v13797_v14 = vpop.f32.mrb[121].mxu1  ;;  %v7212_v48 = vpop.f32.mrb[121].mxu0  ;;  %15039 = vst [vmem:[#allocation91_spill] sm:$0xff] %v13813_v4  ;;  %v8321_v35 = vcombine.low %v13424_v39, %v8313_v15  ;;  %v8322_v56 = vcombine.high %v13424_v39, %v8313_v15  ;;  %v8323_v13 = vcombine.low %v13427_v5, %v8320_v25  ;;  %v8324_v29 = vcombine.high %v13427_v5, %v8320_v25  ;;  %v15077_v0 = vld [vmem:[#allocation46_spill] sm:$0xff] }
 0x591   : > { %v13807_v12 = vpop.f32.mrb[122].mxu1  ;;  %v10454_v8 = vpop.f32.mrb[122].mxu0  ;;  %v8766_v43 = vadd.f32 %v15040_v38, %v13697_v22  ;;  %v8375_v61 = vrot.slane %v8361_v23, %v13185_v32  ;;  %v7687_v19 = vcombine.high %v13710_v58, %v13722_v36  ;;  %v13838_v39 = vrot.slane %v7686_v37, %v13185_v32 }
 0x592   : > { %v7135_v26 = vpop.f32.mrb[123].mxu1  ;;  %v7214_v17 = vpop.f32.mrb[123].mxu0  ;;  %v8962_v45 = vrot.slane %v8321_v35, 6  ;;  %v8963_v2 = vrot.slane %v8322_v56, 6  ;;  %v8964_v30 = vrot.slane %v8323_v13, 6  ;;  %v8965_v54 = vrot.slane %v8324_v29, 6 }
 0x593   : > { %v8916_v41 = vadd.f32 %v8816_v3, %v8766_v43  ;;  %v8376_v62 = vcombine.low %v13450_v11, %v8375_v61  ;;  %v7702_v63 = vrot.slane %v7687_v19, %v13185_v32  ;;  %v7757_v36 = vcombine.low %v13730_v40, %v13736_v9 }
 0x594   : > { %v13845_v48 = vadd.f32 %v8962_v45, %v13777_v51  ;;  %v13847_v34 = vadd.f32 %v8963_v2, %v8913_v24  ;;  %v7758_v58 = vcombine.high %v13730_v40, %v13736_v9  ;;  %v13855_v11 = vadd.f32 %v8964_v30, %v8914_v21 }
 0x595   : > { %v13857_v60 = vadd.f32 %v8965_v54, %v8915_v6  ;;  %v8966_v8 = vrot.slane %v8376_v62, 6  ;;  %v7828_v51 = vcombine.low %v13765_v46, %v13770_v33  ;;  %v13866_v17 = vrot.slane %v7757_v36, %v13185_v32 }
 0x596   : > { %15041 = vst [vmem:[#allocation92_spill] sm:$0xff] %v13845_v48  ;;  %15042 = vst [vmem:[#allocation93_spill] sm:$0xff] %v13847_v34  ;;  %v13869_v40 = vrot.slane %v7758_v58, %v13185_v32  ;;  %v7829_v9 = vcombine.high %v13765_v46, %v13770_v33  ;;  %v7899_v21 = vcombine.low %v13775_v47, %v13782_v16  ;;  %v15049_v36 = vrot.slane %v13398_v57, 4 }
 0x597   : > { %v13842_v31 = vpop.f32.mrb[124].mxu1  ;;  %v10457_v5 = vpop.f32.mrb[124].mxu0  ;;  %15043 = vst [vmem:[#allocation94_spill] sm:$0xff] %v13855_v11  ;;  %15044 = vst [vmem:[#allocation95_spill] sm:$0xff] %v13857_v60  ;;  %v13879_v23 = vadd.f32 %v8966_v8, %v8916_v41  ;;  %v13882_v35 = vrot.slane %v7828_v51, %v13185_v32  ;;  %v7900_v56 = vcombine.high %v13775_v47, %v13782_v16  ;;  %v8774_v41 = vrot.slane %v13434_v52, 4 }
 0x598   : > { %v13853_v3 = vpop.f32.mrb[125].mxu1  ;;  %v7224_v50 = vpop.f32.mrb[125].mxu0  ;;  %v7970_v38 = vcombine.low %v13793_v28, %v13797_v14  ;;  %v13889_v33 = vrot.slane %v7829_v9, %v13185_v32  ;;  %v13892_v46 = vrot.slane %v7899_v21, %v13185_v32  ;;  %v7971_v43 = vcombine.high %v13793_v28, %v13797_v14  ;;  %v15050_v21 = vld [vmem:[#allocation32_spill] sm:$0xff] }
 0x599   : > { %v13861_v15 = vpop.f32.mrb[126].mxu1  ;;  %v13863_v24 = vpop.f32.mrb[126].mxu0  ;;  %15045 = vst [vmem:[#allocation96_spill] sm:$0xff] %v13879_v23  ;;  %v8041_v37 = vcombine.low %v13807_v12, %v7135_v26  ;;  %v13898_v13 = vrot.slane %v7900_v56, %v13185_v32  ;;  %v8042_v47 = vcombine.high %v13807_v12, %v7135_v26  ;;  %v7688_v16 = vcombine.high %v10457_v5, %v10457_v5 }
 0x59a   : > { %v13875_v6 = vpop.f32.mrb[127].mxu1  ;;  %v13877_v25 = vpop.f32.mrb[127].mxu0  ;;  %15046 = vst [vmem:[#allocation97_spill] sm:$0xff] %v13892_v46  ;;  %v13901_v29 = vrot.slane %v7970_v38, %v13185_v32  ;;  %v13905_v61 = vrot.slane %v7971_v43, %v13185_v32  ;;  %v7709_v45 = vrot.slane %v10457_v5, %v13185_v32  ;;  %v8773_v28 = vrot.slane %v13431_v44, 4  ;;  %v15051_v38 = vld [vmem:[#allocation36_spill] sm:$0xff] }
 0x59b   : > { %15047 = vst [vmem:[#allocation98_spill] sm:$0xff] %v13898_v13  ;;  %v13908_v19 = vrot.slane %v8041_v37, %v13185_v32  ;;  %v13913_v14 = vrot.slane %v8042_v47, %v13185_v32  ;;  %v7716_v2 = vrot.slane %v7688_v16, %v13185_v32  ;;  %v15048_v12 = vrot.slane %v13395_v10, 4  ;;  %v15052_v47 = vld [vmem:[#allocation37_spill] sm:$0xff]  ;;  %v15053_v16 = vld [vmem:[#allocation38_spill] sm:$0xff] }
 0x59c   : > { %v7717_v62 = vcombine.low %v13838_v39, %v7709_v45  ;;  %v13926_v5 = vcombine.high %v13838_v39, %v7709_v45  ;;  %v8872_v58 = vadd.f32 %v15049_v36, %v13421_v59  ;;  %v8873_v50 = vadd.f32 %v8773_v28, %v13389_v27  ;;  %v15054_v45 = vld [vmem:[#allocation39_spill] sm:$0xff] }
 0x59d   : > { %v8871_v26 = vadd.f32 %v15048_v12, %v13387_v7  ;;  %v13936_v7 = vcombine.low %v7702_v63, %v7716_v2  ;;  %v13938_v9 = vcombine.high %v7702_v63, %v7716_v2  ;;  %v8874_v56 = vadd.f32 %v8774_v41, %v15050_v21 }
 0x59e   : > { %v8921_v43 = vrot.slane %v15051_v38, 6  ;;  %v8922_v59 = vrot.slane %v15052_v47, 6  ;;  %v8923_v27 = vrot.slane %v15053_v16, 6  ;;  %v8924_v28 = vrot.slane %v15054_v45, 6 }
 0x59f   : > { %v13920_v30 = vpop.f32.mrb[128].mxu1  ;;  %v13922_v54 = vpop.f32.mrb[128].mxu0  ;;  %v8112_v23 = vcombine.low %v13842_v31, %v13853_v3  ;;  %v8113_v48 = vcombine.high %v13842_v31, %v13853_v3  ;;  %v15067_v53 = vrot.slane %v15052_v47, 4  ;;  %v15078_v22 = vrot.slane %v15077_v0, 6 }
 0x5a0   : > { %v13932_v8 = vpop.f32.mrb[129].mxu1  ;;  %v13934_v51 = vpop.f32.mrb[129].mxu0  ;;  %v9021_v2 = vadd.f32 %v8921_v43, %v8871_v26  ;;  %v9022_v60 = vadd.f32 %v8922_v59, %v8872_v58  ;;  %v9023_v11 = vadd.f32 %v8923_v27, %v8873_v50  ;;  %v9024_v34 = vadd.f32 %v8924_v28, %v8874_v56  ;;  %v15058_v50 = vld [vmem:[#allocation25_spill] sm:$0xff]  ;;  %v15065_v28 = vld [vmem:[#allocation35_spill] sm:$0xff] }
 0x5a1   : > { %v13942_v39 = vpop.f32.mrb[130].mxu1  ;;  %v13944_v37 = vpop.f32.mrb[130].mxu0  ;;  %v13961_v12 = vrot.slane %v8112_v23, %v13185_v32  ;;  %v7759_v26 = vcombine.high %v13863_v24, %v13863_v24  ;;  %v7780_v43 = vrot.slane %v13863_v24, %v13185_v32  ;;  %v13975_v31 = vrot.slane %v8113_v48, %v13185_v32  ;;  %v15059_v24 = vld [vmem:[#allocation31_spill] sm:$0xff] }
 0x5a2   : > { %v13950_v36 = vpop.f32.mrb[131].mxu1  ;;  %v13952_v63 = vpop.f32.mrb[131].mxu0  ;;  %v9071_v4 = vadd.f32 %v9021_v2, %v7717_v62  ;;  %v9072_v21 = vadd.f32 %v9022_v60, %v13926_v5  ;;  %v13969_v41 = vadd.f32 %v9023_v11, %v13936_v7  ;;  %v13972_v58 = vadd.f32 %v9024_v34, %v13938_v9  ;;  %v15063_v34 = vld [vmem:[#allocation26_spill] sm:$0xff] }
 0x5a3   : > { %15055 = vst [vmem:[#allocation32_spill] sm:$0xff] %v13961_v12  ;;  %15057 = vst [vmem:[#allocation37_spill] sm:$0xff] %v13975_v31  ;;  %v7787_v3 = vrot.slane %v7759_v26, %v13185_v32  ;;  %v13979_v23 = vcombine.low %v13866_v17, %v7780_v43  ;;  %v7789_v62 = vcombine.high %v13866_v17, %v7780_v43  ;;  %v15060_v56 = vrot.slane %v15059_v24, 2  ;;  %v15073_v31 = vld [vmem:[#allocation40_spill] sm:$0xff] }
 0x5a4   : > { %15056 = vst [vmem:[#allocation36_spill] sm:$0xff] %v13969_v41  ;;  %v15064_v27 = vrot.slane %v13395_v10, 2  ;;  %v8775_v2 = vrot.slane %v15065_v28, 4  ;;  %v8776_v26 = vrot.slane %v15051_v38, 4  ;;  %v8877_v17 = vadd.f32 %v15067_v53, %v15066_v18  ;;  %v15071_v10 = vld [vmem:[#allocation41_spill] sm:$0xff] }
 0x5a5   : > { %v8725_v60 = vadd.f32 %v15060_v56, %v15058_v50  ;;  %v14002_v50 = vcombine.low %v13869_v40, %v7787_v3  ;;  %v14005_v56 = vcombine.high %v13869_v40, %v7787_v3  ;;  %v8925_v38 = vrot.slane %v15073_v31, 6  ;;  %v15081_v3 = vld [vmem:[#allocation47_spill] sm:$0xff] }
 0x5a6   : > { %v8726_v48 = vadd.f32 %v15064_v27, %v15063_v34  ;;  %v15072_v34 = vrot.slane %v15053_v16, 4  ;;  %v9027_v1 = vadd.f32 %v15078_v22, %v8877_v17  ;;  %v9121_v41 = vrot.slane %v7789_v62, 2 }
 0x5a7   : > { %v13985_v59 = vpop.f32.mrb[132].mxu1  ;;  %v13987_v11 = vpop.f32.mrb[132].mxu0  ;;  %15070 = vst [vmem:[#allocation26_spill] sm:$0xff] %v14005_v56  ;;  %v8875_v53 = vadd.f32 %v8775_v2, %v8725_v60  ;;  %v15094_v2 = vld [vmem:[#allocation29_spill] sm:$0xff] }
 0x5a8   : > { %15061 = vst [vmem:[#allocation38_spill] sm:$0xff] %v13985_v59  ;;  %15062 = vst [vmem:[#allocation39_spill] sm:$0xff] %v13987_v11  ;;  %v13997_v43 = vpop.f32.mrb[133].mxu1  ;;  %v13999_v55 = vpop.f32.mrb[133].mxu0  ;;  %v8878_v27 = vadd.f32 %v15072_v34, %v15071_v10  ;;  %v8876_v18 = vadd.f32 %v8776_v26, %v8726_v48  ;;  %v15082_v11 = vrot.slane %v15081_v3, 6  ;;  %v9120_v34 = vrot.slane %v13979_v23, 2 }
 0x5a9   : > { %15068 = vst [vmem:[#allocation25_spill] sm:$0xff] %v13997_v43  ;;  %15069 = vst [vmem:[#allocation31_spill] sm:$0xff] %v13999_v55  ;;  %v14011_v12 = vpop.f32.mrb[134].mxu1  ;;  %v14013_v59 = vpop.f32.mrb[134].mxu0  ;;  %v15076_v43 = vld [vmem:[#allocation45_spill] sm:$0xff]  ;;  %v14027_v48 = vadd.f32 %v9027_v1, %v14002_v50  ;;  %v14033_v26 = vadd.f32 %v9121_v41, %v9071_v4  ;;  %v8183_v1 = vcombine.low %v13861_v15, %v13875_v6  ;;  %v15084_v41 = vld [vmem:[#allocation22_spill] sm:$0xff] }
 0x5aa   : > { %15074 = vst [vmem:[#allocation35_spill] sm:$0xff] %v14011_v12  ;;  %15075 = vst [vmem:[#allocation33_spill] sm:$0xff] %v14013_v59  ;;  %v8926_v55 = vrot.slane %v15076_v43, 6  ;;  %v14018_v20 = vpop.f32.mrb[135].mxu1  ;;  %v14020_v40 = vpop.f32.mrb[135].mxu0  ;;  %v9028_v10 = vadd.f32 %v15082_v11, %v8878_v27  ;;  %v9122_v12 = vrot.slane %v14002_v50, 2  ;;  %v9025_v59 = vadd.f32 %v8925_v38, %v8875_v53 }
 0x5ab   : > { %15079 = vst [vmem:[#allocation41_spill] sm:$0xff] %v14018_v20  ;;  %15080 = vst [vmem:[#allocation40_spill] sm:$0xff] %v14020_v40  ;;  %v9267_v11 = vrot.slane %v14002_v50, 4  ;;  %v8184_v38 = vcombine.high %v13861_v15, %v13875_v6  ;;  %v7617_v4 = vcombine.high %v13877_v25, %v13877_v25  ;;  %v14060_v53 = vrot.slane %v8183_v1, %v13185_v32 }
 0x5ac   : > { %v9026_v60 = vadd.f32 %v8926_v55, %v8876_v18  ;;  %v14031_v22 = vadd.f32 %v9028_v10, %v14005_v56  ;;  %v14035_v17 = vadd.f32 %v9122_v12, %v9072_v21  ;;  %v14039_v27 = vadd.f32 %v9025_v59, %v13979_v23  ;;  %v15085_v21 = vld [vmem:[#allocation27_spill] sm:$0xff]  ;;  %v15091_v10 = vld [vmem:[#allocation28_spill] sm:$0xff] }
 0x5ad   : > { %v9268_v55 = vrot.slane %v14005_v56, 4  ;;  %v7638_v12 = vrot.slane %v13877_v25, %v13185_v32  ;;  %v15086_v23 = vrot.slane %v15085_v21, 4  ;;  %15089 = vst [vmem:[#allocation22_spill] sm:$0xff] %v14060_v53  ;;  %v15090_v18 = vld [vmem:[#allocation23_spill] sm:$0xff]  ;;  %v15092_v15 = vrot.slane %v15091_v10, 4  ;;  %v15096_v25 = vld [vmem:[#allocation30_spill] sm:$0xff] }
 0x5ae   : > { %15083 = vst [vmem:[#allocation45_spill] sm:$0xff] %v14031_v22  ;;  %v14041_v40 = vadd.f32 %v9026_v60, %v7789_v62  ;;  %v15093_v60 = vld [vmem:[#allocation24_spill] sm:$0xff]  ;;  %v15095_v20 = vrot.slane %v15094_v2, 4  ;;  %v15097_v56 = vrot.slane %v15059_v24, 4  ;;  %v7645_v1 = vrot.slane %v7617_v4, %v13185_v32 }
 0x5af   : > { %v8867_v59 = vadd.f32 %v15086_v23, %v15084_v41  ;;  %v14055_v62 = vpop.f32.mrb[136].mxu1  ;;  %v14057_v50 = vpop.f32.mrb[136].mxu0  ;;  %v8868_v6 = vadd.f32 %v15092_v15, %v15090_v18  ;;  %v7646_v10 = vcombine.low %v13818_v42, %v7638_v12  ;;  %v7647_v18 = vcombine.high %v13818_v42, %v7638_v12 }
 0x5b0   : > { %15087 = vst [vmem:[#allocation46_spill] sm:$0xff] %v14055_v62  ;;  %15088 = vst [vmem:[#allocation47_spill] sm:$0xff] %v14057_v50  ;;  %v8869_v22 = vadd.f32 %v15095_v20, %v15093_v60  ;;  %v8870_v21 = vadd.f32 %v15097_v56, %v15096_v25  ;;  %v14071_v41 = vpop.f32.mrb[137].mxu1  ;;  %v14073_v23 = vpop.f32.mrb[137].mxu0  ;;  %v14076_v62 = vrot.slane %v8184_v38, %v13185_v32  ;;  %v8917_v60 = vrot.slane %v13398_v57, 6 }
 0x5b1   : > { %15098 = vst [vmem:[#allocation27_spill] sm:$0xff] %v14071_v41  ;;  %15099 = vst [vmem:[#allocation23_spill] sm:$0xff] %v14073_v23  ;;  %v14081_v15 = vpop.f32.mrb[138].mxu1  ;;  %v14083_v20 = vpop.f32.mrb[138].mxu0  ;;  %v8918_v56 = vrot.slane %v13431_v44, 6  ;;  %v8919_v25 = vrot.slane %v13434_v52, 6  ;;  %v7648_v4 = vcombine.low %v13821_v49, %v7645_v1  ;;  %v7649_v42 = vcombine.high %v13821_v49, %v7645_v1 }
 0x5b2   : > { %15100 = vst [vmem:[#allocation28_spill] sm:$0xff] %v14076_v62  ;;  %15101 = vst [vmem:[#allocation24_spill] sm:$0xff] %v14081_v15  ;;  %v8920_v23 = vrot.slane %v15065_v28, 6  ;;  %v14089_v38 = vpop.f32.mrb[139].mxu1  ;;  %v14091_v41 = vpop.f32.mrb[139].mxu0  ;;  %v7972_v12 = vcombine.high %v13922_v54, %v13922_v54  ;;  %v7993_v57 = vrot.slane %v13922_v54, %v13185_v32  ;;  %v9017_v15 = vadd.f32 %v8917_v60, %v8867_v59 }
 0x5b3   : > { %15102 = vst [vmem:[#allocation29_spill] sm:$0xff] %v14083_v20  ;;  %15103 = vst [vmem:[#allocation30_spill] sm:$0xff] %v14089_v38  ;;  %v9018_v20 = vadd.f32 %v8918_v56, %v8868_v6  ;;  %v9019_v50 = vadd.f32 %v8919_v25, %v8869_v22  ;;  %v15105_v49 = vrot.slane %v15077_v0, 2  ;;  %v15106_v6 = vrot.slane %v15081_v3, 2  ;;  %v15114_v25 = vld [vmem:[#allocation54_spill] sm:$0xff] }
 0x5b4   : > { %15104 = vst [vmem:[#allocation99_spill] sm:$0xff] %v14091_v41  ;;  %v9020_v62 = vadd.f32 %v8920_v23, %v8870_v21  ;;  %v8000_v53 = vrot.slane %v7972_v12, %v13185_v32  ;;  %v14101_v38 = vcombine.low %v13901_v29, %v7993_v57  ;;  %v14104_v41 = vcombine.high %v13901_v29, %v7993_v57  ;;  %v15107_v29 = vld [vmem:[#allocation51_spill] sm:$0xff] }
 0x5b5   : > { %v8737_v1 = vadd.f32 %v15105_v49, %v15052_v47  ;;  %v9067_v13 = vadd.f32 %v9017_v15, %v7646_v10  ;;  %v9068_v46 = vadd.f32 %v9018_v20, %v7647_v18  ;;  %v9069_v44 = vadd.f32 %v9019_v50, %v7648_v4  ;;  %v15115_v4 = vld [vmem:[#allocation57_spill] sm:$0xff]  ;;  %v15117_v57 = vld [vmem:[#allocation55_spill] sm:$0xff]  ;;  %v15118_v49 = vld [vmem:[#allocation58_spill] sm:$0xff] }
 0x5b6   : > { %v9070_v54 = vadd.f32 %v9020_v62, %v7649_v42  ;;  %v14110_v59 = vcombine.low %v13905_v61, %v8000_v53  ;;  %v14113_v22 = vcombine.high %v13905_v61, %v8000_v53  ;;  %v8738_v21 = vadd.f32 %v15106_v6, %v15053_v16  ;;  %v15112_v61 = vld [vmem:[#allocation52_spill] sm:$0xff] }
 0x5b7   : > { %v15108_v23 = vrot.slane %v15107_v29, 4  ;;  %v15109_v56 = vrot.slane %v13926_v5, 2  ;;  %v15110_v10 = vrot.slane %v13936_v7, 2  ;;  %v15111_v62 = vrot.slane %v13938_v9, 2  ;;  %v15121_v9 = vld [vmem:[#allocation63_spill] sm:$0xff] }
 0x5b8   : > { %v14128_v15 = vadd.f32 %v9120_v34, %v9070_v54  ;;  %v15113_v53 = vrot.slane %v15112_v61, 4  ;;  %v15116_v42 = vrot.slane %v15115_v4, 4  ;;  %v15119_v5 = vrot.slane %v15118_v49, 4  ;;  %v15139_v34 = vld [vmem:[#allocation50_spill] sm:$0xff] }
 0x5b9   : > { %v8887_v60 = vadd.f32 %v15108_v23, %v8737_v1  ;;  %v9217_v47 = vadd.f32 %v15109_v56, %v9067_v13  ;;  %v9218_v50 = vadd.f32 %v15110_v10, %v9068_v46  ;;  %v14126_v18 = vadd.f32 %v15111_v62, %v9069_v44  ;;  %v15120_v1 = vld [vmem:[#allocation60_spill] sm:$0xff]  ;;  %v15124_v10 = vld [vmem:[#allocation65_spill] sm:$0xff] }
 0x5ba   : > { %v8888_v20 = vadd.f32 %v15113_v53, %v8738_v21  ;;  %v8889_v12 = vadd.f32 %v15116_v42, %v15114_v25  ;;  %v8890_v13 = vadd.f32 %v15119_v5, %v15117_v57  ;;  %v8937_v7 = vrot.slane %v15120_v1, 6  ;;  %v15122_v23 = vld [vmem:[#allocation64_spill] sm:$0xff]  ;;  %v15138_v5 = vld [vmem:[#allocation49_spill] sm:$0xff] }
 0x5bb   : > { %v9367_v46 = vadd.f32 %v9267_v11, %v9217_v47  ;;  %v9368_v6 = vadd.f32 %v9268_v55, %v9218_v50  ;;  %v8938_v44 = vrot.slane %v15121_v9, 6  ;;  %v15123_v56 = vrot.slane %v15122_v23, 6  ;;  %v15137_v57 = vld [vmem:[#allocation48_spill] sm:$0xff] }
 0x5bc   : > { %v9037_v54 = vadd.f32 %v8937_v7, %v8887_v60  ;;  %v15125_v62 = vrot.slane %v15124_v10, 6  ;;  %v9277_v50 = vrot.slane %v14101_v38, 4  ;;  %v15133_v7 = vld [vmem:[#allocation43_spill] sm:$0xff]  ;;  %v8930_v25 = vrot.slane %v15138_v5, 6 }
 0x5bd   : > { %v9039_v21 = vadd.f32 %v15123_v56, %v8889_v12  ;;  %v9487_v42 = vcombine.low %v9367_v46, %v9368_v6  ;;  %v9038_v49 = vadd.f32 %v8938_v44, %v8888_v20  ;;  %v8254_v46 = vcombine.low %v13920_v30, %v13932_v8 }
 0x5be   : > { %v9040_v53 = vadd.f32 %v15125_v62, %v8890_v13  ;;  %v14149_v55 = vadd.f32 %v9037_v54, %v14101_v38  ;;  %v8255_v6 = vcombine.high %v13920_v30, %v13932_v8  ;;  %v7830_v44 = vcombine.high %v13934_v51, %v13934_v51 }
 0x5bf   : > { %v14152_v47 = vadd.f32 %v9039_v21, %v14110_v59  ;;  %v14159_v12 = vrot.slane %v9487_v42, %v13185_v32  ;;  %v14162_v20 = vadd.f32 %v9038_v49, %v14104_v41  ;;  %v7851_v54 = vrot.slane %v13934_v51, %v13185_v32 }
 0x5c0   : > { %v14155_v60 = vadd.f32 %v9040_v53, %v14113_v22  ;;  %v15128_v49 = vrot.slane %v13434_v52, 2  ;;  %v15129_v21 = vrot.slane %v15065_v28, 2  ;;  %v15130_v53 = vld [vmem:[#allocation42_spill] sm:$0xff]  ;;  %v15131_v42 = vrot.slane %v15076_v43, 4 }
 0x5c1   : > { %15126 = vst [vmem:[#allocation51_spill] sm:$0xff] %v14152_v47  ;;  %v14185_v30 = vrot.slane %v8254_v46, %v13185_v32  ;;  %v14188_v8 = vrot.slane %v8255_v6, %v13185_v32  ;;  %v7858_v51 = vrot.slane %v7830_v44, %v13185_v32  ;;  %v15134_v13 = vrot.slane %v15077_v0, 4 }
 0x5c2   : > { %15127 = vst [vmem:[#allocation52_spill] sm:$0xff] %v14155_v60  ;;  %v8729_v56 = vadd.f32 %v15128_v49, %v15094_v2  ;;  %v8730_v62 = vadd.f32 %v15129_v21, %v15059_v24  ;;  %v8881_v11 = vadd.f32 %v15131_v42, %v15130_v53  ;;  %v7859_v49 = vcombine.low %v13882_v35, %v7851_v54 }
 0x5c3   : > { %15132 = vst [vmem:[#allocation54_spill] sm:$0xff] %v14188_v8  ;;  %v8882_v2 = vadd.f32 %v15134_v13, %v15133_v7  ;;  %v7860_v24 = vcombine.high %v13882_v35, %v7851_v54  ;;  %v15135_v28 = vrot.slane %v15054_v45, 4  ;;  %v15136_v53 = vrot.slane %v15073_v31, 4 }
 0x5c4   : > { %v7861_v42 = vcombine.low %v13889_v33, %v7858_v51  ;;  %v7862_v6 = vcombine.high %v13889_v33, %v7858_v51  ;;  %v8929_v44 = vrot.slane %v15137_v57, 6  ;;  %v15140_v13 = vrot.slane %v15139_v34, 6 }
 0x5c5   : > { %v8879_v21 = vadd.f32 %v15135_v28, %v8729_v56  ;;  %v8880_v46 = vadd.f32 %v15136_v53, %v8730_v62  ;;  %v15141_v47 = vrot.slane %v15107_v29, 6  ;;  %v9124_v54 = vrot.slane %v7859_v49, 2 }
 0x5c6   : > { %v9031_v7 = vadd.f32 %v15140_v13, %v8881_v11  ;;  %v9125_v60 = vrot.slane %v7860_v24, 2  ;;  %v9126_v31 = vrot.slane %v7861_v42, 2  ;;  %v9127_v62 = vrot.slane %v7862_v6, 2 }
 0x5c7   : > { %v9032_v35 = vadd.f32 %v15141_v47, %v8882_v2  ;;  %v9029_v56 = vadd.f32 %v8929_v44, %v8879_v21  ;;  %v9030_v28 = vadd.f32 %v8930_v25, %v8880_v46  ;;  %v14211_v33 = vadd.f32 %v9124_v54, %v13972_v58 }
 0x5c8   : > { %v14208_v53 = vadd.f32 %v9031_v7, %v7861_v42  ;;  %v14214_v51 = vadd.f32 %v9125_v60, %v14039_v27  ;;  %v14221_v47 = vadd.f32 %v9126_v31, %v14041_v40  ;;  %v9227_v25 = vadd.f32 %v9127_v62, %v14027_v48  ;;  %v9418_v31 = vld [vmem:[%s11611_s5 + $0x8] sm:$0x3] }
 0x5c9   : > { %v9082_v10 = vadd.f32 %v9032_v35, %v7862_v6  ;;  %v14216_v8 = vadd.f32 %v9029_v56, %v7859_v49  ;;  %v14218_v11 = vadd.f32 %v9030_v28, %v7860_v24  ;;  %v9269_v2 = vrot.slane %v7859_v49, 4  ;;  %v15146_v56 = vld [vmem:[#allocation56_spill] sm:$0xff] }
 0x5ca   : > { %v9270_v21 = vrot.slane %v7860_v24, 4  ;;  %v9271_v46 = vrot.slane %v7861_v42, 4  ;;  %v9272_v44 = vrot.slane %v7862_v6, 4  ;;  %v14224_v13 = vadd.f32 %v9277_v50, %v9227_v25  ;;  %v15150_v25 = vld [vmem:[#allocation61_spill] sm:$0xff] }
 0x5cb   : > { %v8043_v58 = vcombine.high %v13944_v37, %v13944_v37  ;;  %v8064_v27 = vrot.slane %v13944_v37, %v13185_v32  ;;  %v15142_v60 = vrot.slane %v15139_v34, 2  ;;  %v9369_v7 = vadd.f32 %v9269_v2, %v14126_v18 }
 0x5cc   : > { %v9370_v48 = vadd.f32 %v9270_v21, %v14128_v15  ;;  %v9371_v49 = vadd.f32 %v9271_v46, %v14033_v26  ;;  %v14237_v50 = vadd.f32 %v9272_v44, %v14035_v17  ;;  %v15143_v6 = vrot.slane %v15107_v29, 2  ;;  %v15144_v15 = vld [vmem:[#allocation59_spill] sm:$0xff] }
 0x5cd   : > { %v8741_v40 = vadd.f32 %v15142_v60, %v15076_v43  ;;  %v8071_v24 = vrot.slane %v8043_v58, %v13185_v32  ;;  %v14241_v42 = vcombine.low %v13908_v19, %v8064_v27  ;;  %v8073_v37 = vcombine.high %v13908_v19, %v8064_v27  ;;  %v15152_v58 = vld [vmem:[#allocation66_spill] sm:$0xff]  ;;  %v15153_v60 = vld [vmem:[#allocation67_spill] sm:$0xff] }
 0x5ce   : > { %v8742_v43 = vadd.f32 %v15143_v6, %v15077_v0  ;;  %v9488_v35 = vcombine.low %v9369_v7, %v9370_v48  ;;  %v9510_v18 = vrot.slane %v9371_v49, %v13185_v32  ;;  %v15145_v54 = vrot.slane %v15144_v15, 4  ;;  %v15154_v7 = vld [vmem:[#allocation69_spill] sm:$0xff] }
 0x5cf   : > { %v15147_v17 = vrot.slane %v15121_v9, 4  ;;  %v14255_v62 = vcombine.low %v13913_v14, %v8071_v24  ;;  %v14258_v19 = vcombine.high %v13913_v14, %v8071_v24  ;;  %v15149_v0 = vrot.slane %v15120_v1, 4  ;;  %v15156_v14 = vld [vmem:[#allocation70_spill] sm:$0xff]  ;;  %v15177_v1 = vld [vmem:[#allocation45_spill] sm:$0xff] }
 0x5d0   : > { %v8891_v26 = vadd.f32 %v15145_v54, %v8741_v40  ;;  %v15151_v2 = vrot.slane %v15122_v23, 4  ;;  %v9502_v46 = vrot.slane %v9488_v35, %v13185_v32  ;;  %v9748_v44 = vadd.f32 %v9510_v18, %v9418_v31 }
 0x5d1   : > { %v8893_v28 = vadd.f32 %v15147_v17, %v15146_v56  ;;  %15148 = vst [vmem:[#allocation55_spill] sm:$0xff] %v14258_v19  ;;  %v8892_v29 = vadd.f32 %v15149_v0, %v8742_v43  ;;  %v8941_v27 = vrot.slane %v15152_v58, 6  ;;  %v8942_v40 = vrot.slane %v15153_v60, 6  ;;  %v9417_v17 = vld [vmem:[%s11611_s5] sm:$0xff]  ;;  %v15174_v0 = vld [vmem:[#allocation36_spill] sm:$0xff] }
 0x5d2   : > { %v8894_v21 = vadd.f32 %v15151_v2, %v15150_v25  ;;  %v15155_v48 = vrot.slane %v15154_v7, 6  ;;  %v15157_v24 = vrot.slane %v15156_v14, 6  ;;  %v9137_v43 = vrot.slane %v8073_v37, 2  ;;  %9768 = vst [vmem:[%s11611_s5 + $0x8] sm:$0x3] %v9748_v44 }
 0x5d3   : > { %v9503_v54 = vcombine.low %v14159_v12, %v9502_v46  ;;  %v9041_v56 = vadd.f32 %v8941_v27, %v8891_v26  ;;  %v9042_v35 = vadd.f32 %v8942_v40, %v8892_v29  ;;  %v9138_v18 = vrot.slane %v14255_v62, 2 }
 0x5d4   : > { %v9043_v49 = vadd.f32 %v15155_v48, %v8893_v28  ;;  %v9044_v6 = vadd.f32 %v15157_v24, %v8894_v21  ;;  %v15159_v25 = vrot.slane %v14101_v38, 2  ;;  %v14292_v29 = vadd.f32 %v9137_v43, %v14149_v55 }
 0x5d5   : > { %v9747_v21 = vadd.f32 %v9503_v54, %v9417_v17  ;;  %v14287_v12 = vadd.f32 %v9041_v56, %v14241_v42  ;;  %v14289_v26 = vadd.f32 %v9042_v35, %v8073_v37  ;;  %v14295_v46 = vadd.f32 %v9138_v18, %v14162_v20  ;;  %v15163_v56 = vld [vmem:[#allocation44_spill] sm:$0xff]  ;;  %v15165_v18 = vld [vmem:[#allocation97_spill] sm:$0xff] }
 0x5d6   : > { %v14278_v31 = vadd.f32 %v9043_v49, %v14255_v62  ;;  %v14281_v28 = vadd.f32 %v9044_v6, %v14258_v19  ;;  %v9232_v2 = vadd.f32 %v15159_v25, %v9082_v10  ;;  %v9281_v44 = vrot.slane %v14241_v42, 4 }
 0x5d7   : > { %v9282_v27 = vrot.slane %v8073_v37, 4  ;;  %v9283_v40 = vrot.slane %v14255_v62, 4  ;;  %9767 = vst [vmem:[%s11611_s5] sm:$0xff] %v9747_v21  ;;  %v9284_v38 = vrot.slane %v14258_v19, 4  ;;  %v8325_v10 = vcombine.low %v13942_v39, %v13950_v36  ;;  %v15160_v37 = vld [vmem:[#allocation34_spill] sm:$0xff] }
 0x5d8   : > { %15158 = vst [vmem:[#allocation60_spill] sm:$0xff] %v14281_v28  ;;  %v8326_v48 = vcombine.high %v13942_v39, %v13950_v36  ;;  %v7901_v55 = vcombine.high %v13952_v63, %v13952_v63  ;;  %v7922_v20 = vrot.slane %v13952_v63, %v13185_v32  ;;  %v15161_v62 = vrot.slane %v15053_v16, 2  ;;  %v15168_v21 = vld [vmem:[#allocation98_spill] sm:$0xff] }
 0x5d9   : > { %v14307_v49 = vadd.f32 %v9282_v27, %v9232_v2  ;;  %v15162_v6 = vrot.slane %v15054_v45, 2  ;;  %v14318_v54 = vrot.slane %v8325_v10, %v13185_v32  ;;  %v15164_v35 = vrot.slane %v15138_v5, 4 }
 0x5da   : > { %v8733_v24 = vadd.f32 %v15161_v62, %v15160_v37  ;;  %v14321_v39 = vrot.slane %v8326_v48, %v13185_v32  ;;  %v7929_v36 = vrot.slane %v7901_v55, %v13185_v32  ;;  %v7930_v17 = vcombine.low %v15165_v18, %v7922_v20  ;;  %v15169_v48 = vld [vmem:[#allocation53_spill] sm:$0xff] }
 0x5db   : > { %v8734_v43 = vadd.f32 %v15162_v6, %v13434_v52  ;;  %v8885_v63 = vadd.f32 %v15164_v35, %v15163_v56  ;;  %v7931_v16 = vcombine.high %v15165_v18, %v7922_v20  ;;  %v15166_v25 = vrot.slane %v15081_v3, 4  ;;  %v15171_v56 = vld [vmem:[#allocation58_spill] sm:$0xff] }
 0x5dc   : > { %v15167_v52 = vrot.slane %v15137_v57, 4  ;;  %v7932_v27 = vcombine.low %v15168_v21, %v7929_v36  ;;  %v7933_v10 = vcombine.high %v15168_v21, %v7929_v36  ;;  %v15170_v55 = vrot.slane %v15139_v34, 4 }
 0x5dd   : > { %v8883_v45 = vadd.f32 %v15166_v25, %v8733_v24  ;;  %v8933_v62 = vrot.slane %v15112_v61, 6  ;;  %v8934_v6 = vrot.slane %v15115_v4, 6  ;;  %v15172_v20 = vrot.slane %v15171_v56, 6 }
 0x5de   : > { %v8884_v2 = vadd.f32 %v15167_v52, %v8734_v43  ;;  %v8886_v37 = vadd.f32 %v15170_v55, %v15169_v48  ;;  %v9128_v3 = vrot.slane %v7930_v17, 2  ;;  %v9129_v24 = vrot.slane %v7931_v16, 2  ;;  %v15175_v48 = vld [vmem:[#allocation26_spill] sm:$0xff] }
 0x5df   : > { %v9035_v35 = vadd.f32 %v15172_v20, %v8885_v63  ;;  %v9033_v18 = vadd.f32 %v8933_v62, %v8883_v45  ;;  %v15173_v57 = vrot.slane %v15144_v15, 6  ;;  %v9130_v25 = vrot.slane %v7932_v27, 2 }
 0x5e0   : > { %v9131_v52 = vrot.slane %v7933_v10, 2  ;;  %v9034_v36 = vadd.f32 %v8934_v6, %v8884_v2  ;;  %v15176_v55 = vrot.slane %v15175_v48, 2  ;;  %v9228_v28 = vadd.f32 %v9128_v3, %v15177_v1 }
 0x5e1   : > { %v9036_v43 = vadd.f32 %v15173_v57, %v8886_v37  ;;  %v14344_v21 = vadd.f32 %v9035_v35, %v7932_v27  ;;  %v9083_v19 = vadd.f32 %v9033_v18, %v7930_v17  ;;  %v9229_v63 = vadd.f32 %v9129_v24, %v14216_v8 }
 0x5e2   : > { %v9223_v61 = vadd.f32 %v15176_v55, %v15174_v0  ;;  %v9230_v45 = vadd.f32 %v9130_v25, %v14218_v11  ;;  %v9084_v62 = vadd.f32 %v9034_v36, %v7931_v16  ;;  %v9231_v37 = vadd.f32 %v9131_v52, %v14208_v53 }
 0x5e3   : > { %v14350_v4 = vadd.f32 %v9036_v43, %v7933_v10  ;;  %v9273_v20 = vrot.slane %v7930_v17, 4  ;;  %v9274_v2 = vrot.slane %v7931_v16, 4  ;;  %v15178_v6 = vrot.slane %v14104_v41, 2 }
 0x5e4   : > { %v9275_v57 = vrot.slane %v7932_v27, 4  ;;  %v9276_v48 = vrot.slane %v7933_v10, 4  ;;  %v15179_v0 = vrot.slane %v14104_v41, 4  ;;  %v15180_v3 = vrot.slane %v14110_v59, 2 }
 0x5e5   : > { %v9233_v35 = vadd.f32 %v15178_v6, %v9083_v19  ;;  %v9373_v8 = vadd.f32 %v9273_v20, %v9223_v61  ;;  %v9374_v11 = vadd.f32 %v9274_v2, %v14211_v33  ;;  %v15181_v53 = vrot.slane %v14110_v59, 4 }
 0x5e6   : > { %v9378_v1 = vadd.f32 %v15179_v0, %v9228_v28  ;;  %v9234_v18 = vadd.f32 %v15180_v3, %v9084_v62  ;;  %v9375_v16 = vadd.f32 %v9275_v57, %v14214_v51  ;;  %v9376_v19 = vadd.f32 %v9276_v48, %v14221_v47  ;;  %v9420_v51 = vld [vmem:[%s11611_s5 + $0x18] sm:$0x3]  ;;  %v9422_v47 = vld [vmem:[%s11611_s5 + $0x28] sm:$0x3]  ;;  %v15186_v0 = vld [vmem:[#allocation74_spill] sm:$0xff] }
 0x5e7   : > { %v9379_v17 = vadd.f32 %v15181_v53, %v9229_v63  ;;  %v15182_v27 = vrot.slane %v14113_v22, 4  ;;  %v9381_v41 = vadd.f32 %v9281_v44, %v9231_v37  ;;  %v9383_v28 = vadd.f32 %v9283_v40, %v9233_v35 }
 0x5e8   : > { %v14368_v24 = vadd.f32 %v9284_v38, %v9234_v18  ;;  %v9511_v43 = vcombine.low %v14237_v50, %v9373_v8  ;;  %v9535_v25 = vcombine.low %v14224_v13, %v9378_v1  ;;  %v9512_v52 = vcombine.low %v9374_v11, %v9375_v16  ;;  %v15183_v38 = vld [vmem:[#allocation39_spill] sm:$0xff]  ;;  %v9419_v8 = vld [vmem:[%s11611_s5 + $0x10] sm:$0xff]  ;;  %v9421_v11 = vld [vmem:[%s11611_s5 + $0x20] sm:$0xff] }
 0x5e9   : > { %v9380_v10 = vadd.f32 %v15182_v27, %v9230_v45  ;;  %v9534_v33 = vrot.slane %v9376_v19, %v13185_v32  ;;  %v9558_v36 = vrot.slane %v9381_v41, %v13185_v32  ;;  %v9559_v40 = vcombine.low %v14307_v49, %v9383_v28  ;;  %v15187_v1 = vld [vmem:[#allocation79_spill] sm:$0xff]  ;;  %v15190_v41 = vld [vmem:[#allocation77_spill] sm:$0xff] }
 0x5ea   : > { %v9519_v55 = vrot.slane %v9511_v43, %v13185_v32  ;;  %v9543_v44 = vrot.slane %v9535_v25, %v13185_v32  ;;  %v8256_v13 = vcombine.high %v15183_v38, %v15183_v38  ;;  %v9526_v50 = vrot.slane %v9512_v52, %v13185_v32  ;;  %v15192_v25 = vld [vmem:[#allocation78_spill] sm:$0xff] }
 0x5eb   : > { %v9536_v59 = vcombine.low %v9379_v17, %v9380_v10  ;;  %v9750_v63 = vadd.f32 %v9534_v33, %v9420_v51  ;;  %v9752_v45 = vadd.f32 %v9558_v36, %v9422_v47  ;;  %v14384_v62 = vrot.slane %v9559_v40, %v13185_v32  ;;  %v15189_v17 = vld [vmem:[#allocation54_spill] sm:$0xff]  ;;  %v15195_v36 = vld [vmem:[#allocation80_spill] sm:$0xff] }
 0x5ec   : > { %v8277_v37 = vrot.slane %v15183_v38, %v13185_v32  ;;  %v8284_v20 = vrot.slane %v8256_v13, %v13185_v32  ;;  %v15184_v49 = vrot.slane %v15154_v7, 2  ;;  %v9527_v6 = vcombine.low %v9519_v55, %v9526_v50  ;;  %v15199_v13 = vld [vmem:[#allocation83_spill] sm:$0xff] }
 0x5ed   : > { %v9550_v61 = vrot.slane %v9536_v59, %v13185_v32  ;;  %9770 = vst [vmem:[%s11611_s5 + $0x18] sm:$0x3] %v9750_v63  ;;  %9772 = vst [vmem:[%s11611_s5 + $0x28] sm:$0x3] %v9752_v45  ;;  %v15185_v57 = vrot.slane %v15156_v14, 2  ;;  %v15188_v3 = vrot.slane %v15187_v1, 4 }
 0x5ee   : > { %v8753_v2 = vadd.f32 %v15184_v49, %v15121_v9  ;;  %v14403_v53 = vcombine.low %v14185_v30, %v8277_v37  ;;  %v14406_v9 = vcombine.high %v14185_v30, %v8277_v37  ;;  %v14409_v16 = vcombine.low %v15189_v17, %v8284_v20  ;;  %v15194_v59 = vld [vmem:[#allocation81_spill] sm:$0xff]  ;;  %v15201_v63 = vld [vmem:[#allocation84_spill] sm:$0xff] }
 0x5ef   : > { %v9551_v35 = vcombine.low %v9543_v44, %v9550_v61  ;;  %v8754_v48 = vadd.f32 %v15185_v57, %v15122_v23  ;;  %v8905_v18 = vadd.f32 %v15188_v3, %v15186_v0  ;;  %v14412_v19 = vcombine.high %v15189_v17, %v8284_v20  ;;  %v15197_v30 = vld [vmem:[#allocation85_spill] sm:$0xff] }
 0x5f0   : > { %v9749_v27 = vadd.f32 %v9527_v6, %v9419_v8  ;;  %v15191_v28 = vrot.slane %v15190_v41, 4  ;;  %v15193_v52 = vrot.slane %v15192_v25, 4  ;;  %v15196_v51 = vrot.slane %v15195_v36, 4 }
 0x5f1   : > { %v9751_v10 = vadd.f32 %v9551_v35, %v9421_v11  ;;  %v15198_v55 = vrot.slane %v15197_v30, 6  ;;  %v9148_v40 = vrot.slane %v14403_v53, 2  ;;  %v9149_v38 = vrot.slane %v14406_v9, 2 }
 0x5f2   : > { %v8903_v43 = vadd.f32 %v15191_v28, %v8753_v2  ;;  %v8904_v33 = vadd.f32 %v15193_v52, %v8754_v48  ;;  %v8906_v47 = vadd.f32 %v15196_v51, %v15194_v59  ;;  %9769 = vst [vmem:[%s11611_s5 + $0x10] sm:$0xff] %v9749_v27  ;;  %v15200_v50 = vrot.slane %v15199_v13, 6  ;;  %v15203_v2 = vld [vmem:[#allocation86_spill] sm:$0xff]  ;;  %v15205_v27 = vld [vmem:[#allocation25_spill] sm:$0xff]  ;;  %v15207_v52 = vld [vmem:[#allocation31_spill] sm:$0xff] }
 0x5f3   : > { %v9055_v44 = vadd.f32 %v15198_v55, %v8905_v18  ;;  %9771 = vst [vmem:[%s11611_s5 + $0x20] sm:$0xff] %v9751_v10  ;;  %v15202_v45 = vrot.slane %v15201_v63, 6  ;;  %v9150_v20 = vrot.slane %v14409_v16, 2  ;;  %v15204_v6 = vrot.slane %v15203_v2, 6  ;;  %v15206_v10 = vld [vmem:[#allocation38_spill] sm:$0xff] }
 0x5f4   : > { %v9053_v61 = vadd.f32 %v15200_v50, %v8903_v43  ;;  %v9293_v48 = vrot.slane %v14403_v53, 4  ;;  %v8377_v28 = vcombine.low %v15206_v10, %v15205_v27  ;;  %v8378_v43 = vcombine.high %v15206_v10, %v15205_v27 }
 0x5f5   : > { %v9054_v37 = vadd.f32 %v15202_v45, %v8904_v33  ;;  %v9056_v35 = vadd.f32 %v15204_v6, %v8906_v47  ;;  %v14436_v57 = vadd.f32 %v9055_v44, %v14409_v16  ;;  %v8114_v33 = vcombine.high %v15207_v52, %v15207_v52  ;;  %v15210_v44 = vld [vmem:[#allocation62_spill] sm:$0xff]  ;;  %v15214_v6 = vld [vmem:[#allocation32_spill] sm:$0xff] }
 0x5f6   : > { %v14441_v3 = vadd.f32 %v9053_v61, %v14403_v53  ;;  %v8135_v59 = vrot.slane %v15207_v52, %v13185_v32  ;;  %v15208_v51 = vrot.slane %v15171_v56, 2  ;;  %v15209_v30 = vrot.slane %v15144_v15, 2  ;;  %v15215_v15 = vld [vmem:[#allocation65_spill] sm:$0xff] }
 0x5f7   : > { %v14444_v18 = vadd.f32 %v9054_v37, %v14406_v9  ;;  %v14449_v17 = vadd.f32 %v9056_v35, %v14412_v19  ;;  %v15211_v13 = vrot.slane %v15153_v60, 4  ;;  %v14469_v61 = vrot.slane %v8377_v28, %v13185_v32  ;;  %v15212_v37 = vld [vmem:[#allocation68_spill] sm:$0xff]  ;;  %v15218_v52 = vld [vmem:[#allocation37_spill] sm:$0xff] }
 0x5f8   : > { %v8745_v47 = vadd.f32 %v15208_v51, %v15138_v5  ;;  %v8746_v55 = vadd.f32 %v15209_v30, %v15139_v34  ;;  %v14472_v63 = vrot.slane %v8378_v43, %v13185_v32  ;;  %v8142_v45 = vrot.slane %v8114_v33, %v13185_v32  ;;  %v15219_v30 = vld [vmem:[#allocation72_spill] sm:$0xff] }
 0x5f9   : > { %v8897_v50 = vadd.f32 %v15211_v13, %v15210_v44  ;;  %v15213_v2 = vrot.slane %v15154_v7, 4  ;;  %v8143_v35 = vcombine.low %v15214_v6, %v8135_v59  ;;  %v8144_v34 = vcombine.high %v15214_v6, %v8135_v59  ;;  %v15220_v44 = vld [vmem:[#allocation75_spill] sm:$0xff]  ;;  %v15221_v7 = vld [vmem:[#allocation76_spill] sm:$0xff] }
 0x5fa   : > { %v15216_v27 = vrot.slane %v15215_v15, 4  ;;  %v15217_v10 = vrot.slane %v15152_v58, 4  ;;  %v8145_v51 = vcombine.low %v15218_v52, %v8142_v45  ;;  %v8146_v43 = vcombine.high %v15218_v52, %v8142_v45 }
 0x5fb   : > { %v8898_v5 = vadd.f32 %v15213_v2, %v15212_v37  ;;  %v8945_v33 = vrot.slane %v15219_v30, 6  ;;  %v8946_v13 = vrot.slane %v15220_v44, 6  ;;  %v15222_v37 = vrot.slane %v15221_v7, 6 }
 0x5fc   : > { %v8895_v60 = vadd.f32 %v15216_v27, %v8745_v47  ;;  %v8896_v28 = vadd.f32 %v15217_v10, %v8746_v55  ;;  %v15223_v49 = vrot.slane %v15190_v41, 6  ;;  %v9140_v6 = vrot.slane %v8143_v35, 2 }
 0x5fd   : > { %v9047_v2 = vadd.f32 %v15222_v37, %v8897_v50  ;;  %v9141_v11 = vrot.slane %v8144_v34, 2  ;;  %v9142_v58 = vrot.slane %v8145_v51, 2  ;;  %v9143_v55 = vrot.slane %v8146_v43, 2 }
 0x5fe   : > { %v9048_v59 = vadd.f32 %v15223_v49, %v8898_v5  ;;  %v9045_v47 = vadd.f32 %v8945_v33, %v8895_v60  ;;  %v9046_v27 = vadd.f32 %v8946_v13, %v8896_v28  ;;  %v15224_v45 = vrot.slane %v14113_v22, 2  ;;  %v15226_v49 = vld [vmem:[#allocation52_spill] sm:$0xff] }
 0x5ff   : > { %v14492_v10 = vadd.f32 %v9047_v2, %v8145_v51  ;;  %v15225_v0 = vrot.slane %v14241_v42, 2  ;;  %v14505_v5 = vadd.f32 %v9140_v6, %v15226_v49  ;;  %v14508_v60 = vadd.f32 %v9141_v11, %v14287_v12  ;;  %v15227_v42 = vld [vmem:[#allocation33_spill] sm:$0xff] }
 0x600   : > { %v9098_v8 = vadd.f32 %v9048_v59, %v8146_v43  ;;  %v9235_v52 = vadd.f32 %v15224_v45, %v14344_v21  ;;  %v14500_v37 = vadd.f32 %v9045_v47, %v8143_v35  ;;  %v14502_v41 = vadd.f32 %v9046_v27, %v8144_v34  ;;  %v15229_v27 = vld [vmem:[#allocation35_spill] sm:$0xff]  ;;  %v15231_v45 = vld [vmem:[#allocation88_spill] sm:$0xff] }
 0x601   : > { %v9236_v50 = vadd.f32 %v15225_v0, %v14350_v4  ;;  %v14511_v28 = vadd.f32 %v9142_v58, %v14289_v26  ;;  %v9243_v22 = vadd.f32 %v9143_v55, %v14278_v31  ;;  %v9285_v21 = vrot.slane %v8143_v35, 4  ;;  %v15230_v58 = vld [vmem:[#allocation87_spill] sm:$0xff] }
 0x602   : > { %v9286_v33 = vrot.slane %v8144_v34, 4  ;;  %v9287_v13 = vrot.slane %v8145_v51, 4  ;;  %v9288_v4 = vrot.slane %v8146_v43, 4  ;;  %v8327_v0 = vcombine.high %v15227_v42, %v15227_v42 }
 0x603   : > { %v8348_v2 = vrot.slane %v15227_v42, %v13185_v32  ;;  %v9385_v59 = vadd.f32 %v9285_v21, %v9235_v52  ;;  %v14518_v12 = vadd.f32 %v9293_v48, %v9243_v22  ;;  %v9248_v26 = vadd.f32 %v9148_v40, %v9098_v8  ;;  %v15228_v48 = vld [vmem:[#allocation41_spill] sm:$0xff] }
 0x604   : > { %v9386_v6 = vadd.f32 %v9286_v33, %v9236_v50  ;;  %v9387_v31 = vadd.f32 %v9287_v13, %v14292_v29  ;;  %v9388_v11 = vadd.f32 %v9288_v4, %v14295_v46  ;;  %v8355_v35 = vrot.slane %v8327_v0, %v13185_v32  ;;  %v9424_v40 = vld [vmem:[%s11611_s5 + $0x38] sm:$0x3] }
 0x605   : > { %v14526_v34 = vcombine.low %v14318_v54, %v8348_v2  ;;  %v9560_v51 = vcombine.low %v14368_v24, %v9385_v59  ;;  %v8357_v47 = vcombine.high %v14318_v54, %v8348_v2  ;;  %v8412_v53 = vcombine.low %v15229_v27, %v15228_v48  ;;  %v15232_v22 = vld [vmem:[#allocation89_spill] sm:$0xff]  ;;  %v9423_v59 = vld [vmem:[%s11611_s5 + $0x30] sm:$0xff] }
 0x606   : > { %v9582_v43 = vrot.slane %v9386_v6, %v13185_v32  ;;  %v9583_v8 = vcombine.low %v9387_v31, %v9388_v11  ;;  %v14535_v29 = vcombine.low %v14321_v39, %v8355_v35  ;;  %v14538_v46 = vcombine.high %v14321_v39, %v8355_v35  ;;  %v15233_v39 = vld [vmem:[#allocation90_spill] sm:$0xff] }
 0x607   : > { %v14542_v24 = vadd.f32 %v15230_v58, %v14526_v34  ;;  %v9574_v55 = vrot.slane %v9560_v51, %v13185_v32  ;;  %v14546_v52 = vadd.f32 %v15231_v45, %v8357_v47  ;;  %v9152_v50 = vrot.slane %v14526_v34, 2  ;;  %v15234_v58 = vld [vmem:[#allocation40_spill] sm:$0xff] }
 0x608   : > { %v9754_v54 = vadd.f32 %v9582_v43, %v9424_v40  ;;  %v14550_v49 = vrot.slane %v9583_v8, %v13185_v32  ;;  %v14554_v21 = vadd.f32 %v15232_v22, %v14535_v29  ;;  %v14558_v33 = vadd.f32 %v15233_v39, %v14538_v46  ;;  %v15240_v22 = vld [vmem:[#allocation73_spill] sm:$0xff] }
 0x609   : > { %v9153_v13 = vrot.slane %v8357_v47, 2  ;;  %v9575_v4 = vcombine.low %v14384_v62, %v9574_v55  ;;  %v9154_v42 = vrot.slane %v14535_v29, 2  ;;  %v9155_v0 = vrot.slane %v14538_v46, 2 }
 0x60a   : > { %9774 = vst [vmem:[%s11611_s5 + $0x38] sm:$0x3] %v9754_v54  ;;  %v9297_v2 = vrot.slane %v14526_v34, 4  ;;  %v9298_v31 = vrot.slane %v8357_v47, 4  ;;  %v9299_v11 = vrot.slane %v14535_v29, 4  ;;  %v9300_v35 = vrot.slane %v14538_v46, 4 }
 0x60b   : > { %v14567_v6 = vadd.f32 %v9153_v13, %v14441_v3  ;;  %v9753_v51 = vadd.f32 %v9575_v4, %v9423_v59  ;;  %v14572_v62 = vadd.f32 %v9154_v42, %v14444_v18  ;;  %v8413_v43 = vcombine.high %v15229_v27, %v15228_v48  ;;  %v15235_v29 = vld [vmem:[#allocation57_spill] sm:$0xff] }
 0x60c   : > { %v14577_v40 = vrot.slane %v8412_v53, %v13185_v32  ;;  %v14579_v8 = vadd.f32 %v9298_v31, %v9248_v26  ;;  %v8185_v3 = vcombine.high %v15234_v58, %v15234_v58  ;;  %v8206_v47 = vrot.slane %v15234_v58, %v13185_v32  ;;  %v15238_v26 = vld [vmem:[#allocation71_spill] sm:$0xff] }
 0x60d   : > { %v15236_v55 = vrot.slane %v15122_v23, 2  ;;  %9773 = vst [vmem:[%s11611_s5 + $0x30] sm:$0xff] %v9753_v51  ;;  %v14590_v18 = vrot.slane %v8413_v43, %v13185_v32  ;;  %v15237_v48 = vrot.slane %v15215_v15, 2  ;;  %v15239_v53 = vrot.slane %v15220_v44, 4  ;;  %v15242_v23 = vld [vmem:[#allocation22_spill] sm:$0xff] }
 0x60e   : > { %v15241_v39 = vrot.slane %v15221_v7, 4  ;;  %v8213_v4 = vrot.slane %v8185_v3, %v13185_v32  ;;  %v8214_v42 = vcombine.low %v15242_v23, %v8206_v47  ;;  %v8215_v59 = vcombine.high %v15242_v23, %v8206_v47 }
 0x60f   : > { %v8749_v54 = vadd.f32 %v15236_v55, %v15235_v29  ;;  %v8750_v27 = vadd.f32 %v15237_v48, %v15171_v56  ;;  %v8901_v45 = vadd.f32 %v15239_v53, %v15238_v26  ;;  %v15243_v31 = vrot.slane %v15156_v14, 4  ;;  %v15246_v29 = vld [vmem:[#allocation28_spill] sm:$0xff]  ;;  %v15247_v48 = vld [vmem:[#allocation82_spill] sm:$0xff] }
 0x610   : > { %v8902_v13 = vadd.f32 %v15241_v39, %v15240_v22  ;;  %v15244_v15 = vrot.slane %v15219_v30, 4  ;;  %v8949_v43 = vrot.slane %v15192_v25, 6  ;;  %v8950_v44 = vrot.slane %v15187_v1, 6  ;;  %v15249_v30 = vld [vmem:[#allocation51_spill] sm:$0xff] }
 0x611   : > { %v8899_v51 = vadd.f32 %v15243_v31, %v8749_v54  ;;  %v15245_v58 = vrot.slane %v15195_v36, 6  ;;  %v8216_v55 = vcombine.low %v15246_v29, %v8213_v4  ;;  %v8217_v3 = vcombine.high %v15246_v29, %v8213_v4 }
 0x612   : > { %v8900_v56 = vadd.f32 %v15244_v15, %v8750_v27  ;;  %v15248_v26 = vrot.slane %v15247_v48, 6  ;;  %v9144_v53 = vrot.slane %v8214_v42, 2  ;;  %v9145_v22 = vrot.slane %v8215_v59, 2  ;;  %v15250_v27 = vld [vmem:[#allocation55_spill] sm:$0xff] }
 0x613   : > { %v9051_v7 = vadd.f32 %v15245_v58, %v8901_v45  ;;  %v9049_v14 = vadd.f32 %v8949_v43, %v8899_v51  ;;  %v15251_v39 = vrot.slane %v15250_v27, 2  ;;  %v9146_v36 = vrot.slane %v8216_v55, 2  ;;  %v15252_v58 = vld [vmem:[#allocation60_spill] sm:$0xff] }
 0x614   : > { %v9052_v47 = vadd.f32 %v15248_v26, %v8902_v13  ;;  %v9050_v54 = vadd.f32 %v8950_v44, %v8900_v56  ;;  %v9147_v45 = vrot.slane %v8217_v3, 2  ;;  %v9244_v4 = vadd.f32 %v9144_v53, %v15252_v58 }
 0x615   : > { %v9239_v25 = vadd.f32 %v15251_v39, %v15249_v30  ;;  %v9101_v23 = vadd.f32 %v9051_v7, %v8216_v55  ;;  %v9099_v31 = vadd.f32 %v9049_v14, %v8214_v42  ;;  %v9245_v29 = vadd.f32 %v9145_v22, %v14500_v37 }
 0x616   : > { %v14619_v1 = vadd.f32 %v9052_v47, %v8217_v3  ;;  %v9100_v15 = vadd.f32 %v9050_v54, %v8215_v59  ;;  %v9246_v13 = vadd.f32 %v9146_v36, %v14502_v41  ;;  %v9247_v51 = vadd.f32 %v9147_v45, %v14492_v10 }
 0x617   : > { %v9289_v56 = vrot.slane %v8214_v42, 4  ;;  %v9290_v43 = vrot.slane %v8215_v59, 4  ;;  %v9249_v44 = vadd.f32 %v9149_v38, %v9099_v31  ;;  %v9291_v48 = vrot.slane %v8216_v55, 4 }
 0x618   : > { %v9250_v7 = vadd.f32 %v9150_v20, %v9100_v15  ;;  %v9292_v26 = vrot.slane %v8217_v3, 4  ;;  %v15253_v37 = vrot.slane %v14406_v9, 4  ;;  %v15254_v10 = vrot.slane %v14409_v16, 4 }
 0x619   : > { %v9389_v47 = vadd.f32 %v9289_v56, %v9239_v25  ;;  %v9390_v53 = vadd.f32 %v9290_v43, %v14505_v5  ;;  %v9391_v59 = vadd.f32 %v9291_v48, %v14508_v60  ;;  %v15255_v14 = vrot.slane %v14412_v19, 4  ;;  %v9426_v60 = vld [vmem:[%s11611_s5 + $0x48] sm:$0x3]  ;;  %v15258_v56 = vld [vmem:[#allocation46_spill] sm:$0xff]  ;;  %v9427_v48 = vld [vmem:[%s11611_s5 + $0x50] sm:$0xff] }
 0x61a   : > { %v9394_v41 = vadd.f32 %v15253_v37, %v9244_v4  ;;  %v9395_v42 = vadd.f32 %v15254_v10, %v9245_v29  ;;  %v9392_v38 = vadd.f32 %v9292_v26, %v14511_v28  ;;  %v9397_v55 = vadd.f32 %v9297_v2, %v9247_v51  ;;  %v9428_v28 = vld [vmem:[%s11611_s5 + $0x58] sm:$0x3]  ;;  %v9425_v29 = vld [vmem:[%s11611_s5 + $0x40] sm:$0xff]  ;;  %v15257_v51 = vld [vmem:[#allocation27_spill] sm:$0xff] }
 0x61b   : > { %v9396_v20 = vadd.f32 %v15255_v14, %v9246_v13  ;;  %v9399_v3 = vadd.f32 %v9299_v11, %v9249_v44  ;;  %v9400_v54 = vadd.f32 %v9300_v35, %v9250_v7  ;;  %v9584_v22 = vcombine.low %v9389_v47, %v9390_v53  ;;  %v15256_v35 = vld [vmem:[#allocation47_spill] sm:$0xff]  ;;  %v9429_v10 = vld [vmem:[%s11611_s5 + $0x60] sm:$0xff] }
 0x61c   : > { %v9608_v30 = vcombine.low %v9394_v41, %v9395_v42  ;;  %v9606_v5 = vrot.slane %v9391_v59, %v13185_v32  ;;  %v9607_v9 = vcombine.low %v9392_v38, %v14518_v12  ;;  %v9631_v16 = vcombine.low %v9397_v55, %v14579_v8 }
 0x61d   : > { %v9630_v27 = vrot.slane %v9396_v20, %v13185_v32  ;;  %v9598_v39 = vrot.slane %v9584_v22, %v13185_v32  ;;  %v9632_v11 = vcombine.low %v9399_v3, %v9400_v54  ;;  %v8449_v25 = vcombine.high %v15256_v35, %v15256_v35 }
 0x61e   : > { %v9622_v2 = vrot.slane %v9608_v30, %v13185_v32  ;;  %v9615_v12 = vrot.slane %v9607_v9, %v13185_v32  ;;  %v9639_v36 = vrot.slane %v9631_v16, %v13185_v32  ;;  %v9756_v45 = vadd.f32 %v9606_v5, %v9426_v60 }
 0x61f   : > { %v9758_v31 = vadd.f32 %v9630_v27, %v9428_v28  ;;  %v9599_v8 = vcombine.low %v14550_v49, %v9598_v39  ;;  %v9646_v15 = vrot.slane %v9632_v11, %v13185_v32  ;;  %v8470_v58 = vrot.slane %v15256_v35, %v13185_v32  ;;  %v15259_v49 = vld [vmem:[#allocation23_spill] sm:$0xff]  ;;  %v15263_v35 = vld [vmem:[#allocation93_spill] sm:$0xff] }
 0x620   : > { %v8477_v4 = vrot.slane %v8449_v25, %v13185_v32  ;;  %v9623_v13 = vcombine.low %v9615_v12, %v9622_v2  ;;  %9776 = vst [vmem:[%s11611_s5 + $0x48] sm:$0x3] %v9756_v45  ;;  %v8447_v43 = vcombine.low %v15258_v56, %v15257_v51  ;;  %v8448_v44 = vcombine.high %v15258_v56, %v15257_v51  ;;  %v15261_v27 = vld [vmem:[#allocation91_spill] sm:$0xff]  ;;  %v15264_v25 = vld [vmem:[#allocation94_spill] sm:$0xff]  ;;  %v15265_v56 = vld [vmem:[#allocation29_spill] sm:$0xff] }
 0x621   : > { %9778 = vst [vmem:[%s11611_s5 + $0x58] sm:$0x3] %v9758_v31  ;;  %v8379_v7 = vcombine.high %v15259_v49, %v15259_v49  ;;  %v9647_v26 = vcombine.low %v9639_v36, %v9646_v15  ;;  %v9755_v47 = vadd.f32 %v9599_v8, %v9425_v29  ;;  %v8400_v53 = vrot.slane %v15259_v49, %v13185_v32 }
 0x622   : > { %v15260_v37 = vrot.slane %v14412_v19, 2  ;;  %v9757_v42 = vadd.f32 %v9623_v13, %v9427_v48  ;;  %v8456_v59 = vrot.slane %v8447_v43, %v13185_v32  ;;  %v8463_v38 = vrot.slane %v8448_v44, %v13185_v32 }
 0x623   : > { %v8407_v14 = vrot.slane %v8379_v7, %v13185_v32  ;;  %v9759_v20 = vadd.f32 %v9647_v26, %v9429_v10  ;;  %9775 = vst [vmem:[%s11611_s5 + $0x40] sm:$0xff] %v9755_v47  ;;  %v8408_v55 = vcombine.low %v14469_v61, %v8400_v53  ;;  %v8409_v3 = vcombine.high %v14469_v61, %v8400_v53  ;;  %v15262_v61 = vld [vmem:[#allocation92_spill] sm:$0xff]  ;;  %v15266_v53 = vld [vmem:[#allocation30_spill] sm:$0xff] }
 0x624   : > { %v9251_v41 = vadd.f32 %v15260_v37, %v9101_v23  ;;  %v9252_v19 = vadd.f32 %v9152_v50, %v14619_v1  ;;  %9777 = vst [vmem:[%s11611_s5 + $0x50] sm:$0xff] %v9757_v42  ;;  %v8478_v23 = vcombine.low %v8456_v59, %v8470_v58  ;;  %v14680_v54 = vcombine.high %v8456_v59, %v8470_v58 }
 0x625   : > { %v14682_v22 = vcombine.low %v8463_v38, %v8477_v4  ;;  %v8481_v30 = vcombine.high %v8463_v38, %v8477_v4  ;;  %9779 = vst [vmem:[%s11611_s5 + $0x60] sm:$0xff] %v9759_v20  ;;  %v8410_v5 = vcombine.low %v14472_v63, %v8407_v14  ;;  %v8411_v9 = vcombine.high %v14472_v63, %v8407_v14  ;;  %v15268_v38 = vld [vmem:[#allocation99_spill] sm:$0xff] }
 0x626   : > { %v14688_v16 = vadd.f32 %v15261_v27, %v8408_v55  ;;  %v14691_v60 = vadd.f32 %v15262_v61, %v8409_v3  ;;  %v9164_v34 = vrot.slane %v8478_v23, 2  ;;  %v9165_v50 = vrot.slane %v14680_v54, 2 }
 0x627   : > { %v9166_v1 = vrot.slane %v14682_v22, 2  ;;  %v9309_v28 = vrot.slane %v8478_v23, 4  ;;  %v9310_v39 = vrot.slane %v14680_v54, 4  ;;  %v9311_v2 = vrot.slane %v14682_v22, 4  ;;  %v9432_v54 = vld [vmem:[%s11611_s5 + $0x78] sm:$0x3] }
 0x628   : > { %v14697_v11 = vrot.slane %v8481_v30, 4  ;;  %v14700_v63 = vadd.f32 %v15263_v35, %v8410_v5  ;;  %v9114_v12 = vadd.f32 %v15264_v25, %v8411_v9  ;;  %v9156_v36 = vrot.slane %v8408_v55, 2 }
 0x629   : > { %v9157_v45 = vrot.slane %v8409_v3, 2  ;;  %v9158_v31 = vrot.slane %v8410_v5, 2  ;;  %v9159_v8 = vrot.slane %v8411_v9, 2  ;;  %v9301_v15 = vrot.slane %v8408_v55, 4 }
 0x62a   : > { %v9302_v58 = vrot.slane %v8409_v3, 4  ;;  %v9303_v4 = vrot.slane %v8410_v5, 4  ;;  %v9256_v29 = vadd.f32 %v9156_v36, %v14449_v17  ;;  %v9304_v51 = vrot.slane %v8411_v9, 4 }
 0x62b   : > { %v9257_v13 = vadd.f32 %v9157_v45, %v14542_v24  ;;  %v8484_v43 = vcombine.high %v15265_v56, %v15265_v56  ;;  %v9259_v44 = vadd.f32 %v9159_v8, %v14554_v21  ;;  %v9401_v49 = vadd.f32 %v9301_v15, %v9251_v41  ;;  %v15267_v24 = vld [vmem:[#allocation24_spill] sm:$0xff]  ;;  %v9430_v41 = vld [vmem:[%s11611_s5 + $0x68] sm:$0x3] }
 0x62c   : > { %v9402_v7 = vadd.f32 %v9302_v58, %v9252_v19  ;;  %v9403_v48 = vadd.f32 %v9303_v4, %v14567_v6  ;;  %v14710_v26 = vadd.f32 %v9304_v51, %v14572_v62  ;;  %v8505_v47 = vrot.slane %v15265_v56, %v13185_v32  ;;  %v15269_v45 = vld [vmem:[#allocation95_spill] sm:$0xff]  ;;  %v15270_v15 = vld [vmem:[#allocation96_spill] sm:$0xff] }
 0x62d   : > { %v8512_v17 = vrot.slane %v8484_v43, %v13185_v32  ;;  %v8482_v37 = vcombine.low %v15267_v24, %v15266_v53  ;;  %v14717_v10 = vadd.f32 %v9309_v28, %v9259_v44  ;;  %v9654_v42 = vrot.slane %v9401_v49, %v13185_v32 }
 0x62e   : > { %v9655_v21 = vcombine.low %v9402_v7, %v9403_v48  ;;  %v8483_v6 = vcombine.high %v15267_v24, %v15266_v53  ;;  %v9264_v59 = vadd.f32 %v9164_v34, %v9114_v12  ;;  %v8414_v14 = vcombine.high %v15268_v38, %v15268_v38 }
 0x62f   : > { %v8491_v62 = vrot.slane %v8482_v37, %v13185_v32  ;;  %v8435_v20 = vrot.slane %v15268_v38, %v13185_v32  ;;  %v9760_v3 = vadd.f32 %v9654_v42, %v9430_v41  ;;  %v9255_v23 = vadd.f32 %v9155_v0, %v14436_v57 }
 0x630   : > { %v14729_v55 = vrot.slane %v9655_v21, %v13185_v32  ;;  %v8498_v19 = vrot.slane %v8483_v6, %v13185_v32  ;;  %v8442_v9 = vrot.slane %v8414_v14, %v13185_v32  ;;  %v9258_v35 = vadd.f32 %v9158_v31, %v14546_v52 }
 0x631   : > { %v8513_v30 = vcombine.low %v8491_v62, %v8505_v47  ;;  %v8514_v5 = vcombine.high %v8491_v62, %v8505_v47  ;;  %v8443_v27 = vcombine.low %v14577_v40, %v8435_v20  ;;  %9780 = vst [vmem:[%s11611_s5 + $0x68] sm:$0x3] %v9760_v3  ;;  %v8444_v28 = vcombine.high %v14577_v40, %v8435_v20 }
 0x632   : > { %v8515_v61 = vcombine.low %v8498_v19, %v8512_v17  ;;  %v8516_v34 = vcombine.high %v8498_v19, %v8512_v17  ;;  %v8445_v36 = vcombine.low %v14590_v18, %v8442_v9  ;;  %v8446_v46 = vcombine.high %v14590_v18, %v8442_v9 }
 0x633   : > { %v9313_v25 = vrot.slane %v8513_v30, 4  ;;  %v9314_v12 = vrot.slane %v8514_v5, 4  ;;  %v9115_v8 = vadd.f32 %v15269_v45, %v8443_v27  ;;  %v9116_v58 = vadd.f32 %v15270_v15, %v8444_v28  ;;  %v9431_v5 = vld [vmem:[%s11611_s5 + $0x70] sm:$0xff] }
 0x634   : > { %v9315_v57 = vrot.slane %v8515_v61, 4  ;;  %v9316_v0 = vrot.slane %v8516_v34, 4  ;;  %v9160_v51 = vrot.slane %v8443_v27, 2  ;;  %v9161_v56 = vrot.slane %v8444_v28, 2  ;;  %v9433_v61 = vld [vmem:[%s11611_s5 + $0x80] sm:$0xff]  ;;  %v9435_v34 = vld [vmem:[%s11611_s5 + $0x90] sm:$0xff] }
 0x635   : > { %v9414_v4 = vadd.f32 %v9314_v12, %v9264_v59  ;;  %v9162_v43 = vrot.slane %v8445_v36, 2  ;;  %v9163_v44 = vrot.slane %v8446_v46, 2  ;;  %v9265_v40 = vadd.f32 %v9165_v50, %v9115_v8 }
 0x636   : > { %v9266_v49 = vadd.f32 %v9166_v1, %v9116_v58  ;;  %v9305_v52 = vrot.slane %v8443_v27, 4  ;;  %v9260_v31 = vadd.f32 %v9160_v51, %v14558_v33  ;;  %v9261_v7 = vadd.f32 %v9161_v56, %v14688_v16 }
 0x637   : > { %v9262_v18 = vadd.f32 %v9162_v43, %v14691_v60  ;;  %v9306_v48 = vrot.slane %v8444_v28, 4  ;;  %v9263_v47 = vadd.f32 %v9163_v44, %v14700_v63  ;;  %v9307_v17 = vrot.slane %v8445_v36, 4 }
 0x638   : > { %v9308_v53 = vrot.slane %v8446_v46, 4  ;;  %v9405_v24 = vadd.f32 %v9305_v52, %v9255_v23  ;;  %v9410_v42 = vadd.f32 %v9310_v39, %v9260_v31  ;;  %v9411_v50 = vadd.f32 %v9311_v2, %v9261_v7 }
 0x639   : > { %v9406_v37 = vadd.f32 %v9306_v48, %v9256_v29  ;;  %v9412_v33 = vadd.f32 %v14697_v11, %v9262_v18  ;;  %v9407_v16 = vadd.f32 %v9307_v17, %v9257_v13  ;;  %v9413_v60 = vadd.f32 %v9313_v25, %v9263_v47  ;;  %v9434_v13 = vld [vmem:[%s11611_s5 + $0x88] sm:$0x3] }
 0x63a   : > { %v9408_v1 = vadd.f32 %v9308_v53, %v9258_v35  ;;  %v9415_v21 = vadd.f32 %v9315_v57, %v9265_v40  ;;  %v9416_v63 = vadd.f32 %v9316_v0, %v9266_v49  ;;  %v9656_v6 = vcombine.low %v14710_v26, %v9405_v24 }
 0x63b   : > { %v9678_v41 = vrot.slane %v9406_v37, %v13185_v32  ;;  %v9680_v29 = vcombine.low %v14717_v10, %v9410_v42  ;;  %v9702_v22 = vrot.slane %v9411_v50, %v13185_v32  ;;  %v9703_v2 = vcombine.low %v9412_v33, %v9413_v60  ;;  %v9436_v10 = vld [vmem:[%s11611_s5 + $0x98] sm:$0x3] }
 0x63c   : > { %v9679_v39 = vcombine.low %v9407_v16, %v9408_v1  ;;  %v9704_v11 = vcombine.low %v9414_v4, %v9415_v21  ;;  %v9670_v62 = vrot.slane %v9656_v6, %v13185_v32  ;;  %v9726_v26 = vrot.slane %v9416_v63, %v13185_v32 }
 0x63d   : > { %v9694_v59 = vrot.slane %v9680_v29, %v13185_v32  ;;  %v9762_v38 = vadd.f32 %v9678_v41, %v9432_v54  ;;  %v9711_v20 = vrot.slane %v9703_v2, %v13185_v32  ;;  %v9764_v19 = vadd.f32 %v9702_v22, %v9434_v13 }
 0x63e   : > { %v9687_v14 = vrot.slane %v9679_v39, %v13185_v32  ;;  %v9718_v3 = vrot.slane %v9704_v11, %v13185_v32  ;;  %v9671_v23 = vcombine.low %v14729_v55, %v9670_v62  ;;  %v9766_v30 = vadd.f32 %v9726_v26, %v9436_v10 }
 0x63f   : > { %9782 = vst [vmem:[%s11611_s5 + $0x78] sm:$0x3] %v9762_v38  ;;  %9784 = vst [vmem:[%s11611_s5 + $0x88] sm:$0x3] %v9764_v19 }
 0x640   : > { %v9695_v9 = vcombine.low %v9687_v14, %v9694_v59  ;;  %v9719_v27 = vcombine.low %v9711_v20, %v9718_v3  ;;  %v9761_v28 = vadd.f32 %v9671_v23, %v9431_v5  ;;  %9786 = vst [vmem:[%s11611_s5 + $0x98] sm:$0x3] %v9766_v30 }
 0x642   : > { %v9763_v35 = vadd.f32 %v9695_v9, %v9433_v61  ;;  %v9765_v25 = vadd.f32 %v9719_v27, %v9435_v34  ;;  %9781 = vst [vmem:[%s11611_s5 + $0x70] sm:$0xff] %v9761_v28 }
 0x644   : > { %9783 = vst [vmem:[%s11611_s5 + $0x80] sm:$0xff] %v9763_v35  ;;  %9785 = vst [vmem:[%s11611_s5 + $0x90] sm:$0xff] %v9765_v25 }
 0x645 PF: > { %s24_s28 = sadd.s32 1, %s11217_s28   ;;  %s15271_s25 = sld [smem:[#allocation19_spill]] }
 0x646   : > { %p21_p6 = scmp.ge.s32.totalorder %s24_s28, 6   ;;  %s15272_s7 = sld [smem:[#allocation20_spill]] }
 0x647   : > { %s15273_s27 = sld [smem:[#allocation21_spill]]  ;;  %s15274_s18 = smov %s11181_s19 }
 0x648   : > { %s15275_s19 = smov %s11185_s20  ;;  %s15276_s20 = smov %s11480_s12 }
 0x649   : > { %s15277_s21 = smov %s11193_s22  ;;  %s15278_s22 = smov %s11197_s23 }
 0x64a   : > { %s15279_s23 = smov %s11428_s2  ;;  %s15280_s24 = smov %s11209_s26 }
 0x64b   :  { %23 = sbr.rel (!%p21_p6) target bundleno = 17 (0x11), region = 122 }
 0x64c   : > { %s15281_s26 = smov %s15272_s7 }
 0x652   :  { %9808 = vsyncpa [#allocation5], 1 }
 0x653   :  { %9810 = vsyncpa [#allocation5 + $0x1], 1 }
 0x654   :  { %9811 = vsyncpa [#allocation7], 1 }
 0x655   :  { %9813 = vsyncpa [#allocation7 + $0x1], 1 }
 0x656   :  { %9814 = vsyncpa [#allocation10], 1 }
 0x657   :  { %9816 = vsyncpa [#allocation10 + $0x1], 1 }

</bundles_post_ra>
